<compile_context>
chip_gen: v7x
topology: tpu7x:2x2x1
jax: 0.10.0
libtpu: 0.0.40
codegen_flags: <defaults>
</compile_context>

<pallas_src>
import functools

import jax
import jax.numpy as jnp
import numpy as np
from jax.experimental import pallas as pl
from jax.experimental.pallas import tpu as pltpu

H = 64          # LSTM hidden size
C_CONV = 32     # conv output channels
C_IN = 27       # conv input channels (26 letters + blank)
C_PAD = 32      # conv input channels, zero-padded for lane-friendly layout
N_ALPHA = 26
LANES = 128     # lane-dense padding for the alphabet / logits path


def hangman_kernel(seq_ref,     # ((L+2)*TB, 32) bf16  padded one-hot word state, row = t_pad*TB + b
                   wl_ref,      # (TB, 1)   int32 word lengths
                   alpha_ref,   # (TB, 128) bf16  alphabet state, zero-padded lanes
                   wc0_ref,     # (32, 32)  bf16  conv tap k=0 (BN scale folded)
                   wc1_ref,     # (32, 32)  bf16  conv tap k=1
                   wc2_ref,     # (32, 32)  bf16  conv tap k=2
                   shift_ref,   # (1, 32)   f32   folded BN shift (incl. conv bias)
                   wih_ref,     # (32, 256) bf16  packed LSTM input weights [i,f,o,2*g]
                   whh_ref,     # (64, 256) bf16  packed LSTM hidden weights [i,f,o,2*g]
                   blstm_ref,   # (1, 256)  f32   packed LSTM bias (b_ih+b_hh, g doubled)
                   w1a_ref,     # (64, 64)  bf16  fc1 weights on lstm features
                   w1b_ref,     # (128, 64) bf16  fc1 weights on alphabet (zero-padded rows)
                   b1_ref,      # (1, 64)   f32
                   w2_ref,      # (64, 128) bf16  fc2 weights (zero-padded lanes)
                   b2_ref,      # (1, 128)  f32
                   out_ref,     # (TB, 128) f32
                   xg_ref):     # (L*TB, 256) f32 VMEM scratch: hoisted gate slab
    TB = wl_ref.shape[0]
    LT = xg_ref.shape[0]
    L = LT // TB

    # ---- Conv1d(k=3,pad=1) + BN(eval) + ReLU over the whole (L*TB) slab as 3
    #      row-shifted MXU matmuls on the lane-dense padded sequence. ----
    x = (jnp.dot(seq_ref[0:L * TB, :], wc0_ref[...], preferred_element_type=jnp.float32)
         + jnp.dot(seq_ref[TB:(L + 1) * TB, :], wc1_ref[...], preferred_element_type=jnp.float32)
         + jnp.dot(seq_ref[2 * TB:(L + 2) * TB, :], wc2_ref[...], preferred_element_type=jnp.float32))
    x = jnp.maximum(x + shift_ref[...], 0.0)                            # (L*TB, 32) f32

    # ---- LSTM input projection hoisted out of the recurrence; gate slab lives
    #      in an explicit VMEM scratch so the unrolled loop stays vreg-bounded. ----
    xg_ref[...] = jnp.dot(x.astype(jnp.bfloat16), wih_ref[...],
                          preferred_element_type=jnp.float32) + blstm_ref[...]

    whh = whh_ref[...]                                                   # loop-invariant
    wl = wl_ref[...]
    h = jnp.zeros((TB, H), jnp.float32)
    c = jnp.zeros((TB, H), jnp.float32)
    feat = jnp.zeros((TB, H), jnp.float32)

    # Fully unrolled recurrence: one MXU dot on the serial path per step.
    # TODO(synk): for production L, bucket the batch by word_length in the
    # wrapper and gate unrolled steps via scalar prefetch to skip dead steps.
    for t in range(L):
        gates = xg_ref[t * TB:(t + 1) * TB, :] + jnp.dot(
            h.astype(jnp.bfloat16), whh, preferred_element_type=jnp.float32)   # (TB, 256)
        # g-gate columns were pre-scaled by 2 at pack time so one sigmoid covers
        # all gates: tanh(z) = 2*sigmoid(2z) - 1.
        act = jax.nn.sigmoid(gates)
        i_g = act[:, 0 * H:1 * H]
        f_g = act[:, 1 * H:2 * H]
        o_g = act[:, 2 * H:3 * H]
        g_g = 2.0 * act[:, 3 * H:4 * H] - 1.0
        c = f_g * c + i_g * g_g
        h = o_g * jnp.tanh(c)
        # capture h at the last valid timestep of each sequence
        feat = jnp.where(wl == (t + 1), h, feat)

    # ---- combine_features: Linear(90->64) + ReLU + (Dropout=id) + Linear(64->26) ----
    alpha = alpha_ref[...]                                               # (TB, 128) bf16
    h1 = jnp.maximum(
        jnp.dot(feat.astype(jnp.bfloat16), w1a_ref[...], preferred_element_type=jnp.float32)
        + jnp.dot(alpha, w1b_ref[...], preferred_element_type=jnp.float32)
        + b1_ref[...], 0.0)
    logits = jnp.dot(h1.astype(jnp.bfloat16), w2_ref[...],
                     preferred_element_type=jnp.float32) + b2_ref[...]

    # masked_fill(alphabet_state == 1, -inf); padded lanes stay 0 and are sliced off.
    out_ref[...] = jnp.where(alpha == 1.0, -jnp.inf, logits)


def init_params(key):
    """Deterministic synthetic parameters with PyTorch-native shapes."""
    ks = jax.random.split(key, 12)
    s = 0.1
    return dict(
        conv_w=jax.random.normal(ks[0], (32, 27, 3), jnp.float32) * s,   # (out, in, k)
        conv_b=jax.random.normal(ks[1], (32,), jnp.float32) * s,
        bn_gamma=jnp.ones((32,), jnp.float32),
        bn_beta=jnp.zeros((32,), jnp.float32),
        bn_mean=jax.random.normal(ks[2], (32,), jnp.float32) * s,
        bn_var=jnp.abs(jax.random.normal(ks[3], (32,), jnp.float32)) * s + 1.0,
        w_ih=jax.random.normal(ks[4], (4 * H, 32), jnp.float32) * s,
        w_hh=jax.random.normal(ks[5], (4 * H, H), jnp.float32) * s,
        b_ih=jax.random.normal(ks[6], (4 * H,), jnp.float32) * s,
        b_hh=jax.random.normal(ks[7], (4 * H,), jnp.float32) * s,
        fc1_w=jax.random.normal(ks[8], (64, H + N_ALPHA), jnp.float32) * s,
        fc1_b=jax.random.normal(ks[9], (64,), jnp.float32) * s,
        fc2_w=jax.random.normal(ks[10], (26, 64), jnp.float32) * s,
        fc2_b=jax.random.normal(ks[11], (26,), jnp.float32) * s,
    )


def pack_params(p):
    """Re-layout PyTorch-style parameters for the kernel (bf16 MXU operands)."""
    eps = 1e-5
    scale = p['bn_gamma'] / jnp.sqrt(p['bn_var'] + eps)                  # (32,)
    shift = p['bn_beta'] + scale * (p['conv_b'] - p['bn_mean'])          # fold conv bias + BN(eval)

    def conv_tap(k):  # (out,in) at tap k -> (in_pad=32, out=32), BN scale folded column-wise
        w = p['conv_w'][:, :, k].T * scale[None, :]                      # (27, 32)
        return jnp.pad(w, ((0, C_PAD - C_IN), (0, 0))).astype(jnp.bfloat16)

    def reorder(w):
        # PyTorch gate order [i, f, g, o] -> packed [i, f, o, 2*g]
        # (the factor 2 enables tanh(z) = 2*sigmoid(2z) - 1 in the kernel).
        return jnp.concatenate(
            [w[0:H], w[H:2 * H], w[3 * H:4 * H], 2.0 * w[2 * H:3 * H]], axis=0)

    w1b = p['fc1_w'][:, H:].T                                            # (26, 64)
    w2 = p['fc2_w'].T                                                    # (64, 26)
    return dict(
        wc0=conv_tap(0), wc1=conv_tap(1), wc2=conv_tap(2),               # (32, 32) bf16 each
        shift=shift.reshape(1, C_CONV),                                  # (1, 32) f32
        wih=reorder(p['w_ih']).T.astype(jnp.bfloat16),                   # (32, 256)
        whh=reorder(p['w_hh']).T.astype(jnp.bfloat16),                   # (64, 256)
        blstm=reorder(p['b_ih'] + p['b_hh']).reshape(1, 4 * H),          # (1, 256) f32
        w1a=p['fc1_w'][:, :H].T.astype(jnp.bfloat16),                    # (64, 64)
        w1b=jnp.pad(w1b, ((0, LANES - N_ALPHA), (0, 0))).astype(jnp.bfloat16),   # (128, 64)
        b1=p['fc1_b'].reshape(1, 64),                                    # f32
        w2=jnp.pad(w2, ((0, 0), (0, LANES - N_ALPHA))).astype(jnp.bfloat16),     # (64, 128)
        b2=jnp.pad(p['fc2_b'], (0, LANES - N_ALPHA)).reshape(1, LANES),  # (1, 128) f32
    )


@functools.partial(jax.jit, static_argnames=("tb",))
def hangman_forward(word_state, word_length, alphabet_state, packed, tb=128):
    B, L, C = word_state.shape
    assert C == C_IN
    assert tb % 16 == 0, "tb must be a multiple of 16 (bf16 sublane packing)"
    nb = -(-B // tb)                 # number of batch blocks
    b_pad = nb * tb

    # ---- wrapper-side layout plumbing (plain JAX / XLA) ----
    # pad batch, pad time by 1 each side (conv padding=1), pad channels 27 -> 32,
    # ship as bf16 (one-hot is exact) to halve streamed HBM bytes.
    ws = jnp.pad(word_state.astype(jnp.bfloat16),
                 ((0, b_pad - B), (1, 1), (0, C_PAD - C)))               # (b_pad, L+2, 32)
    # time-major batch blocks: (nb, (L+2)*tb, 32), row = t_pad*tb + local_b
    seq = (ws.transpose(1, 0, 2)
             .reshape(L + 2, nb, tb, C_PAD)
             .transpose(1, 0, 2, 3)
             .reshape(nb, (L + 2) * tb, C_PAD))

    wl = jnp.pad(word_length.astype(jnp.int32), (0, b_pad - B)).reshape(nb, tb, 1)
    alpha = jnp.pad(alphabet_state.astype(jnp.bfloat16),
                    ((0, b_pad - B), (0, LANES - N_ALPHA))).reshape(nb, tb, LANES)

    weights = (packed['wc0'], packed['wc1'], packed['wc2'], packed['shift'],
               packed['wih'], packed['whh'], packed['blstm'],
               packed['w1a'], packed['w1b'], packed['b1'],
               packed['w2'], packed['b2'])

    in_specs = [
        pl.BlockSpec((None, (L + 2) * tb, C_PAD), lambda i: (i, 0, 0)),  # padded sequence
        pl.BlockSpec((None, tb, 1), lambda i: (i, 0, 0)),                # word lengths
        pl.BlockSpec((None, tb, LANES), lambda i: (i, 0, 0)),            # alphabet state
    ] + [pl.BlockSpec(w.shape, lambda i: (0, 0)) for w in weights]       # resident weights

    # VMEM budget: only raise the scoped limit if large tiles actually need it
    # (matters on v5e's 16 MiB default; harmless headroom elsewhere).
    est_vmem = (L * tb * 4 * H * 4                      # xg scratch (f32)
                + 2 * (L + 2) * tb * C_PAD * 2          # double-buffered seq (bf16)
                + 2 * tb * LANES * (2 + 4)              # alpha in + out blocks
                + 512 * 1024)                           # weights + slack
    cp_kwargs = dict(dimension_semantics=("parallel",))
    if est_vmem > (12 << 20):
        cp_kwargs["vmem_limit_bytes"] = min(2 * est_vmem, 100 << 20)

    out = pl.pallas_call(
        hangman_kernel,
        out_shape=jax.ShapeDtypeStruct((nb, tb, LANES), jnp.float32),
        grid=(nb,),
        in_specs=in_specs,
        out_specs=pl.BlockSpec((None, tb, LANES), lambda i: (i, 0, 0)),
        scratch_shapes=[pltpu.VMEM((L * tb, 4 * H), jnp.float32)],
        compiler_params=pltpu.CompilerParams(**cp_kwargs),
    )(seq, wl, alpha, *weights)

    return out.reshape(b_pad, LANES)[:B, :N_ALPHA]


def reference_forward(word_state, word_length, alphabet_state, p):
    """Pure-JAX f32 reference mirroring the PyTorch forward (eval mode)."""
    eps = 1e-5
    B, L, _ = word_state.shape
    x = jnp.transpose(word_state, (0, 2, 1))                             # (B, 27, L)
    xp = jnp.pad(x, ((0, 0), (0, 0), (1, 1)))
    conv = jnp.stack([jnp.einsum('oik,bik->bo', p['conv_w'], xp[:, :, t:t + 3])
                      for t in range(L)], axis=-1) + p['conv_b'][None, :, None]
    bn = ((conv - p['bn_mean'][None, :, None])
          / jnp.sqrt(p['bn_var'][None, :, None] + eps)
          * p['bn_gamma'][None, :, None] + p['bn_beta'][None, :, None])
    seq = jnp.transpose(jnp.maximum(bn, 0.0), (0, 2, 1))                 # (B, L, 32)

    h = jnp.zeros((B, H)); c = jnp.zeros((B, H)); feat = jnp.zeros((B, H))
    for t in range(L):
        gates = seq[:, t, :] @ p['w_ih'].T + h @ p['w_hh'].T + p['b_ih'] + p['b_hh']
        i = jax.nn.sigmoid(gates[:, :H]); f = jax.nn.sigmoid(gates[:, H:2 * H])
        g = jnp.tanh(gates[:, 2 * H:3 * H]); o = jax.nn.sigmoid(gates[:, 3 * H:])
        c = f * c + i * g
        h = o * jnp.tanh(c)
        feat = jnp.where((word_length == t + 1)[:, None], h, feat)

    combined = jnp.concatenate([feat, alphabet_state], axis=1)
    h1 = jnp.maximum(combined @ p['fc1_w'].T + p['fc1_b'], 0.0)
    logits = h1 @ p['fc2_w'].T + p['fc2_b']
    return jnp.where(alphabet_state == 1.0, -jnp.inf, logits)


if __name__ == "__main__":
    key = jax.random.PRNGKey(0)
    k_par, k_idx, k_alpha = jax.random.split(key, 3)

    B, L = 2, 8
    params = init_params(k_par)
    packed = pack_params(params)

    # word_state: one-hot over 27 symbols, shape (B, L, 27)
    idx = jax.random.randint(k_idx, (B, L), 0, C_IN)
    word_state = jax.nn.one_hot(idx, C_IN, dtype=jnp.float32)
    word_length = jnp.array([5, 8], dtype=jnp.int32)
    alphabet_state = (jax.random.uniform(k_alpha, (B, N_ALPHA)) < 0.3).astype(jnp.float32)

    out = hangman_forward(word_state, word_length, alphabet_state, packed)
    out = jax.block_until_ready(out)

    ref = reference_forward(word_state, word_length, alphabet_state, params)
    assert out.shape == (B, N_ALPHA)
    # bf16 MXU operands (f32 accumulation) -> loosened tolerance vs. the f32 reference.
    assert np.allclose(np.asarray(out), np.asarray(ref), atol=3e-2, rtol=3e-2), \
        f"mismatch:\n{out}\nvs\n{ref}"

    print("KERNEL_OK")
</pallas_src>

<mosaic_0001>
module attributes {stable_mosaic.version = 11 : i64} {
  func.func @hangman_kernel(%arg0: i32, %arg1: memref<1x1280x32xbf16, #tpu.memory_space<vmem>>, %arg2: memref<1x128x1xi32, #tpu.memory_space<vmem>>, %arg3: memref<1x128x128xbf16, #tpu.memory_space<vmem>>, %arg4: memref<32x32xbf16, #tpu.memory_space<vmem>>, %arg5: memref<32x32xbf16, #tpu.memory_space<vmem>>, %arg6: memref<32x32xbf16, #tpu.memory_space<vmem>>, %arg7: memref<1x32xf32, #tpu.memory_space<vmem>>, %arg8: memref<32x256xbf16, #tpu.memory_space<vmem>>, %arg9: memref<64x256xbf16, #tpu.memory_space<vmem>>, %arg10: memref<1x256xf32, #tpu.memory_space<vmem>>, %arg11: memref<64x64xbf16, #tpu.memory_space<vmem>>, %arg12: memref<128x64xbf16, #tpu.memory_space<vmem>>, %arg13: memref<1x64xf32, #tpu.memory_space<vmem>>, %arg14: memref<64x128xbf16, #tpu.memory_space<vmem>>, %arg15: memref<1x128xf32, #tpu.memory_space<vmem>>, %arg16: memref<1x128x128xf32, #tpu.memory_space<vmem>>, %arg17: memref<1024x256xf32, #tpu.memory_space<vmem>>) attributes {dimension_semantics = [#tpu.dimension_semantics<parallel>], iteration_bounds = array<i64: 1>, scalar_prefetch = 0 : i64, scratch_operands = 1 : i64, tpu.core_type = #tpu.core_type<tc>, window_params = [{transform_indices = @transform_0, window_bounds = array<i64: 1, 1280, 32>}, {transform_indices = @transform_1, window_bounds = array<i64: 1, 128, 1>}, {transform_indices = @transform_2, window_bounds = array<i64: 1, 128, 128>}, {pipeline_mode = #tpu.pipeline_mode<synchronous>, transform_indices = @transform_3, window_bounds = array<i64: 32, 32>}, {pipeline_mode = #tpu.pipeline_mode<synchronous>, transform_indices = @transform_4, window_bounds = array<i64: 32, 32>}, {pipeline_mode = #tpu.pipeline_mode<synchronous>, transform_indices = @transform_5, window_bounds = array<i64: 32, 32>}, {pipeline_mode = #tpu.pipeline_mode<synchronous>, transform_indices = @transform_6, window_bounds = array<i64: 1, 32>}, {pipeline_mode = #tpu.pipeline_mode<synchronous>, transform_indices = @transform_7, window_bounds = array<i64: 32, 256>}, {pipeline_mode = #tpu.pipeline_mode<synchronous>, transform_indices = @transform_8, window_bounds = array<i64: 64, 256>}, {pipeline_mode = #tpu.pipeline_mode<synchronous>, transform_indices = @transform_9, window_bounds = array<i64: 1, 256>}, {pipeline_mode = #tpu.pipeline_mode<synchronous>, transform_indices = @transform_10, window_bounds = array<i64: 64, 64>}, {pipeline_mode = #tpu.pipeline_mode<synchronous>, transform_indices = @transform_11, window_bounds = array<i64: 128, 64>}, {pipeline_mode = #tpu.pipeline_mode<synchronous>, transform_indices = @transform_12, window_bounds = array<i64: 1, 64>}, {pipeline_mode = #tpu.pipeline_mode<synchronous>, transform_indices = @transform_13, window_bounds = array<i64: 64, 128>}, {pipeline_mode = #tpu.pipeline_mode<synchronous>, transform_indices = @transform_14, window_bounds = array<i64: 1, 128>}, {transform_indices = @transform_15, window_bounds = array<i64: 1, 128, 128>}]} {
    %c0 = arith.constant 0 : index
    %c0_0 = arith.constant 0 : index
    %c0_1 = arith.constant 0 : index
    %0 = vector.load %arg1[%c0, %c0_0, %c0_1] : memref<1x1280x32xbf16, #tpu.memory_space<vmem>>, vector<1x1024x32xbf16>
    %1 = vector.shape_cast %0 : vector<1x1024x32xbf16> to vector<1024x32xbf16>
    %c0_2 = arith.constant 0 : index
    %c0_3 = arith.constant 0 : index
    %2 = vector.load %arg4[%c0_2, %c0_3] : memref<32x32xbf16, #tpu.memory_space<vmem>>, vector<32x32xbf16>
    %cst = arith.constant dense<0.000000e+00> : vector<1024x32xf32>
    %3 = tpu.matmul %1, %2, %cst {dimension_numbers = #tpu.dot_dimension_numbers<[1], [0], [0], [1], [0, 0, 1, 1], [], []>} : vector<1024x32xbf16>, vector<32x32xbf16>, vector<1024x32xf32> -> vector<1024x32xf32>
    %c0_4 = arith.constant 0 : index
    %c128 = arith.constant 128 : index
    %c0_5 = arith.constant 0 : index
    %4 = vector.load %arg1[%c0_4, %c128, %c0_5] : memref<1x1280x32xbf16, #tpu.memory_space<vmem>>, vector<1x1024x32xbf16>
    %5 = vector.shape_cast %4 : vector<1x1024x32xbf16> to vector<1024x32xbf16>
    %c0_6 = arith.constant 0 : index
    %c0_7 = arith.constant 0 : index
    %6 = vector.load %arg5[%c0_6, %c0_7] : memref<32x32xbf16, #tpu.memory_space<vmem>>, vector<32x32xbf16>
    %cst_8 = arith.constant dense<0.000000e+00> : vector<1024x32xf32>
    %7 = tpu.matmul %5, %6, %cst_8 {dimension_numbers = #tpu.dot_dimension_numbers<[1], [0], [0], [1], [0, 0, 1, 1], [], []>} : vector<1024x32xbf16>, vector<32x32xbf16>, vector<1024x32xf32> -> vector<1024x32xf32>
    %8 = arith.addf %3, %7 : vector<1024x32xf32>
    %c0_9 = arith.constant 0 : index
    %c256 = arith.constant 256 : index
    %c0_10 = arith.constant 0 : index
    %9 = vector.load %arg1[%c0_9, %c256, %c0_10] : memref<1x1280x32xbf16, #tpu.memory_space<vmem>>, vector<1x1024x32xbf16>
    %10 = vector.shape_cast %9 : vector<1x1024x32xbf16> to vector<1024x32xbf16>
    %c0_11 = arith.constant 0 : index
    %c0_12 = arith.constant 0 : index
    %11 = vector.load %arg6[%c0_11, %c0_12] : memref<32x32xbf16, #tpu.memory_space<vmem>>, vector<32x32xbf16>
    %cst_13 = arith.constant dense<0.000000e+00> : vector<1024x32xf32>
    %12 = tpu.matmul %10, %11, %cst_13 {dimension_numbers = #tpu.dot_dimension_numbers<[1], [0], [0], [1], [0, 0, 1, 1], [], []>} : vector<1024x32xbf16>, vector<32x32xbf16>, vector<1024x32xf32> -> vector<1024x32xf32>
    %13 = arith.addf %8, %12 : vector<1024x32xf32>
    %c0_14 = arith.constant 0 : index
    %c0_15 = arith.constant 0 : index
    %14 = vector.load %arg7[%c0_14, %c0_15] : memref<1x32xf32, #tpu.memory_space<vmem>>, vector<1x32xf32>
    %15 = vector.broadcast %14 : vector<1x32xf32> to vector<1024x32xf32>
    %16 = arith.addf %13, %15 : vector<1024x32xf32>
    %cst_16 = arith.constant 0.000000e+00 : f32
    %17 = vector.broadcast %cst_16 : f32 to vector<1024x32xf32>
    %18 = arith.maximumf %16, %17 : vector<1024x32xf32>
    %19 = arith.truncf %18 : vector<1024x32xf32> to vector<1024x32xbf16>
    %c0_17 = arith.constant 0 : index
    %c0_18 = arith.constant 0 : index
    %20 = vector.load %arg8[%c0_17, %c0_18] : memref<32x256xbf16, #tpu.memory_space<vmem>>, vector<32x256xbf16>
    %cst_19 = arith.constant dense<0.000000e+00> : vector<1024x256xf32>
    %21 = tpu.matmul %19, %20, %cst_19 {dimension_numbers = #tpu.dot_dimension_numbers<[1], [0], [0], [1], [0, 0, 1, 1], [], []>} : vector<1024x32xbf16>, vector<32x256xbf16>, vector<1024x256xf32> -> vector<1024x256xf32>
    %c0_20 = arith.constant 0 : index
    %c0_21 = arith.constant 0 : index
    %22 = vector.load %arg10[%c0_20, %c0_21] : memref<1x256xf32, #tpu.memory_space<vmem>>, vector<1x256xf32>
    %23 = vector.broadcast %22 : vector<1x256xf32> to vector<1024x256xf32>
    %24 = arith.addf %21, %23 : vector<1024x256xf32>
    %c0_22 = arith.constant 0 : index
    %c0_23 = arith.constant 0 : index
    %25 = vector.load %arg17[%c0_22, %c0_23] : memref<1024x256xf32, #tpu.memory_space<vmem>>, vector<1024x256xf32>
    tpu.vector_store %arg17[%c0_22, %c0_23], %24 {strides = array<i32>} : memref<1024x256xf32, #tpu.memory_space<vmem>>, vector<1024x256xf32>,
    %c0_24 = arith.constant 0 : index
    %c0_25 = arith.constant 0 : index
    %26 = vector.load %arg9[%c0_24, %c0_25] : memref<64x256xbf16, #tpu.memory_space<vmem>>, vector<64x256xbf16>
    %c0_26 = arith.constant 0 : index
    %c0_27 = arith.constant 0 : index
    %c0_28 = arith.constant 0 : index
    %27 = vector.load %arg2[%c0_26, %c0_27, %c0_28] : memref<1x128x1xi32, #tpu.memory_space<vmem>>, vector<1x128x1xi32>
    %28 = vector.shape_cast %27 : vector<1x128x1xi32> to vector<128x1xi32>
    %cst_29 = arith.constant 0.000000e+00 : f32
    %29 = vector.broadcast %cst_29 : f32 to vector<128x64xf32>
    %cst_30 = arith.constant 0.000000e+00 : f32
    %30 = vector.broadcast %cst_30 : f32 to vector<128x64xf32>
    %cst_31 = arith.constant 0.000000e+00 : f32
    %31 = vector.broadcast %cst_31 : f32 to vector<128x64xf32>
    %c0_32 = arith.constant 0 : index
    %c0_33 = arith.constant 0 : index
    %32 = vector.load %arg17[%c0_32, %c0_33] : memref<1024x256xf32, #tpu.memory_space<vmem>>, vector<128x256xf32>
    %33 = arith.truncf %29 : vector<128x64xf32> to vector<128x64xbf16>
    %cst_34 = arith.constant dense<0.000000e+00> : vector<128x256xf32>
    %34 = tpu.matmul %33, %26, %cst_34 {dimension_numbers = #tpu.dot_dimension_numbers<[1], [0], [0], [1], [0, 0, 1, 1], [], []>} : vector<128x64xbf16>, vector<64x256xbf16>, vector<128x256xf32> -> vector<128x256xf32>
    %35 = arith.addf %32, %34 : vector<128x256xf32>
    %36 = arith.negf %35 : vector<128x256xf32>
    %37 = math.exp %36 : vector<128x256xf32>
    %cst_35 = arith.constant 1.000000e+00 : f32
    %38 = vector.broadcast %cst_35 : f32 to vector<128x256xf32>
    %39 = arith.addf %38, %37 : vector<128x256xf32>
    %40 = arith.divf %38, %39 : vector<128x256xf32>
    %41 = vector.extract_strided_slice %40 {offsets = [0, 0], sizes = [128, 64], strides = [1, 1]} : vector<128x256xf32> to vector<128x64xf32>
    %42 = vector.extract_strided_slice %40 {offsets = [0, 64], sizes = [128, 64], strides = [1, 1]} : vector<128x256xf32> to vector<128x64xf32>
    %43 = vector.extract_strided_slice %40 {offsets = [0, 128], sizes = [128, 64], strides = [1, 1]} : vector<128x256xf32> to vector<128x64xf32>
    %44 = vector.extract_strided_slice %40 {offsets = [0, 192], sizes = [128, 64], strides = [1, 1]} : vector<128x256xf32> to vector<128x64xf32>
    %cst_36 = arith.constant 2.000000e+00 : f32
    %45 = vector.broadcast %cst_36 : f32 to vector<128x64xf32>
    %46 = arith.mulf %45, %44 : vector<128x64xf32>
    %cst_37 = arith.constant 1.000000e+00 : f32
    %47 = vector.broadcast %cst_37 : f32 to vector<128x64xf32>
    %48 = arith.subf %46, %47 : vector<128x64xf32>
    %49 = arith.mulf %42, %30 : vector<128x64xf32>
    %50 = arith.mulf %41, %48 : vector<128x64xf32>
    %51 = arith.addf %49, %50 : vector<128x64xf32>
    %52 = math.tanh %51 : vector<128x64xf32>
    %53 = arith.mulf %43, %52 : vector<128x64xf32>
    %c1_i32 = arith.constant 1 : i32
    %54 = vector.broadcast %c1_i32 : i32 to vector<128x1xi32>
    %55 = arith.cmpi eq, %28, %54 : vector<128x1xi32>
    %56 = vector.shape_cast %55 : vector<128x1xi1> to vector<128x1xi1>
    %57 = vector.broadcast %56 : vector<128x1xi1> to vector<128x64xi1>
    %58 = arith.select %57, %53, %31 : vector<128x64xi1>, vector<128x64xf32>
    %c128_38 = arith.constant 128 : index
    %c0_39 = arith.constant 0 : index
    %59 = vector.load %arg17[%c128_38, %c0_39] : memref<1024x256xf32, #tpu.memory_space<vmem>>, vector<128x256xf32>
    %60 = arith.truncf %53 : vector<128x64xf32> to vector<128x64xbf16>
    %cst_40 = arith.constant dense<0.000000e+00> : vector<128x256xf32>
    %61 = tpu.matmul %60, %26, %cst_40 {dimension_numbers = #tpu.dot_dimension_numbers<[1], [0], [0], [1], [0, 0, 1, 1], [], []>} : vector<128x64xbf16>, vector<64x256xbf16>, vector<128x256xf32> -> vector<128x256xf32>
    %62 = arith.addf %59, %61 : vector<128x256xf32>
    %63 = arith.negf %62 : vector<128x256xf32>
    %64 = math.exp %63 : vector<128x256xf32>
    %cst_41 = arith.constant 1.000000e+00 : f32
    %65 = vector.broadcast %cst_41 : f32 to vector<128x256xf32>
    %66 = arith.addf %65, %64 : vector<128x256xf32>
    %67 = arith.divf %65, %66 : vector<128x256xf32>
    %68 = vector.extract_strided_slice %67 {offsets = [0, 0], sizes = [128, 64], strides = [1, 1]} : vector<128x256xf32> to vector<128x64xf32>
    %69 = vector.extract_strided_slice %67 {offsets = [0, 64], sizes = [128, 64], strides = [1, 1]} : vector<128x256xf32> to vector<128x64xf32>
    %70 = vector.extract_strided_slice %67 {offsets = [0, 128], sizes = [128, 64], strides = [1, 1]} : vector<128x256xf32> to vector<128x64xf32>
    %71 = vector.extract_strided_slice %67 {offsets = [0, 192], sizes = [128, 64], strides = [1, 1]} : vector<128x256xf32> to vector<128x64xf32>
    %cst_42 = arith.constant 2.000000e+00 : f32
    %72 = vector.broadcast %cst_42 : f32 to vector<128x64xf32>
    %73 = arith.mulf %72, %71 : vector<128x64xf32>
    %cst_43 = arith.constant 1.000000e+00 : f32
    %74 = vector.broadcast %cst_43 : f32 to vector<128x64xf32>
    %75 = arith.subf %73, %74 : vector<128x64xf32>
    %76 = arith.mulf %69, %51 : vector<128x64xf32>
    %77 = arith.mulf %68, %75 : vector<128x64xf32>
    %78 = arith.addf %76, %77 : vector<128x64xf32>
    %79 = math.tanh %78 : vector<128x64xf32>
    %80 = arith.mulf %70, %79 : vector<128x64xf32>
    %c2_i32 = arith.constant 2 : i32
    %81 = vector.broadcast %c2_i32 : i32 to vector<128x1xi32>
    %82 = arith.cmpi eq, %28, %81 : vector<128x1xi32>
    %83 = vector.shape_cast %82 : vector<128x1xi1> to vector<128x1xi1>
    %84 = vector.broadcast %83 : vector<128x1xi1> to vector<128x64xi1>
    %85 = arith.select %84, %80, %58 : vector<128x64xi1>, vector<128x64xf32>
    %c256_44 = arith.constant 256 : index
    %c0_45 = arith.constant 0 : index
    %86 = vector.load %arg17[%c256_44, %c0_45] : memref<1024x256xf32, #tpu.memory_space<vmem>>, vector<128x256xf32>
    %87 = arith.truncf %80 : vector<128x64xf32> to vector<128x64xbf16>
    %cst_46 = arith.constant dense<0.000000e+00> : vector<128x256xf32>
    %88 = tpu.matmul %87, %26, %cst_46 {dimension_numbers = #tpu.dot_dimension_numbers<[1], [0], [0], [1], [0, 0, 1, 1], [], []>} : vector<128x64xbf16>, vector<64x256xbf16>, vector<128x256xf32> -> vector<128x256xf32>
    %89 = arith.addf %86, %88 : vector<128x256xf32>
    %90 = arith.negf %89 : vector<128x256xf32>
    %91 = math.exp %90 : vector<128x256xf32>
    %cst_47 = arith.constant 1.000000e+00 : f32
    %92 = vector.broadcast %cst_47 : f32 to vector<128x256xf32>
    %93 = arith.addf %92, %91 : vector<128x256xf32>
    %94 = arith.divf %92, %93 : vector<128x256xf32>
    %95 = vector.extract_strided_slice %94 {offsets = [0, 0], sizes = [128, 64], strides = [1, 1]} : vector<128x256xf32> to vector<128x64xf32>
    %96 = vector.extract_strided_slice %94 {offsets = [0, 64], sizes = [128, 64], strides = [1, 1]} : vector<128x256xf32> to vector<128x64xf32>
    %97 = vector.extract_strided_slice %94 {offsets = [0, 128], sizes = [128, 64], strides = [1, 1]} : vector<128x256xf32> to vector<128x64xf32>
    %98 = vector.extract_strided_slice %94 {offsets = [0, 192], sizes = [128, 64], strides = [1, 1]} : vector<128x256xf32> to vector<128x64xf32>
    %cst_48 = arith.constant 2.000000e+00 : f32
    %99 = vector.broadcast %cst_48 : f32 to vector<128x64xf32>
    %100 = arith.mulf %99, %98 : vector<128x64xf32>
    %cst_49 = arith.constant 1.000000e+00 : f32
    %101 = vector.broadcast %cst_49 : f32 to vector<128x64xf32>
    %102 = arith.subf %100, %101 : vector<128x64xf32>
    %103 = arith.mulf %96, %78 : vector<128x64xf32>
    %104 = arith.mulf %95, %102 : vector<128x64xf32>
    %105 = arith.addf %103, %104 : vector<128x64xf32>
    %106 = math.tanh %105 : vector<128x64xf32>
    %107 = arith.mulf %97, %106 : vector<128x64xf32>
    %c3_i32 = arith.constant 3 : i32
    %108 = vector.broadcast %c3_i32 : i32 to vector<128x1xi32>
    %109 = arith.cmpi eq, %28, %108 : vector<128x1xi32>
    %110 = vector.shape_cast %109 : vector<128x1xi1> to vector<128x1xi1>
    %111 = vector.broadcast %110 : vector<128x1xi1> to vector<128x64xi1>
    %112 = arith.select %111, %107, %85 : vector<128x64xi1>, vector<128x64xf32>
    %c384 = arith.constant 384 : index
    %c0_50 = arith.constant 0 : index
    %113 = vector.load %arg17[%c384, %c0_50] : memref<1024x256xf32, #tpu.memory_space<vmem>>, vector<128x256xf32>
    %114 = arith.truncf %107 : vector<128x64xf32> to vector<128x64xbf16>
    %cst_51 = arith.constant dense<0.000000e+00> : vector<128x256xf32>
    %115 = tpu.matmul %114, %26, %cst_51 {dimension_numbers = #tpu.dot_dimension_numbers<[1], [0], [0], [1], [0, 0, 1, 1], [], []>} : vector<128x64xbf16>, vector<64x256xbf16>, vector<128x256xf32> -> vector<128x256xf32>
    %116 = arith.addf %113, %115 : vector<128x256xf32>
    %117 = arith.negf %116 : vector<128x256xf32>
    %118 = math.exp %117 : vector<128x256xf32>
    %cst_52 = arith.constant 1.000000e+00 : f32
    %119 = vector.broadcast %cst_52 : f32 to vector<128x256xf32>
    %120 = arith.addf %119, %118 : vector<128x256xf32>
    %121 = arith.divf %119, %120 : vector<128x256xf32>
    %122 = vector.extract_strided_slice %121 {offsets = [0, 0], sizes = [128, 64], strides = [1, 1]} : vector<128x256xf32> to vector<128x64xf32>
    %123 = vector.extract_strided_slice %121 {offsets = [0, 64], sizes = [128, 64], strides = [1, 1]} : vector<128x256xf32> to vector<128x64xf32>
    %124 = vector.extract_strided_slice %121 {offsets = [0, 128], sizes = [128, 64], strides = [1, 1]} : vector<128x256xf32> to vector<128x64xf32>
    %125 = vector.extract_strided_slice %121 {offsets = [0, 192], sizes = [128, 64], strides = [1, 1]} : vector<128x256xf32> to vector<128x64xf32>
    %cst_53 = arith.constant 2.000000e+00 : f32
    %126 = vector.broadcast %cst_53 : f32 to vector<128x64xf32>
    %127 = arith.mulf %126, %125 : vector<128x64xf32>
    %cst_54 = arith.constant 1.000000e+00 : f32
    %128 = vector.broadcast %cst_54 : f32 to vector<128x64xf32>
    %129 = arith.subf %127, %128 : vector<128x64xf32>
    %130 = arith.mulf %123, %105 : vector<128x64xf32>
    %131 = arith.mulf %122, %129 : vector<128x64xf32>
    %132 = arith.addf %130, %131 : vector<128x64xf32>
    %133 = math.tanh %132 : vector<128x64xf32>
    %134 = arith.mulf %124, %133 : vector<128x64xf32>
    %c4_i32 = arith.constant 4 : i32
    %135 = vector.broadcast %c4_i32 : i32 to vector<128x1xi32>
    %136 = arith.cmpi eq, %28, %135 : vector<128x1xi32>
    %137 = vector.shape_cast %136 : vector<128x1xi1> to vector<128x1xi1>
    %138 = vector.broadcast %137 : vector<128x1xi1> to vector<128x64xi1>
    %139 = arith.select %138, %134, %112 : vector<128x64xi1>, vector<128x64xf32>
    %c512 = arith.constant 512 : index
    %c0_55 = arith.constant 0 : index
    %140 = vector.load %arg17[%c512, %c0_55] : memref<1024x256xf32, #tpu.memory_space<vmem>>, vector<128x256xf32>
    %141 = arith.truncf %134 : vector<128x64xf32> to vector<128x64xbf16>
    %cst_56 = arith.constant dense<0.000000e+00> : vector<128x256xf32>
    %142 = tpu.matmul %141, %26, %cst_56 {dimension_numbers = #tpu.dot_dimension_numbers<[1], [0], [0], [1], [0, 0, 1, 1], [], []>} : vector<128x64xbf16>, vector<64x256xbf16>, vector<128x256xf32> -> vector<128x256xf32>
    %143 = arith.addf %140, %142 : vector<128x256xf32>
    %144 = arith.negf %143 : vector<128x256xf32>
    %145 = math.exp %144 : vector<128x256xf32>
    %cst_57 = arith.constant 1.000000e+00 : f32
    %146 = vector.broadcast %cst_57 : f32 to vector<128x256xf32>
    %147 = arith.addf %146, %145 : vector<128x256xf32>
    %148 = arith.divf %146, %147 : vector<128x256xf32>
    %149 = vector.extract_strided_slice %148 {offsets = [0, 0], sizes = [128, 64], strides = [1, 1]} : vector<128x256xf32> to vector<128x64xf32>
    %150 = vector.extract_strided_slice %148 {offsets = [0, 64], sizes = [128, 64], strides = [1, 1]} : vector<128x256xf32> to vector<128x64xf32>
    %151 = vector.extract_strided_slice %148 {offsets = [0, 128], sizes = [128, 64], strides = [1, 1]} : vector<128x256xf32> to vector<128x64xf32>
    %152 = vector.extract_strided_slice %148 {offsets = [0, 192], sizes = [128, 64], strides = [1, 1]} : vector<128x256xf32> to vector<128x64xf32>
    %cst_58 = arith.constant 2.000000e+00 : f32
    %153 = vector.broadcast %cst_58 : f32 to vector<128x64xf32>
    %154 = arith.mulf %153, %152 : vector<128x64xf32>
    %cst_59 = arith.constant 1.000000e+00 : f32
    %155 = vector.broadcast %cst_59 : f32 to vector<128x64xf32>
    %156 = arith.subf %154, %155 : vector<128x64xf32>
    %157 = arith.mulf %150, %132 : vector<128x64xf32>
    %158 = arith.mulf %149, %156 : vector<128x64xf32>
    %159 = arith.addf %157, %158 : vector<128x64xf32>
    %160 = math.tanh %159 : vector<128x64xf32>
    %161 = arith.mulf %151, %160 : vector<128x64xf32>
    %c5_i32 = arith.constant 5 : i32
    %162 = vector.broadcast %c5_i32 : i32 to vector<128x1xi32>
    %163 = arith.cmpi eq, %28, %162 : vector<128x1xi32>
    %164 = vector.shape_cast %163 : vector<128x1xi1> to vector<128x1xi1>
    %165 = vector.broadcast %164 : vector<128x1xi1> to vector<128x64xi1>
    %166 = arith.select %165, %161, %139 : vector<128x64xi1>, vector<128x64xf32>
    %c640 = arith.constant 640 : index
    %c0_60 = arith.constant 0 : index
    %167 = vector.load %arg17[%c640, %c0_60] : memref<1024x256xf32, #tpu.memory_space<vmem>>, vector<128x256xf32>
    %168 = arith.truncf %161 : vector<128x64xf32> to vector<128x64xbf16>
    %cst_61 = arith.constant dense<0.000000e+00> : vector<128x256xf32>
    %169 = tpu.matmul %168, %26, %cst_61 {dimension_numbers = #tpu.dot_dimension_numbers<[1], [0], [0], [1], [0, 0, 1, 1], [], []>} : vector<128x64xbf16>, vector<64x256xbf16>, vector<128x256xf32> -> vector<128x256xf32>
    %170 = arith.addf %167, %169 : vector<128x256xf32>
    %171 = arith.negf %170 : vector<128x256xf32>
    %172 = math.exp %171 : vector<128x256xf32>
    %cst_62 = arith.constant 1.000000e+00 : f32
    %173 = vector.broadcast %cst_62 : f32 to vector<128x256xf32>
    %174 = arith.addf %173, %172 : vector<128x256xf32>
    %175 = arith.divf %173, %174 : vector<128x256xf32>
    %176 = vector.extract_strided_slice %175 {offsets = [0, 0], sizes = [128, 64], strides = [1, 1]} : vector<128x256xf32> to vector<128x64xf32>
    %177 = vector.extract_strided_slice %175 {offsets = [0, 64], sizes = [128, 64], strides = [1, 1]} : vector<128x256xf32> to vector<128x64xf32>
    %178 = vector.extract_strided_slice %175 {offsets = [0, 128], sizes = [128, 64], strides = [1, 1]} : vector<128x256xf32> to vector<128x64xf32>
    %179 = vector.extract_strided_slice %175 {offsets = [0, 192], sizes = [128, 64], strides = [1, 1]} : vector<128x256xf32> to vector<128x64xf32>
    %cst_63 = arith.constant 2.000000e+00 : f32
    %180 = vector.broadcast %cst_63 : f32 to vector<128x64xf32>
    %181 = arith.mulf %180, %179 : vector<128x64xf32>
    %cst_64 = arith.constant 1.000000e+00 : f32
    %182 = vector.broadcast %cst_64 : f32 to vector<128x64xf32>
    %183 = arith.subf %181, %182 : vector<128x64xf32>
    %184 = arith.mulf %177, %159 : vector<128x64xf32>
    %185 = arith.mulf %176, %183 : vector<128x64xf32>
    %186 = arith.addf %184, %185 : vector<128x64xf32>
    %187 = math.tanh %186 : vector<128x64xf32>
    %188 = arith.mulf %178, %187 : vector<128x64xf32>
    %c6_i32 = arith.constant 6 : i32
    %189 = vector.broadcast %c6_i32 : i32 to vector<128x1xi32>
    %190 = arith.cmpi eq, %28, %189 : vector<128x1xi32>
    %191 = vector.shape_cast %190 : vector<128x1xi1> to vector<128x1xi1>
    %192 = vector.broadcast %191 : vector<128x1xi1> to vector<128x64xi1>
    %193 = arith.select %192, %188, %166 : vector<128x64xi1>, vector<128x64xf32>
    %c768 = arith.constant 768 : index
    %c0_65 = arith.constant 0 : index
    %194 = vector.load %arg17[%c768, %c0_65] : memref<1024x256xf32, #tpu.memory_space<vmem>>, vector<128x256xf32>
    %195 = arith.truncf %188 : vector<128x64xf32> to vector<128x64xbf16>
    %cst_66 = arith.constant dense<0.000000e+00> : vector<128x256xf32>
    %196 = tpu.matmul %195, %26, %cst_66 {dimension_numbers = #tpu.dot_dimension_numbers<[1], [0], [0], [1], [0, 0, 1, 1], [], []>} : vector<128x64xbf16>, vector<64x256xbf16>, vector<128x256xf32> -> vector<128x256xf32>
    %197 = arith.addf %194, %196 : vector<128x256xf32>
    %198 = arith.negf %197 : vector<128x256xf32>
    %199 = math.exp %198 : vector<128x256xf32>
    %cst_67 = arith.constant 1.000000e+00 : f32
    %200 = vector.broadcast %cst_67 : f32 to vector<128x256xf32>
    %201 = arith.addf %200, %199 : vector<128x256xf32>
    %202 = arith.divf %200, %201 : vector<128x256xf32>
    %203 = vector.extract_strided_slice %202 {offsets = [0, 0], sizes = [128, 64], strides = [1, 1]} : vector<128x256xf32> to vector<128x64xf32>
    %204 = vector.extract_strided_slice %202 {offsets = [0, 64], sizes = [128, 64], strides = [1, 1]} : vector<128x256xf32> to vector<128x64xf32>
    %205 = vector.extract_strided_slice %202 {offsets = [0, 128], sizes = [128, 64], strides = [1, 1]} : vector<128x256xf32> to vector<128x64xf32>
    %206 = vector.extract_strided_slice %202 {offsets = [0, 192], sizes = [128, 64], strides = [1, 1]} : vector<128x256xf32> to vector<128x64xf32>
    %cst_68 = arith.constant 2.000000e+00 : f32
    %207 = vector.broadcast %cst_68 : f32 to vector<128x64xf32>
    %208 = arith.mulf %207, %206 : vector<128x64xf32>
    %cst_69 = arith.constant 1.000000e+00 : f32
    %209 = vector.broadcast %cst_69 : f32 to vector<128x64xf32>
    %210 = arith.subf %208, %209 : vector<128x64xf32>
    %211 = arith.mulf %204, %186 : vector<128x64xf32>
    %212 = arith.mulf %203, %210 : vector<128x64xf32>
    %213 = arith.addf %211, %212 : vector<128x64xf32>
    %214 = math.tanh %213 : vector<128x64xf32>
    %215 = arith.mulf %205, %214 : vector<128x64xf32>
    %c7_i32 = arith.constant 7 : i32
    %216 = vector.broadcast %c7_i32 : i32 to vector<128x1xi32>
    %217 = arith.cmpi eq, %28, %216 : vector<128x1xi32>
    %218 = vector.shape_cast %217 : vector<128x1xi1> to vector<128x1xi1>
    %219 = vector.broadcast %218 : vector<128x1xi1> to vector<128x64xi1>
    %220 = arith.select %219, %215, %193 : vector<128x64xi1>, vector<128x64xf32>
    %c896 = arith.constant 896 : index
    %c0_70 = arith.constant 0 : index
    %221 = vector.load %arg17[%c896, %c0_70] : memref<1024x256xf32, #tpu.memory_space<vmem>>, vector<128x256xf32>
    %222 = arith.truncf %215 : vector<128x64xf32> to vector<128x64xbf16>
    %cst_71 = arith.constant dense<0.000000e+00> : vector<128x256xf32>
    %223 = tpu.matmul %222, %26, %cst_71 {dimension_numbers = #tpu.dot_dimension_numbers<[1], [0], [0], [1], [0, 0, 1, 1], [], []>} : vector<128x64xbf16>, vector<64x256xbf16>, vector<128x256xf32> -> vector<128x256xf32>
    %224 = arith.addf %221, %223 : vector<128x256xf32>
    %225 = arith.negf %224 : vector<128x256xf32>
    %226 = math.exp %225 : vector<128x256xf32>
    %cst_72 = arith.constant 1.000000e+00 : f32
    %227 = vector.broadcast %cst_72 : f32 to vector<128x256xf32>
    %228 = arith.addf %227, %226 : vector<128x256xf32>
    %229 = arith.divf %227, %228 : vector<128x256xf32>
    %230 = vector.extract_strided_slice %229 {offsets = [0, 0], sizes = [128, 64], strides = [1, 1]} : vector<128x256xf32> to vector<128x64xf32>
    %231 = vector.extract_strided_slice %229 {offsets = [0, 64], sizes = [128, 64], strides = [1, 1]} : vector<128x256xf32> to vector<128x64xf32>
    %232 = vector.extract_strided_slice %229 {offsets = [0, 128], sizes = [128, 64], strides = [1, 1]} : vector<128x256xf32> to vector<128x64xf32>
    %233 = vector.extract_strided_slice %229 {offsets = [0, 192], sizes = [128, 64], strides = [1, 1]} : vector<128x256xf32> to vector<128x64xf32>
    %cst_73 = arith.constant 2.000000e+00 : f32
    %234 = vector.broadcast %cst_73 : f32 to vector<128x64xf32>
    %235 = arith.mulf %234, %233 : vector<128x64xf32>
    %cst_74 = arith.constant 1.000000e+00 : f32
    %236 = vector.broadcast %cst_74 : f32 to vector<128x64xf32>
    %237 = arith.subf %235, %236 : vector<128x64xf32>
    %238 = arith.mulf %231, %213 : vector<128x64xf32>
    %239 = arith.mulf %230, %237 : vector<128x64xf32>
    %240 = arith.addf %238, %239 : vector<128x64xf32>
    %241 = math.tanh %240 : vector<128x64xf32>
    %242 = arith.mulf %232, %241 : vector<128x64xf32>
    %c8_i32 = arith.constant 8 : i32
    %243 = vector.broadcast %c8_i32 : i32 to vector<128x1xi32>
    %244 = arith.cmpi eq, %28, %243 : vector<128x1xi32>
    %245 = vector.shape_cast %244 : vector<128x1xi1> to vector<128x1xi1>
    %246 = vector.broadcast %245 : vector<128x1xi1> to vector<128x64xi1>
    %247 = arith.select %246, %242, %220 : vector<128x64xi1>, vector<128x64xf32>
    %c0_75 = arith.constant 0 : index
    %c0_76 = arith.constant 0 : index
    %c0_77 = arith.constant 0 : index
    %248 = vector.load %arg3[%c0_75, %c0_76, %c0_77] : memref<1x128x128xbf16, #tpu.memory_space<vmem>>, vector<1x128x128xbf16>
    %249 = vector.shape_cast %248 : vector<1x128x128xbf16> to vector<128x128xbf16>
    %250 = arith.truncf %247 : vector<128x64xf32> to vector<128x64xbf16>
    %c0_78 = arith.constant 0 : index
    %c0_79 = arith.constant 0 : index
    %251 = vector.load %arg11[%c0_78, %c0_79] : memref<64x64xbf16, #tpu.memory_space<vmem>>, vector<64x64xbf16>
    %cst_80 = arith.constant dense<0.000000e+00> : vector<128x64xf32>
    %252 = tpu.matmul %250, %251, %cst_80 {dimension_numbers = #tpu.dot_dimension_numbers<[1], [0], [0], [1], [0, 0, 1, 1], [], []>} : vector<128x64xbf16>, vector<64x64xbf16>, vector<128x64xf32> -> vector<128x64xf32>
    %c0_81 = arith.constant 0 : index
    %c0_82 = arith.constant 0 : index
    %253 = vector.load %arg12[%c0_81, %c0_82] : memref<128x64xbf16, #tpu.memory_space<vmem>>, vector<128x64xbf16>
    %cst_83 = arith.constant dense<0.000000e+00> : vector<128x64xf32>
    %254 = tpu.matmul %249, %253, %cst_83 {dimension_numbers = #tpu.dot_dimension_numbers<[1], [0], [0], [1], [0, 0, 1, 1], [], []>} : vector<128x128xbf16>, vector<128x64xbf16>, vector<128x64xf32> -> vector<128x64xf32>
    %255 = arith.addf %252, %254 : vector<128x64xf32>
    %c0_84 = arith.constant 0 : index
    %c0_85 = arith.constant 0 : index
    %256 = vector.load %arg13[%c0_84, %c0_85] : memref<1x64xf32, #tpu.memory_space<vmem>>, vector<1x64xf32>
    %257 = vector.broadcast %256 : vector<1x64xf32> to vector<128x64xf32>
    %258 = arith.addf %255, %257 : vector<128x64xf32>
    %cst_86 = arith.constant 0.000000e+00 : f32
    %259 = vector.broadcast %cst_86 : f32 to vector<128x64xf32>
    %260 = arith.maximumf %258, %259 : vector<128x64xf32>
    %261 = arith.truncf %260 : vector<128x64xf32> to vector<128x64xbf16>
    %c0_87 = arith.constant 0 : index
    %c0_88 = arith.constant 0 : index
    %262 = vector.load %arg14[%c0_87, %c0_88] : memref<64x128xbf16, #tpu.memory_space<vmem>>, vector<64x128xbf16>
    %cst_89 = arith.constant dense<0.000000e+00> : vector<128x128xf32>
    %263 = tpu.matmul %261, %262, %cst_89 {dimension_numbers = #tpu.dot_dimension_numbers<[1], [0], [0], [1], [0, 0, 1, 1], [], []>} : vector<128x64xbf16>, vector<64x128xbf16>, vector<128x128xf32> -> vector<128x128xf32>
    %c0_90 = arith.constant 0 : index
    %c0_91 = arith.constant 0 : index
    %264 = vector.load %arg15[%c0_90, %c0_91] : memref<1x128xf32, #tpu.memory_space<vmem>>, vector<1x128xf32>
    %265 = vector.broadcast %264 : vector<1x128xf32> to vector<128x128xf32>
    %266 = arith.addf %263, %265 : vector<128x128xf32>
    %cst_92 = arith.constant 1.000000e+00 : bf16
    %267 = vector.broadcast %cst_92 : bf16 to vector<128x128xbf16>
    %268 = arith.cmpf oeq, %249, %267 : vector<128x128xbf16>
    %cst_93 = arith.constant 0xFF800000 : f32
    %269 = vector.broadcast %cst_93 : f32 to vector<128x128xf32>
    %270 = arith.select %268, %269, %266 : vector<128x128xi1>, vector<128x128xf32>
    %c0_94 = arith.constant 0 : index
    %c0_95 = arith.constant 0 : index
    %c0_96 = arith.constant 0 : index
    %271 = vector.load %arg16[%c0_94, %c0_95, %c0_96] : memref<1x128x128xf32, #tpu.memory_space<vmem>>, vector<1x128x128xf32>
    %272 = vector.shape_cast %271 : vector<1x128x128xf32> to vector<128x128xf32>
    %273 = vector.shape_cast %270 : vector<128x128xf32> to vector<1x128x128xf32>
    tpu.vector_store %arg16[%c0_94, %c0_95, %c0_96], %273 {strides = array<i32>} : memref<1x128x128xf32, #tpu.memory_space<vmem>>, vector<1x128x128xf32>,
    return
  }
  func.func @transform_0(%arg0: i32) -> (i32, i32, i32) {
    %c0_i32 = arith.constant 0 : i32
    %c0_i32_0 = arith.constant 0 : i32
    %c0_i32_1 = arith.constant 0 : i32
    return %arg0, %c0_i32, %c0_i32_0 : i32, i32, i32
  }
  func.func @transform_1(%arg0: i32) -> (i32, i32, i32) {
    %c0_i32 = arith.constant 0 : i32
    %c0_i32_0 = arith.constant 0 : i32
    %c0_i32_1 = arith.constant 0 : i32
    return %arg0, %c0_i32, %c0_i32_0 : i32, i32, i32
  }
  func.func @transform_2(%arg0: i32) -> (i32, i32, i32) {
    %c0_i32 = arith.constant 0 : i32
    %c0_i32_0 = arith.constant 0 : i32
    %c0_i32_1 = arith.constant 0 : i32
    return %arg0, %c0_i32, %c0_i32_0 : i32, i32, i32
  }
  func.func @transform_3(%arg0: i32) -> (i32, i32) {
    %c0_i32 = arith.constant 0 : i32
    %c0_i32_0 = arith.constant 0 : i32
    %c0_i32_1 = arith.constant 0 : i32
    return %c0_i32, %c0_i32_0 : i32, i32
  }
  func.func @transform_4(%arg0: i32) -> (i32, i32) {
    %c0_i32 = arith.constant 0 : i32
    %c0_i32_0 = arith.constant 0 : i32
    %c0_i32_1 = arith.constant 0 : i32
    return %c0_i32, %c0_i32_0 : i32, i32
  }
  func.func @transform_5(%arg0: i32) -> (i32, i32) {
    %c0_i32 = arith.constant 0 : i32
    %c0_i32_0 = arith.constant 0 : i32
    %c0_i32_1 = arith.constant 0 : i32
    return %c0_i32, %c0_i32_0 : i32, i32
  }
  func.func @transform_6(%arg0: i32) -> (i32, i32) {
    %c0_i32 = arith.constant 0 : i32
    %c0_i32_0 = arith.constant 0 : i32
    %c0_i32_1 = arith.constant 0 : i32
    return %c0_i32, %c0_i32_0 : i32, i32
  }
  func.func @transform_7(%arg0: i32) -> (i32, i32) {
    %c0_i32 = arith.constant 0 : i32
    %c0_i32_0 = arith.constant 0 : i32
    %c0_i32_1 = arith.constant 0 : i32
    return %c0_i32, %c0_i32_0 : i32, i32
  }
  func.func @transform_8(%arg0: i32) -> (i32, i32) {
    %c0_i32 = arith.constant 0 : i32
    %c0_i32_0 = arith.constant 0 : i32
    %c0_i32_1 = arith.constant 0 : i32
    return %c0_i32, %c0_i32_0 : i32, i32
  }
  func.func @transform_9(%arg0: i32) -> (i32, i32) {
    %c0_i32 = arith.constant 0 : i32
    %c0_i32_0 = arith.constant 0 : i32
    %c0_i32_1 = arith.constant 0 : i32
    return %c0_i32, %c0_i32_0 : i32, i32
  }
  func.func @transform_10(%arg0: i32) -> (i32, i32) {
    %c0_i32 = arith.constant 0 : i32
    %c0_i32_0 = arith.constant 0 : i32
    %c0_i32_1 = arith.constant 0 : i32
    return %c0_i32, %c0_i32_0 : i32, i32
  }
  func.func @transform_11(%arg0: i32) -> (i32, i32) {
    %c0_i32 = arith.constant 0 : i32
    %c0_i32_0 = arith.constant 0 : i32
    %c0_i32_1 = arith.constant 0 : i32
    return %c0_i32, %c0_i32_0 : i32, i32
  }
  func.func @transform_12(%arg0: i32) -> (i32, i32) {
    %c0_i32 = arith.constant 0 : i32
    %c0_i32_0 = arith.constant 0 : i32
    %c0_i32_1 = arith.constant 0 : i32
    return %c0_i32, %c0_i32_0 : i32, i32
  }
  func.func @transform_13(%arg0: i32) -> (i32, i32) {
    %c0_i32 = arith.constant 0 : i32
    %c0_i32_0 = arith.constant 0 : i32
    %c0_i32_1 = arith.constant 0 : i32
    return %c0_i32, %c0_i32_0 : i32, i32
  }
  func.func @transform_14(%arg0: i32) -> (i32, i32) {
    %c0_i32 = arith.constant 0 : i32
    %c0_i32_0 = arith.constant 0 : i32
    %c0_i32_1 = arith.constant 0 : i32
    return %c0_i32, %c0_i32_0 : i32, i32
  }
  func.func @transform_15(%arg0: i32) -> (i32, i32, i32) {
    %c0_i32 = arith.constant 0 : i32
    %c0_i32_0 = arith.constant 0 : i32
    %c0_i32_1 = arith.constant 0 : i32
    return %arg0, %c0_i32, %c0_i32_0 : i32, i32, i32
  }
}

</mosaic_0001>

<bundles_post_ra>
// kernel: hangman_forward.1
= control target key start
LH: loop header
LB: loop body
LE: loop exit
PB: predicated region body
PF: predicated region fallthrough
CT: control target
= control target key end

     0   :  { %vm538_vm0 = vcmask 261120   ;;  %vm4806_vm1 = vcmask 523264   ;;  %s21560_s4 = inlined_call_operand.vmem [shape: bf16[32,32], index: 4, kind: input, shape index: {}]   ;;  %s21561_s0 = inlined_call_operand.vmem [shape: bf16[1,1280,32], index: 0, kind: input, shape index: {}]   ;;  %s21562_s3 = inlined_call_operand.vmem [shape: bf16[32,32], index: 3, kind: input, shape index: {}]   ;;  %s21563_s5 = inlined_call_operand.vmem [shape: bf16[32,32], index: 5, kind: input, shape index: {}]   ;;  %s21564_s7 = inlined_call_operand.vmem [shape: bf16[32,256], index: 7, kind: input, shape index: {}]   ;;  %s21565_s8 = inlined_call_operand.vmem [shape: bf16[64,256], index: 8, kind: input, shape index: {}]   ;;  %s21566_s6 = inlined_call_operand.vmem [shape: f32[1,32], index: 6, kind: input, shape index: {}]   ;;  %s21567_s9 = inlined_call_operand.vmem [shape: f32[1,256], index: 9, kind: input, shape index: {}]   ;;  %s21568_s1 = inlined_call_operand.vmem [shape: s32[1,128,1], index: 1, kind: input, shape index: {}]   ;;  %s21569_s11 = inlined_call_operand.vmem [shape: bf16[128,64], index: 11, kind: input, shape index: {}]   ;;  %s21570_s2 = inlined_call_operand.vmem [shape: bf16[1,128,128], index: 2, kind: input, shape index: {}]   ;;  %s21571_s10 = inlined_call_operand.vmem [shape: bf16[64,64], index: 10, kind: input, shape index: {}]   ;;  %s21572_s13 = inlined_call_operand.vmem [shape: bf16[64,128], index: 13, kind: input, shape index: {}]   ;;  %s21573_s12 = inlined_call_operand.vmem [shape: f32[1,64], index: 12, kind: input, shape index: {}]   ;;  %s21574_s14 = inlined_call_operand.vmem [shape: f32[1,128], index: 14, kind: input, shape index: {}]   ;;  %s21575_s15 = inlined_call_operand.vmem [shape: f32[1,128,128], index: 15, kind: output, shape index: {}]  }
   0x1   :  { %v14374_v0 = vld [vmem:[%s21560_s4] sm:$0xff]   ;;  %v14375_v1 = vld [vmem:[%s21560_s4 + $0x8] sm:$0xff]   ;;  %v16005_v5 = vld [vmem:[%s21561_s0 + $0x50] sm:$0xff]  }
   0x2   :  { %13106 = vmatprep.subr.bf16.mxu0 %v14374_v0  ;;  %v15990_v2 = vld [vmem:[%s21561_s0 + $0x40] sm:$0xff]   ;;  %v16000_v4 = vld [vmem:[%s21561_s0 + $0x48] sm:$0xff]   ;;  %v16014_v6 = vld [vmem:[%s21561_s0 + $0x58] sm:$0xff]  }
   0x3   :  { %13107 = vmatpush3.bf16.msra.mxu0 %v14374_v0  ;;  %13110 = vmatprep.mubr.msk.bf16.mxu0 %vm538_vm0, %v15990_v2  ;;  %v14378_v3 = vld [vmem:[%s21562_s3] sm:$0xff]   ;;  %v16028_v8 = vld [vmem:[%s21561_s0 + $0x68] sm:$0xff]   ;;  %v16033_v9 = vld [vmem:[%s21561_s0 + $0x70] sm:$0xff]  }
   0x4   :  { %13108 = vmatprep.subr.bf16.mxu0 %v14375_v1  ;;  %v16019_v7 = vld [vmem:[%s21561_s0 + $0x60] sm:$0xff]   ;;  %v16042_v10 = vld [vmem:[%s21561_s0 + $0x78] sm:$0xff]   ;;  %v14411_v12 = vld [vmem:[%s21562_s3 + $0x8] sm:$0xff]  }
   0x5   :  { %v16047_v11 = vld [vmem:[%s21561_s0 + $0x80] sm:$0xff]   ;;  %v16059_v13 = vld [vmem:[%s21561_s0 + $0x88] sm:$0xff]   ;;  %v16064_v14 = vld [vmem:[%s21561_s0 + $0x90] sm:$0xff]  }
   0x6   :  { %v16073_v15 = vld [vmem:[%s21561_s0 + $0x98] sm:$0xff]   ;;  %v16078_v16 = vld [vmem:[%s21561_s0 + $0xa0] sm:$0xff]   ;;  %v16087_v17 = vld [vmem:[%s21561_s0 + $0xa8] sm:$0xff]  }
   0x7   :  { %13109 = vmatpush3.bf16.msra.mxu0 %v14375_v1  ;;  %v16092_v18 = vld [vmem:[%s21561_s0 + $0xb0] sm:$0xff]   ;;  %v16101_v19 = vld [vmem:[%s21561_s0 + $0xb8] sm:$0xff]   ;;  %v16106_v20 = vld [vmem:[%s21561_s0 + $0xc0] sm:$0xff]  }
   0x8   :  { %13238 = vmatprep.subr.bf16.mxu0 %v14378_v3  ;;  %v16115_v21 = vld [vmem:[%s21561_s0 + $0xc8] sm:$0xff]   ;;  %v16120_v22 = vld [vmem:[%s21561_s0 + $0xd0] sm:$0xff]   ;;  %v16129_v23 = vld [vmem:[%s21561_s0 + $0xd8] sm:$0xff]  }
   0x9   :  { %v16134_v24 = vld [vmem:[%s21561_s0 + $0xe0] sm:$0xff]   ;;  %v16143_v25 = vld [vmem:[%s21561_s0 + $0xe8] sm:$0xff]   ;;  %v16148_v26 = vld [vmem:[%s21561_s0 + $0xf0] sm:$0xff]  }
   0xa   :  { %13111 = vmatmul.mubr.msk.bf16.vlgmr.msra.gmra.mrb[0].mxu0 %vm538_vm0, %v16000_v4  ;;  %v16157_v27 = vld [vmem:[%s21561_s0 + $0xf8] sm:$0xff]   ;;  %v16162_v28 = vld [vmem:[%s21561_s0 + $0x100] sm:$0xff]   ;;  %v16171_v29 = vld [vmem:[%s21561_s0 + $0x108] sm:$0xff]  }
   0xb   :  { %13239 = vmatpush3.bf16.msra.mxu0 %v14378_v3  ;;  %13114 = vmatprep.mubr.msk.bf16.mxu0 %vm538_vm0, %v16005_v5  ;;  %v16176_v30 = vld [vmem:[%s21561_s0 + $0x110] sm:$0xff]   ;;  %v16185_v31 = vld [vmem:[%s21561_s0 + $0x118] sm:$0xff]   ;;  %v16190_v32 = vld [vmem:[%s21561_s0 + $0x120] sm:$0xff]  }
   0xc   :  { %13240 = vmatprep.subr.bf16.mxu0 %v14411_v12  ;;  %v16199_v33 = vld [vmem:[%s21561_s0 + $0x128] sm:$0xff]   ;;  %v16204_v34 = vld [vmem:[%s21561_s0 + $0x130] sm:$0xff]   ;;  %v16213_v35 = vld [vmem:[%s21561_s0 + $0x138] sm:$0xff]  }
   0xd   :  { %v16218_v36 = vld [vmem:[%s21561_s0 + $0x140] sm:$0xff]   ;;  %v16227_v37 = vld [vmem:[%s21561_s0 + $0x148] sm:$0xff]   ;;  %v16232_v38 = vld [vmem:[%s21561_s0 + $0x150] sm:$0xff]  }
   0xe   :  { %v16241_v39 = vld [vmem:[%s21563_s5] sm:$0xff]   ;;  %v16247_v40 = vld [vmem:[%s21561_s0 + $0x158] sm:$0xff]   ;;  %v16261_v42 = vld [vmem:[%s21561_s0 + $0x168] sm:$0xff]  }
   0xf   :  { %13241 = vmatpush3.bf16.msra.mxu0 %v14411_v12  ;;  %v16252_v41 = vld [vmem:[%s21561_s0 + $0x160] sm:$0xff]   ;;  %v16266_v43 = vld [vmem:[%s21561_s0 + $0x170] sm:$0xff]   ;;  %v16275_v44 = vld [vmem:[%s21561_s0 + $0x178] sm:$0xff]  }
  0x10   :  { %13370 = vmatprep.subr.bf16.mxu0 %v16241_v39  ;;  %v16280_v45 = vld [vmem:[%s21561_s0 + $0x180] sm:$0xff]   ;;  %v16289_v46 = vld [vmem:[%s21561_s0 + $0x188] sm:$0xff]   ;;  %v16294_v47 = vld [vmem:[%s21561_s0 + $0x190] sm:$0xff]  }
  0x11   :  { %v16303_v48 = vld [vmem:[%s21561_s0 + $0x198] sm:$0xff]   ;;  %v16308_v49 = vld [vmem:[%s21561_s0 + $0x1a0] sm:$0xff]   ;;  %v16317_v50 = vld [vmem:[%s21561_s0 + $0x1a8] sm:$0xff]  }
  0x12   :  { %13115 = vmatmul.mubr.msk.bf16.gmra.mrb[4].mxu0 %vm538_vm0, %v16014_v6  ;;  %v16322_v51 = vld [vmem:[%s21561_s0 + $0x1b0] sm:$0xff]   ;;  %v16331_v52 = vld [vmem:[%s21561_s0 + $0x1b8] sm:$0xff]   ;;  %v16336_v53 = vld [vmem:[%s21561_s0 + $0x1c0] sm:$0xff]  }
  0x13   :  { %13118 = vmatprep.mubr.msk.bf16.mxu0 %vm538_vm0, %v16019_v7  ;;  %v16345_v54 = vld [vmem:[%s21561_s0 + $0x1c8] sm:$0xff]   ;;  %v16350_v55 = vld [vmem:[%s21561_s0 + $0x1d0] sm:$0xff]   ;;  %v16359_v56 = vld [vmem:[%s21561_s0 + $0x1d8] sm:$0xff]  }
  0x14   :  { %v16364_v57 = vld [vmem:[%s21561_s0 + $0x1e0] sm:$0xff]   ;;  %v16373_v58 = vld [vmem:[%s21561_s0 + $0x1e8] sm:$0xff]   ;;  %v16378_v59 = vld [vmem:[%s21561_s0 + $0x1f0] sm:$0xff]  }
  0x15   :  { %v16387_v60 = vld [vmem:[%s21561_s0 + $0x1f8] sm:$0xff]   ;;  %v14434_v61 = vld [vmem:[%s21561_s0 + $0x200] sm:$0xff]   ;;  %v14435_v62 = vld [vmem:[%s21561_s0 + $0x208] sm:$0xff]  }
  0x16   :  { %v14436_v63 = vld [vmem:[%s21561_s0 + $0x210] sm:$0xff]   ;;  %v14437_v0 = vld [vmem:[%s21561_s0 + $0x218] sm:$0xff]   ;;  %v14438_v1 = vld [vmem:[%s21561_s0 + $0x220] sm:$0xff]  }
  0x17   :  { %v14439_v3 = vld [vmem:[%s21561_s0 + $0x228] sm:$0xff]   ;;  %v14440_v12 = vld [vmem:[%s21561_s0 + $0x230] sm:$0xff]  }
  0x1a   :  { %13119 = vmatmul.mubr.msk.bf16.gmra.mrb[8].mxu0 %vm538_vm0, %v16028_v8 }
  0x1b   :  { %13122 = vmatprep.mubr.msk.bf16.mxu0 %vm538_vm0, %v16033_v9 }
  0x22   :  { %13123 = vmatmul.mubr.msk.bf16.gmra.mrb[12].mxu0 %vm538_vm0, %v16042_v10 }
  0x23   :  { %13126 = vmatprep.mubr.msk.bf16.mxu0 %vm538_vm0, %v16047_v11 }
  0x2a   :  { %13127 = vmatmul.mubr.msk.bf16.gmra.mrb[16].mxu0 %vm538_vm0, %v16059_v13 }
  0x2b   :  { %13130 = vmatprep.mubr.msk.bf16.mxu0 %vm538_vm0, %v16064_v14 }
  0x32   :  { %13131 = vmatmul.mubr.msk.bf16.gmra.mrb[20].mxu0 %vm538_vm0, %v16073_v15 }
  0x33   :  { %13134 = vmatprep.mubr.msk.bf16.mxu0 %vm538_vm0, %v16078_v16 }
  0x3a   :  { %13135 = vmatmul.mubr.msk.bf16.gmra.mrb[24].mxu0 %vm538_vm0, %v16087_v17 }
  0x3b   :  { %13138 = vmatprep.mubr.msk.bf16.mxu0 %vm538_vm0, %v16092_v18 }
  0x42   :  { %13139 = vmatmul.mubr.msk.bf16.gmra.mrb[28].mxu0 %vm538_vm0, %v16101_v19 }
  0x43   :  { %13142 = vmatprep.mubr.msk.bf16.mxu0 %vm538_vm0, %v16106_v20 }
  0x4a   :  { %13143 = vmatmul.mubr.msk.bf16.gmra.mrb[32].mxu0 %vm538_vm0, %v16115_v21 }
  0x4b   :  { %13146 = vmatprep.mubr.msk.bf16.mxu0 %vm538_vm0, %v16120_v22 }
  0x52   :  { %13147 = vmatmul.mubr.msk.bf16.gmra.mrb[36].mxu0 %vm538_vm0, %v16129_v23 }
  0x53   :  { %13150 = vmatprep.mubr.msk.bf16.mxu0 %vm538_vm0, %v16134_v24 }
  0x5a   :  { %13151 = vmatmul.mubr.msk.bf16.gmra.mrb[40].mxu0 %vm538_vm0, %v16143_v25 }
  0x5b   :  { %13154 = vmatprep.mubr.msk.bf16.mxu0 %vm538_vm0, %v16148_v26 }
  0x62   :  { %13155 = vmatmul.mubr.msk.bf16.gmra.mrb[44].mxu0 %vm538_vm0, %v16157_v27 }
  0x63   :  { %13158 = vmatprep.mubr.msk.bf16.mxu0 %vm538_vm0, %v16162_v28 }
  0x6a   :  { %13159 = vmatmul.mubr.msk.bf16.gmra.mrb[48].mxu0 %vm538_vm0, %v16171_v29 }
  0x6b   :  { %13162 = vmatprep.mubr.msk.bf16.mxu0 %vm538_vm0, %v16176_v30 }
  0x72   :  { %13163 = vmatmul.mubr.msk.bf16.gmra.mrb[52].mxu0 %vm538_vm0, %v16185_v31 }
  0x73   :  { %13166 = vmatprep.mubr.msk.bf16.mxu0 %vm538_vm0, %v16190_v32 }
  0x7a   :  { %13167 = vmatmul.mubr.msk.bf16.gmra.mrb[56].mxu0 %vm538_vm0, %v16199_v33 }
  0x7b   :  { %13170 = vmatprep.mubr.msk.bf16.mxu0 %vm538_vm0, %v16204_v34 }
  0x82   :  { %13171 = vmatmul.mubr.msk.bf16.gmra.mrb[60].mxu0 %vm538_vm0, %v16213_v35 }
  0x83   :  { %13174 = vmatprep.mubr.msk.bf16.mxu0 %vm538_vm0, %v16218_v36 }
  0x8a   :  { %13175 = vmatmul.mubr.msk.bf16.gmra.mrb[64].mxu0 %vm538_vm0, %v16227_v37 }
  0x8b   :  { %13178 = vmatprep.mubr.msk.bf16.mxu0 %vm538_vm0, %v16232_v38 }
  0x92   :  { %13179 = vmatmul.mubr.msk.bf16.gmra.mrb[68].mxu0 %vm538_vm0, %v16247_v40 }
  0x93   :  { %13182 = vmatprep.mubr.msk.bf16.mxu0 %vm538_vm0, %v16252_v41 }
  0x9a   :  { %13183 = vmatmul.mubr.msk.bf16.gmra.mrb[72].mxu0 %vm538_vm0, %v16261_v42 }
  0x9b   :  { %13186 = vmatprep.mubr.msk.bf16.mxu0 %vm538_vm0, %v16266_v43 }
  0xa2   :  { %13187 = vmatmul.mubr.msk.bf16.gmra.mrb[76].mxu0 %vm538_vm0, %v16275_v44 }
  0xa3   :  { %13190 = vmatprep.mubr.msk.bf16.mxu0 %vm538_vm0, %v16280_v45 }
  0xaa   :  { %13191 = vmatmul.mubr.msk.bf16.gmra.mrb[80].mxu0 %vm538_vm0, %v16289_v46 }
  0xab   :  { %13194 = vmatprep.mubr.msk.bf16.mxu0 %vm538_vm0, %v16294_v47 }
  0xb2   :  { %13195 = vmatmul.mubr.msk.bf16.gmra.mrb[84].mxu0 %vm538_vm0, %v16303_v48 }
  0xb3   :  { %13198 = vmatprep.mubr.msk.bf16.mxu0 %vm538_vm0, %v16308_v49 }
  0xba   :  { %13199 = vmatmul.mubr.msk.bf16.gmra.mrb[88].mxu0 %vm538_vm0, %v16317_v50 }
  0xbb   :  { %13202 = vmatprep.mubr.msk.bf16.mxu0 %vm538_vm0, %v16322_v51 }
  0xc2   :  { %13203 = vmatmul.mubr.msk.bf16.gmra.mrb[92].mxu0 %vm538_vm0, %v16331_v52 }
  0xc3   :  { %13206 = vmatprep.mubr.msk.bf16.mxu0 %vm538_vm0, %v16336_v53 }
  0xca   :  { %13207 = vmatmul.mubr.msk.bf16.gmra.mrb[96].mxu0 %vm538_vm0, %v16345_v54 }
  0xcb   :  { %13210 = vmatprep.mubr.msk.bf16.mxu0 %vm538_vm0, %v16350_v55 }
  0xd2   :  { %13211 = vmatmul.mubr.msk.bf16.gmra.mrb[100].mxu0 %vm538_vm0, %v16359_v56 }
  0xd3   :  { %13214 = vmatprep.mubr.msk.bf16.mxu0 %vm538_vm0, %v16364_v57 }
  0xda   :  { %13215 = vmatmul.mubr.msk.bf16.gmra.mrb[104].mxu0 %vm538_vm0, %v16373_v58 }
  0xdb   :  { %13218 = vmatprep.mubr.msk.bf16.mxu0 %vm538_vm0, %v16378_v59 }
  0xe2   :  { %13219 = vmatmul.mubr.msk.bf16.gmra.mrb[108].mxu0 %vm538_vm0, %v16387_v60 }
  0xe3   :  { %13222 = vmatprep.mubr.msk.bf16.mxu0 %vm538_vm0, %v14434_v61  ;;  %v14441_v61 = vld [vmem:[%s21561_s0 + $0x238] sm:$0xff]  }
  0xea   :  { %13223 = vmatmul.mubr.msk.bf16.gmra.mrb[112].mxu0 %vm538_vm0, %v14435_v62  ;;  %v14442_v62 = vld [vmem:[%s21561_s0] sm:$0xff]  }
  0xeb   :  { %13226 = vmatprep.mubr.msk.bf16.mxu0 %vm538_vm0, %v14436_v63  ;;  %v14443_v63 = vld [vmem:[%s21561_s0 + $0x8] sm:$0xff]  }
  0xf2   :  { %13227 = vmatmul.mubr.msk.bf16.gmra.mrb[116].mxu0 %vm538_vm0, %v14437_v0  ;;  %v14445_v0 = vld [vmem:[%s21561_s0 + $0x10] sm:$0xff]  }
  0xf3   :  { %13230 = vmatprep.mubr.msk.bf16.mxu0 %vm538_vm0, %v14438_v1  ;;  %v14451_v1 = vld [vmem:[%s21563_s5 + $0x8] sm:$0xff]   ;;  %s15900_s5 = smov 64  }
  0xfa   :  { %13231 = vmatmul.mubr.msk.bf16.gmra.mrb[120].mxu0 %vm538_vm0, %v14439_v3  ;;  %v14446_v3 = vld [vmem:[%s21561_s0 + $0x18] sm:$0xff]  }
  0xfb   :  { %13234 = vmatprep.mubr.msk.bf16.mxu0 %vm538_vm0, %v14440_v12  ;;  %v14447_v12 = vld [vmem:[%s21561_s0 + $0x20] sm:$0xff]  }
 0x102   :  { %13235 = vmatmul.mubr.msk.bf16.gmra.mrb[124].mxu0 %vm538_vm0, %v14441_v61  ;;  %v14449_v61 = vld [vmem:[%s21561_s0 + $0x30] sm:$0xff]  }
 0x103   :  { %13242 = vmatprep.mubr.msk.bf16.mxu0 %vm538_vm0, %v14442_v62  ;;  %v14450_v62 = vld [vmem:[%s21561_s0 + $0x38] sm:$0xff]  }
 0x10a   :  { %13243 = vmatmul.mubr.msk.bf16.vlgmr.msra.gmra.mrb[0].mxu0 %vm538_vm0, %v14443_v63  ;;  %v14502_v63 = vld [vmem:[%s21561_s0 + $0x210] sm:$0xff]  }
 0x10b   :  { %13371 = vmatpush3.bf16.msra.mxu0 %v16241_v39  ;;  %13246 = vmatprep.mubr.msk.bf16.mxu0 %vm538_vm0, %v14445_v0  ;;  %v14448_v39 = vld [vmem:[%s21561_s0 + $0x28] sm:$0xff]   ;;  %v14503_v0 = vld [vmem:[%s21561_s0 + $0x218] sm:$0xff]  }
 0x10c   :  { %13372 = vmatprep.subr.bf16.mxu0 %v14451_v1 }
 0x10f   :  { %13373 = vmatpush3.bf16.msra.mxu0 %v14451_v1  ;;  %v14504_v1 = vld [vmem:[%s21561_s0 + $0x220] sm:$0xff]  }
 0x112   :  { %13247 = vmatmul.mubr.msk.bf16.gmra.mrb[4].mxu0 %vm538_vm0, %v14446_v3  ;;  %v14505_v3 = vld [vmem:[%s21561_s0 + $0x228] sm:$0xff]  }
 0x113   :  { %13250 = vmatprep.mubr.msk.bf16.mxu0 %vm538_vm0, %v14447_v12  ;;  %v14506_v12 = vld [vmem:[%s21561_s0 + $0x230] sm:$0xff]  }
 0x11a   :  { %13251 = vmatmul.mubr.msk.bf16.gmra.mrb[8].mxu0 %vm538_vm0, %v14448_v39  ;;  %v16811_v39 = vld [vmem:[%s21566_s6] ss:$0 sm:$0xff] }
 0x11b   :  { %13254 = vmatprep.mubr.msk.bf16.mxu0 %vm538_vm0, %v14449_v61 }
 0x122   :  { %13255 = vmatmul.mubr.msk.bf16.gmra.mrb[12].mxu0 %vm538_vm0, %v14450_v62 }
 0x123   :  { %13258 = vmatprep.mubr.msk.bf16.mxu0 %vm538_vm0, %v15990_v2  ;;  %v14452_v2 = vld [vmem:[%s21561_s0 + $0x80] sm:$0xff]  }
 0x12a   :  { %13259 = vmatmul.mubr.msk.bf16.gmra.mrb[16].mxu0 %vm538_vm0, %v16000_v4  ;;  %v14453_v4 = vld [vmem:[%s21561_s0 + $0x88] sm:$0xff]  }
 0x12b   :  { %13262 = vmatprep.mubr.msk.bf16.mxu0 %vm538_vm0, %v16005_v5  ;;  %v14454_v5 = vld [vmem:[%s21561_s0 + $0x90] sm:$0xff]  }
 0x132   :  { %13263 = vmatmul.mubr.msk.bf16.gmra.mrb[20].mxu0 %vm538_vm0, %v16014_v6  ;;  %v14455_v6 = vld [vmem:[%s21561_s0 + $0x98] sm:$0xff]  }
 0x133   :  { %13266 = vmatprep.mubr.msk.bf16.mxu0 %vm538_vm0, %v16019_v7  ;;  %v14456_v7 = vld [vmem:[%s21561_s0 + $0xa0] sm:$0xff]  }
 0x13a   :  { %13267 = vmatmul.mubr.msk.bf16.gmra.mrb[24].mxu0 %vm538_vm0, %v16028_v8  ;;  %v14457_v8 = vld [vmem:[%s21561_s0 + $0xa8] sm:$0xff]  }
 0x13b   :  { %13270 = vmatprep.mubr.msk.bf16.mxu0 %vm538_vm0, %v16033_v9  ;;  %v14458_v9 = vld [vmem:[%s21561_s0 + $0xb0] sm:$0xff]  }
 0x142   :  { %13271 = vmatmul.mubr.msk.bf16.gmra.mrb[28].mxu0 %vm538_vm0, %v16042_v10  ;;  %v14459_v10 = vld [vmem:[%s21561_s0 + $0xb8] sm:$0xff]  }
 0x143   :  { %13274 = vmatprep.mubr.msk.bf16.mxu0 %vm538_vm0, %v16047_v11  ;;  %v14460_v11 = vld [vmem:[%s21561_s0 + $0xc0] sm:$0xff]  }
 0x14a   :  { %13275 = vmatmul.mubr.msk.bf16.gmra.mrb[32].mxu0 %vm538_vm0, %v16059_v13  ;;  %v14461_v13 = vld [vmem:[%s21561_s0 + $0xc8] sm:$0xff]  }
 0x14b   :  { %13278 = vmatprep.mubr.msk.bf16.mxu0 %vm538_vm0, %v16064_v14  ;;  %v14462_v14 = vld [vmem:[%s21561_s0 + $0xd0] sm:$0xff]  }
 0x152   :  { %13279 = vmatmul.mubr.msk.bf16.gmra.mrb[36].mxu0 %vm538_vm0, %v16073_v15  ;;  %v14463_v15 = vld [vmem:[%s21561_s0 + $0xd8] sm:$0xff]  }
 0x153   :  { %13282 = vmatprep.mubr.msk.bf16.mxu0 %vm538_vm0, %v16078_v16  ;;  %v14464_v16 = vld [vmem:[%s21561_s0 + $0xe0] sm:$0xff]  }
 0x15a   :  { %13283 = vmatmul.mubr.msk.bf16.gmra.mrb[40].mxu0 %vm538_vm0, %v16087_v17  ;;  %v14465_v17 = vld [vmem:[%s21561_s0 + $0xe8] sm:$0xff]  }
 0x15b   :  { %13286 = vmatprep.mubr.msk.bf16.mxu0 %vm538_vm0, %v16092_v18  ;;  %v14466_v18 = vld [vmem:[%s21561_s0 + $0xf0] sm:$0xff]  }
 0x162   :  { %13287 = vmatmul.mubr.msk.bf16.gmra.mrb[44].mxu0 %vm538_vm0, %v16101_v19  ;;  %v14467_v19 = vld [vmem:[%s21561_s0 + $0xf8] sm:$0xff]  }
 0x163   :  { %13290 = vmatprep.mubr.msk.bf16.mxu0 %vm538_vm0, %v16106_v20  ;;  %v14468_v20 = vld [vmem:[%s21561_s0 + $0x100] sm:$0xff]  }
 0x16a   :  { %13291 = vmatmul.mubr.msk.bf16.gmra.mrb[48].mxu0 %vm538_vm0, %v16115_v21  ;;  %v14469_v21 = vld [vmem:[%s21561_s0 + $0x108] sm:$0xff]  }
 0x16b   :  { %13294 = vmatprep.mubr.msk.bf16.mxu0 %vm538_vm0, %v16120_v22  ;;  %v14470_v22 = vld [vmem:[%s21561_s0 + $0x110] sm:$0xff]  }
 0x172   :  { %13295 = vmatmul.mubr.msk.bf16.gmra.mrb[52].mxu0 %vm538_vm0, %v16129_v23  ;;  %v14471_v23 = vld [vmem:[%s21561_s0 + $0x118] sm:$0xff]  }
 0x173   :  { %13298 = vmatprep.mubr.msk.bf16.mxu0 %vm538_vm0, %v16134_v24  ;;  %v14472_v24 = vld [vmem:[%s21561_s0 + $0x120] sm:$0xff]  }
 0x17a   :  { %13299 = vmatmul.mubr.msk.bf16.gmra.mrb[56].mxu0 %vm538_vm0, %v16143_v25  ;;  %v14473_v25 = vld [vmem:[%s21561_s0 + $0x128] sm:$0xff]  }
 0x17b   :  { %13302 = vmatprep.mubr.msk.bf16.mxu0 %vm538_vm0, %v16148_v26  ;;  %v14474_v26 = vld [vmem:[%s21561_s0 + $0x130] sm:$0xff]  }
 0x182   :  { %13303 = vmatmul.mubr.msk.bf16.gmra.mrb[60].mxu0 %vm538_vm0, %v16157_v27  ;;  %v14475_v27 = vld [vmem:[%s21561_s0 + $0x138] sm:$0xff]  }
 0x183   :  { %13306 = vmatprep.mubr.msk.bf16.mxu0 %vm538_vm0, %v16162_v28  ;;  %v14476_v28 = vld [vmem:[%s21561_s0 + $0x140] sm:$0xff]  }
 0x18a   :  { %13307 = vmatmul.mubr.msk.bf16.gmra.mrb[64].mxu0 %vm538_vm0, %v16171_v29  ;;  %v14477_v29 = vld [vmem:[%s21561_s0 + $0x148] sm:$0xff]  }
 0x18b   :  { %13310 = vmatprep.mubr.msk.bf16.mxu0 %vm538_vm0, %v16176_v30  ;;  %v14478_v30 = vld [vmem:[%s21561_s0 + $0x150] sm:$0xff]  }
 0x192   :  { %13311 = vmatmul.mubr.msk.bf16.gmra.mrb[68].mxu0 %vm538_vm0, %v16185_v31  ;;  %v14479_v31 = vld [vmem:[%s21561_s0 + $0x158] sm:$0xff]  }
 0x193   :  { %13314 = vmatprep.mubr.msk.bf16.mxu0 %vm538_vm0, %v16190_v32  ;;  %v14480_v32 = vld [vmem:[%s21561_s0 + $0x160] sm:$0xff]  }
 0x19a   :  { %13315 = vmatmul.mubr.msk.bf16.gmra.mrb[72].mxu0 %vm538_vm0, %v16199_v33  ;;  %v14481_v33 = vld [vmem:[%s21561_s0 + $0x168] sm:$0xff]  }
 0x19b   :  { %13318 = vmatprep.mubr.msk.bf16.mxu0 %vm538_vm0, %v16204_v34  ;;  %v14482_v34 = vld [vmem:[%s21561_s0 + $0x170] sm:$0xff]  }
 0x1a2   :  { %13319 = vmatmul.mubr.msk.bf16.gmra.mrb[76].mxu0 %vm538_vm0, %v16213_v35  ;;  %v14483_v35 = vld [vmem:[%s21561_s0 + $0x178] sm:$0xff]  }
 0x1a3   :  { %13322 = vmatprep.mubr.msk.bf16.mxu0 %vm538_vm0, %v16218_v36  ;;  %v14484_v36 = vld [vmem:[%s21561_s0 + $0x180] sm:$0xff]  }
 0x1aa   :  { %13323 = vmatmul.mubr.msk.bf16.gmra.mrb[80].mxu0 %vm538_vm0, %v16227_v37  ;;  %v14516_v37 = vld [vmem:[%s21564_s7] ss:$8 sps:$4 sm:$0xff]  }
 0x1ab   :  { %13326 = vmatprep.mubr.msk.bf16.mxu0 %vm538_vm0, %v16232_v38  ;;  %v14518_v38 = vld [vmem:[%s21564_s7 + $0x4] ss:$8 sps:$4 sm:$0xff]  }
 0x1ac   :  { %3781 = vmatprep.subr.bf16.mxu0 %v14518_v38  ;;  %13582 = vmatprep.subr.bf16.mxu1 %v14518_v38 }
 0x1ad   :  { %13584 = vmatpush1.bf16.msra.mxu1 %v14516_v37 }
 0x1b2   :  { %13327 = vmatmul.mubr.msk.bf16.gmra.mrb[84].mxu0 %vm538_vm0, %v16247_v40  ;;  %v14521_v40 = vld [vmem:[%s21564_s7 + $0x14] ss:$8 sps:$4 sm:$0xff]  }
 0x1b3   :  { %13330 = vmatprep.mubr.msk.bf16.mxu0 %vm538_vm0, %v16252_v41  ;;  %v14519_v41 = vld [vmem:[%s21564_s7 + $0x10] ss:$8 sps:$4 sm:$0xff]   ;;  %13583 = vmatprep.subr.bf16.mxu1 %v14521_v40 }
 0x1b4   :  { %13585 = vmatpush1.bf16.msra.mxu1 %v14519_v41 }
 0x1ba   :  { %13331 = vmatmul.mubr.msk.bf16.gmra.mrb[88].mxu0 %vm538_vm0, %v16261_v42  ;;  %v14485_v42 = vld [vmem:[%s21561_s0 + $0x188] sm:$0xff]  }
 0x1bb   :  { %13334 = vmatprep.mubr.msk.bf16.mxu0 %vm538_vm0, %v16266_v43  ;;  %v14486_v43 = vld [vmem:[%s21561_s0 + $0x190] sm:$0xff]  }
 0x1c2   :  { %13335 = vmatmul.mubr.msk.bf16.gmra.mrb[92].mxu0 %vm538_vm0, %v16275_v44  ;;  %v21576_v44 = vmov 0  }
 0x1c3   :  { %13338 = vmatprep.mubr.msk.bf16.mxu0 %vm538_vm0, %v16280_v45  ;;  %3913 = vmatprep.mubr.bf16.mxu1 %v21576_v44  ;;  %v14487_v45 = vld [vmem:[%s21561_s0 + $0x198] sm:$0xff]  }
 0x1c4   :  { %14372 = vset.pattern.permute.xlu0 %v21576_v44  ;;  %14373 = vset.pattern.permute.xlu1 %v21576_v44 }
 0x1ca   :  { %13339 = vmatmul.mubr.msk.bf16.gmra.mrb[96].mxu0 %vm538_vm0, %v16289_v46  ;;  %v14488_v46 = vld [vmem:[%s21561_s0 + $0x1a0] sm:$0xff]  }
 0x1cb   :  { %13342 = vmatprep.mubr.msk.bf16.mxu0 %vm538_vm0, %v16294_v47  ;;  %v14489_v47 = vld [vmem:[%s21561_s0 + $0x1a8] sm:$0xff]  }
 0x1d2   :  { %13343 = vmatmul.mubr.msk.bf16.gmra.mrb[100].mxu0 %vm538_vm0, %v16303_v48  ;;  %v14522_v48 = vld [vmem:[%s21565_s8 + $0x4] ss:$8 sps:$4 sm:$0xff]  }
 0x1d3   :  { %13346 = vmatprep.mubr.msk.bf16.mxu0 %vm538_vm0, %v16308_v49  ;;  %v14490_v49 = vld [vmem:[%s21561_s0 + $0x1b0] sm:$0xff]   ;;  %4810 = vmatprep.subr.bf16.mxu1 %v14522_v48 }
 0x1da   :  { %13347 = vmatmul.mubr.msk.bf16.gmra.mrb[104].mxu0 %vm538_vm0, %v16317_v50  ;;  %v14491_v50 = vld [vmem:[%s21561_s0 + $0x1b8] sm:$0xff]  }
 0x1db   :  { %13350 = vmatprep.mubr.msk.bf16.mxu0 %vm538_vm0, %v16322_v51  ;;  %v14492_v51 = vld [vmem:[%s21561_s0 + $0x1c0] sm:$0xff]  }
 0x1e2   :  { %13351 = vmatmul.mubr.msk.bf16.gmra.mrb[108].mxu0 %vm538_vm0, %v16331_v52  ;;  %v14493_v52 = vld [vmem:[%s21561_s0 + $0x1c8] sm:$0xff]  }
 0x1e3   :  { %13354 = vmatprep.mubr.msk.bf16.mxu0 %vm538_vm0, %v16336_v53  ;;  %v14494_v53 = vld [vmem:[%s21561_s0 + $0x1d0] sm:$0xff]  }
 0x1ea   :  { %13355 = vmatmul.mubr.msk.bf16.gmra.mrb[112].mxu0 %vm538_vm0, %v16345_v54  ;;  %v14495_v54 = vld [vmem:[%s21561_s0 + $0x1d8] sm:$0xff]  }
 0x1eb   :  { %13358 = vmatprep.mubr.msk.bf16.mxu0 %vm538_vm0, %v16350_v55  ;;  %v14496_v55 = vld [vmem:[%s21561_s0 + $0x1e0] sm:$0xff]  }
 0x1f2   :  { %13359 = vmatmul.mubr.msk.bf16.gmra.mrb[116].mxu0 %vm538_vm0, %v16359_v56  ;;  %v14497_v56 = vld [vmem:[%s21561_s0 + $0x1e8] sm:$0xff]  }
 0x1f3   :  { %13362 = vmatprep.mubr.msk.bf16.mxu0 %vm538_vm0, %v16364_v57  ;;  %v14498_v57 = vld [vmem:[%s21561_s0 + $0x1f0] sm:$0xff]  }
 0x1fa   :  { %13363 = vmatmul.mubr.msk.bf16.gmra.mrb[120].mxu0 %vm538_vm0, %v16373_v58  ;;  %v14499_v58 = vld [vmem:[%s21561_s0 + $0x1f8] sm:$0xff]  }
 0x1fb   :  { %13366 = vmatprep.mubr.msk.bf16.mxu0 %vm538_vm0, %v16378_v59  ;;  %v14500_v59 = vld [vmem:[%s21561_s0 + $0x200] sm:$0xff]  }
 0x202   :  { %13367 = vmatmul.mubr.msk.bf16.gmra.mrb[124].mxu0 %vm538_vm0, %v16387_v60  ;;  %v14501_v60 = vld [vmem:[%s21561_s0 + $0x208] sm:$0xff]  }
 0x203   :  { %13374 = vmatprep.mubr.msk.bf16.mxu0 %vm538_vm0, %v14452_v2 }
 0x20a   :  { %13375 = vmatmul.mubr.msk.bf16.vlgmr.msra.gmra.mrb[0].mxu0 %vm538_vm0, %v14453_v4  ;;  %v14507_v4 = vld [vmem:[%s21561_s0 + $0x238] sm:$0xff]  }
 0x20b   :  { %13378 = vmatprep.mubr.msk.bf16.mxu0 %vm538_vm0, %v14454_v5  ;;  %3782 = vmatpush1.bf16.msra.mxu0 %v14516_v37  ;;  %v14511_v37 = vld [vmem:[%s21561_s0 + $0x258] sm:$0xff]  }
 0x20c   :  { %3783 = vmatprep.subr.bf16.mxu0 %v14521_v40 }
 0x20f   :  { %3784 = vmatpush1.bf16.msra.mxu0 %v14519_v41  ;;  %v14512_v41 = vld [vmem:[%s21561_s0 + $0x260] sm:$0xff]  }
 0x212   :  { %13379 = vmatmul.mubr.msk.bf16.gmra.mrb[4].mxu0 %vm538_vm0, %v14455_v6 }
 0x213   :  { %13382 = vmatprep.mubr.msk.bf16.mxu0 %vm538_vm0, %v14456_v7  ;;  %v14508_v7 = vld [vmem:[%s21561_s0 + $0x240] sm:$0xff]  }
 0x21a   :  { %13383 = vmatmul.mubr.msk.bf16.gmra.mrb[8].mxu0 %vm538_vm0, %v14457_v8 }
 0x21b   :  { %13386 = vmatprep.mubr.msk.bf16.mxu0 %vm538_vm0, %v14458_v9 }
 0x222   :  { %13387 = vmatmul.mubr.msk.bf16.gmra.mrb[12].mxu0 %vm538_vm0, %v14459_v10 }
 0x223   :  { %13390 = vmatprep.mubr.msk.bf16.mxu0 %vm538_vm0, %v14460_v11 }
 0x22a   :  { %13391 = vmatmul.mubr.msk.bf16.gmra.mrb[16].mxu0 %vm538_vm0, %v14461_v13 }
 0x22b   :  { %13394 = vmatprep.mubr.msk.bf16.mxu0 %vm538_vm0, %v14462_v14 }
 0x232   :  { %13395 = vmatmul.mubr.msk.bf16.gmra.mrb[20].mxu0 %vm538_vm0, %v14463_v15 }
 0x233   :  { %13398 = vmatprep.mubr.msk.bf16.mxu0 %vm538_vm0, %v14464_v16 }
 0x23a   :  { %13399 = vmatmul.mubr.msk.bf16.gmra.mrb[24].mxu0 %vm538_vm0, %v14465_v17 }
 0x23b   :  { %13402 = vmatprep.mubr.msk.bf16.mxu0 %vm538_vm0, %v14466_v18 }
 0x242   :  { %13403 = vmatmul.mubr.msk.bf16.gmra.mrb[28].mxu0 %vm538_vm0, %v14467_v19 }
 0x243   :  { %13406 = vmatprep.mubr.msk.bf16.mxu0 %vm538_vm0, %v14468_v20 }
 0x24a   :  { %13407 = vmatmul.mubr.msk.bf16.gmra.mrb[32].mxu0 %vm538_vm0, %v14469_v21  ;;  %v14509_v21 = vld [vmem:[%s21561_s0 + $0x248] sm:$0xff]  }
 0x24b   :  { %13410 = vmatprep.mubr.msk.bf16.mxu0 %vm538_vm0, %v14470_v22 }
 0x252   :  { %13411 = vmatmul.mubr.msk.bf16.gmra.mrb[36].mxu0 %vm538_vm0, %v14471_v23 }
 0x253   :  { %13414 = vmatprep.mubr.msk.bf16.mxu0 %vm538_vm0, %v14472_v24  ;;  %v14510_v24 = vld [vmem:[%s21561_s0 + $0x250] sm:$0xff]  }
 0x25a   :  { %13415 = vmatmul.mubr.msk.bf16.gmra.mrb[40].mxu0 %vm538_vm0, %v14473_v25 }
 0x25b   :  { %13418 = vmatprep.mubr.msk.bf16.mxu0 %vm538_vm0, %v14474_v26 }
 0x262   :  { %13419 = vmatmul.mubr.msk.bf16.gmra.mrb[44].mxu0 %vm538_vm0, %v14475_v27 }
 0x263   :  { %13422 = vmatprep.mubr.msk.bf16.mxu0 %vm538_vm0, %v14476_v28 }
 0x26a   :  { %13423 = vmatmul.mubr.msk.bf16.gmra.mrb[48].mxu0 %vm538_vm0, %v14477_v29 }
 0x26b   :  { %13426 = vmatprep.mubr.msk.bf16.mxu0 %vm538_vm0, %v14478_v30 }
 0x272   :  { %13427 = vmatmul.mubr.msk.bf16.gmra.mrb[52].mxu0 %vm538_vm0, %v14479_v31 }
 0x273   :  { %13430 = vmatprep.mubr.msk.bf16.mxu0 %vm538_vm0, %v14480_v32 }
 0x27a   :  { %13431 = vmatmul.mubr.msk.bf16.gmra.mrb[56].mxu0 %vm538_vm0, %v14481_v33 }
 0x27b   :  { %13434 = vmatprep.mubr.msk.bf16.mxu0 %vm538_vm0, %v14482_v34 }
 0x282   :  { %13435 = vmatmul.mubr.msk.bf16.gmra.mrb[60].mxu0 %vm538_vm0, %v14483_v35 }
 0x283   :  { %13438 = vmatprep.mubr.msk.bf16.mxu0 %vm538_vm0, %v14484_v36 }
 0x28a   :  { %13439 = vmatmul.mubr.msk.bf16.gmra.mrb[64].mxu0 %vm538_vm0, %v14485_v42 }
 0x28b   :  { %13442 = vmatprep.mubr.msk.bf16.mxu0 %vm538_vm0, %v14486_v43 }
 0x292   :  { %13443 = vmatmul.mubr.msk.bf16.gmra.mrb[68].mxu0 %vm538_vm0, %v14487_v45 }
 0x293   :  { %13446 = vmatprep.mubr.msk.bf16.mxu0 %vm538_vm0, %v14488_v46 }
 0x29a   :  { %13447 = vmatmul.mubr.msk.bf16.gmra.mrb[72].mxu0 %vm538_vm0, %v14489_v47 }
 0x29b   :  { %13450 = vmatprep.mubr.msk.bf16.mxu0 %vm538_vm0, %v14490_v49 }
 0x2a2   :  { %13451 = vmatmul.mubr.msk.bf16.gmra.mrb[76].mxu0 %vm538_vm0, %v14491_v50 }
 0x2a3   :  { %13454 = vmatprep.mubr.msk.bf16.mxu0 %vm538_vm0, %v14492_v51 }
 0x2aa   :  { %13455 = vmatmul.mubr.msk.bf16.gmra.mrb[80].mxu0 %vm538_vm0, %v14493_v52 }
 0x2ab   :  { %13458 = vmatprep.mubr.msk.bf16.mxu0 %vm538_vm0, %v14494_v53 }
 0x2b2   :  { %13459 = vmatmul.mubr.msk.bf16.gmra.mrb[84].mxu0 %vm538_vm0, %v14495_v54 }
 0x2b3   :  { %13462 = vmatprep.mubr.msk.bf16.mxu0 %vm538_vm0, %v14496_v55  ;;  %v14513_v55 = vld [vmem:[%s21561_s0 + $0x268] sm:$0xff]  }
 0x2ba   :  { %13463 = vmatmul.mubr.msk.bf16.gmra.mrb[88].mxu0 %vm538_vm0, %v14497_v56 }
 0x2bb   :  { %13466 = vmatprep.mubr.msk.bf16.mxu0 %vm538_vm0, %v14498_v57 }
 0x2c2   :  { %13467 = vmatmul.mubr.msk.bf16.gmra.mrb[92].mxu0 %vm538_vm0, %v14499_v58  ;;  %v14514_v58 = vld [vmem:[%s21561_s0 + $0x270] sm:$0xff]  }
 0x2c3   :  { %13470 = vmatprep.mubr.msk.bf16.mxu0 %vm538_vm0, %v14500_v59 }
 0x2ca   :  { %13471 = vmatmul.mubr.msk.bf16.gmra.mrb[96].mxu0 %vm538_vm0, %v14501_v60 }
 0x2cb   :  { %13474 = vmatprep.mubr.msk.bf16.mxu0 %vm538_vm0, %v14502_v63 }
 0x2d2   :  { %13475 = vmatmul.mubr.msk.bf16.gmra.mrb[100].mxu0 %vm538_vm0, %v14503_v0 }
 0x2d3   :  { %13478 = vmatprep.mubr.msk.bf16.mxu0 %vm538_vm0, %v14504_v1 }
 0x2da   :  { %13479 = vmatmul.mubr.msk.bf16.gmra.mrb[104].mxu0 %vm538_vm0, %v14505_v3 }
 0x2db   :  { %13482 = vmatprep.mubr.msk.bf16.mxu0 %vm538_vm0, %v14506_v12 }
 0x2dd   :  { %v13376_v61 = vpop.f32.mrb[0].mxu0 }
 0x2de   :  { %v3235_v62 = vadd.f32 %v13376_v61, %v16811_v39  ;;  %v2587_v2 = vpop.f32.mrb[1].mxu0 }
 0x2df   :  { %v3233_v5 = vadd.f32 %v16811_v39, %v2587_v2  ;;  %v13377_v6 = vpop.f32.mrb[2].mxu0 }
 0x2e0   :  { %v3236_v8 = vadd.f32 %v13377_v6, %v16811_v39  ;;  %v2590_v9 = vpop.f32.mrb[3].mxu0  ;;  %v3363_v11 = vmax.f32 %v3235_v62, 0.0  ;;  %v14515_v6 = vld [vmem:[%s21561_s0 + $0x278] sm:$0xff]  }
 0x2e1   :  { %v3234_v10 = vadd.f32 %v16811_v39, %v2590_v9  ;;  %v3361_v14 = vmax.f32 %v3233_v5, 0.0 }
 0x2e2   :  { %v3364_v13 = vmax.f32 %v3236_v8, 0.0  ;;  %13483 = vmatmul.mubr.msk.bf16.gmra.mrb[108].mxu0 %vm538_vm0, %v14507_v4 }
 0x2e3   :  { %v3362_v15 = vmax.f32 %v3234_v10, 0.0  ;;  %13486 = vmatprep.mubr.msk.bf16.mxu0 %vm538_vm0, %v14508_v7 }
 0x2e4   :  { %v16826_v16 = vpack.c.bf16 %v3364_v13, %v3363_v11 }
 0x2e5   :  { %v16828_v17 = vpack.c.bf16 %v3362_v15, %v3361_v14  ;;  %v13380_v18 = vpop.f32.mrb[4].mxu0 }
 0x2e6   :  { %v3239_v19 = vadd.f32 %v13380_v18, %v16811_v39  ;;  %v2603_v20 = vpop.f32.mrb[5].mxu0 }
 0x2e7   :  { %v3237_v22 = vadd.f32 %v16811_v39, %v2603_v20  ;;  %v13381_v23 = vpop.f32.mrb[6].mxu0 }
 0x2e8   :  { %v3240_v25 = vadd.f32 %v13381_v23, %v16811_v39  ;;  %v2606_v26 = vpop.f32.mrb[7].mxu0  ;;  %v3367_v28 = vmax.f32 %v3239_v19, 0.0 }
 0x2e9   :  { %v3238_v27 = vadd.f32 %v16811_v39, %v2606_v26  ;;  %v3365_v30 = vmax.f32 %v3237_v22, 0.0 }
 0x2ea   :  { %v3368_v29 = vmax.f32 %v3240_v25, 0.0  ;;  %13487 = vmatmul.mubr.msk.bf16.gmra.mrb[112].mxu0 %vm538_vm0, %v14509_v21 }
 0x2eb   :  { %v3366_v31 = vmax.f32 %v3238_v27, 0.0  ;;  %13490 = vmatprep.mubr.msk.bf16.mxu0 %vm538_vm0, %v14510_v24 }
 0x2ec   :  { %v16842_v32 = vpack.c.bf16 %v3368_v29, %v3367_v28 }
 0x2ed   :  { %v16844_v33 = vpack.c.bf16 %v3366_v31, %v3365_v30  ;;  %v13384_v34 = vpop.f32.mrb[8].mxu0 }
 0x2ee   :  { %v3243_v35 = vadd.f32 %v13384_v34, %v16811_v39  ;;  %v2619_v36 = vpop.f32.mrb[9].mxu0 }
 0x2ef   :  { %v3241_v38 = vadd.f32 %v16811_v39, %v2619_v36  ;;  %v13385_v40 = vpop.f32.mrb[10].mxu0  ;;  %v14524_v36 = vld [vmem:[%s21565_s8] ss:$8 sps:$4 sm:$0xff]  }
 0x2f0   :  { %v3244_v42 = vadd.f32 %v13385_v40, %v16811_v39  ;;  %v2622_v43 = vpop.f32.mrb[11].mxu0  ;;  %v3371_v46 = vmax.f32 %v3243_v35, 0.0  ;;  %v14525_v40 = vld [vmem:[%s21565_s8 + $0x14] ss:$8 sps:$4 sm:$0xff]  }
 0x2f1   :  { %v3242_v45 = vadd.f32 %v16811_v39, %v2622_v43  ;;  %v3369_v48 = vmax.f32 %v3241_v38, 0.0 }
 0x2f2   :  { %v3372_v47 = vmax.f32 %v3244_v42, 0.0  ;;  %13491 = vmatmul.mubr.msk.bf16.gmra.mrb[116].mxu0 %vm538_vm0, %v14511_v37 }
 0x2f3   :  { %v3370_v49 = vmax.f32 %v3242_v45, 0.0  ;;  %13494 = vmatprep.mubr.msk.bf16.mxu0 %vm538_vm0, %v14512_v41 }
 0x2f4   :  { %v16858_v50 = vpack.c.bf16 %v3372_v47, %v3371_v46  ;;  %v14527_v47 = vld [vmem:[%s21565_s8 + $0x10] ss:$8 sps:$4 sm:$0xff]  }
 0x2f5   :  { %v16860_v51 = vpack.c.bf16 %v3370_v49, %v3369_v48  ;;  %v13388_v52 = vpop.f32.mrb[12].mxu0 }
 0x2f6   :  { %v3247_v53 = vadd.f32 %v13388_v52, %v16811_v39  ;;  %v2635_v54 = vpop.f32.mrb[13].mxu0 }
 0x2f7   :  { %v3245_v56 = vadd.f32 %v16811_v39, %v2635_v54  ;;  %v13389_v57 = vpop.f32.mrb[14].mxu0 }
 0x2f8   :  { %v3248_v59 = vadd.f32 %v13389_v57, %v16811_v39  ;;  %v2638_v60 = vpop.f32.mrb[15].mxu0  ;;  %v3375_v0 = vmax.f32 %v3247_v53, 0.0 }
 0x2f9   :  { %v3246_v63 = vadd.f32 %v16811_v39, %v2638_v60  ;;  %v3373_v3 = vmax.f32 %v3245_v56, 0.0 }
 0x2fa   :  { %v3376_v1 = vmax.f32 %v3248_v59, 0.0  ;;  %13495 = vmatmul.mubr.msk.bf16.gmra.mrb[120].mxu0 %vm538_vm0, %v14513_v55 }
 0x2fb   :  { %v3374_v12 = vmax.f32 %v3246_v63, 0.0  ;;  %13498 = vmatprep.mubr.msk.bf16.mxu0 %vm538_vm0, %v14514_v58 }
 0x2fc   :  { %v16874_v61 = vpack.c.bf16 %v3376_v1, %v3375_v0 }
 0x2fd   :  { %v16876_v62 = vpack.c.bf16 %v3374_v12, %v3373_v3  ;;  %v13392_v2 = vpop.f32.mrb[16].mxu0 }
 0x2fe   :  { %v3251_v4 = vadd.f32 %v13392_v2, %v16811_v39  ;;  %v2651_v5 = vpop.f32.mrb[17].mxu0 }
 0x2ff   :  { %v3249_v7 = vadd.f32 %v16811_v39, %v2651_v5  ;;  %v13393_v8 = vpop.f32.mrb[18].mxu0 }
 0x300   :  { %v3252_v9 = vadd.f32 %v13393_v8, %v16811_v39  ;;  %v2654_v10 = vpop.f32.mrb[19].mxu0  ;;  %v3379_v13 = vmax.f32 %v3251_v4, 0.0 }
 0x301   :  { %v3250_v11 = vadd.f32 %v16811_v39, %v2654_v10  ;;  %v3377_v15 = vmax.f32 %v3249_v7, 0.0 }
 0x302   :  { %v3380_v14 = vmax.f32 %v3252_v9, 0.0  ;;  %13499 = vmatmul.mubr.msk.bf16.gmra.mrb[124].mxu0 %vm538_vm0, %v14515_v6 }
 0x303   :  { %v3378_v18 = vmax.f32 %v3250_v11, 0.0  ;;  %3813 = vmatprep.mubr.bf16.mxu0 %v21576_v44 }
 0x304   :  { %v16887_v19 = vpack.c.bf16 %v3380_v14, %v3379_v13 }
 0x305   :  { %v16889_v20 = vpack.c.bf16 %v3378_v18, %v3377_v15  ;;  %v13396_v21 = vpop.f32.mrb[20].mxu0 }
 0x306   :  { %v3255_v22 = vadd.f32 %v13396_v21, %v16811_v39  ;;  %v2667_v23 = vpop.f32.mrb[21].mxu0 }
 0x307   :  { %v3253_v24 = vadd.f32 %v16811_v39, %v2667_v23  ;;  %v13397_v25 = vpop.f32.mrb[22].mxu0 }
 0x308   :  { %v3256_v26 = vadd.f32 %v13397_v25, %v16811_v39  ;;  %v2670_v27 = vpop.f32.mrb[23].mxu0  ;;  %v3383_v29 = vmax.f32 %v3255_v22, 0.0 }
 0x309   :  { %v3254_v28 = vadd.f32 %v16811_v39, %v2670_v27  ;;  %v3381_v31 = vmax.f32 %v3253_v24, 0.0 }
 0x30a   :  { %v3384_v30 = vmax.f32 %v3256_v26, 0.0  ;;  %12314 = vmatmul.mubr.msk.bf16.vlgmr.msra.gmra.mrb[128].mxu0 %vm538_vm0, %v16828_v17 }
 0x30b   :  { %v3382_v34 = vmax.f32 %v3254_v28, 0.0  ;;  %3823 = vmatprep.mubr.bf16.mxu0 %v21576_v44 }
 0x30c   :  { %v3500_v35 = vpack.c.bf16 %v3384_v30, %v3383_v29 }
 0x30d   :  { %v3499_v37 = vpack.c.bf16 %v3382_v34, %v3381_v31  ;;  %v13400_v38 = vpop.f32.mrb[24].mxu0 }
 0x30e   :  { %v3259_v41 = vadd.f32 %v13400_v38, %v16811_v39  ;;  %v2683_v42 = vpop.f32.mrb[25].mxu0 }
 0x30f   :  { %v3257_v17 = vadd.f32 %v16811_v39, %v2683_v42  ;;  %v13401_v43 = vpop.f32.mrb[26].mxu0  ;;  %12324 = vmatmul.mubr.msk.bf16.vlgmr.msra.gmra.mrb[0].mxu1 %vm538_vm0, %v3499_v37 }
 0x310   :  { %v3260_v45 = vadd.f32 %v13401_v43, %v16811_v39  ;;  %v2686_v46 = vpop.f32.mrb[27].mxu0  ;;  %4811 = vmatpush1.bf16.msra.mxu1 %v14524_v36  ;;  %3923 = vmatprep.mubr.bf16.mxu1 %v21576_v44  ;;  %v3387_v49 = vmax.f32 %v3259_v41, 0.0 }
 0x311   :  { %v3258_v48 = vadd.f32 %v16811_v39, %v2686_v46  ;;  %4812 = vmatprep.subr.bf16.mxu1 %v14525_v40  ;;  %v3385_v53 = vmax.f32 %v3257_v17, 0.0 }
 0x312   :  { %v3388_v52 = vmax.f32 %v3260_v45, 0.0  ;;  %12315 = vmatmul.mubr.msk.bf16.gmra.mrb[132].mxu0 %vm538_vm0, %v16826_v16 }
 0x313   :  { %v3386_v54 = vmax.f32 %v3258_v48, 0.0  ;;  %3833 = vmatprep.mubr.bf16.mxu0 %v21576_v44 }
 0x314   :  { %v3502_v55 = vpack.c.bf16 %v3388_v52, %v3387_v49  ;;  %4813 = vmatpush1.bf16.msra.mxu1 %v14527_v47 }
 0x315   :  { %v3501_v56 = vpack.c.bf16 %v3386_v54, %v3385_v53  ;;  %v13404_v57 = vpop.f32.mrb[28].mxu0 }
 0x316   :  { %v3263_v58 = vadd.f32 %v13404_v57, %v16811_v39  ;;  %v2699_v59 = vpop.f32.mrb[29].mxu0 }
 0x317   :  { %v3261_v60 = vadd.f32 %v16811_v39, %v2699_v59  ;;  %v13405_v63 = vpop.f32.mrb[30].mxu0  ;;  %12325 = vmatmul.mubr.msk.bf16.gmra.mrb[4].mxu1 %vm538_vm0, %v3500_v35 }
 0x318   :  { %v3264_v0 = vadd.f32 %v13405_v63, %v16811_v39  ;;  %v2702_v1 = vpop.f32.mrb[31].mxu0  ;;  %3933 = vmatprep.mubr.bf16.mxu1 %v21576_v44  ;;  %v3391_v3 = vmax.f32 %v3263_v58, 0.0 }
 0x319   :  { %v3262_v16 = vadd.f32 %v16811_v39, %v2702_v1  ;;  %v3389_v2 = vmax.f32 %v3261_v60, 0.0 }
 0x31a   :  { %v3392_v12 = vmax.f32 %v3264_v0, 0.0  ;;  %12316 = vmatmul.mubr.msk.bf16.gmra.mrb[136].mxu0 %vm538_vm0, %v16844_v33 }
 0x31b   :  { %v3390_v4 = vmax.f32 %v3262_v16, 0.0  ;;  %3843 = vmatprep.mubr.bf16.mxu0 %v21576_v44 }
 0x31c   :  { %v3504_v5 = vpack.c.bf16 %v3392_v12, %v3391_v3 }
 0x31d   :  { %v3503_v6 = vpack.c.bf16 %v3390_v4, %v3389_v2  ;;  %v13408_v7 = vpop.f32.mrb[32].mxu0 }
 0x31e   :  { %v3267_v8 = vadd.f32 %v13408_v7, %v16811_v39  ;;  %v2715_v9 = vpop.f32.mrb[33].mxu0 }
 0x31f   :  { %v3265_v10 = vadd.f32 %v16811_v39, %v2715_v9  ;;  %v13409_v11 = vpop.f32.mrb[34].mxu0  ;;  %12326 = vmatmul.mubr.msk.bf16.gmra.mrb[8].mxu1 %vm538_vm0, %v3501_v56 }
 0x320   :  { %v3268_v13 = vadd.f32 %v13409_v11, %v16811_v39  ;;  %v2718_v14 = vpop.f32.mrb[35].mxu0  ;;  %3943 = vmatprep.mubr.bf16.mxu1 %v21576_v44  ;;  %v3395_v15 = vmax.f32 %v3267_v8, 0.0 }
 0x321   :  { %v3266_v33 = vadd.f32 %v16811_v39, %v2718_v14  ;;  %v3393_v21 = vmax.f32 %v3265_v10, 0.0 }
 0x322   :  { %v3396_v18 = vmax.f32 %v3268_v13, 0.0  ;;  %12317 = vmatmul.mubr.msk.bf16.gmra.mrb[140].mxu0 %vm538_vm0, %v16842_v32 }
 0x323   :  { %v3394_v22 = vmax.f32 %v3266_v33, 0.0  ;;  %3853 = vmatprep.mubr.bf16.mxu0 %v21576_v44 }
 0x324   :  { %v16934_v23 = vpack.c.bf16 %v3396_v18, %v3395_v15 }
 0x325   :  { %v3505_v24 = vpack.c.bf16 %v3394_v22, %v3393_v21  ;;  %v13412_v25 = vpop.f32.mrb[36].mxu0 }
 0x326   :  { %v3271_v26 = vadd.f32 %v13412_v25, %v16811_v39  ;;  %v2731_v27 = vpop.f32.mrb[37].mxu0 }
 0x327   :  { %v3269_v28 = vadd.f32 %v16811_v39, %v2731_v27  ;;  %v13413_v29 = vpop.f32.mrb[38].mxu0  ;;  %12327 = vmatmul.mubr.msk.bf16.gmra.mrb[12].mxu1 %vm538_vm0, %v3502_v55 }
 0x328   :  { %v3272_v30 = vadd.f32 %v13413_v29, %v16811_v39  ;;  %v2734_v31 = vpop.f32.mrb[39].mxu0  ;;  %3953 = vmatprep.mubr.bf16.mxu1 %v21576_v44  ;;  %v3399_v34 = vmax.f32 %v3271_v26, 0.0 }
 0x329   :  { %v3270_v32 = vadd.f32 %v16811_v39, %v2734_v31  ;;  %v3397_v36 = vmax.f32 %v3269_v28, 0.0 }
 0x32a   :  { %v3400_v35 = vmax.f32 %v3272_v30, 0.0  ;;  %12318 = vmatmul.mubr.msk.bf16.gmra.mrb[144].mxu0 %vm538_vm0, %v16860_v51 }
 0x32b   :  { %v3398_v37 = vmax.f32 %v3270_v32, 0.0  ;;  %3863 = vmatprep.mubr.bf16.mxu0 %v21576_v44 }
 0x32c   :  { %v16945_v38 = vpack.c.bf16 %v3400_v35, %v3399_v34 }
 0x32d   :  { %v16947_v40 = vpack.c.bf16 %v3398_v37, %v3397_v36  ;;  %v13416_v41 = vpop.f32.mrb[40].mxu0 }
 0x32e   :  { %v3275_v42 = vadd.f32 %v13416_v41, %v16811_v39  ;;  %v2747_v17 = vpop.f32.mrb[41].mxu0 }
 0x32f   :  { %v3273_v43 = vadd.f32 %v16811_v39, %v2747_v17  ;;  %v13417_v45 = vpop.f32.mrb[42].mxu0  ;;  %12328 = vmatmul.mubr.msk.bf16.gmra.mrb[16].mxu1 %vm538_vm0, %v3503_v6 }
 0x330   :  { %v3276_v46 = vadd.f32 %v13417_v45, %v16811_v39  ;;  %v2750_v51 = vpop.f32.mrb[43].mxu0  ;;  %3963 = vmatprep.mubr.bf16.mxu1 %v21576_v44  ;;  %v3403_v48 = vmax.f32 %v3275_v42, 0.0 }
 0x331   :  { %v3274_v47 = vadd.f32 %v16811_v39, %v2750_v51  ;;  %v3401_v52 = vmax.f32 %v3273_v43, 0.0 }
 0x332   :  { %v3404_v49 = vmax.f32 %v3276_v46, 0.0  ;;  %12319 = vmatmul.mubr.msk.bf16.gmra.mrb[148].mxu0 %vm538_vm0, %v16858_v50 }
 0x333   :  { %v3402_v53 = vmax.f32 %v3274_v47, 0.0  ;;  %3873 = vmatprep.mubr.bf16.mxu0 %v21576_v44 }
 0x334   :  { %v16958_v54 = vpack.c.bf16 %v3404_v49, %v3403_v48 }
 0x335   :  { %v16960_v55 = vpack.c.bf16 %v3402_v53, %v3401_v52  ;;  %v13420_v56 = vpop.f32.mrb[44].mxu0 }
 0x336   :  { %v3279_v57 = vadd.f32 %v13420_v56, %v16811_v39  ;;  %v2763_v58 = vpop.f32.mrb[45].mxu0 }
 0x337   :  { %v3277_v59 = vadd.f32 %v16811_v39, %v2763_v58  ;;  %v13421_v60 = vpop.f32.mrb[46].mxu0  ;;  %12329 = vmatmul.mubr.msk.bf16.gmra.mrb[20].mxu1 %vm538_vm0, %v3504_v5 }
 0x338   :  { %v3280_v63 = vadd.f32 %v13421_v60, %v16811_v39  ;;  %v2766_v50 = vpop.f32.mrb[47].mxu0  ;;  %3973 = vmatprep.mubr.bf16.mxu1 %v21576_v44  ;;  %v3407_v1 = vmax.f32 %v3279_v57, 0.0  ;;  %v3559_v57 = vlaneseq }
 0x339   :  { %v3278_v0 = vadd.f32 %v16811_v39, %v2766_v50  ;;  %v3405_v3 = vmax.f32 %v3277_v59, 0.0 }
 0x33a   :  { %v3408_v16 = vmax.f32 %v3280_v63, 0.0  ;;  %12320 = vmatmul.mubr.msk.bf16.gmra.mrb[152].mxu0 %vm538_vm0, %v16876_v62  ;;  %v17021_v63 = vshrl.u32 %v3559_v57, 7 }
 0x33b   :  { %v3406_v12 = vmax.f32 %v3278_v0, 0.0  ;;  %3883 = vmatprep.mubr.bf16.mxu0 %v21576_v44 }
 0x33c   :  { %v16971_v2 = vpack.c.bf16 %v3408_v16, %v3407_v1  ;;  %v3561_v16 = vsub.s32 0, %v17021_v63 }
 0x33d   :  { %v16973_v4 = vpack.c.bf16 %v3406_v12, %v3405_v3  ;;  %v13424_v5 = vpop.f32.mrb[48].mxu0 }
 0x33e   :  { %v3283_v6 = vadd.f32 %v13424_v5, %v16811_v39  ;;  %v2779_v7 = vpop.f32.mrb[49].mxu0  ;;  %v17028_v5 = vld [vmem:[%s21567_s9] sm:$0x3] }
 0x33f   :  { %v3281_v8 = vadd.f32 %v16811_v39, %v2779_v7  ;;  %v13425_v9 = vpop.f32.mrb[50].mxu0  ;;  %12330 = vmatmul.mubr.msk.bf16.gmra.mrb[24].mxu1 %vm538_vm0, %v3505_v24 }
 0x340   :  { %v3284_v10 = vadd.f32 %v13425_v9, %v16811_v39  ;;  %v2782_v62 = vpop.f32.mrb[51].mxu0  ;;  %3983 = vmatprep.mubr.bf16.mxu1 %v21576_v44  ;;  %v3411_v13 = vmax.f32 %v3283_v6, 0.0  ;;  %v17033_v6 = vrot.slane %v17028_v5, %v3561_v16 }
 0x341   :  { %v3282_v11 = vadd.f32 %v16811_v39, %v2782_v62  ;;  %v3409_v33 = vmax.f32 %v3281_v8, 0.0 }
 0x342   :  { %v3412_v14 = vmax.f32 %v3284_v10, 0.0  ;;  %12321 = vmatmul.mubr.msk.bf16.gmra.mrb[156].mxu0 %vm538_vm0, %v16874_v61 }
 0x343   :  { %v3410_v15 = vmax.f32 %v3282_v11, 0.0  ;;  %3893 = vmatprep.mubr.bf16.mxu0 %v21576_v44 }
 0x344   :  { %v16984_v18 = vpack.c.bf16 %v3412_v14, %v3411_v13 }
 0x345   :  { %v16986_v21 = vpack.c.bf16 %v3410_v15, %v3409_v33  ;;  %v13428_v22 = vpop.f32.mrb[52].mxu0 }
 0x346   :  { %v3287_v24 = vadd.f32 %v13428_v22, %v16811_v39  ;;  %v2795_v25 = vpop.f32.mrb[53].mxu0 }
 0x347   :  { %v3285_v26 = vadd.f32 %v16811_v39, %v2795_v25  ;;  %v13429_v27 = vpop.f32.mrb[54].mxu0  ;;  %12331 = vmatmul.mubr.msk.bf16.gmra.mrb[28].mxu1 %vm538_vm0, %v16934_v23 }
 0x348   :  { %v3288_v61 = vadd.f32 %v13429_v27, %v16811_v39  ;;  %v2798_v28 = vpop.f32.mrb[55].mxu0  ;;  %3993 = vmatprep.mubr.bf16.mxu1 %v21576_v44  ;;  %v3415_v30 = vmax.f32 %v3287_v24, 0.0 }
 0x349   :  { %v3286_v29 = vadd.f32 %v16811_v39, %v2798_v28  ;;  %v3413_v32 = vmax.f32 %v3285_v26, 0.0 }
 0x34a   :  { %v3416_v31 = vmax.f32 %v3288_v61, 0.0  ;;  %12322 = vmatmul.mubr.msk.bf16.gmra.mrb[160].mxu0 %vm538_vm0, %v16889_v20 }
 0x34b   :  { %v3414_v34 = vmax.f32 %v3286_v29, 0.0  ;;  %3903 = vmatprep.mubr.bf16.mxu0 %v21576_v44 }
 0x34c   :  { %v16998_v35 = vpack.c.bf16 %v3416_v31, %v3415_v30 }
 0x34d   :  { %v17000_v36 = vpack.c.bf16 %v3414_v34, %v3413_v32  ;;  %v13432_v23 = vpop.f32.mrb[56].mxu0  ;;  %v17057_v34 = vld [vmem:[%s21565_s8 + $0x24] ss:$8 sps:$4 sm:$0xff]  }
 0x34e   :  { %v3291_v37 = vadd.f32 %v13432_v23, %v16811_v39  ;;  %v2811_v41 = vpop.f32.mrb[57].mxu0  ;;  %4814 = vmatprep.subr.bf16.mxu1 %v17057_v34 }
 0x34f   :  { %v3289_v42 = vadd.f32 %v16811_v39, %v2811_v41  ;;  %v13433_v17 = vpop.f32.mrb[58].mxu0  ;;  %12332 = vmatmul.mubr.msk.bf16.gmra.mrb[32].mxu1 %vm538_vm0, %v16947_v40 }
 0x350   :  { %v3292_v20 = vadd.f32 %v13433_v17, %v16811_v39  ;;  %v2814_v43 = vpop.f32.mrb[59].mxu0  ;;  %4003 = vmatprep.mubr.bf16.mxu1 %v21576_v44  ;;  %v3419_v46 = vmax.f32 %v3291_v37, 0.0  ;;  %v17063_v37 = vld [vmem:[%s21565_s8 + $0x20] ss:$8 sps:$4 sm:$0xff]  }
 0x351   :  { %v3290_v45 = vadd.f32 %v16811_v39, %v2814_v43  ;;  %v3417_v47 = vmax.f32 %v3289_v42, 0.0  ;;  %4815 = vmatpush1.bf16.msra.mxu1 %v17063_v37 }
 0x352   :  { %v3420_v51 = vmax.f32 %v3292_v20, 0.0  ;;  %12323 = vmatmul.mubr.msk.bf16.gmra.mrb[164].mxu0 %vm538_vm0, %v16887_v19 }
 0x353   :  { %v3418_v48 = vmax.f32 %v3290_v45, 0.0 }
 0x354   :  { %v17011_v49 = vpack.c.bf16 %v3420_v51, %v3419_v46 }
 0x355   :  { %v17013_v52 = vpack.c.bf16 %v3418_v48, %v3417_v47  ;;  %v13436_v53 = vpop.f32.mrb[60].mxu0 }
 0x356   :  { %v3295_v40 = vadd.f32 %v13436_v53, %v16811_v39  ;;  %v2827_v56 = vpop.f32.mrb[61].mxu0 }
 0x357   :  { %v3293_v58 = vadd.f32 %v16811_v39, %v2827_v56  ;;  %v13437_v59 = vpop.f32.mrb[62].mxu0  ;;  %12333 = vmatmul.mubr.msk.bf16.gmra.mrb[36].mxu1 %vm538_vm0, %v16945_v38 }
 0x358   :  { %v3296_v60 = vadd.f32 %v13437_v59, %v16811_v39  ;;  %v2830_v19 = vpop.f32.mrb[63].mxu0  ;;  %4013 = vmatprep.mubr.bf16.mxu1 %v21576_v44  ;;  %v3423_v0 = vmax.f32 %v3295_v40, 0.0 }
 0x359   :  { %v3294_v50 = vadd.f32 %v16811_v39, %v2830_v19  ;;  %v3421_v3 = vmax.f32 %v3293_v58, 0.0 }
 0x35a   :  { %v3424_v1 = vmax.f32 %v3296_v60, 0.0 }
 0x35b   :  { %v3422_v12 = vmax.f32 %v3294_v50, 0.0 }
 0x35c   :  { %v17030_v38 = vpack.c.bf16 %v3424_v1, %v3423_v0 }
 0x35d   :  { %v17035_v7 = vpack.c.bf16 %v3422_v12, %v3421_v3  ;;  %v13440_v8 = vpop.f32.mrb[64].mxu0 }
 0x35e   :  { %v3299_v9 = vadd.f32 %v13440_v8, %v16811_v39  ;;  %v2843_v10 = vpop.f32.mrb[65].mxu0 }
 0x35f   :  { %v3297_v62 = vadd.f32 %v16811_v39, %v2843_v10  ;;  %v13441_v11 = vpop.f32.mrb[66].mxu0  ;;  %12334 = vmatmul.mubr.msk.bf16.gmra.mrb[40].mxu1 %vm538_vm0, %v16960_v55 }
 0x360   :  { %v3300_v13 = vadd.f32 %v13441_v11, %v16811_v39  ;;  %v2846_v14 = vpop.f32.mrb[67].mxu0  ;;  %4023 = vmatprep.mubr.bf16.mxu1 %v21576_v44  ;;  %v3427_v15 = vmax.f32 %v3299_v9, 0.0 }
 0x361   :  { %v3298_v33 = vadd.f32 %v16811_v39, %v2846_v14  ;;  %v3425_v24 = vmax.f32 %v3297_v62, 0.0 }
 0x362   :  { %v3428_v22 = vmax.f32 %v3300_v13, 0.0 }
 0x363   :  { %v3426_v25 = vmax.f32 %v3298_v33, 0.0 }
 0x364   :  { %v17044_v26 = vpack.c.bf16 %v3428_v22, %v3427_v15 }
 0x365   :  { %v17046_v27 = vpack.c.bf16 %v3426_v25, %v3425_v24  ;;  %v13444_v61 = vpop.f32.mrb[68].mxu0 }
 0x366   :  { %v3303_v28 = vadd.f32 %v13444_v61, %v16811_v39  ;;  %v2859_v29 = vpop.f32.mrb[69].mxu0 }
 0x367   :  { %v3301_v55 = vadd.f32 %v16811_v39, %v2859_v29  ;;  %v13445_v30 = vpop.f32.mrb[70].mxu0  ;;  %12335 = vmatmul.mubr.msk.bf16.gmra.mrb[44].mxu1 %vm538_vm0, %v16958_v54 }
 0x368   :  { %v3304_v31 = vadd.f32 %v13445_v30, %v16811_v39  ;;  %v2862_v32 = vpop.f32.mrb[71].mxu0  ;;  %4033 = vmatprep.mubr.bf16.mxu1 %v21576_v44  ;;  %v3431_v41 = vmax.f32 %v3303_v28, 0.0 }
 0x369   :  { %v3302_v23 = vadd.f32 %v16811_v39, %v2862_v32  ;;  %v3429_v54 = vmax.f32 %v3301_v55, 0.0 }
 0x36a   :  { %v3432_v42 = vmax.f32 %v3304_v31, 0.0 }
 0x36b   :  { %v3430_v17 = vmax.f32 %v3302_v23, 0.0 }
 0x36c   :  { %v17067_v20 = vpack.c.bf16 %v3432_v42, %v3431_v41 }
 0x36d   :  { %v17069_v43 = vpack.c.bf16 %v3430_v17, %v3429_v54  ;;  %v13448_v45 = vpop.f32.mrb[72].mxu0 }
 0x36e   :  { %v3307_v46 = vadd.f32 %v13448_v45, %v16811_v39  ;;  %v2875_v51 = vpop.f32.mrb[73].mxu0 }
 0x36f   :  { %v3305_v47 = vadd.f32 %v16811_v39, %v2875_v51  ;;  %v13449_v48 = vpop.f32.mrb[74].mxu0  ;;  %12336 = vmatmul.mubr.msk.bf16.gmra.mrb[48].mxu1 %vm538_vm0, %v16973_v4 }
 0x370   :  { %v3308_v53 = vadd.f32 %v13449_v48, %v16811_v39  ;;  %v2878_v40 = vpop.f32.mrb[75].mxu0  ;;  %4043 = vmatprep.mubr.bf16.mxu1 %v21576_v44  ;;  %v3435_v57 = vmax.f32 %v3307_v46, 0.0 }
 0x371   :  { %v3306_v56 = vadd.f32 %v16811_v39, %v2878_v40  ;;  %v3433_v59 = vmax.f32 %v3305_v47, 0.0 }
 0x372   :  { %v3436_v58 = vmax.f32 %v3308_v53, 0.0 }
 0x373   :  { %v3434_v60 = vmax.f32 %v3306_v56, 0.0 }
 0x374   :  { %v17078_v19 = vpack.c.bf16 %v3436_v58, %v3435_v57 }
 0x375   :  { %v17080_v50 = vpack.c.bf16 %v3434_v60, %v3433_v59  ;;  %v13452_v0 = vpop.f32.mrb[76].mxu0 }
 0x376   :  { %v3311_v1 = vadd.f32 %v13452_v0, %v16811_v39  ;;  %v2891_v16 = vpop.f32.mrb[77].mxu0 }
 0x377   :  { %v3309_v4 = vadd.f32 %v16811_v39, %v2891_v16  ;;  %v13453_v3 = vpop.f32.mrb[78].mxu0  ;;  %12337 = vmatmul.mubr.msk.bf16.gmra.mrb[52].mxu1 %vm538_vm0, %v16971_v2 }
 0x378   :  { %v3312_v12 = vadd.f32 %v13453_v3, %v16811_v39  ;;  %v2894_v8 = vpop.f32.mrb[79].mxu0  ;;  %4053 = vmatprep.mubr.bf16.mxu1 %v21576_v44  ;;  %v3439_v10 = vmax.f32 %v3311_v1, 0.0 }
 0x379   :  { %v3310_v9 = vadd.f32 %v16811_v39, %v2894_v8  ;;  %v3437_v11 = vmax.f32 %v3309_v4, 0.0 }
 0x37a   :  { %v3440_v62 = vmax.f32 %v3312_v12, 0.0 }
 0x37b   :  { %v3438_v13 = vmax.f32 %v3310_v9, 0.0 }
 0x37c   :  { %v17089_v14 = vpack.c.bf16 %v3440_v62, %v3439_v10 }
 0x37d   :  { %v17091_v33 = vpack.c.bf16 %v3438_v13, %v3437_v11  ;;  %v13456_v15 = vpop.f32.mrb[80].mxu0 }
 0x37e   :  { %v3315_v22 = vadd.f32 %v13456_v15, %v16811_v39  ;;  %v2907_v24 = vpop.f32.mrb[81].mxu0 }
 0x37f   :  { %v3313_v2 = vadd.f32 %v16811_v39, %v2907_v24  ;;  %v13457_v25 = vpop.f32.mrb[82].mxu0  ;;  %12338 = vmatmul.mubr.msk.bf16.gmra.mrb[56].mxu1 %vm538_vm0, %v16986_v21 }
 0x380   :  { %v3316_v61 = vadd.f32 %v13457_v25, %v16811_v39  ;;  %v2910_v28 = vpop.f32.mrb[83].mxu0  ;;  %4063 = vmatprep.mubr.bf16.mxu1 %v21576_v44  ;;  %v3443_v55 = vmax.f32 %v3315_v22, 0.0 }
 0x381   :  { %v3314_v29 = vadd.f32 %v16811_v39, %v2910_v28  ;;  %v3441_v31 = vmax.f32 %v3313_v2, 0.0 }
 0x382   :  { %v3444_v30 = vmax.f32 %v3316_v61, 0.0 }
 0x383   :  { %v3442_v32 = vmax.f32 %v3314_v29, 0.0 }
 0x384   :  { %v17100_v23 = vpack.c.bf16 %v3444_v30, %v3443_v55 }
 0x385   :  { %v17102_v41 = vpack.c.bf16 %v3442_v32, %v3441_v31  ;;  %v13460_v42 = vpop.f32.mrb[84].mxu0 }
 0x386   :  { %v3319_v54 = vadd.f32 %v13460_v42, %v16811_v39  ;;  %v2923_v17 = vpop.f32.mrb[85].mxu0 }
 0x387   :  { %v3317_v21 = vadd.f32 %v16811_v39, %v2923_v17  ;;  %v13461_v45 = vpop.f32.mrb[86].mxu0  ;;  %12339 = vmatmul.mubr.msk.bf16.gmra.mrb[60].mxu1 %vm538_vm0, %v16984_v18 }
 0x388   :  { %v3320_v46 = vadd.f32 %v13461_v45, %v16811_v39  ;;  %v2926_v51 = vpop.f32.mrb[87].mxu0  ;;  %4073 = vmatprep.mubr.bf16.mxu1 %v21576_v44  ;;  %v3447_v48 = vmax.f32 %v3319_v54, 0.0 }
 0x389   :  { %v3318_v47 = vadd.f32 %v16811_v39, %v2926_v51  ;;  %v3445_v40 = vmax.f32 %v3317_v21, 0.0 }
 0x38a   :  { %v3448_v53 = vmax.f32 %v3320_v46, 0.0 }
 0x38b   :  { %v3446_v56 = vmax.f32 %v3318_v47, 0.0 }
 0x38c   :  { %v17111_v57 = vpack.c.bf16 %v3448_v53, %v3447_v48 }
 0x38d   :  { %v17113_v58 = vpack.c.bf16 %v3446_v56, %v3445_v40  ;;  %v13464_v59 = vpop.f32.mrb[88].mxu0 }
 0x38e   :  { %v3323_v60 = vadd.f32 %v13464_v59, %v16811_v39  ;;  %v2939_v0 = vpop.f32.mrb[89].mxu0 }
 0x38f   :  { %v3321_v18 = vadd.f32 %v16811_v39, %v2939_v0  ;;  %v13465_v1 = vpop.f32.mrb[90].mxu0  ;;  %12340 = vmatmul.mubr.msk.bf16.gmra.mrb[64].mxu1 %vm538_vm0, %v17000_v36 }
 0x390   :  { %v3324_v16 = vadd.f32 %v13465_v1, %v16811_v39  ;;  %v2942_v4 = vpop.f32.mrb[91].mxu0  ;;  %4083 = vmatprep.mubr.bf16.mxu1 %v21576_v44  ;;  %v3451_v12 = vmax.f32 %v3323_v60, 0.0 }
 0x391   :  { %v3322_v3 = vadd.f32 %v16811_v39, %v2942_v4  ;;  %v3449_v9 = vmax.f32 %v3321_v18, 0.0 }
 0x392   :  { %v3452_v8 = vmax.f32 %v3324_v16, 0.0 }
 0x393   :  { %v3450_v10 = vmax.f32 %v3322_v3, 0.0 }
 0x394   :  { %v17122_v62 = vpack.c.bf16 %v3452_v8, %v3451_v12 }
 0x395   :  { %v17124_v11 = vpack.c.bf16 %v3450_v10, %v3449_v9  ;;  %v13468_v13 = vpop.f32.mrb[92].mxu0 }
 0x396   :  { %v3327_v15 = vadd.f32 %v13468_v13, %v16811_v39  ;;  %v2955_v22 = vpop.f32.mrb[93].mxu0 }
 0x397   :  { %v3325_v36 = vadd.f32 %v16811_v39, %v2955_v22  ;;  %v13469_v24 = vpop.f32.mrb[94].mxu0  ;;  %12341 = vmatmul.mubr.msk.bf16.gmra.mrb[68].mxu1 %vm538_vm0, %v16998_v35 }
 0x398   :  { %v3328_v2 = vadd.f32 %v13469_v24, %v16811_v39  ;;  %v2958_v25 = vpop.f32.mrb[95].mxu0  ;;  %4093 = vmatprep.mubr.bf16.mxu1 %v21576_v44  ;;  %v3455_v28 = vmax.f32 %v3327_v15, 0.0 }
 0x399   :  { %v3326_v61 = vadd.f32 %v16811_v39, %v2958_v25  ;;  %v3453_v55 = vmax.f32 %v3325_v36, 0.0 }
 0x39a   :  { %v3456_v29 = vmax.f32 %v3328_v2, 0.0 }
 0x39b   :  { %v3454_v30 = vmax.f32 %v3326_v61, 0.0 }
 0x39c   :  { %v17133_v31 = vpack.c.bf16 %v3456_v29, %v3455_v28 }
 0x39d   :  { %v17135_v32 = vpack.c.bf16 %v3454_v30, %v3453_v55  ;;  %v13472_v42 = vpop.f32.mrb[96].mxu0 }
 0x39e   :  { %v3331_v54 = vadd.f32 %v13472_v42, %v16811_v39  ;;  %v2971_v17 = vpop.f32.mrb[97].mxu0 }
 0x39f   :  { %v3329_v35 = vadd.f32 %v16811_v39, %v2971_v17  ;;  %v13473_v21 = vpop.f32.mrb[98].mxu0  ;;  %12342 = vmatmul.mubr.msk.bf16.gmra.mrb[72].mxu1 %vm538_vm0, %v17013_v52 }
 0x3a0   :  { %v3332_v45 = vadd.f32 %v13473_v21, %v16811_v39  ;;  %v2974_v46 = vpop.f32.mrb[99].mxu0  ;;  %4103 = vmatprep.mubr.bf16.mxu1 %v21576_v44  ;;  %v3459_v47 = vmax.f32 %v3331_v54, 0.0 }
 0x3a1   :  { %v3330_v51 = vadd.f32 %v16811_v39, %v2974_v46  ;;  %v3457_v53 = vmax.f32 %v3329_v35, 0.0 }
 0x3a2   :  { %v3460_v48 = vmax.f32 %v3332_v45, 0.0 }
 0x3a3   :  { %v3458_v40 = vmax.f32 %v3330_v51, 0.0 }
 0x3a4   :  { %v17144_v56 = vpack.c.bf16 %v3460_v48, %v3459_v47 }
 0x3a5   :  { %v17146_v59 = vpack.c.bf16 %v3458_v40, %v3457_v53  ;;  %v13476_v60 = vpop.f32.mrb[100].mxu0 }
 0x3a6   :  { %v3335_v0 = vadd.f32 %v13476_v60, %v16811_v39  ;;  %v2987_v18 = vpop.f32.mrb[101].mxu0 }
 0x3a7   :  { %v3333_v52 = vadd.f32 %v16811_v39, %v2987_v18  ;;  %v13477_v1 = vpop.f32.mrb[102].mxu0  ;;  %12343 = vmatmul.mubr.msk.bf16.gmra.mrb[76].mxu1 %vm538_vm0, %v17011_v49 }
 0x3a8   :  { %v3336_v16 = vadd.f32 %v13477_v1, %v16811_v39  ;;  %v2990_v4 = vpop.f32.mrb[103].mxu0  ;;  %4113 = vmatprep.mubr.bf16.mxu1 %v21576_v44  ;;  %v3463_v12 = vmax.f32 %v3335_v0, 0.0 }
 0x3a9   :  { %v3334_v3 = vadd.f32 %v16811_v39, %v2990_v4  ;;  %v3461_v9 = vmax.f32 %v3333_v52, 0.0 }
 0x3aa   :  { %v3464_v8 = vmax.f32 %v3336_v16, 0.0 }
 0x3ab   :  { %v3462_v10 = vmax.f32 %v3334_v3, 0.0 }
 0x3ac   :  { %v17155_v13 = vpack.c.bf16 %v3464_v8, %v3463_v12 }
 0x3ad   :  { %v17157_v15 = vpack.c.bf16 %v3462_v10, %v3461_v9  ;;  %v13480_v22 = vpop.f32.mrb[104].mxu0 }
 0x3ae   :  { %v3339_v36 = vadd.f32 %v13480_v22, %v16811_v39  ;;  %v3003_v24 = vpop.f32.mrb[105].mxu0 }
 0x3af   :  { %v3337_v49 = vadd.f32 %v16811_v39, %v3003_v24  ;;  %v13481_v2 = vpop.f32.mrb[106].mxu0  ;;  %12344 = vmatmul.mubr.msk.bf16.gmra.mrb[80].mxu1 %vm538_vm0, %v17035_v7 }
 0x3b0   :  { %v3340_v25 = vadd.f32 %v13481_v2, %v16811_v39  ;;  %v3006_v61 = vpop.f32.mrb[107].mxu0  ;;  %4123 = vmatprep.mubr.bf16.mxu1 %v21576_v44  ;;  %v3467_v29 = vmax.f32 %v3339_v36, 0.0 }
 0x3b1   :  { %v3338_v28 = vadd.f32 %v16811_v39, %v3006_v61  ;;  %v3465_v30 = vmax.f32 %v3337_v49, 0.0 }
 0x3b2   :  { %v3468_v55 = vmax.f32 %v3340_v25, 0.0 }
 0x3b3   :  { %v3466_v42 = vmax.f32 %v3338_v28, 0.0 }
 0x3b4   :  { %v17166_v54 = vpack.c.bf16 %v3468_v55, %v3467_v29  ;;  %v15838_v55 = vld [vmem:[%s21566_s6] ss:$0 sm:$0xff] }
 0x3b5   :  { %v17168_v17 = vpack.c.bf16 %v3466_v42, %v3465_v30  ;;  %v13484_v35 = vpop.f32.mrb[108].mxu0 }
 0x3b6   :  { %v3343_v21 = vadd.f32 %v13484_v35, %v16811_v39  ;;  %v3019_v45 = vpop.f32.mrb[109].mxu0 }
 0x3b7   :  { %v3341_v7 = vadd.f32 %v16811_v39, %v3019_v45  ;;  %v13485_v46 = vpop.f32.mrb[110].mxu0  ;;  %12345 = vmatmul.mubr.msk.bf16.gmra.mrb[84].mxu1 %vm538_vm0, %v17030_v38 }
 0x3b8   :  { %v3344_v51 = vadd.f32 %v13485_v46, %v16811_v39  ;;  %v3022_v47 = vpop.f32.mrb[111].mxu0  ;;  %4133 = vmatprep.mubr.bf16.mxu1 %v21576_v44  ;;  %v3471_v53 = vmax.f32 %v3343_v21, 0.0 }
 0x3b9   :  { %v3342_v48 = vadd.f32 %v16811_v39, %v3022_v47  ;;  %v3469_v60 = vmax.f32 %v3341_v7, 0.0 }
 0x3ba   :  { %v3472_v40 = vmax.f32 %v3344_v51, 0.0 }
 0x3bb   :  { %v3470_v0 = vmax.f32 %v3342_v48, 0.0 }
 0x3bc   :  { %v17177_v18 = vpack.c.bf16 %v3472_v40, %v3471_v53 }
 0x3bd   :  { %v17179_v52 = vpack.c.bf16 %v3470_v0, %v3469_v60  ;;  %v13488_v1 = vpop.f32.mrb[112].mxu0  ;;  %v17209_v60 = vld [vmem:[%s21565_s8 + $0x34] ss:$8 sps:$4 sm:$0xff]   ;;  %v17214_v0 = vld [vmem:[%s21565_s8 + $0x30] ss:$8 sps:$4 sm:$0xff]  }
 0x3be   :  { %v3347_v16 = vadd.f32 %v13488_v1, %v16811_v39  ;;  %v3035_v4 = vpop.f32.mrb[113].mxu0  ;;  %4816 = vmatprep.subr.bf16.mxu1 %v17209_v60 }
 0x3bf   :  { %v3345_v38 = vadd.f32 %v16811_v39, %v3035_v4  ;;  %v13489_v3 = vpop.f32.mrb[114].mxu0  ;;  %12346 = vmatmul.mubr.msk.bf16.gmra.mrb[88].mxu1 %vm538_vm0, %v17046_v27 }
 0x3c0   :  { %v3348_v12 = vadd.f32 %v13489_v3, %v16811_v39  ;;  %v3038_v8 = vpop.f32.mrb[115].mxu0  ;;  %4143 = vmatprep.mubr.bf16.mxu1 %v21576_v44  ;;  %v3475_v10 = vmax.f32 %v3347_v16, 0.0  ;;  %4817 = vmatpush1.bf16.msra.mxu1 %v17214_v0 }
 0x3c1   :  { %v3346_v9 = vadd.f32 %v16811_v39, %v3038_v8  ;;  %v3473_v36 = vmax.f32 %v3345_v38, 0.0  ;;  %v17222_v8 = vld [vmem:[%s21565_s8 + $0x4] ss:$8 sps:$4 sm:$0xff]  }
 0x3c2   :  { %v3476_v22 = vmax.f32 %v3348_v12, 0.0  ;;  %5627 = vmatprep.subr.bf16.mxu1 %v17222_v8 }
 0x3c3   :  { %v3474_v24 = vmax.f32 %v3346_v9, 0.0 }
 0x3c4   :  { %v17188_v49 = vpack.c.bf16 %v3476_v22, %v3475_v10 }
 0x3c5   :  { %v17190_v2 = vpack.c.bf16 %v3474_v24, %v3473_v36  ;;  %v13492_v25 = vpop.f32.mrb[116].mxu0 }
 0x3c6   :  { %v3351_v61 = vadd.f32 %v13492_v25, %v16811_v39  ;;  %v3051_v28 = vpop.f32.mrb[117].mxu0 }
 0x3c7   :  { %v3349_v27 = vadd.f32 %v16811_v39, %v3051_v28  ;;  %v13493_v29 = vpop.f32.mrb[118].mxu0  ;;  %12347 = vmatmul.mubr.msk.bf16.gmra.mrb[92].mxu1 %vm538_vm0, %v17044_v26 }
 0x3c8   :  { %v3352_v30 = vadd.f32 %v15838_v55, %v13493_v29  ;;  %v3054_v42 = vpop.f32.mrb[119].mxu0  ;;  %4153 = vmatprep.mubr.bf16.mxu1 %v21576_v44  ;;  %v3479_v21 = vmax.f32 %v3351_v61, 0.0 }
 0x3c9   :  { %v3350_v35 = vadd.f32 %v15838_v55, %v3054_v42  ;;  %v3477_v7 = vmax.f32 %v3349_v27, 0.0 }
 0x3ca   :  { %v3480_v45 = vmax.f32 %v3352_v30, 0.0 }
 0x3cb   :  { %v3478_v46 = vmax.f32 %v3350_v35, 0.0 }
 0x3cc   :  { %v17200_v51 = vpack.c.bf16 %v3480_v45, %v3479_v21 }
 0x3cd   :  { %v17202_v39 = vpack.c.bf16 %v3478_v46, %v3477_v7  ;;  %v13496_v47 = vpop.f32.mrb[120].mxu0 }
 0x3ce   :  { %v3355_v48 = vadd.f32 %v15838_v55, %v13496_v47  ;;  %v3067_v26 = vpop.f32.mrb[121].mxu0 }
 0x3cf   :  { %v3353_v53 = vadd.f32 %v15838_v55, %v3067_v26  ;;  %v13497_v40 = vpop.f32.mrb[122].mxu0  ;;  %12348 = vmatmul.mubr.msk.bf16.gmra.mrb[96].mxu1 %vm538_vm0, %v17069_v43 }
 0x3d0   :  { %v3356_v1 = vadd.f32 %v15838_v55, %v13497_v40  ;;  %v3070_v16 = vpop.f32.mrb[123].mxu0  ;;  %4163 = vmatprep.mubr.bf16.mxu1 %v21576_v44  ;;  %v3483_v38 = vmax.f32 %v3355_v48, 0.0 }
 0x3d1   :  { %v3354_v4 = vadd.f32 %v15838_v55, %v3070_v16  ;;  %v3481_v43 = vmax.f32 %v3353_v53, 0.0 }
 0x3d2   :  { %v3484_v3 = vmax.f32 %v3356_v1, 0.0 }
 0x3d3   :  { %v3482_v12 = vmax.f32 %v3354_v4, 0.0 }
 0x3d4   :  { %v17225_v9 = vpack.c.bf16 %v3484_v3, %v3483_v38 }
 0x3d5   :  { %v17227_v10 = vpack.c.bf16 %v3482_v12, %v3481_v43  ;;  %v13500_v22 = vpop.f32.mrb[124].mxu0 }
 0x3d6   :  { %v3359_v36 = vadd.f32 %v15838_v55, %v13500_v22  ;;  %v3083_v24 = vpop.f32.mrb[125].mxu0 }
 0x3d7   :  { %v3357_v25 = vadd.f32 %v15838_v55, %v3083_v24  ;;  %v13501_v61 = vpop.f32.mrb[126].mxu0  ;;  %12349 = vmatmul.mubr.msk.bf16.gmra.mrb[100].mxu1 %vm538_vm0, %v17067_v20 }
 0x3d8   :  { %v3360_v28 = vadd.f32 %v15838_v55, %v13501_v61  ;;  %v3086_v27 = vpop.f32.mrb[127].mxu0  ;;  %4173 = vmatprep.mubr.bf16.mxu1 %v21576_v44  ;;  %v3487_v30 = vmax.f32 %v3359_v36, 0.0 }
 0x3d9   :  { %v3358_v29 = vadd.f32 %v15838_v55, %v3086_v27  ;;  %v3485_v35 = vmax.f32 %v3357_v25, 0.0 }
 0x3da   :  { %v3488_v42 = vmax.f32 %v3360_v28, 0.0 }
 0x3db   :  { %v3486_v21 = vmax.f32 %v3358_v29, 0.0 }
 0x3dc   :  { %v17232_v45 = vpack.c.bf16 %v3488_v42, %v3487_v30 }
 0x3dd   :  { %v17234_v7 = vpack.c.bf16 %v3486_v21, %v3485_v35  ;;  %v17236_v46 = vpop.f32.mrb[128].mxu0 }
 0x3de   :  { %v17238_v47 = vpop.f32.mrb[129].mxu0 }
 0x3df   :  { %v17240_v48 = vpop.f32.mrb[130].mxu0  ;;  %12350 = vmatmul.mubr.msk.bf16.gmra.mrb[104].mxu1 %vm538_vm0, %v17080_v50 }
 0x3e0   :  { %v17244_v20 = vpop.f32.mrb[131].mxu0  ;;  %4183 = vmatprep.mubr.bf16.mxu1 %v21576_v44 }
 0x3e5   :  { %v17247_v55 = vpop.f32.mrb[132].mxu0 }
 0x3e6   :  { %v17249_v26 = vpop.f32.mrb[133].mxu0 }
 0x3e7   :  { %v17251_v53 = vpop.f32.mrb[134].mxu0  ;;  %12351 = vmatmul.mubr.msk.bf16.gmra.mrb[108].mxu1 %vm538_vm0, %v17078_v19 }
 0x3e8   :  { %v17255_v40 = vpop.f32.mrb[135].mxu0  ;;  %4193 = vmatprep.mubr.bf16.mxu1 %v21576_v44 }
 0x3ed   :  { %v17258_v1 = vpop.f32.mrb[136].mxu0 }
 0x3ee   :  { %v17260_v50 = vpop.f32.mrb[137].mxu0 }
 0x3ef   :  { %v17262_v16 = vpop.f32.mrb[138].mxu0  ;;  %12352 = vmatmul.mubr.msk.bf16.gmra.mrb[112].mxu1 %vm538_vm0, %v17091_v33 }
 0x3f0   :  { %v17266_v4 = vpop.f32.mrb[139].mxu0  ;;  %4203 = vmatprep.mubr.bf16.mxu1 %v21576_v44 }
 0x3f5   :  { %v17269_v38 = vpop.f32.mrb[140].mxu0 }
 0x3f6   :  { %v17271_v19 = vpop.f32.mrb[141].mxu0 }
 0x3f7   :  { %v17273_v3 = vpop.f32.mrb[142].mxu0  ;;  %12353 = vmatmul.mubr.msk.bf16.gmra.mrb[116].mxu1 %vm538_vm0, %v17089_v14 }
 0x3f8   :  { %v17277_v43 = vpop.f32.mrb[143].mxu0  ;;  %4213 = vmatprep.mubr.bf16.mxu1 %v21576_v44 }
 0x3fd   :  { %v17280_v12 = vpop.f32.mrb[144].mxu0 }
 0x3fe   :  { %v17282_v33 = vpop.f32.mrb[145].mxu0 }
 0x3ff   :  { %v17284_v22 = vpop.f32.mrb[146].mxu0  ;;  %12354 = vmatmul.mubr.msk.bf16.gmra.mrb[120].mxu1 %vm538_vm0, %v17102_v41 }
 0x400   :  { %v17288_v36 = vpop.f32.mrb[147].mxu0  ;;  %4223 = vmatprep.mubr.bf16.mxu1 %v21576_v44 }
 0x405   :  { %v17291_v24 = vpop.f32.mrb[148].mxu0 }
 0x406   :  { %v17293_v14 = vpop.f32.mrb[149].mxu0 }
 0x407   :  { %v17295_v25 = vpop.f32.mrb[150].mxu0  ;;  %12355 = vmatmul.mubr.msk.bf16.gmra.mrb[124].mxu1 %vm538_vm0, %v17100_v23 }
 0x408   :  { %v17299_v61 = vpop.f32.mrb[151].mxu0  ;;  %4233 = vmatprep.mubr.bf16.mxu1 %v21576_v44 }
 0x40d   :  { %v17302_v28 = vpop.f32.mrb[152].mxu0 }
 0x40e   :  { %v17304_v41 = vpop.f32.mrb[153].mxu0 }
 0x40f   :  { %v17306_v27 = vpop.f32.mrb[154].mxu0  ;;  %12356 = vmatmul.mubr.msk.bf16.gmra.mrb[128].mxu1 %vm538_vm0, %v17113_v58 }
 0x410   :  { %v17310_v29 = vpop.f32.mrb[155].mxu0  ;;  %4243 = vmatprep.mubr.bf16.mxu1 %v21576_v44 }
 0x411   :  { %21702 = vst [vmem:[#allocation3_spill] sm:$0xff] %v17310_v29 }
 0x415   :  { %v17313_v30 = vpop.f32.mrb[156].mxu0 }
 0x416   :  { %21703 = vst [vmem:[#allocation4_spill] sm:$0xff] %v17313_v30  ;;  %v17315_v23 = vpop.f32.mrb[157].mxu0 }
 0x417   :  { %v17317_v42 = vpop.f32.mrb[158].mxu0  ;;  %12357 = vmatmul.mubr.msk.bf16.gmra.mrb[132].mxu1 %vm538_vm0, %v17111_v57 }
 0x418   :  { %21704 = vst [vmem:[#allocation5_spill] sm:$0xff] %v17317_v42  ;;  %v17321_v35 = vpop.f32.mrb[159].mxu0  ;;  %4253 = vmatprep.mubr.bf16.mxu1 %v21576_v44 }
 0x419   :  { %21705 = vst [vmem:[#allocation6_spill] sm:$0xff] %v17321_v35 }
 0x41d   :  { %v17324_v21 = vpop.f32.mrb[160].mxu0 }
 0x41e   :  { %21706 = vst [vmem:[#allocation7_spill] sm:$0xff] %v17324_v21  ;;  %v17326_v58 = vpop.f32.mrb[161].mxu0 }
 0x41f   :  { %v17328_v29 = vpop.f32.mrb[162].mxu0  ;;  %12358 = vmatmul.mubr.msk.bf16.gmra.mrb[136].mxu1 %vm538_vm0, %v17124_v11  ;;  %v15841_v11 = vld [vmem:[%s21565_s8 + $0x14] ss:$8 sps:$4 sm:$0xff]  }
 0x420   :  { %v17332_v30 = vpop.f32.mrb[163].mxu0  ;;  %4263 = vmatprep.mubr.bf16.mxu1 %v21576_v44 }
 0x425   :  { %v17335_v42 = vpop.f32.mrb[164].mxu0 }
 0x426   :  { %v17337_v57 = vpop.f32.mrb[165].mxu0 }
 0x427   :  { %v17339_v35 = vpop.f32.mrb[166].mxu0  ;;  %12359 = vmatmul.mubr.msk.bf16.gmra.mrb[140].mxu1 %vm538_vm0, %v17122_v62  ;;  %v15840_v62 = vld [vmem:[%s21565_s8] ss:$8 sps:$4 sm:$0xff]  }
 0x428   :  { %v17343_v21 = vpop.f32.mrb[167].mxu0  ;;  %4273 = vmatprep.mubr.bf16.mxu1 %v21576_v44 }
 0x42f   :  { %12360 = vmatmul.mubr.msk.bf16.gmra.mrb[144].mxu1 %vm538_vm0, %v17135_v32  ;;  %v3816_v32 = vadd.f32 %v17236_v46, %v17033_v6 }
 0x430   :  { %4283 = vmatprep.mubr.bf16.mxu1 %v21576_v44 }
 0x437   :  { %12361 = vmatmul.mubr.msk.bf16.gmra.mrb[148].mxu1 %vm538_vm0, %v17133_v31  ;;  %v15842_v31 = vld [vmem:[%s21565_s8 + $0x10] ss:$8 sps:$4 sm:$0xff]  }
 0x438   :  { %4293 = vmatprep.mubr.bf16.mxu1 %v21576_v44 }
 0x43f   :  { %12362 = vmatmul.mubr.msk.bf16.gmra.mrb[152].mxu1 %vm538_vm0, %v17146_v59 }
 0x440   :  { %4303 = vmatprep.mubr.bf16.mxu1 %v21576_v44 }
 0x447   :  { %12363 = vmatmul.mubr.msk.bf16.gmra.mrb[156].mxu1 %vm538_vm0, %v17144_v56 }
 0x448   :  { %4313 = vmatprep.mubr.bf16.mxu1 %v21576_v44 }
 0x44f   :  { %12364 = vmatmul.mubr.msk.bf16.gmra.mrb[160].mxu1 %vm538_vm0, %v17157_v15 }
 0x450   :  { %4323 = vmatprep.mubr.bf16.mxu1 %v21576_v44 }
 0x457   :  { %12365 = vmatmul.mubr.msk.bf16.gmra.mrb[164].mxu1 %vm538_vm0, %v17155_v13  ;;  %v3820_v13 = vadd.f32 %v17240_v48, %v17033_v6 }
 0x458   :  { %4333 = vmatprep.mubr.bf16.mxu1 %v21576_v44 }
 0x45f   :  { %12366 = vmatmul.mubr.msk.bf16.gmra.mrb[168].mxu1 %vm538_vm0, %v17168_v17 }
 0x460   :  { %4343 = vmatprep.mubr.bf16.mxu1 %v21576_v44 }
 0x467   :  { %12367 = vmatmul.mubr.msk.bf16.gmra.mrb[172].mxu1 %vm538_vm0, %v17166_v54 }
 0x468   :  { %4353 = vmatprep.mubr.bf16.mxu1 %v21576_v44 }
 0x46f   :  { %12368 = vmatmul.mubr.msk.bf16.gmra.mrb[176].mxu1 %vm538_vm0, %v17179_v52 }
 0x470   :  { %4363 = vmatprep.mubr.bf16.mxu1 %v21576_v44 }
 0x477   :  { %12369 = vmatmul.mubr.msk.bf16.gmra.mrb[180].mxu1 %vm538_vm0, %v17177_v18 }
 0x478   :  { %4373 = vmatprep.mubr.bf16.mxu1 %v21576_v44 }
 0x47f   :  { %12370 = vmatmul.mubr.msk.bf16.gmra.mrb[184].mxu1 %vm538_vm0, %v17190_v2 }
 0x480   :  { %4383 = vmatprep.mubr.bf16.mxu1 %v21576_v44 }
 0x487   :  { %12371 = vmatmul.mubr.msk.bf16.gmra.mrb[188].mxu1 %vm538_vm0, %v17188_v49 }
 0x488   :  { %4393 = vmatprep.mubr.bf16.mxu1 %v21576_v44 }
 0x48f   :  { %12372 = vmatmul.mubr.msk.bf16.gmra.mrb[192].mxu1 %vm538_vm0, %v17202_v39  ;;  %v3826_v39 = vadd.f32 %v17247_v55, %v17033_v6 }
 0x490   :  { %4403 = vmatprep.mubr.bf16.mxu1 %v21576_v44 }
 0x497   :  { %12373 = vmatmul.mubr.msk.bf16.gmra.mrb[196].mxu1 %vm538_vm0, %v17200_v51 }
 0x498   :  { %4413 = vmatprep.mubr.bf16.mxu1 %v21576_v44 }
 0x49f   :  { %12374 = vmatmul.mubr.msk.bf16.gmra.mrb[200].mxu1 %vm538_vm0, %v17227_v10 }
 0x4a0   :  { %4423 = vmatprep.mubr.bf16.mxu1 %v21576_v44 }
 0x4a7   :  { %12375 = vmatmul.mubr.msk.bf16.gmra.mrb[204].mxu1 %vm538_vm0, %v17225_v9 }
 0x4a8   :  { %4433 = vmatprep.mubr.bf16.mxu1 %v21576_v44 }
 0x4af   :  { %12376 = vmatmul.mubr.msk.bf16.gmra.mrb[208].mxu1 %vm538_vm0, %v17234_v7 }
 0x4b0   :  { %4443 = vmatprep.mubr.bf16.mxu1 %v21576_v44 }
 0x4b7   :  { %12377 = vmatmul.mubr.msk.bf16.gmra.mrb[212].mxu1 %vm538_vm0, %v17232_v45 }
 0x4b8   :  { %4842 = vmatprep.mubr.bf16.mxu1 %v21576_v44 }
 0x4bf   :  { %4843 = vmatmul.mubr.bf16.vlgmr.msra.gmra.mrb[216].mxu1 %v21576_v44 }
 0x4c0   :  { %4852 = vmatprep.mubr.bf16.mxu1 %v21576_v44  ;;  %5628 = vmatpush1.bf16.msra.mxu1 %v15840_v62  ;;  %v3836_v62 = vadd.f32 %v17258_v1, %v17033_v6 }
 0x4c1   :  { %5629 = vmatprep.subr.bf16.mxu1 %v15841_v11 }
 0x4c4   :  { %5630 = vmatpush1.bf16.msra.mxu1 %v15842_v31 }
 0x4c5   :  { %5631 = vmatprep.subr.bf16.mxu1 %v17057_v34  ;;  %v3565_v34 = vsub.s32 1, %v17021_v63 }
 0x4c7   :  { %4853 = vmatmul.mubr.bf16.gmra.mrb[220].mxu1 %v21576_v44 }
 0x4c8   :  { %4862 = vmatprep.mubr.bf16.mxu1 %v21576_v44  ;;  %5632 = vmatpush1.bf16.msra.mxu1 %v17063_v37  ;;  %v17432_v37 = vrot.slane %v17028_v5, %v3565_v34 }
 0x4c9   :  { %5633 = vmatprep.subr.bf16.mxu1 %v17209_v60 }
 0x4ca   :  { %v3818_v56 = vadd.f32 %v17238_v47, %v17432_v37  ;;  %v3822_v17 = vadd.f32 %v17244_v20, %v17432_v37  ;;  %v3828_v60 = vadd.f32 %v17249_v26, %v17432_v37  ;;  %v3832_v45 = vadd.f32 %v17255_v40, %v17432_v37 }
 0x4cb   :  { %v3840_v40 = vadd.f32 %v17262_v16, %v17033_v6  ;;  %v3846_v16 = vadd.f32 %v17269_v38, %v17033_v6 }
 0x4cc   :  { %5634 = vmatpush1.bf16.msra.mxu1 %v17214_v0 }
 0x4cd   :  { %6444 = vmatprep.subr.bf16.mxu1 %v17222_v8  ;;  %v3830_v8 = vadd.f32 %v17251_v53, %v17033_v6  ;;  %v3838_v53 = vadd.f32 %v17260_v50, %v17432_v37 }
 0x4cf   :  { %4863 = vmatmul.mubr.bf16.gmra.mrb[224].mxu1 %v21576_v44 }
 0x4d0   :  { %4872 = vmatprep.mubr.bf16.mxu1 %v21576_v44 }
 0x4d7   :  { %4873 = vmatmul.mubr.bf16.gmra.mrb[228].mxu1 %v21576_v44 }
 0x4d8   :  { %4882 = vmatprep.mubr.bf16.mxu1 %v21576_v44 }
 0x4df   :  { %4883 = vmatmul.mubr.bf16.gmra.mrb[232].mxu1 %v21576_v44 }
 0x4e0   :  { %4892 = vmatprep.mubr.bf16.mxu1 %v21576_v44 }
 0x4e7   :  { %4893 = vmatmul.mubr.bf16.gmra.mrb[236].mxu1 %v21576_v44 }
 0x4e8   :  { %4902 = vmatprep.mubr.bf16.mxu1 %v21576_v44 }
 0x4ef   :  { %4903 = vmatmul.mubr.bf16.gmra.mrb[240].mxu1 %v21576_v44 }
 0x4f0   :  { %4912 = vmatprep.mubr.bf16.mxu1 %v21576_v44 }
 0x4f7   :  { %4913 = vmatmul.mubr.bf16.gmra.mrb[244].mxu1 %v21576_v44 }
 0x4f8   :  { %5659 = vmatprep.mubr.bf16.mxu1 %v21576_v44 }
 0x592   :  { %v4844_v59 = vpop.f32.mrb[216].mxu1 }
 0x593   :  { %v17440_v15 = vadd.f32 %v4844_v59, %v3816_v32  ;;  %v4846_v54 = vpop.f32.mrb[217].mxu1 }
 0x594   :  { %v4924_v63 = vadd.f32 %v4846_v54, %v3818_v56  ;;  %v4848_v18 = vpop.f32.mrb[218].mxu1 }
 0x595   :  { %v17444_v5 = vadd.f32 %v4848_v18, %v3820_v13  ;;  %v4850_v52 = vpop.f32.mrb[219].mxu1  ;;  %v3842_v13 = vadd.f32 %v17266_v4, %v17432_v37 }
 0x596   :  { %v12387_v49 = vmul.f32 -1.442695, %v4924_v63  ;;  %v4926_v2 = vadd.f32 %v4850_v52, %v3822_v17 }
 0x598   :  { %14558 = vpow2.f32 %v12387_v49  ;;  %v12389_v51 = vmul.f32 -1.442695, %v4926_v2 }
 0x59a   :  { %14560 = vpow2.f32 %v12389_v51  ;;  %v4854_v0 = vpop.f32.mrb[220].mxu1  ;;  %v3848_v51 = vadd.f32 %v17271_v19, %v17432_v37 }
 0x59b   :  { %v17452_v9 = vadd.f32 %v4854_v0, %v3826_v39  ;;  %v4856_v10 = vpop.f32.mrb[221].mxu1  ;;  %v3850_v39 = vadd.f32 %v17273_v3, %v17033_v6 }
 0x59c   :  { %v4928_v7 = vadd.f32 %v4856_v10, %v3828_v60  ;;  %v4858_v46 = vpop.f32.mrb[222].mxu1 }
 0x59d   :  { %v17456_v47 = vadd.f32 %v4858_v46, %v3830_v8  ;;  %v4860_v48 = vpop.f32.mrb[223].mxu1 }
 0x59e   :  { %v12391_v20 = vmul.f32 -1.442695, %v4928_v7  ;;  %v4930_v55 = vadd.f32 %v4860_v48, %v3832_v45  ;;  %v3852_v45 = vadd.f32 %v17277_v43, %v17432_v37  ;;  %v3856_v43 = vadd.f32 %v17280_v12, %v17033_v6 }
 0x5a0   :  { %14562 = vpow2.f32 %v12391_v20  ;;  %v12393_v26 = vmul.f32 -1.442695, %v4930_v55 }
 0x5a2   :  { %v14559_v11 = vpop.eup %14558  ;;  %14564 = vpow2.f32 %v12393_v26  ;;  %v4864_v31 = vpop.f32.mrb[224].mxu1 }
 0x5a3   :  { %v5052_v34 = vadd.f32 1.0, %v14559_v11  ;;  %v17464_v32 = vadd.f32 %v4864_v31, %v3836_v62  ;;  %v4866_v56 = vpop.f32.mrb[225].mxu1 }
 0x5a4   :  { %v14561_v59 = vpop.eup %14560  ;;  %v4932_v54 = vadd.f32 %v4866_v56, %v3838_v53  ;;  %v4868_v17 = vpop.f32.mrb[226].mxu1  ;;  %v3858_v53 = vadd.f32 %v17282_v33, %v17432_v37 }
 0x5a5   :  { %14566 = vrcp.f32 %v5052_v34  ;;  %v5054_v1 = vadd.f32 1.0, %v14561_v59  ;;  %v17468_v63 = vadd.f32 %v4868_v17, %v3840_v40  ;;  %v4870_v50 = vpop.f32.mrb[227].mxu1  ;;  %v3860_v59 = vadd.f32 %v17284_v22, %v17033_v6 }
 0x5a6   :  { %v12395_v18 = vmul.f32 -1.442695, %v4932_v54  ;;  %v4934_v52 = vadd.f32 %v4870_v50, %v3842_v13  ;;  %v3862_v17 = vadd.f32 %v17288_v36, %v17432_v37 }
 0x5a7   :  { %14568 = vrcp.f32 %v5054_v1 }
 0x5a8   :  { %v12397_v49 = vmul.f32 -1.442695, %v4934_v52  ;;  %14570 = vpow2.f32 %v12395_v18 }
 0x5aa   :  { %v14563_v2 = vpop.eup %14562  ;;  %v4874_v4 = vpop.f32.mrb[228].mxu1  ;;  %14572 = vpow2.f32 %v12397_v49 }
 0x5ab   :  { %v5056_v60 = vadd.f32 1.0, %v14563_v2  ;;  %v17476_v0 = vadd.f32 %v4874_v4, %v3846_v16  ;;  %v4876_v8 = vpop.f32.mrb[229].mxu1 }
 0x5ac   :  { %v14565_v10 = vpop.eup %14564  ;;  %v4936_v7 = vadd.f32 %v4876_v8, %v3848_v51  ;;  %v4878_v38 = vpop.f32.mrb[230].mxu1  ;;  %v3868_v8 = vadd.f32 %v17293_v14, %v17432_v37 }
 0x5ad   :  { %14574 = vrcp.f32 %v5056_v60  ;;  %v5058_v46 = vadd.f32 1.0, %v14565_v10  ;;  %v17480_v48 = vadd.f32 %v4878_v38, %v3850_v39  ;;  %v4880_v19 = vpop.f32.mrb[231].mxu1  ;;  %v3866_v60 = vadd.f32 %v17291_v24, %v17033_v6 }
 0x5ae   :  { %v12399_v20 = vmul.f32 -1.442695, %v4936_v7  ;;  %v4938_v55 = vadd.f32 %v4880_v19, %v3852_v45 }
 0x5af   :  { %v17482_v26 = vpop.eup %14566  ;;  %14576 = vrcp.f32 %v5058_v46  ;;  %v3870_v46 = vadd.f32 %v17295_v25, %v17033_v6 }
 0x5b0   :  { %v12401_v3 = vmul.f32 -1.442695, %v4938_v55  ;;  %v5147_v62 = vmul.f32 2.0, %v17482_v26  ;;  %14578 = vpow2.f32 %v12399_v20  ;;  %v3872_v55 = vadd.f32 %v17299_v61, %v17432_v37 }
 0x5b1   :  { %v17485_v11 = vpop.eup %14568  ;;  %v3876_v61 = vadd.f32 %v17302_v28, %v17033_v6  ;;  %v21707_v28 = vld [vmem:[#allocation3_spill] sm:$0xff] }
 0x5b2   :  { %v4884_v31 = vpop.f32.mrb[232].mxu1  ;;  %v12418_v40 = vadd.f32 -1.0, %v5147_v62  ;;  %v5148_v34 = vmul.f32 2.0, %v17485_v11  ;;  %v14571_v56 = vpop.eup %14570  ;;  %14580 = vpow2.f32 %v12401_v3 }
 0x5b3   :  { %v17494_v13 = vadd.f32 %v4884_v31, %v3856_v43  ;;  %v4886_v54 = vpop.f32.mrb[233].mxu1  ;;  %v5060_v12 = vadd.f32 1.0, %v14571_v56 }
 0x5b4   :  { %v4940_v1 = vadd.f32 %v4886_v54, %v3858_v53  ;;  %5211 = vrot.lane.b32.xlu0 %v12418_v40, %s15900_s5  ;;  %v4888_v33 = vpop.f32.mrb[234].mxu1  ;;  %v14573_v50 = vpop.eup %14572  ;;  %v12419_v49 = vadd.f32 -1.0, %v5148_v34 }
 0x5b5   :  { %v17499_v18 = vadd.f32 %v4888_v33, %v3860_v59  ;;  %v4890_v52 = vpop.f32.mrb[235].mxu1  ;;  %14582 = vrcp.f32 %v5060_v12  ;;  %v5062_v22 = vadd.f32 1.0, %v14573_v50  ;;  %v3878_v12 = vadd.f32 %v17304_v41, %v17432_v37 }
 0x5b6   :  { %v12403_v16 = vmul.f32 -1.442695, %v4940_v1  ;;  %v4942_v2 = vadd.f32 %v4890_v52, %v3862_v17  ;;  %v3880_v33 = vadd.f32 %v17306_v27, %v17033_v6 }
 0x5b7   :  { %v17501_v51 = vpop.eup %14574  ;;  %14584 = vrcp.f32 %v5062_v22 }
 0x5b8   :  { %v12405_v4 = vmul.f32 -1.442695, %v4942_v2  ;;  %5213 = vrot.lane.b32.xlu0 %v12419_v49, %s15900_s5  ;;  %v5149_v36 = vmul.f32 2.0, %v17501_v51  ;;  %14586 = vpow2.f32 %v12403_v16  ;;  %v3882_v2 = vadd.f32 %v21707_v28, %v17432_v37 }
 0x5b9   :  { %v17505_v39 = vpop.eup %14576 }
 0x5ba   :  { %v4894_v10 = vpop.f32.mrb[236].mxu1  ;;  %v12420_v45 = vadd.f32 -1.0, %v5149_v36  ;;  %v5150_v7 = vmul.f32 2.0, %v17505_v39  ;;  %v14579_v38 = vpop.eup %14578  ;;  %14588 = vpow2.f32 %v12405_v4 }
 0x5bb   :  { %v17514_v19 = vadd.f32 %v4894_v10, %v3866_v60  ;;  %v4896_v20 = vpop.f32.mrb[237].mxu1  ;;  %v5064_v3 = vadd.f32 1.0, %v14579_v38 }
 0x5bc   :  { %v4944_v24 = vadd.f32 %v4896_v20, %v3868_v8  ;;  %5215 = vrot.lane.b32.xlu1 %v12420_v45, %s15900_s5  ;;  %v4898_v14 = vpop.f32.mrb[238].mxu1  ;;  %v14581_v62 = vpop.eup %14580  ;;  %v12421_v31 = vadd.f32 -1.0, %v5150_v7  ;;  %v21708_v20 = vld [vmem:[#allocation4_spill] sm:$0xff] }
 0x5bd   :  { %v17519_v43 = vadd.f32 %v4898_v14, %v3870_v46  ;;  %v4900_v53 = vpop.f32.mrb[239].mxu1  ;;  %14590 = vrcp.f32 %v5064_v3  ;;  %v5066_v40 = vadd.f32 1.0, %v14581_v62  ;;  %v3888_v62 = vadd.f32 %v17315_v23, %v17432_v37 }
 0x5be   :  { %v12407_v25 = vmul.f32 -1.442695, %v4944_v24  ;;  %v4946_v34 = vadd.f32 %v4900_v53, %v3872_v55  ;;  %v3886_v55 = vadd.f32 %v21708_v20, %v17033_v6  ;;  %v21709_v53 = vld [vmem:[#allocation5_spill] sm:$0xff] }
 0x5bf   :  { %v17521_v56 = vpop.eup %14582  ;;  %14592 = vrcp.f32 %v5066_v40 }
 0x5c0   :  { %v12409_v59 = vmul.f32 -1.442695, %v4946_v34  ;;  %5217 = vrot.lane.b32.xlu1 %v12421_v31, %s15900_s5  ;;  %v5151_v54 = vmul.f32 2.0, %v17521_v56  ;;  %14594 = vpow2.f32 %v12407_v25  ;;  %v3890_v31 = vadd.f32 %v21709_v53, %v17033_v6 }
 0x5c1   :  { %v17527_v17 = vpop.eup %14584 }
 0x5c2   :  { %v4904_v1 = vpop.f32.mrb[240].mxu1  ;;  %v12422_v49 = vadd.f32 -1.0, %v5151_v54  ;;  %v5152_v22 = vmul.f32 2.0, %v17527_v17  ;;  %v14587_v16 = vpop.eup %14586  ;;  %14596 = vpow2.f32 %v12409_v59 }
 0x5c3   :  { %v17533_v50 = vadd.f32 %v4904_v1, %v3876_v61  ;;  %v4906_v52 = vpop.f32.mrb[241].mxu1  ;;  %v5068_v60 = vadd.f32 1.0, %v14587_v16 }
 0x5c4   :  { %v4948_v4 = vadd.f32 %v4906_v52, %v3878_v12  ;;  %v4908_v36 = vpop.f32.mrb[242].mxu1  ;;  %5219 = vrot.lane.b32.xlu0 %v12422_v49, %s15900_s5  ;;  %v12423_v27 = vadd.f32 -1.0, %v5152_v22  ;;  %v14589_v10 = vpop.eup %14588  ;;  %v21710_v12 = vld [vmem:[#allocation6_spill] sm:$0xff] }
 0x5c5   :  { %v17539_v41 = vadd.f32 %v4908_v36, %v3880_v33  ;;  %v4910_v8 = vpop.f32.mrb[243].mxu1  ;;  %14598 = vrcp.f32 %v5068_v60  ;;  %v5070_v7 = vadd.f32 1.0, %v14589_v10  ;;  %v3892_v1 = vadd.f32 %v21710_v12, %v17432_v37 }
 0x5c6   :  { %v4950_v45 = vadd.f32 %v4910_v8, %v3882_v2  ;;  %v12411_v38 = vmul.f32 -1.442695, %v4948_v4  ;;  %5221 = vrot.lane.b32.xlu1 %v12423_v27, %s15900_s5 }
 0x5c7   :  { %v17542_v46 = vpop.eup %14590  ;;  %14600 = vrcp.f32 %v5070_v7 }
 0x5c8   :  { %v12413_v3 = vmul.f32 -1.442695, %v4950_v45  ;;  %v5153_v24 = vmul.f32 2.0, %v17542_v46  ;;  %14602 = vpow2.f32 %v12411_v38 }
 0x5c9   :  { %v17547_v14 = vpop.eup %14592 }
 0x5ca   :  { %v4914_v40 = vpop.f32.mrb[244].mxu1  ;;  %v12424_v59 = vadd.f32 -1.0, %v5153_v24  ;;  %v5154_v61 = vmul.f32 2.0, %v17547_v14  ;;  %v14595_v54 = vpop.eup %14594  ;;  %14604 = vpow2.f32 %v12413_v3 }
 0x5cb   :  { %v17553_v25 = vadd.f32 %v4914_v40, %v3886_v55  ;;  %v4916_v34 = vpop.f32.mrb[245].mxu1  ;;  %v5072_v49 = vadd.f32 1.0, %v14595_v54 }
 0x5cc   :  { %v4952_v33 = vadd.f32 %v4916_v34, %v3888_v62  ;;  %v4918_v52 = vpop.f32.mrb[246].mxu1  ;;  %5223 = vrot.lane.b32.xlu0 %v12424_v59, %s15900_s5  ;;  %v14597_v16 = vpop.eup %14596  ;;  %v12425_v36 = vadd.f32 -1.0, %v5154_v61 }
 0x5cd   :  { %v17559_v23 = vadd.f32 %v4918_v52, %v3890_v31  ;;  %v4920_v22 = vpop.f32.mrb[247].mxu1  ;;  %14606 = vrcp.f32 %v5072_v49  ;;  %v5074_v2 = vadd.f32 1.0, %v14597_v16 }
 0x5ce   :  { %v4954_v28 = vadd.f32 %v4920_v22, %v3892_v1  ;;  %v12415_v4 = vmul.f32 -1.442695, %v4952_v33  ;;  %5225 = vrot.lane.b32.xlu1 %v12425_v36, %s15900_s5 }
 0x5cf   :  { %v17561_v60 = vpop.eup %14598  ;;  %14608 = vrcp.f32 %v5074_v2 }
 0x5d0   :  { %v12417_v8 = vmul.f32 -1.442695, %v4954_v28  ;;  %v5155_v27 = vmul.f32 2.0, %v17561_v60  ;;  %14610 = vpow2.f32 %v12415_v4 }
 0x5d1   :  { %v17565_v10 = vpop.eup %14600 }
 0x5d2   :  { %v12426_v45 = vadd.f32 -1.0, %v5155_v27  ;;  %v5156_v7 = vmul.f32 2.0, %v17565_v10  ;;  %v14603_v38 = vpop.eup %14602  ;;  %14612 = vpow2.f32 %v12417_v8 }
 0x5d3   :  { %v5076_v20 = vadd.f32 1.0, %v14603_v38  ;;  %v12388_v38 = vmul.f32 -1.442695, %v17444_v5 }
 0x5d4   :  { %5227 = vrot.lane.b32.xlu0 %v12426_v45, %s15900_s5  ;;  %v12427_v55 = vadd.f32 -1.0, %v5156_v7  ;;  %v14605_v3 = vpop.eup %14604  ;;  %v12386_v7 = vmul.f32 -1.442695, %v17440_v15 }
 0x5d5   :  { %14614 = vrcp.f32 %v5076_v20  ;;  %v5078_v24 = vadd.f32 1.0, %v14605_v3  ;;  %v12390_v20 = vmul.f32 -1.442695, %v17452_v9  ;;  %v12398_v9 = vmul.f32 -1.442695, %v17476_v0 }
 0x5d6   :  { %5229 = vrot.lane.b32.xlu1 %v12427_v55, %s15900_s5  ;;  %v12392_v55 = vmul.f32 -1.442695, %v17456_v47 }
 0x5d7   :  { %v17570_v62 = vpop.eup %14606  ;;  %14616 = vrcp.f32 %v5078_v24 }
 0x5d8   :  { %v5157_v53 = vmul.f32 2.0, %v17570_v62 }
 0x5d9   :  { %v17573_v31 = vpop.eup %14608 }
 0x5da   :  { %v12428_v40 = vadd.f32 -1.0, %v5157_v53  ;;  %v5158_v34 = vmul.f32 2.0, %v17573_v31  ;;  %v14611_v59 = vpop.eup %14610  ;;  %v12394_v53 = vmul.f32 -1.442695, %v17464_v32 }
 0x5db   :  { %v5080_v61 = vadd.f32 1.0, %v14611_v59 }
 0x5dc   :  { %5231 = vrot.lane.b32.xlu0 %v12428_v40, %s15900_s5  ;;  %v12429_v54 = vadd.f32 -1.0, %v5158_v34  ;;  %v14613_v12 = vpop.eup %14612  ;;  %v12396_v34 = vmul.f32 -1.442695, %v17468_v63 }
 0x5dd   :  { %14618 = vrcp.f32 %v5080_v61  ;;  %v5082_v1 = vadd.f32 1.0, %v14613_v12 }
 0x5de   :  { %5233 = vrot.lane.b32.xlu1 %v12429_v54, %s15900_s5  ;;  %v12400_v54 = vmul.f32 -1.442695, %v17480_v48 }
 0x5df   :  { %v17578_v33 = vpop.eup %14614  ;;  %14620 = vrcp.f32 %v5082_v1 }
 0x5e0   :  { %v5159_v52 = vmul.f32 2.0, %v17578_v33  ;;  %14622 = vpow2.f32 %v12386_v7 }
 0x5e1   :  { %v17581_v49 = vpop.eup %14616  ;;  %14624 = vpow2.f32 %v12388_v38  ;;  %v12406_v38 = vmul.f32 -1.442695, %v17514_v19 }
 0x5e2   :  { %v12430_v22 = vadd.f32 -1.0, %v5159_v52  ;;  %v5160_v16 = vmul.f32 2.0, %v17581_v49  ;;  %14626 = vpow2.f32 %v12390_v20 }
 0x5e3   :  { %14628 = vpow2.f32 %v12392_v55 }
 0x5e4   :  { %5235 = vrot.lane.b32.xlu0 %v12430_v22, %s15900_s5  ;;  %v12431_v28 = vadd.f32 -1.0, %v5160_v16  ;;  %v12402_v22 = vmul.f32 -1.442695, %v17494_v13 }
 0x5e6   :  { %5237 = vrot.lane.b32.xlu1 %v12431_v28, %s15900_s5  ;;  %v12404_v28 = vmul.f32 -1.442695, %v17499_v18 }
 0x5e7   :  { %v17586_v2 = vpop.eup %14618 }
 0x5e8   :  { %v5161_v4 = vmul.f32 2.0, %v17586_v2 }
 0x5e9   :  { %v17589_v36 = vpop.eup %14620 }
 0x5ea   :  { %v12432_v8 = vadd.f32 -1.0, %v5161_v4  ;;  %v5162_v27 = vmul.f32 2.0, %v17589_v36  ;;  %v14623_v3 = vpop.eup %14622 }
 0x5eb   :  { %v5051_v24 = vadd.f32 1.0, %v14623_v3  ;;  %v14625_v40 = vpop.eup %14624  ;;  %v12408_v3 = vmul.f32 -1.442695, %v17519_v43 }
 0x5ec   :  { %5239 = vrot.lane.b32.xlu0 %v12432_v8, %s15900_s5  ;;  %v12433_v45 = vadd.f32 -1.0, %v5162_v27  ;;  %v14627_v59 = vpop.eup %14626  ;;  %v5053_v15 = vadd.f32 1.0, %v14625_v40 }
 0x5ed   :  { %14630 = vrcp.f32 %v5051_v24  ;;  %v5055_v5 = vadd.f32 1.0, %v14627_v59  ;;  %v14629_v61 = vpop.eup %14628 }
 0x5ee   :  { %5241 = vrot.lane.b32.xlu1 %v12433_v45, %s15900_s5  ;;  %14632 = vpow2.f32 %v12394_v53  ;;  %v5057_v47 = vadd.f32 1.0, %v14629_v61 }
 0x5ef   :  { %14634 = vpow2.f32 %v12396_v34 }
 0x5f0   :  { %14636 = vrcp.f32 %v5053_v15 }
 0x5f1   :  { %14638 = vrcp.f32 %v5055_v5 }
 0x5f2   :  { %14640 = vpow2.f32 %v12398_v9 }
 0x5f3   :  { %14642 = vrcp.f32 %v5057_v47  ;;  %v12410_v47 = vmul.f32 -1.442695, %v17533_v50 }
 0x5f4   :  { %14644 = vpow2.f32 %v12400_v54 }
 0x5f5   :  { %14646 = vpow2.f32 %v12402_v22 }
 0x5f7   :  { %v17602_v12 = vpop.eup %14630 }
 0x5f8   :  { %v14633_v32 = vpop.eup %14632 }
 0x5f9   :  { %v14635_v52 = vpop.eup %14634  ;;  %v5059_v16 = vadd.f32 1.0, %v14633_v32 }
 0x5fa   :  { %v17607_v0 = vpop.eup %14636  ;;  %v5061_v48 = vadd.f32 1.0, %v14635_v52 }
 0x5fb   :  { %v17611_v27 = vpop.eup %14638  ;;  %14648 = vrcp.f32 %v5059_v16 }
 0x5fc   :  { %v14641_v45 = vpop.eup %14640  ;;  %14650 = vpow2.f32 %v12404_v28 }
 0x5fd   :  { %14652 = vrcp.f32 %v5061_v48  ;;  %v17616_v20 = vpop.eup %14642  ;;  %v5063_v18 = vadd.f32 1.0, %v14641_v45  ;;  %v12416_v45 = vmul.f32 -1.442695, %v17559_v23 }
 0x5fe   :  { %v14645_v55 = vpop.eup %14644  ;;  %14654 = vpow2.f32 %v12406_v38 }
 0x5ff   :  { %14656 = vrcp.f32 %v5063_v18  ;;  %v5065_v40 = vadd.f32 1.0, %v14645_v55  ;;  %v14647_v34 = vpop.eup %14646 }
 0x600   :  { %14658 = vpow2.f32 %v12408_v3  ;;  %v5067_v43 = vadd.f32 1.0, %v14647_v34 }
 0x601   :  { %14660 = vrcp.f32 %v5065_v40 }
 0x602   :  { %14662 = vrcp.f32 %v5067_v43 }
 0x603   :  { %14664 = vpow2.f32 %v12410_v47 }
 0x605   :  { %v17622_v59 = vpop.eup %14648 }
 0x606   :  { %v14651_v15 = vpop.eup %14650 }
 0x607   :  { %v17625_v61 = vpop.eup %14652  ;;  %v5069_v32 = vadd.f32 1.0, %v14651_v15 }
 0x609   :  { %14666 = vrcp.f32 %v5069_v32 }
 0x626   :  { %v5212_v1 = vpop.permute.xlu0 %5211 }
 0x627   :  { %v5259_v63 = vmul.f32 %v17602_v12, %v5212_v1  ;;  %v12412_v1 = vmul.f32 -1.442695, %v17539_v41 }
 0x629   :  { %5291 = vrot.lane.b32.xlu0 %v5259_v63, %s15900_s5  ;;  %v14655_v63 = vpop.eup %14654  ;;  %14668 = vpow2.f32 %v12412_v1 }
 0x62a   :  { %v5214_v4 = vpop.permute.xlu0 %5213  ;;  %v17632_v52 = vpop.eup %14656  ;;  %v5071_v28 = vadd.f32 1.0, %v14655_v63 }
 0x62b   :  { %v5260_v8 = vmul.f32 %v17607_v0, %v5214_v4  ;;  %v14659_v16 = vpop.eup %14658  ;;  %v12414_v4 = vmul.f32 -1.442695, %v17553_v25 }
 0x62c   :  { %v17637_v48 = vpop.eup %14660  ;;  %v5073_v41 = vadd.f32 1.0, %v14659_v16  ;;  %14670 = vrcp.f32 %v5071_v28 }
 0x62d   :  { %5293 = vrot.lane.b32.xlu1 %v5260_v8, %s15900_s5  ;;  %14672 = vpow2.f32 %v12414_v4 }
 0x62e   :  { %v5216_v13 = vpop.permute.xlu1 %5215  ;;  %14674 = vrcp.f32 %v5073_v41 }
 0x62f   :  { %v5261_v7 = vmul.f32 %v17611_v27, %v5216_v13  ;;  %14676 = vpow2.f32 %v12416_v45 }
 0x631   :  { %5295 = vrot.lane.b32.xlu0 %v5261_v7, %s15900_s5  ;;  %v17642_v7 = vpop.eup %14662 }
 0x632   :  { %v5218_v24 = vpop.permute.xlu1 %5217  ;;  %v14665_v38 = vpop.eup %14664 }
 0x633   :  { %v5262_v53 = vmul.f32 %v17616_v20, %v5218_v24  ;;  %v17644_v18 = vpop.eup %14666 }
 0x634   :  { %v14669_v3 = vpop.eup %14668 }
 0x635   :  { %5297 = vrot.lane.b32.xlu1 %v5262_v53, %s15900_s5  ;;  %v5075_v53 = vadd.f32 1.0, %v14665_v38  ;;  %v5077_v40 = vadd.f32 1.0, %v14669_v3 }
 0x636   :  { %v5220_v19 = vpop.permute.xlu0 %5219  ;;  %v17650_v34 = vpop.eup %14670 }
 0x637   :  { %v5263_v5 = vmul.f32 %v17622_v59, %v5220_v19  ;;  %14678 = vrcp.f32 %v5075_v53  ;;  %v14673_v19 = vpop.eup %14672  ;;  %v5180_v53 = vmul.f32 0.0, %v17607_v0  ;;  %v5183_v0 = vmul.f32 0.0, %v17622_v59 }
 0x638   :  { %v5222_v9 = vpop.permute.xlu1 %5221  ;;  %14680 = vrcp.f32 %v5077_v40  ;;  %v5185_v59 = vmul.f32 0.0, %v17632_v52 }
 0x639   :  { %v5264_v54 = vmul.f32 %v17625_v61, %v5222_v9  ;;  %5299 = vrot.lane.b32.xlu0 %v5263_v5, %s15900_s5  ;;  %v17652_v5 = vpop.eup %14674 }
 0x63a   :  { %v14677_v9 = vpop.eup %14676 }
 0x63b   :  { %5301 = vrot.lane.b32.xlu1 %v5264_v54, %s15900_s5  ;;  %v5079_v54 = vadd.f32 1.0, %v14673_v19  ;;  %v5081_v1 = vadd.f32 1.0, %v14677_v9  ;;  %v5181_v19 = vmul.f32 0.0, %v17611_v27 }
 0x63d   :  { %14682 = vrcp.f32 %v5079_v54 }
 0x63e   :  { %v5224_v22 = vpop.permute.xlu0 %5223  ;;  %14684 = vrcp.f32 %v5081_v1 }
 0x63f   :  { %v5265_v50 = vmul.f32 %v17632_v52, %v5224_v22  ;;  %v5187_v52 = vmul.f32 0.0, %v17642_v7 }
 0x640   :  { %v5226_v8 = vpop.permute.xlu1 %5225 }
 0x641   :  { %5303 = vrot.lane.b32.xlu0 %v5265_v50, %s15900_s5  ;;  %v5266_v13 = vmul.f32 %v17637_v48, %v5226_v8  ;;  %v17658_v63 = vpop.eup %14678 }
 0x642   :  { %v17661_v50 = vpop.eup %14680 }
 0x643   :  { %5305 = vrot.lane.b32.xlu1 %v5266_v13, %s15900_s5 }
 0x646   :  { %v5228_v25 = vpop.permute.xlu0 %5227 }
 0x647   :  { %v5267_v55 = vmul.f32 %v17642_v7, %v5228_v25  ;;  %v17666_v41 = vpop.eup %14682 }
 0x648   :  { %v5230_v24 = vpop.permute.xlu1 %5229  ;;  %v17669_v13 = vpop.eup %14684 }
 0x649   :  { %v5268_v23 = vmul.f32 %v17644_v18, %v5230_v24  ;;  %5307 = vrot.lane.b32.xlu0 %v5267_v55, %s15900_s5  ;;  %v5179_v55 = vmul.f32 0.0, %v17602_v12  ;;  %v5182_v12 = vmul.f32 0.0, %v17616_v20 }
 0x64b   :  { %5309 = vrot.lane.b32.xlu1 %v5268_v23, %s15900_s5 }
 0x64e   :  { %v5232_v15 = vpop.permute.xlu0 %5231 }
 0x64f   :  { %v5269_v43 = vmul.f32 %v17650_v34, %v5232_v15 }
 0x650   :  { %v5234_v47 = vpop.permute.xlu1 %5233 }
 0x651   :  { %v5270_v32 = vmul.f32 %v17652_v5, %v5234_v47  ;;  %5311 = vrot.lane.b32.xlu0 %v5269_v43, %s15900_s5 }
 0x653   :  { %5313 = vrot.lane.b32.xlu1 %v5270_v32, %s15900_s5 }
 0x656   :  { %v5236_v22 = vpop.permute.xlu0 %5235 }
 0x657   :  { %v5271_v16 = vmul.f32 %v17658_v63, %v5236_v22  ;;  %v5184_v22 = vmul.f32 0.0, %v17625_v61  ;;  %v5186_v61 = vmul.f32 0.0, %v17637_v48 }
 0x658   :  { %v5238_v28 = vpop.permute.xlu1 %5237 }
 0x659   :  { %v5272_v4 = vmul.f32 %v17661_v50, %v5238_v28  ;;  %5315 = vrot.lane.b32.xlu0 %v5271_v16, %s15900_s5 }
 0x65b   :  { %5317 = vrot.lane.b32.xlu1 %v5272_v4, %s15900_s5 }
 0x65e   :  { %v5240_v8 = vpop.permute.xlu0 %5239 }
 0x65f   :  { %v5273_v45 = vmul.f32 %v17666_v41, %v5240_v8 }
 0x660   :  { %v5242_v38 = vpop.permute.xlu1 %5241 }
 0x661   :  { %v5274_v25 = vmul.f32 %v17669_v13, %v5242_v38  ;;  %5319 = vrot.lane.b32.xlu0 %v5273_v45, %s15900_s5 }
 0x663   :  { %5321 = vrot.lane.b32.xlu1 %v5274_v25, %s15900_s5 }
 0x69b   :  { %v5292_v3 = vpop.permute.xlu0 %5291 }
 0x69c   :  { %v17675_v24 = vadd.f32 %v5292_v3, %v5179_v55 }
 0x69e   :  { %14686 = vtanh.f32 %v17675_v24 }
 0x69f   :  { %v5294_v23 = vpop.permute.xlu1 %5293 }
 0x6a0   :  { %v17679_v40 = vadd.f32 %v5294_v23, %v5180_v53 }
 0x6a2   :  { %14688 = vtanh.f32 %v17679_v40 }
 0x6a3   :  { %v5296_v15 = vpop.permute.xlu0 %5295 }
 0x6a4   :  { %v17683_v43 = vadd.f32 %v5296_v15, %v5181_v19  ;;  %v5188_v19 = vmul.f32 0.0, %v17644_v18  ;;  %v5190_v18 = vmul.f32 0.0, %v17652_v5  ;;  %v5192_v5 = vmul.f32 0.0, %v17661_v50 }
 0x6a5   :  { %v5194_v50 = vmul.f32 0.0, %v17669_v13 }
 0x6a6   :  { %14690 = vtanh.f32 %v17683_v43 }
 0x6a7   :  { %v5298_v9 = vpop.permute.xlu1 %5297 }
 0x6a8   :  { %v14687_v47 = vpop.eup %14686  ;;  %v17687_v54 = vadd.f32 %v5298_v9, %v5182_v12  ;;  %v5189_v9 = vmul.f32 0.0, %v17650_v34  ;;  %v5191_v34 = vmul.f32 0.0, %v17658_v63  ;;  %v5193_v63 = vmul.f32 0.0, %v17666_v41 }
 0x6a9   :  { %5387 = vrot.lane.b32.xlu0 %v14687_v47, %s15900_s5 }
 0x6aa   :  { %14692 = vtanh.f32 %v17687_v54 }
 0x6ab   :  { %v5300_v1 = vpop.permute.xlu0 %5299 }
 0x6ac   :  { %v14689_v32 = vpop.eup %14688  ;;  %v17692_v27 = vadd.f32 %v5300_v1, %v5183_v0 }
 0x6ad   :  { %5389 = vrot.lane.b32.xlu1 %v14689_v32, %s15900_s5  ;;  %v5302_v16 = vpop.permute.xlu1 %5301 }
 0x6ae   :  { %14694 = vtanh.f32 %v17692_v27  ;;  %v17697_v20 = vadd.f32 %v5302_v16, %v5184_v22 }
 0x6b0   :  { %v14691_v28 = vpop.eup %14690  ;;  %14696 = vtanh.f32 %v17697_v20 }
 0x6b1   :  { %5391 = vrot.lane.b32.xlu0 %v14691_v28, %s15900_s5 }
 0x6b3   :  { %v5304_v8 = vpop.permute.xlu0 %5303 }
 0x6b4   :  { %v14693_v4 = vpop.eup %14692  ;;  %v17702_v45 = vadd.f32 %v5304_v8, %v5185_v59 }
 0x6b5   :  { %5393 = vrot.lane.b32.xlu1 %v14693_v4, %s15900_s5  ;;  %v5306_v38 = vpop.permute.xlu1 %5305 }
 0x6b6   :  { %14698 = vtanh.f32 %v17702_v45  ;;  %v17707_v55 = vadd.f32 %v5306_v38, %v5186_v61 }
 0x6b8   :  { %v14695_v25 = vpop.eup %14694  ;;  %14700 = vtanh.f32 %v17707_v55 }
 0x6b9   :  { %5395 = vrot.lane.b32.xlu0 %v14695_v25, %s15900_s5 }
 0x6ba   :  { %v14697_v3 = vpop.eup %14696 }
 0x6bb   :  { %5397 = vrot.lane.b32.xlu1 %v14697_v3, %s15900_s5  ;;  %v5308_v53 = vpop.permute.xlu0 %5307 }
 0x6bc   :  { %v17713_v23 = vadd.f32 %v5308_v53, %v5187_v52 }
 0x6bd   :  { %v5310_v15 = vpop.permute.xlu1 %5309 }
 0x6be   :  { %14702 = vtanh.f32 %v17713_v23  ;;  %v17717_v48 = vadd.f32 %v5310_v15, %v5188_v19 }
 0x6c0   :  { %v14699_v12 = vpop.eup %14698  ;;  %14704 = vtanh.f32 %v17717_v48 }
 0x6c1   :  { %5399 = vrot.lane.b32.xlu0 %v14699_v12, %s15900_s5 }
 0x6c2   :  { %v14701_v7 = vpop.eup %14700 }
 0x6c3   :  { %v5312_v47 = vpop.permute.xlu0 %5311  ;;  %5401 = vrot.lane.b32.xlu1 %v14701_v7, %s15900_s5 }
 0x6c4   :  { %v17722_v0 = vadd.f32 %v5312_v47, %v5189_v9 }
 0x6c5   :  { %v5314_v32 = vpop.permute.xlu1 %5313 }
 0x6c6   :  { %14706 = vtanh.f32 %v17722_v0  ;;  %v17727_v1 = vadd.f32 %v5314_v32, %v5190_v18 }
 0x6c8   :  { %v14703_v22 = vpop.eup %14702  ;;  %14708 = vtanh.f32 %v17727_v1 }
 0x6c9   :  { %5403 = vrot.lane.b32.xlu0 %v14703_v22, %s15900_s5  ;;  %v15843_v22 = vld [vmem:[%s21565_s8] ss:$8 sps:$4 sm:$0xff]  }
 0x6ca   :  { %v14705_v16 = vpop.eup %14704 }
 0x6cb   :  { %5405 = vrot.lane.b32.xlu1 %v14705_v16, %s15900_s5  ;;  %v5316_v28 = vpop.permute.xlu0 %5315 }
 0x6cc   :  { %v17733_v59 = vadd.f32 %v5316_v28, %v5191_v34  ;;  %v15845_v28 = vld [vmem:[%s21565_s8 + $0x10] ss:$8 sps:$4 sm:$0xff]  }
 0x6cd   :  { %v5318_v4 = vpop.permute.xlu1 %5317 }
 0x6ce   :  { %14710 = vtanh.f32 %v17733_v59  ;;  %v17737_v8 = vadd.f32 %v5318_v4, %v5192_v5  ;;  %v15846_v4 = vld [vmem:[%s21565_s8 + $0x24] ss:$8 sps:$4 sm:$0xff]  }
 0x6d0   :  { %v14707_v61 = vpop.eup %14706  ;;  %14712 = vtanh.f32 %v17737_v8 }
 0x6d1   :  { %5407 = vrot.lane.b32.xlu0 %v14707_v61, %s15900_s5 }
 0x6d2   :  { %v14709_v38 = vpop.eup %14708 }
 0x6d3   :  { %5409 = vrot.lane.b32.xlu1 %v14709_v38, %s15900_s5  ;;  %v5320_v25 = vpop.permute.xlu0 %5319  ;;  %v15848_v38 = vld [vmem:[%s21565_s8 + $0x34] ss:$8 sps:$4 sm:$0xff]  }
 0x6d4   :  { %v17743_v3 = vadd.f32 %v5320_v25, %v5193_v63 }
 0x6d5   :  { %v5322_v52 = vpop.permute.xlu1 %5321 }
 0x6d6   :  { %14714 = vtanh.f32 %v17743_v3  ;;  %v17747_v53 = vadd.f32 %v5322_v52, %v5194_v50  ;;  %v15849_v50 = vld [vmem:[%s21565_s8 + $0x30] ss:$8 sps:$4 sm:$0xff]  }
 0x6d8   :  { %v14711_v19 = vpop.eup %14710  ;;  %14716 = vtanh.f32 %v17747_v53 }
 0x6d9   :  { %5411 = vrot.lane.b32.xlu0 %v14711_v19, %s15900_s5  ;;  %v15850_v19 = vld [vmem:[%s21565_s8 + $0x4] ss:$8 sps:$4 sm:$0xff]  }
 0x6da   :  { %v14713_v15 = vpop.eup %14712 }
 0x6db   :  { %5413 = vrot.lane.b32.xlu1 %v14713_v15, %s15900_s5 }
 0x6e0   :  { %v14715_v41 = vpop.eup %14714 }
 0x6e1   :  { %5415 = vrot.lane.b32.xlu0 %v14715_v41, %s15900_s5 }
 0x6e2   :  { %v14717_v12 = vpop.eup %14716 }
 0x6e3   :  { %5417 = vrot.lane.b32.xlu1 %v14717_v12, %s15900_s5 }
 0x71b   :  { %v5388_v13 = vpop.permute.xlu0 %5387 }
 0x71c   :  { %v17755_v7 = vmul.f32 %v17482_v26, %v5388_v13  ;;  %v15844_v26 = vld [vmem:[%s21565_s8 + $0x14] ss:$8 sps:$4 sm:$0xff]  }
 0x71e   :  { %21711 = vst [vmem:[#allocation3_spill] sm:$0xff] %v17755_v7 }
 0x71f   :  { %v5390_v9 = vpop.permute.xlu1 %5389 }
 0x720   :  { %v17758_v47 = vmul.f32 %v17485_v11, %v5390_v9 }
 0x722   :  { %21712 = vst [vmem:[#allocation4_spill] sm:$0xff] %v17758_v47  ;;  %v5595_v18 = vpack.c.bf16 %v17758_v47, %v17755_v7 }
 0x723   :  { %v5392_v32 = vpop.permute.xlu0 %5391 }
 0x724   :  { %12434 = vmatmul.mubr.msk.bf16.vlgmr.msra.gmra.mrb[248].mxu1 %vm4806_vm1, %v5595_v18  ;;  %v17771_v16 = vmul.f32 %v17501_v51, %v5392_v32 }
 0x725   :  { %5669 = vmatprep.mubr.bf16.mxu1 %v21576_v44  ;;  %6445 = vmatpush1.bf16.msra.mxu1 %v15843_v22 }
 0x726   :  { %6446 = vmatprep.subr.bf16.mxu1 %v15844_v26  ;;  %21713 = vst [vmem:[#allocation5_spill] sm:$0xff] %v17771_v16 }
 0x727   :  { %v5394_v11 = vpop.permute.xlu1 %5393 }
 0x728   :  { %v17774_v34 = vmul.f32 %v17505_v39, %v5394_v11  ;;  %v15847_v39 = vld [vmem:[%s21565_s8 + $0x20] ss:$8 sps:$4 sm:$0xff]  }
 0x729   :  { %6447 = vmatpush1.bf16.msra.mxu1 %v15845_v28 }
 0x72a   :  { %21714 = vst [vmem:[#allocation6_spill] sm:$0xff] %v17774_v34  ;;  %v5596_v5 = vpack.c.bf16 %v17774_v34, %v17771_v16  ;;  %6448 = vmatprep.subr.bf16.mxu1 %v15846_v4 }
 0x72b   :  { %v5396_v51 = vpop.permute.xlu0 %5395 }
 0x72c   :  { %12435 = vmatmul.mubr.msk.bf16.gmra.mrb[252].mxu1 %vm4806_vm1, %v5596_v5  ;;  %v17796_v25 = vmul.f32 %v17521_v56, %v5396_v51 }
 0x72d   :  { %5679 = vmatprep.mubr.bf16.mxu1 %v21576_v44  ;;  %6449 = vmatpush1.bf16.msra.mxu1 %v15847_v39  ;;  %v5398_v61 = vpop.permute.xlu1 %5397 }
 0x72e   :  { %6450 = vmatprep.subr.bf16.mxu1 %v15848_v38  ;;  %v17793_v63 = vmul.f32 %v17527_v17, %v5398_v61  ;;  %21716 = vst [vmem:[#allocation9_spill] sm:$0xff] %v17796_v25 }
 0x730   :  { %21715 = vst [vmem:[#allocation8_spill] sm:$0xff] %v17793_v63  ;;  %v5597_v52 = vpack.c.bf16 %v17793_v63, %v17796_v25 }
 0x731   :  { %6451 = vmatpush1.bf16.msra.mxu1 %v15849_v50  ;;  %v3898_v50 = vadd.f32 %v17326_v58, %v17432_v37  ;;  %v3906_v58 = vadd.f32 %v17335_v42, %v17033_v6 }
 0x732   :  { %7261 = vmatprep.subr.bf16.mxu1 %v15850_v19 }
 0x733   :  { %v5400_v17 = vpop.permute.xlu0 %5399 }
 0x734   :  { %12436 = vmatmul.mubr.msk.bf16.gmra.mrb[0].mxu1 %vm4806_vm1, %v5597_v52  ;;  %v17809_v15 = vmul.f32 %v17542_v46, %v5400_v17  ;;  %v3902_v17 = vadd.f32 %v17332_v30, %v17432_v37  ;;  %v3910_v30 = vadd.f32 %v17339_v35, %v17033_v6 }
 0x735   :  { %5689 = vmatprep.mubr.bf16.mxu1 %v21576_v44  ;;  %v5402_v56 = vpop.permute.xlu1 %5401 }
 0x736   :  { %21717 = vst [vmem:[#allocation10_spill] sm:$0xff] %v17809_v15  ;;  %v17812_v41 = vmul.f32 %v17547_v14, %v5402_v56 }
 0x738   :  { %21718 = vst [vmem:[#allocation11_spill] sm:$0xff] %v17812_v41  ;;  %v5598_v12 = vpack.c.bf16 %v17812_v41, %v17809_v15 }
 0x73b   :  { %v5404_v13 = vpop.permute.xlu0 %5403 }
 0x73c   :  { %12437 = vmatmul.mubr.msk.bf16.gmra.mrb[4].mxu1 %vm4806_vm1, %v5598_v12  ;;  %v17822_v32 = vmul.f32 %v17561_v60, %v5404_v13 }
 0x73d   :  { %5699 = vmatprep.mubr.bf16.mxu1 %v21576_v44  ;;  %v5406_v9 = vpop.permute.xlu1 %5405 }
 0x73e   :  { %v17819_v18 = vmul.f32 %v17565_v10, %v5406_v9 }
 0x740   :  { %v5599_v46 = vpack.c.bf16 %v17819_v18, %v17822_v32 }
 0x743   :  { %v5408_v14 = vpop.permute.xlu0 %5407 }
 0x744   :  { %12438 = vmatmul.mubr.msk.bf16.gmra.mrb[8].mxu1 %vm4806_vm1, %v5599_v46  ;;  %v17832_v11 = vmul.f32 %v17570_v62, %v5408_v14 }
 0x745   :  { %5709 = vmatprep.mubr.bf16.mxu1 %v21576_v44  ;;  %v5410_v22 = vpop.permute.xlu1 %5409 }
 0x746   :  { %v17829_v26 = vmul.f32 %v17573_v31, %v5410_v22  ;;  %21719 = vst [vmem:[#allocation12_spill] sm:$0xff] %v17832_v11 }
 0x748   :  { %v5600_v10 = vpack.c.bf16 %v17829_v26, %v17832_v11 }
 0x74b   :  { %v5412_v60 = vpop.permute.xlu0 %5411 }
 0x74c   :  { %12439 = vmatmul.mubr.msk.bf16.gmra.mrb[12].mxu1 %vm4806_vm1, %v5600_v10  ;;  %v17839_v5 = vmul.f32 %v17578_v33, %v5412_v60 }
 0x74d   :  { %5719 = vmatprep.mubr.bf16.mxu1 %v21576_v44  ;;  %v5414_v28 = vpop.permute.xlu1 %5413 }
 0x74e   :  { %21720 = vst [vmem:[#allocation13_spill] sm:$0xff] %v17839_v5  ;;  %v17842_v4 = vmul.f32 %v17581_v49, %v5414_v28  ;;  %v21724_v49 = vld [vmem:[#allocation7_spill] sm:$0xff] }
 0x74f   :  { %v3896_v38 = vadd.f32 %v21724_v49, %v17033_v6 }
 0x750   :  { %21721 = vst [vmem:[#allocation14_spill] sm:$0xff] %v17842_v4  ;;  %v5601_v31 = vpack.c.bf16 %v17842_v4, %v17839_v5 }
 0x753   :  { %v5416_v62 = vpop.permute.xlu0 %5415 }
 0x754   :  { %12440 = vmatmul.mubr.msk.bf16.gmra.mrb[16].mxu1 %vm4806_vm1, %v5601_v31  ;;  %v17849_v39 = vmul.f32 %v17586_v2, %v5416_v62  ;;  %v3900_v2 = vadd.f32 %v17328_v29, %v17033_v6  ;;  %v3908_v29 = vadd.f32 %v17337_v57, %v17432_v37  ;;  %v3912_v31 = vadd.f32 %v17343_v21, %v17432_v37 }
 0x755   :  { %5729 = vmatprep.mubr.bf16.mxu1 %v21576_v44  ;;  %v5418_v51 = vpop.permute.xlu1 %5417 }
 0x756   :  { %21722 = vst [vmem:[#allocation15_spill] sm:$0xff] %v17849_v39  ;;  %v17852_v61 = vmul.f32 %v17589_v36, %v5418_v51 }
 0x758   :  { %21723 = vst [vmem:[#allocation16_spill] sm:$0xff] %v17852_v61  ;;  %v5602_v33 = vpack.c.bf16 %v17852_v61, %v17849_v39 }
 0x75c   :  { %12441 = vmatmul.mubr.msk.bf16.gmra.mrb[20].mxu1 %vm4806_vm1, %v5602_v33 }
 0x75d   :  { %6476 = vmatprep.mubr.bf16.mxu1 %v21576_v44 }
 0x7f7   :  { %v5661_v52 = vpop.f32.mrb[248].mxu1 }
 0x7f8   :  { %v17864_v19 = vadd.f32 %v5661_v52, %v3896_v38  ;;  %v5663_v36 = vpop.f32.mrb[249].mxu1 }
 0x7f9   :  { %v5741_v56 = vadd.f32 %v5663_v36, %v3898_v50  ;;  %v5665_v12 = vpop.f32.mrb[250].mxu1 }
 0x7fa   :  { %v17868_v13 = vadd.f32 %v5665_v12, %v3900_v2  ;;  %v5667_v9 = vpop.f32.mrb[251].mxu1 }
 0x7fb   :  { %v12443_v46 = vmul.f32 -1.442695, %v5741_v56  ;;  %v5743_v14 = vadd.f32 %v5667_v9, %v3902_v17 }
 0x7fd   :  { %14718 = vpow2.f32 %v12443_v46  ;;  %v12445_v22 = vmul.f32 -1.442695, %v5743_v14 }
 0x7ff   :  { %14720 = vpow2.f32 %v12445_v22  ;;  %v5671_v10 = vpop.f32.mrb[252].mxu1 }
 0x800   :  { %v17876_v60 = vadd.f32 %v5671_v10, %v3906_v58  ;;  %v5673_v28 = vpop.f32.mrb[253].mxu1 }
 0x801   :  { %v5745_v62 = vadd.f32 %v5673_v28, %v3908_v29  ;;  %v5675_v51 = vpop.f32.mrb[254].mxu1 }
 0x802   :  { %v17880_v33 = vadd.f32 %v5675_v51, %v3910_v30  ;;  %v5677_v49 = vpop.f32.mrb[255].mxu1 }
 0x803   :  { %v12447_v42 = vmul.f32 -1.442695, %v5745_v62  ;;  %v5747_v38 = vadd.f32 %v5677_v49, %v3912_v31 }
 0x805   :  { %14722 = vpow2.f32 %v12447_v42  ;;  %v12449_v57 = vmul.f32 -1.442695, %v5747_v38 }
 0x807   :  { %v14719_v50 = vpop.eup %14718  ;;  %14724 = vpow2.f32 %v12449_v57  ;;  %v17882_v52 = vpop.f32.mrb[0].mxu1 }
 0x808   :  { %v5869_v35 = vadd.f32 1.0, %v14719_v50  ;;  %v5683_v2 = vpop.f32.mrb[1].mxu1 }
 0x809   :  { %v14721_v36 = vpop.eup %14720  ;;  %v13667_v17 = vadd.f32 %v5683_v2, %v17432_v37  ;;  %v17885_v56 = vpop.f32.mrb[2].mxu1 }
 0x80a   :  { %14726 = vrcp.f32 %v5869_v35  ;;  %v5871_v21 = vadd.f32 1.0, %v14721_v36  ;;  %v5687_v12 = vpop.f32.mrb[3].mxu1 }
 0x80b   :  { %v12451_v9 = vmul.f32 -1.442695, %v13667_v17  ;;  %v13669_v46 = vadd.f32 %v5687_v12, %v17432_v37 }
 0x80c   :  { %14728 = vrcp.f32 %v5871_v21 }
 0x80d   :  { %v12453_v14 = vmul.f32 -1.442695, %v13669_v46  ;;  %14730 = vpow2.f32 %v12451_v9 }
 0x80f   :  { %v14723_v22 = vpop.eup %14722  ;;  %14732 = vpow2.f32 %v12453_v14  ;;  %v17888_v29 = vpop.f32.mrb[4].mxu1 }
 0x810   :  { %v5873_v58 = vadd.f32 1.0, %v14723_v22  ;;  %v5693_v30 = vpop.f32.mrb[5].mxu1 }
 0x811   :  { %v14725_v10 = vpop.eup %14724  ;;  %v13671_v31 = vadd.f32 %v5693_v30, %v17432_v37  ;;  %v17891_v62 = vpop.f32.mrb[6].mxu1 }
 0x812   :  { %14734 = vrcp.f32 %v5873_v58  ;;  %v5875_v28 = vadd.f32 1.0, %v14725_v10  ;;  %v5697_v51 = vpop.f32.mrb[7].mxu1 }
 0x813   :  { %v12455_v42 = vmul.f32 -1.442695, %v13671_v31  ;;  %v13673_v38 = vadd.f32 %v5697_v51, %v17432_v37 }
 0x814   :  { %v17893_v49 = vpop.eup %14726  ;;  %14736 = vrcp.f32 %v5875_v28 }
 0x815   :  { %v5964_v57 = vmul.f32 2.0, %v17893_v49  ;;  %14738 = vpow2.f32 %v12455_v42  ;;  %v12457_v35 = vmul.f32 -1.442695, %v13673_v38 }
 0x816   :  { %v17897_v50 = vpop.eup %14728 }
 0x817   :  { %v12474_v2 = vadd.f32 -1.0, %v5964_v57  ;;  %v5965_v36 = vmul.f32 2.0, %v17897_v50  ;;  %v14731_v17 = vpop.eup %14730  ;;  %14740 = vpow2.f32 %v12457_v35  ;;  %v17900_v21 = vpop.f32.mrb[8].mxu1 }
 0x818   :  { %v5877_v12 = vadd.f32 1.0, %v14731_v17  ;;  %v5703_v9 = vpop.f32.mrb[9].mxu1 }
 0x819   :  { %6028 = vrot.lane.b32.xlu0 %v12474_v2, %s15900_s5  ;;  %v12475_v46 = vadd.f32 -1.0, %v5965_v36  ;;  %v14733_v14 = vpop.eup %14732  ;;  %v13675_v22 = vadd.f32 %v5703_v9, %v17432_v37  ;;  %v17904_v58 = vpop.f32.mrb[10].mxu1 }
 0x81a   :  { %14742 = vrcp.f32 %v5877_v12  ;;  %v5879_v10 = vadd.f32 1.0, %v14733_v14  ;;  %v5707_v30 = vpop.f32.mrb[11].mxu1 }
 0x81b   :  { %6030 = vrot.lane.b32.xlu1 %v12475_v46, %s15900_s5  ;;  %v12459_v31 = vmul.f32 -1.442695, %v13675_v22  ;;  %v13677_v51 = vadd.f32 %v5707_v30, %v17432_v37 }
 0x81c   :  { %v17907_v28 = vpop.eup %14734  ;;  %14744 = vrcp.f32 %v5879_v10 }
 0x81d   :  { %v5966_v42 = vmul.f32 2.0, %v17907_v28  ;;  %v12461_v57 = vmul.f32 -1.442695, %v13677_v51  ;;  %14746 = vpow2.f32 %v12459_v31 }
 0x81e   :  { %v17911_v38 = vpop.eup %14736 }
 0x81f   :  { %v12476_v35 = vadd.f32 -1.0, %v5966_v42  ;;  %v5967_v2 = vmul.f32 2.0, %v17911_v38  ;;  %v14739_v36 = vpop.eup %14738  ;;  %v17914_v17 = vpop.f32.mrb[12].mxu1  ;;  %14748 = vpow2.f32 %v12461_v57 }
 0x820   :  { %v5881_v12 = vadd.f32 1.0, %v14739_v36  ;;  %v5713_v9 = vpop.f32.mrb[13].mxu1 }
 0x821   :  { %6032 = vrot.lane.b32.xlu0 %v12476_v35, %s15900_s5  ;;  %v12477_v46 = vadd.f32 -1.0, %v5967_v2  ;;  %v14741_v14 = vpop.eup %14740  ;;  %v13679_v22 = vadd.f32 %v5713_v9, %v17432_v37  ;;  %v17918_v10 = vpop.f32.mrb[14].mxu1 }
 0x822   :  { %14750 = vrcp.f32 %v5881_v12  ;;  %v5883_v30 = vadd.f32 1.0, %v14741_v14  ;;  %v5717_v31 = vpop.f32.mrb[15].mxu1 }
 0x823   :  { %6034 = vrot.lane.b32.xlu1 %v12477_v46, %s15900_s5  ;;  %v12463_v51 = vmul.f32 -1.442695, %v13679_v22  ;;  %v13681_v42 = vadd.f32 %v5717_v31, %v17432_v37 }
 0x824   :  { %v17922_v44 = vpop.eup %14742  ;;  %14752 = vrcp.f32 %v5883_v30 }
 0x825   :  { %v12465_v57 = vmul.f32 -1.442695, %v13681_v42  ;;  %v5968_v35 = vmul.f32 2.0, %v17922_v44  ;;  %14754 = vpow2.f32 %v12463_v51 }
 0x826   :  { %v17925_v2 = vpop.eup %14744 }
 0x827   :  { %v17927_v36 = vpop.f32.mrb[16].mxu1  ;;  %v12478_v9 = vadd.f32 -1.0, %v5968_v35  ;;  %v5969_v12 = vmul.f32 2.0, %v17925_v2  ;;  %v14747_v14 = vpop.eup %14746  ;;  %14756 = vpow2.f32 %v12465_v57 }
 0x828   :  { %v5723_v46 = vpop.f32.mrb[17].mxu1  ;;  %v5885_v22 = vadd.f32 1.0, %v14747_v14 }
 0x829   :  { %v13683_v31 = vadd.f32 %v5723_v46, %v17432_v37  ;;  %6036 = vrot.lane.b32.xlu0 %v12478_v9, %s15900_s5  ;;  %v17932_v30 = vpop.f32.mrb[18].mxu1  ;;  %v12479_v42 = vadd.f32 -1.0, %v5969_v12  ;;  %v14749_v15 = vpop.eup %14748 }
 0x82a   :  { %v5727_v41 = vpop.f32.mrb[19].mxu1  ;;  %14758 = vrcp.f32 %v5885_v22  ;;  %v5887_v51 = vadd.f32 1.0, %v14749_v15 }
 0x82b   :  { %v12467_v25 = vmul.f32 -1.442695, %v13683_v31  ;;  %v13685_v35 = vadd.f32 %v5727_v41, %v17432_v37  ;;  %6038 = vrot.lane.b32.xlu1 %v12479_v42, %s15900_s5 }
 0x82c   :  { %v17936_v63 = vpop.eup %14750  ;;  %14760 = vrcp.f32 %v5887_v51 }
 0x82d   :  { %v12469_v57 = vmul.f32 -1.442695, %v13685_v35  ;;  %v5970_v14 = vmul.f32 2.0, %v17936_v63  ;;  %14762 = vpow2.f32 %v12467_v25 }
 0x82e   :  { %v17939_v46 = vpop.eup %14752 }
 0x82f   :  { %v17941_v9 = vpop.f32.mrb[20].mxu1  ;;  %v12480_v12 = vadd.f32 -1.0, %v5970_v14  ;;  %v5971_v22 = vmul.f32 2.0, %v17939_v46  ;;  %v14755_v15 = vpop.eup %14754  ;;  %14764 = vpow2.f32 %v12469_v57 }
 0x830   :  { %v5733_v31 = vpop.f32.mrb[21].mxu1  ;;  %v5889_v16 = vadd.f32 1.0, %v14755_v15 }
 0x831   :  { %v13687_v41 = vadd.f32 %v5733_v31, %v17432_v37  ;;  %6040 = vrot.lane.b32.xlu0 %v12480_v12, %s15900_s5  ;;  %v17946_v42 = vpop.f32.mrb[22].mxu1  ;;  %v12481_v51 = vadd.f32 -1.0, %v5971_v22  ;;  %v14757_v35 = vpop.eup %14756 }
 0x832   :  { %v5737_v34 = vpop.f32.mrb[23].mxu1  ;;  %14766 = vrcp.f32 %v5889_v16  ;;  %v5891_v25 = vadd.f32 1.0, %v14757_v35 }
 0x833   :  { %v12471_v47 = vmul.f32 -1.442695, %v13687_v41  ;;  %v13689_v14 = vadd.f32 %v5737_v34, %v17432_v37  ;;  %6042 = vrot.lane.b32.xlu1 %v12481_v51, %s15900_s5 }
 0x834   :  { %v17950_v7 = vpop.eup %14758  ;;  %14768 = vrcp.f32 %v5891_v25 }
 0x835   :  { %v12473_v57 = vmul.f32 -1.442695, %v13689_v14  ;;  %v5972_v15 = vmul.f32 2.0, %v17950_v7  ;;  %14770 = vpow2.f32 %v12471_v47 }
 0x836   :  { %v17953_v31 = vpop.eup %14760 }
 0x837   :  { %v12482_v12 = vadd.f32 -1.0, %v5972_v15  ;;  %v5973_v22 = vmul.f32 2.0, %v17953_v31  ;;  %v14763_v39 = vpop.eup %14762  ;;  %14772 = vpow2.f32 %v12473_v57 }
 0x838   :  { %v5893_v16 = vadd.f32 1.0, %v14763_v39 }
 0x839   :  { %6044 = vrot.lane.b32.xlu0 %v12482_v12, %s15900_s5  ;;  %v12483_v34 = vadd.f32 -1.0, %v5973_v22  ;;  %v14765_v41 = vpop.eup %14764 }
 0x83a   :  { %14774 = vrcp.f32 %v5893_v16  ;;  %v5895_v51 = vadd.f32 1.0, %v14765_v41 }
 0x83b   :  { %6046 = vrot.lane.b32.xlu1 %v12483_v34, %s15900_s5 }
 0x83c   :  { %v17958_v35 = vpop.eup %14766  ;;  %14776 = vrcp.f32 %v5895_v51 }
 0x83d   :  { %v5974_v25 = vmul.f32 2.0, %v17958_v35 }
 0x83e   :  { %v17961_v47 = vpop.eup %14768 }
 0x83f   :  { %v12484_v14 = vadd.f32 -1.0, %v5974_v25  ;;  %v5975_v15 = vmul.f32 2.0, %v17961_v47  ;;  %v14771_v57 = vpop.eup %14770 }
 0x840   :  { %v5897_v39 = vadd.f32 1.0, %v14771_v57 }
 0x841   :  { %6048 = vrot.lane.b32.xlu0 %v12484_v14, %s15900_s5  ;;  %v12485_v12 = vadd.f32 -1.0, %v5975_v15  ;;  %v14773_v22 = vpop.eup %14772 }
 0x842   :  { %14778 = vrcp.f32 %v5897_v39  ;;  %v5899_v16 = vadd.f32 1.0, %v14773_v22 }
 0x843   :  { %6050 = vrot.lane.b32.xlu1 %v12485_v12, %s15900_s5 }
 0x844   :  { %v17966_v34 = vpop.eup %14774  ;;  %14780 = vrcp.f32 %v5899_v16 }
 0x845   :  { %v5976_v41 = vmul.f32 2.0, %v17966_v34 }
 0x846   :  { %v17969_v51 = vpop.eup %14776 }
 0x847   :  { %v12486_v25 = vadd.f32 -1.0, %v5976_v41  ;;  %v5977_v61 = vmul.f32 2.0, %v17969_v51  ;;  %v12442_v41 = vmul.f32 -1.442695, %v17864_v19 }
 0x849   :  { %6052 = vrot.lane.b32.xlu0 %v12486_v25, %s15900_s5  ;;  %v12487_v57 = vadd.f32 -1.0, %v5977_v61  ;;  %v12444_v61 = vmul.f32 -1.442695, %v17868_v13  ;;  %14782 = vpow2.f32 %v12442_v41  ;;  %v12446_v25 = vmul.f32 -1.442695, %v17876_v60 }
 0x84a   :  { %v13670_v60 = vadd.f32 %v17888_v29, %v17033_v6 }
 0x84b   :  { %6054 = vrot.lane.b32.xlu1 %v12487_v57, %s15900_s5  ;;  %14784 = vpow2.f32 %v12444_v61  ;;  %v12448_v57 = vmul.f32 -1.442695, %v17880_v33 }
 0x84c   :  { %v17974_v14 = vpop.eup %14778  ;;  %14786 = vpow2.f32 %v12446_v25  ;;  %v12454_v25 = vmul.f32 -1.442695, %v13670_v60 }
 0x84d   :  { %v5978_v15 = vmul.f32 2.0, %v17974_v14  ;;  %14788 = vpow2.f32 %v12448_v57 }
 0x84e   :  { %v17977_v39 = vpop.eup %14780 }
 0x84f   :  { %v12488_v12 = vadd.f32 -1.0, %v5978_v15  ;;  %v5979_v22 = vmul.f32 2.0, %v17977_v39  ;;  %v13666_v15 = vadd.f32 %v17882_v52, %v17033_v6  ;;  %v13672_v52 = vadd.f32 %v17891_v62, %v17033_v6 }
 0x851   :  { %6056 = vrot.lane.b32.xlu0 %v12488_v12, %s15900_s5  ;;  %v12489_v16 = vadd.f32 -1.0, %v5979_v22  ;;  %v13668_v22 = vadd.f32 %v17885_v56, %v17033_v6  ;;  %v12450_v19 = vmul.f32 -1.442695, %v13666_v15  ;;  %v12456_v56 = vmul.f32 -1.442695, %v13672_v52 }
 0x853   :  { %6058 = vrot.lane.b32.xlu1 %v12489_v16, %s15900_s5  ;;  %v14783_v5 = vpop.eup %14782  ;;  %v12452_v13 = vmul.f32 -1.442695, %v13668_v22 }
 0x854   :  { %v5868_v16 = vadd.f32 1.0, %v14783_v5  ;;  %v13674_v5 = vadd.f32 %v17900_v21, %v17033_v6 }
 0x855   :  { %v14785_v12 = vpop.eup %14784 }
 0x856   :  { %v5870_v4 = vadd.f32 1.0, %v14785_v12  ;;  %14790 = vrcp.f32 %v5868_v16  ;;  %v14787_v41 = vpop.eup %14786 }
 0x857   :  { %14792 = vpow2.f32 %v12450_v19  ;;  %v14789_v33 = vpop.eup %14788  ;;  %v5872_v61 = vadd.f32 1.0, %v14787_v41  ;;  %v12458_v19 = vmul.f32 -1.442695, %v13674_v5 }
 0x858   :  { %14794 = vrcp.f32 %v5870_v4  ;;  %v5874_v57 = vadd.f32 1.0, %v14789_v33  ;;  %v13676_v4 = vadd.f32 %v17904_v58, %v17033_v6  ;;  %v13678_v58 = vadd.f32 %v17914_v17, %v17033_v6 }
 0x859   :  { %14796 = vpow2.f32 %v12452_v13 }
 0x85a   :  { %14798 = vrcp.f32 %v5872_v61  ;;  %v12460_v21 = vmul.f32 -1.442695, %v13676_v4  ;;  %v12462_v4 = vmul.f32 -1.442695, %v13678_v58 }
 0x85b   :  { %14800 = vpow2.f32 %v12454_v25  ;;  %v13680_v25 = vadd.f32 %v17918_v10, %v17033_v6 }
 0x85c   :  { %14802 = vrcp.f32 %v5874_v57 }
 0x85d   :  { %14804 = vpow2.f32 %v12456_v56 }
 0x85e   :  { %14806 = vpow2.f32 %v12458_v19 }
 0x860   :  { %v17996_v15 = vpop.eup %14790 }
 0x861   :  { %v14793_v12 = vpop.eup %14792 }
 0x862   :  { %v18000_v22 = vpop.eup %14794  ;;  %v5876_v41 = vadd.f32 1.0, %v14793_v12 }
 0x863   :  { %v14797_v16 = vpop.eup %14796 }
 0x864   :  { %v5878_v33 = vadd.f32 1.0, %v14797_v16  ;;  %v18008_v52 = vpop.eup %14798  ;;  %14808 = vrcp.f32 %v5876_v41  ;;  %v12464_v16 = vmul.f32 -1.442695, %v13680_v25 }
 0x865   :  { %v14801_v61 = vpop.eup %14800  ;;  %14810 = vpow2.f32 %v12460_v21 }
 0x866   :  { %v18012_v56 = vpop.eup %14802  ;;  %14812 = vrcp.f32 %v5878_v33  ;;  %v13684_v33 = vadd.f32 %v17932_v30, %v17033_v6  ;;  %v13686_v30 = vadd.f32 %v17941_v9, %v17033_v6 }
 0x867   :  { %v14805_v12 = vpop.eup %14804  ;;  %14814 = vpow2.f32 %v12462_v4 }
 0x868   :  { %v5882_v19 = vadd.f32 1.0, %v14805_v12  ;;  %v14807_v10 = vpop.eup %14806  ;;  %v12468_v4 = vmul.f32 -1.442695, %v13684_v33  ;;  %v12470_v33 = vmul.f32 -1.442695, %v13686_v30 }
 0x869   :  { %v5884_v25 = vadd.f32 1.0, %v14807_v10 }
 0x86e   :  { %v18020_v41 = vpop.eup %14808 }
 0x86f   :  { %v14811_v21 = vpop.eup %14810 }
 0x88b   :  { %v6029_v29 = vpop.permute.xlu0 %6028 }
 0x88c   :  { %v6076_v62 = vmul.f32 %v17996_v15, %v6029_v29 }
 0x88d   :  { %v6031_v13 = vpop.permute.xlu1 %6030 }
 0x88e   :  { %v6077_v60 = vmul.f32 %v18000_v22, %v6031_v13  ;;  %6108 = vrot.lane.b32.xlu0 %v6076_v62, %s15900_s5  ;;  %v5880_v62 = vadd.f32 1.0, %v14801_v61  ;;  %v13682_v13 = vadd.f32 %v17927_v36, %v17033_v6  ;;  %v18025_v61 = vpop.eup %14812  ;;  %v5886_v36 = vadd.f32 1.0, %v14811_v21 }
 0x890   :  { %6110 = vrot.lane.b32.xlu1 %v6077_v60, %s15900_s5  ;;  %14816 = vrcp.f32 %v5880_v62 }
 0x891   :  { %14818 = vpow2.f32 %v12464_v16 }
 0x892   :  { %14820 = vrcp.f32 %v5882_v19  ;;  %v13688_v19 = vadd.f32 %v17946_v42, %v17033_v6 }
 0x893   :  { %v6033_v57 = vpop.permute.xlu0 %6032  ;;  %14822 = vrcp.f32 %v5884_v25 }
 0x894   :  { %v6078_v5 = vmul.f32 %v18008_v52, %v6033_v57  ;;  %v12472_v25 = vmul.f32 -1.442695, %v13688_v19 }
 0x895   :  { %v6035_v29 = vpop.permute.xlu1 %6034 }
 0x896   :  { %v6079_v17 = vmul.f32 %v18012_v56, %v6035_v29  ;;  %6112 = vrot.lane.b32.xlu0 %v6078_v5, %s15900_s5  ;;  %v12466_v5 = vmul.f32 -1.442695, %v13682_v13  ;;  %v14815_v29 = vpop.eup %14814 }
 0x898   :  { %6114 = vrot.lane.b32.xlu1 %v6079_v17, %s15900_s5  ;;  %14824 = vpow2.f32 %v12466_v5 }
 0x899   :  { %14826 = vrcp.f32 %v5886_v36 }
 0x89a   :  { %v18032_v62 = vpop.eup %14816  ;;  %14828 = vpow2.f32 %v12468_v4 }
 0x89b   :  { %v6037_v60 = vpop.permute.xlu0 %6036  ;;  %v14819_v16 = vpop.eup %14818 }
 0x89c   :  { %v6080_v58 = vmul.f32 %v18020_v41, %v6037_v60  ;;  %v18037_v13 = vpop.eup %14820  ;;  %v5888_v60 = vadd.f32 1.0, %v14815_v29  ;;  %v5890_v9 = vadd.f32 1.0, %v14819_v16 }
 0x89d   :  { %v6039_v57 = vpop.permute.xlu1 %6038 }
 0x89e   :  { %v6081_v12 = vmul.f32 %v18025_v61, %v6039_v57  ;;  %6116 = vrot.lane.b32.xlu0 %v6080_v58, %s15900_s5  ;;  %14830 = vrcp.f32 %v5888_v60  ;;  %v18042_v57 = vpop.eup %14822 }
 0x89f   :  { %14832 = vpow2.f32 %v12470_v33 }
 0x8a0   :  { %6118 = vrot.lane.b32.xlu1 %v6081_v12, %s15900_s5  ;;  %14834 = vrcp.f32 %v5890_v9 }
 0x8a1   :  { %14836 = vpow2.f32 %v12472_v25 }
 0x8a2   :  { %v14825_v42 = vpop.eup %14824 }
 0x8a3   :  { %v6041_v17 = vpop.permute.xlu0 %6040  ;;  %v18044_v12 = vpop.eup %14826  ;;  %v5892_v30 = vadd.f32 1.0, %v14825_v42 }
 0x8a4   :  { %v6082_v10 = vmul.f32 %v18032_v62, %v6041_v17  ;;  %v14829_v4 = vpop.eup %14828 }
 0x8a5   :  { %v6043_v21 = vpop.permute.xlu1 %6042  ;;  %v5894_v16 = vadd.f32 1.0, %v14829_v4  ;;  %14838 = vrcp.f32 %v5892_v30 }
 0x8a6   :  { %v6083_v58 = vmul.f32 %v18037_v13, %v6043_v21  ;;  %6120 = vrot.lane.b32.xlu0 %v6082_v10, %s15900_s5 }
 0x8a7   :  { %14840 = vrcp.f32 %v5894_v16 }
 0x8a8   :  { %6122 = vrot.lane.b32.xlu1 %v6083_v58, %s15900_s5  ;;  %v18050_v19 = vpop.eup %14830 }
 0x8a9   :  { %v14833_v10 = vpop.eup %14832 }
 0x8aa   :  { %v18052_v21 = vpop.eup %14834  ;;  %v5896_v25 = vadd.f32 1.0, %v14833_v10 }
 0x8ab   :  { %v6045_v5 = vpop.permute.xlu0 %6044  ;;  %v14837_v58 = vpop.eup %14836 }
 0x8ac   :  { %v6084_v36 = vmul.f32 %v18042_v57, %v6045_v5  ;;  %v5898_v5 = vadd.f32 1.0, %v14837_v58  ;;  %14842 = vrcp.f32 %v5896_v25 }
 0x8ad   :  { %v6047_v29 = vpop.permute.xlu1 %6046 }
 0x8ae   :  { %v6085_v17 = vmul.f32 %v18044_v12, %v6047_v29  ;;  %6124 = vrot.lane.b32.xlu0 %v6084_v36, %s15900_s5  ;;  %14844 = vrcp.f32 %v5898_v5 }
 0x8af   :  { %v18058_v36 = vpop.eup %14838 }
 0x8b0   :  { %6126 = vrot.lane.b32.xlu1 %v6085_v17, %s15900_s5 }
 0x8b1   :  { %v18061_v30 = vpop.eup %14840 }
 0x8b3   :  { %v6049_v60 = vpop.permute.xlu0 %6048 }
 0x8b4   :  { %v6086_v33 = vmul.f32 %v18050_v19, %v6049_v60 }
 0x8b5   :  { %v6051_v9 = vpop.permute.xlu1 %6050 }
 0x8b6   :  { %v6087_v42 = vmul.f32 %v18052_v21, %v6051_v9  ;;  %6128 = vrot.lane.b32.xlu0 %v6086_v33, %s15900_s5  ;;  %v18066_v10 = vpop.eup %14842 }
 0x8b8   :  { %6130 = vrot.lane.b32.xlu1 %v6087_v42, %s15900_s5  ;;  %v18069_v58 = vpop.eup %14844  ;;  %v5996_v42 = vmul.f32 %v17996_v15, %v17675_v24  ;;  %v5999_v24 = vmul.f32 %v18012_v56, %v17687_v54  ;;  %v6001_v54 = vmul.f32 %v18025_v61, %v17697_v20  ;;  %v6003_v20 = vmul.f32 %v18037_v13, %v17707_v55 }
 0x8b9   :  { %v6005_v55 = vmul.f32 %v18044_v12, %v17717_v48  ;;  %v6007_v48 = vmul.f32 %v18052_v21, %v17727_v1  ;;  %v6009_v1 = vmul.f32 %v18061_v30, %v17737_v8  ;;  %v6011_v8 = vmul.f32 %v18069_v58, %v17747_v53 }
 0x8bb   :  { %v6053_v4 = vpop.permute.xlu0 %6052 }
 0x8bc   :  { %v6088_v29 = vmul.f32 %v18058_v36, %v6053_v4 }
 0x8bd   :  { %v6055_v17 = vpop.permute.xlu1 %6054 }
 0x8be   :  { %v6089_v16 = vmul.f32 %v18061_v30, %v6055_v17  ;;  %6132 = vrot.lane.b32.xlu0 %v6088_v29, %s15900_s5  ;;  %v5997_v29 = vmul.f32 %v18000_v22, %v17679_v40 }
 0x8c0   :  { %6134 = vrot.lane.b32.xlu1 %v6089_v16, %s15900_s5 }
 0x8c3   :  { %v6057_v60 = vpop.permute.xlu0 %6056 }
 0x8c4   :  { %v6090_v33 = vmul.f32 %v18066_v10, %v6057_v60  ;;  %v5998_v60 = vmul.f32 %v18008_v52, %v17683_v43  ;;  %v6000_v43 = vmul.f32 %v18020_v41, %v17692_v27  ;;  %v6002_v27 = vmul.f32 %v18032_v62, %v17702_v45 }
 0x8c5   :  { %v6059_v9 = vpop.permute.xlu1 %6058  ;;  %v6004_v45 = vmul.f32 %v18042_v57, %v17713_v23  ;;  %v6006_v23 = vmul.f32 %v18050_v19, %v17722_v0  ;;  %v6008_v0 = vmul.f32 %v18058_v36, %v17733_v59  ;;  %v6010_v59 = vmul.f32 %v18066_v10, %v17743_v3 }
 0x8c6   :  { %v6091_v25 = vmul.f32 %v18069_v58, %v6059_v9  ;;  %6136 = vrot.lane.b32.xlu0 %v6090_v33, %s15900_s5 }
 0x8c8   :  { %6138 = vrot.lane.b32.xlu1 %v6091_v25, %s15900_s5 }
 0x900   :  { %v6109_v5 = vpop.permute.xlu0 %6108 }
 0x901   :  { %v18076_v4 = vadd.f32 %v6109_v5, %v5996_v42 }
 0x902   :  { %v6111_v17 = vpop.permute.xlu1 %6110 }
 0x903   :  { %14846 = vtanh.f32 %v18076_v4  ;;  %v18081_v16 = vadd.f32 %v6111_v17, %v5997_v29 }
 0x905   :  { %14848 = vtanh.f32 %v18081_v16 }
 0x908   :  { %v6113_v33 = vpop.permute.xlu0 %6112 }
 0x909   :  { %v18086_v9 = vadd.f32 %v6113_v33, %v5998_v60 }
 0x90a   :  { %v6115_v15 = vpop.permute.xlu1 %6114 }
 0x90b   :  { %14850 = vtanh.f32 %v18086_v9  ;;  %v18091_v40 = vadd.f32 %v6115_v15, %v5999_v24 }
 0x90d   :  { %v14847_v22 = vpop.eup %14846  ;;  %14852 = vtanh.f32 %v18091_v40 }
 0x90e   :  { %6204 = vrot.lane.b32.xlu0 %v14847_v22, %s15900_s5 }
 0x90f   :  { %v14849_v25 = vpop.eup %14848 }
 0x910   :  { %6206 = vrot.lane.b32.xlu1 %v14849_v25, %s15900_s5  ;;  %v6117_v52 = vpop.permute.xlu0 %6116 }
 0x911   :  { %v18098_v42 = vadd.f32 %v6117_v52, %v6000_v43 }
 0x912   :  { %v6119_v56 = vpop.permute.xlu1 %6118 }
 0x913   :  { %14854 = vtanh.f32 %v18098_v42  ;;  %v18103_v5 = vadd.f32 %v6119_v56, %v6001_v54 }
 0x915   :  { %v14851_v29 = vpop.eup %14850  ;;  %14856 = vtanh.f32 %v18103_v5 }
 0x916   :  { %6208 = vrot.lane.b32.xlu0 %v14851_v29, %s15900_s5 }
 0x917   :  { %v14853_v17 = vpop.eup %14852 }
 0x918   :  { %6210 = vrot.lane.b32.xlu1 %v14853_v17, %s15900_s5  ;;  %v6121_v41 = vpop.permute.xlu0 %6120 }
 0x919   :  { %v18110_v60 = vadd.f32 %v6121_v41, %v6002_v27 }
 0x91a   :  { %v6123_v61 = vpop.permute.xlu1 %6122 }
 0x91b   :  { %14858 = vtanh.f32 %v18110_v60  ;;  %v18115_v33 = vadd.f32 %v6123_v61, %v6003_v20 }
 0x91d   :  { %v14855_v24 = vpop.eup %14854  ;;  %14860 = vtanh.f32 %v18115_v33 }
 0x91e   :  { %6212 = vrot.lane.b32.xlu0 %v14855_v24, %s15900_s5 }
 0x91f   :  { %v14857_v15 = vpop.eup %14856 }
 0x920   :  { %6214 = vrot.lane.b32.xlu1 %v14857_v15, %s15900_s5  ;;  %v6125_v62 = vpop.permute.xlu0 %6124 }
 0x921   :  { %v18122_v22 = vadd.f32 %v6125_v62, %v6004_v45 }
 0x922   :  { %v6127_v13 = vpop.permute.xlu1 %6126 }
 0x923   :  { %14862 = vtanh.f32 %v18122_v22  ;;  %v18127_v25 = vadd.f32 %v6127_v13, %v6005_v55 }
 0x925   :  { %v14859_v43 = vpop.eup %14858  ;;  %14864 = vtanh.f32 %v18127_v25 }
 0x926   :  { %6216 = vrot.lane.b32.xlu0 %v14859_v43, %s15900_s5 }
 0x927   :  { %v14861_v52 = vpop.eup %14860 }
 0x928   :  { %6218 = vrot.lane.b32.xlu1 %v14861_v52, %s15900_s5  ;;  %v6129_v57 = vpop.permute.xlu0 %6128 }
 0x929   :  { %v18134_v54 = vadd.f32 %v6129_v57, %v6006_v23  ;;  %v21727_v23 = vmov 0   ;;  %v15851_v57 = vld [vmem:[%s21565_s8] ss:$8 sps:$4 sm:$0xff]  }
 0x92a   :  { %v6131_v12 = vpop.permute.xlu1 %6130 }
 0x92b   :  { %14866 = vtanh.f32 %v18134_v54  ;;  %v18139_v56 = vadd.f32 %v6131_v12, %v6007_v48 }
 0x92d   :  { %v14863_v29 = vpop.eup %14862  ;;  %14868 = vtanh.f32 %v18139_v56 }
 0x92e   :  { %6220 = vrot.lane.b32.xlu0 %v14863_v29, %s15900_s5  ;;  %v15853_v29 = vld [vmem:[%s21565_s8 + $0x10] ss:$8 sps:$4 sm:$0xff]  }
 0x92f   :  { %v14865_v17 = vpop.eup %14864 }
 0x930   :  { %6222 = vrot.lane.b32.xlu1 %v14865_v17, %s15900_s5  ;;  %v6133_v19 = vpop.permute.xlu0 %6132 }
 0x931   :  { %v18146_v27 = vadd.f32 %v6133_v19, %v6008_v0  ;;  %v15854_v0 = vld [vmem:[%s21565_s8 + $0x24] ss:$8 sps:$4 sm:$0xff]   ;;  %v15856_v19 = vld [vmem:[%s21565_s8 + $0x34] ss:$8 sps:$4 sm:$0xff]  }
 0x932   :  { %v6135_v21 = vpop.permute.xlu1 %6134 }
 0x933   :  { %14870 = vtanh.f32 %v18146_v27  ;;  %v18151_v41 = vadd.f32 %v6135_v21, %v6009_v1 }
 0x935   :  { %v14867_v20 = vpop.eup %14866  ;;  %14872 = vtanh.f32 %v18151_v41 }
 0x936   :  { %6224 = vrot.lane.b32.xlu0 %v14867_v20, %s15900_s5 }
 0x937   :  { %v14869_v61 = vpop.eup %14868 }
 0x938   :  { %6226 = vrot.lane.b32.xlu1 %v14869_v61, %s15900_s5  ;;  %v6137_v36 = vpop.permute.xlu0 %6136  ;;  %v15857_v61 = vld [vmem:[%s21565_s8 + $0x30] ss:$8 sps:$4 sm:$0xff]  }
 0x939   :  { %v18158_v24 = vadd.f32 %v6137_v36, %v6010_v59  ;;  %v15858_v59 = vld [vmem:[%s21565_s8 + $0x4] ss:$8 sps:$4 sm:$0xff]  }
 0x93a   :  { %v6139_v30 = vpop.permute.xlu1 %6138 }
 0x93b   :  { %14874 = vtanh.f32 %v18158_v24  ;;  %v18163_v15 = vadd.f32 %v6139_v30, %v6011_v8 }
 0x93d   :  { %v14871_v45 = vpop.eup %14870  ;;  %14876 = vtanh.f32 %v18163_v15 }
 0x93e   :  { %6228 = vrot.lane.b32.xlu0 %v14871_v45, %s15900_s5 }
 0x93f   :  { %v14873_v62 = vpop.eup %14872 }
 0x940   :  { %6230 = vrot.lane.b32.xlu1 %v14873_v62, %s15900_s5 }
 0x945   :  { %v14875_v3 = vpop.eup %14874 }
 0x946   :  { %6232 = vrot.lane.b32.xlu0 %v14875_v3, %s15900_s5 }
 0x947   :  { %v14877_v10 = vpop.eup %14876 }
 0x948   :  { %6234 = vrot.lane.b32.xlu1 %v14877_v10, %s15900_s5 }
 0x980   :  { %v6205_v53 = vpop.permute.xlu0 %6204 }
 0x981   :  { %v18171_v55 = vmul.f32 %v17893_v49, %v6205_v53  ;;  %v15852_v49 = vld [vmem:[%s21565_s8 + $0x14] ss:$8 sps:$4 sm:$0xff]  }
 0x982   :  { %v6207_v58 = vpop.permute.xlu1 %6206 }
 0x983   :  { %21725 = vst [vmem:[#allocation7_spill] sm:$0xff] %v18171_v55  ;;  %v18174_v13 = vmul.f32 %v17897_v50, %v6207_v58 }
 0x985   :  { %21726 = vst [vmem:[#allocation17_spill] sm:$0xff] %v18174_v13  ;;  %v6412_v43 = vpack.c.bf16 %v18174_v13, %v18171_v55 }
 0x987   :  { %12490 = vmatmul.mubr.msk.bf16.vlgmr.msra.gmra.mrb[24].mxu1 %vm4806_vm1, %v6412_v43 }
 0x988   :  { %v6209_v52 = vpop.permute.xlu0 %6208  ;;  %6486 = vmatprep.mubr.bf16.mxu1 %v21727_v23  ;;  %7262 = vmatpush1.bf16.msra.mxu1 %v15851_v57 }
 0x989   :  { %7263 = vmatprep.subr.bf16.mxu1 %v15852_v49  ;;  %v18187_v48 = vmul.f32 %v17907_v28, %v6209_v52  ;;  %v15855_v28 = vld [vmem:[%s21565_s8 + $0x20] ss:$8 sps:$4 sm:$0xff]  }
 0x98a   :  { %v6211_v50 = vpop.permute.xlu1 %6210 }
 0x98b   :  { %21728 = vst [vmem:[#allocation18_spill] sm:$0xff] %v18187_v48  ;;  %v18190_v12 = vmul.f32 %v17911_v38, %v6211_v50 }
 0x98c   :  { %7264 = vmatpush1.bf16.msra.mxu1 %v15853_v29 }
 0x98d   :  { %21729 = vst [vmem:[#allocation19_spill] sm:$0xff] %v18190_v12  ;;  %v6413_v17 = vpack.c.bf16 %v18190_v12, %v18187_v48  ;;  %7265 = vmatprep.subr.bf16.mxu1 %v15854_v0 }
 0x98f   :  { %12491 = vmatmul.mubr.msk.bf16.gmra.mrb[28].mxu1 %vm4806_vm1, %v6413_v17 }
 0x990   :  { %6496 = vmatprep.mubr.bf16.mxu1 %v21727_v23  ;;  %7266 = vmatpush1.bf16.msra.mxu1 %v15855_v28  ;;  %v6213_v38 = vpop.permute.xlu0 %6212 }
 0x991   :  { %7267 = vmatprep.subr.bf16.mxu1 %v15856_v19  ;;  %v18209_v21 = vmul.f32 %v17922_v44, %v6213_v38 }
 0x992   :  { %v6215_v1 = vpop.permute.xlu1 %6214 }
 0x993   :  { %21730 = vst [vmem:[#allocation20_spill] sm:$0xff] %v18209_v21  ;;  %v18212_v20 = vmul.f32 %v17925_v2, %v6215_v1 }
 0x994   :  { %7268 = vmatpush1.bf16.msra.mxu1 %v15857_v61 }
 0x995   :  { %21731 = vst [vmem:[#allocation21_spill] sm:$0xff] %v18212_v20  ;;  %8078 = vmatprep.subr.bf16.mxu1 %v15858_v59  ;;  %v6414_v36 = vpack.c.bf16 %v18212_v20, %v18209_v21 }
 0x997   :  { %12492 = vmatmul.mubr.msk.bf16.gmra.mrb[32].mxu1 %vm4806_vm1, %v6414_v36 }
 0x998   :  { %v6217_v44 = vpop.permute.xlu0 %6216  ;;  %6506 = vmatprep.mubr.bf16.mxu1 %v21727_v23 }
 0x999   :  { %v18225_v8 = vmul.f32 %v17936_v63, %v6217_v44 }
 0x99a   :  { %v6219_v2 = vpop.permute.xlu1 %6218 }
 0x99b   :  { %21732 = vst [vmem:[#allocation22_spill] sm:$0xff] %v18225_v8  ;;  %v18228_v30 = vmul.f32 %v17939_v46, %v6219_v2 }
 0x99d   :  { %21733 = vst [vmem:[#allocation23_spill] sm:$0xff] %v18228_v30  ;;  %v6415_v45 = vpack.c.bf16 %v18228_v30, %v18225_v8 }
 0x99f   :  { %12493 = vmatmul.mubr.msk.bf16.gmra.mrb[36].mxu1 %vm4806_vm1, %v6415_v45 }
 0x9a0   :  { %6516 = vmatprep.mubr.bf16.mxu1 %v21727_v23  ;;  %v6221_v62 = vpop.permute.xlu0 %6220 }
 0x9a1   :  { %v18235_v10 = vmul.f32 %v17950_v7, %v6221_v62 }
 0x9a2   :  { %v6223_v3 = vpop.permute.xlu1 %6222 }
 0x9a3   :  { %21734 = vst [vmem:[#allocation24_spill] sm:$0xff] %v18235_v10  ;;  %v18238_v53 = vmul.f32 %v17953_v31, %v6223_v3 }
 0x9a5   :  { %21735 = vst [vmem:[#allocation25_spill] sm:$0xff] %v18238_v53  ;;  %v6416_v63 = vpack.c.bf16 %v18238_v53, %v18235_v10 }
 0x9a7   :  { %12494 = vmatmul.mubr.msk.bf16.gmra.mrb[40].mxu1 %vm4806_vm1, %v6416_v63 }
 0x9a8   :  { %v6225_v46 = vpop.permute.xlu0 %6224  ;;  %6526 = vmatprep.mubr.bf16.mxu1 %v21727_v23 }
 0x9a9   :  { %v18245_v43 = vmul.f32 %v17958_v35, %v6225_v46 }
 0x9aa   :  { %v6227_v58 = vpop.permute.xlu1 %6226 }
 0x9ab   :  { %21736 = vst [vmem:[#allocation26_spill] sm:$0xff] %v18245_v43  ;;  %v18248_v52 = vmul.f32 %v17961_v47, %v6227_v58 }
 0x9ad   :  { %21737 = vst [vmem:[#allocation27_spill] sm:$0xff] %v18248_v52  ;;  %v6417_v7 = vpack.c.bf16 %v18248_v52, %v18245_v43 }
 0x9af   :  { %12495 = vmatmul.mubr.msk.bf16.gmra.mrb[44].mxu1 %vm4806_vm1, %v6417_v7 }
 0x9b0   :  { %6536 = vmatprep.mubr.bf16.mxu1 %v21727_v23  ;;  %v6229_v31 = vpop.permute.xlu0 %6228 }
 0x9b1   :  { %v18255_v49 = vmul.f32 %v17966_v34, %v6229_v31 }
 0x9b2   :  { %v6231_v57 = vpop.permute.xlu1 %6230 }
 0x9b3   :  { %21738 = vst [vmem:[#allocation28_spill] sm:$0xff] %v18255_v49  ;;  %v18258_v50 = vmul.f32 %v17969_v51, %v6231_v57 }
 0x9b5   :  { %21739 = vst [vmem:[#allocation29_spill] sm:$0xff] %v18258_v50  ;;  %v6418_v35 = vpack.c.bf16 %v18258_v50, %v18255_v49 }
 0x9b7   :  { %12496 = vmatmul.mubr.msk.bf16.gmra.mrb[48].mxu1 %vm4806_vm1, %v6418_v35 }
 0x9b8   :  { %v6233_v47 = vpop.permute.xlu0 %6232  ;;  %6546 = vmatprep.mubr.bf16.mxu1 %v21727_v23 }
 0x9b9   :  { %v18265_v17 = vmul.f32 %v17974_v14, %v6233_v47 }
 0x9ba   :  { %v6235_v29 = vpop.permute.xlu1 %6234 }
 0x9bb   :  { %21740 = vst [vmem:[#allocation30_spill] sm:$0xff] %v18265_v17  ;;  %v18268_v0 = vmul.f32 %v17977_v39, %v6235_v29 }
 0x9bd   :  { %21741 = vst [vmem:[#allocation31_spill] sm:$0xff] %v18268_v0  ;;  %v6419_v34 = vpack.c.bf16 %v18268_v0, %v18265_v17 }
 0x9bf   :  { %12497 = vmatmul.mubr.msk.bf16.gmra.mrb[52].mxu1 %vm4806_vm1, %v6419_v34 }
 0x9c0   :  { %7293 = vmatprep.mubr.bf16.mxu1 %v21727_v23 }
 0xa5a   :  { %v18274_v51 = vpop.f32.mrb[24].mxu1 }
 0xa5b   :  { %v6480_v28 = vpop.f32.mrb[25].mxu1 }
 0xa5c   :  { %v13691_v38 = vadd.f32 %v6480_v28, %v17432_v37  ;;  %v18277_v19 = vpop.f32.mrb[26].mxu1 }
 0xa5d   :  { %v6484_v1 = vpop.f32.mrb[27].mxu1 }
 0xa5e   :  { %v12499_v14 = vmul.f32 -1.442695, %v13691_v38  ;;  %v13693_v61 = vadd.f32 %v6484_v1, %v17432_v37 }
 0xa60   :  { %14878 = vpow2.f32 %v12499_v14  ;;  %v12501_v39 = vmul.f32 -1.442695, %v13693_v61 }
 0xa62   :  { %14880 = vpow2.f32 %v12501_v39  ;;  %v18280_v59 = vpop.f32.mrb[28].mxu1 }
 0xa63   :  { %v6490_v36 = vpop.f32.mrb[29].mxu1  ;;  %v13694_v53 = vadd.f32 %v18280_v59, %v17033_v6 }
 0xa64   :  { %v13695_v44 = vadd.f32 %v6490_v36, %v17432_v37  ;;  %v18283_v2 = vpop.f32.mrb[30].mxu1 }
 0xa65   :  { %v6494_v45 = vpop.f32.mrb[31].mxu1 }
 0xa66   :  { %v12503_v62 = vmul.f32 -1.442695, %v13695_v44  ;;  %v13697_v3 = vadd.f32 %v6494_v45, %v17432_v37 }
 0xa68   :  { %14882 = vpow2.f32 %v12503_v62  ;;  %v12505_v63 = vmul.f32 -1.442695, %v13697_v3 }
 0xa6a   :  { %v14879_v46 = vpop.eup %14878  ;;  %14884 = vpow2.f32 %v12505_v63  ;;  %v18286_v7 = vpop.f32.mrb[32].mxu1 }
 0xa6b   :  { %v6686_v58 = vadd.f32 1.0, %v14879_v46  ;;  %v6500_v57 = vpop.f32.mrb[33].mxu1 }
 0xa6c   :  { %v14881_v31 = vpop.eup %14880  ;;  %v13699_v47 = vadd.f32 %v6500_v57, %v17432_v37  ;;  %v18289_v29 = vpop.f32.mrb[34].mxu1 }
 0xa6d   :  { %14886 = vrcp.f32 %v6686_v58  ;;  %v6688_v35 = vadd.f32 1.0, %v14881_v31  ;;  %v6504_v34 = vpop.f32.mrb[35].mxu1 }
 0xa6e   :  { %v12507_v28 = vmul.f32 -1.442695, %v13699_v47  ;;  %v13701_v38 = vadd.f32 %v6504_v34, %v17432_v37 }
 0xa6f   :  { %14888 = vrcp.f32 %v6688_v35 }
 0xa70   :  { %14890 = vpow2.f32 %v12507_v28  ;;  %v12509_v1 = vmul.f32 -1.442695, %v13701_v38 }
 0xa72   :  { %v14883_v14 = vpop.eup %14882  ;;  %14892 = vpow2.f32 %v12509_v1  ;;  %v18292_v39 = vpop.f32.mrb[36].mxu1 }
 0xa73   :  { %v6690_v61 = vadd.f32 1.0, %v14883_v14  ;;  %v6510_v44 = vpop.f32.mrb[37].mxu1 }
 0xa74   :  { %v14885_v36 = vpop.eup %14884  ;;  %v13703_v62 = vadd.f32 %v6510_v44, %v17432_v37  ;;  %v18295_v3 = vpop.f32.mrb[38].mxu1 }
 0xa75   :  { %14894 = vrcp.f32 %v6690_v61  ;;  %v6692_v45 = vadd.f32 1.0, %v14885_v36  ;;  %v6514_v63 = vpop.f32.mrb[39].mxu1 }
 0xa76   :  { %v12511_v58 = vmul.f32 -1.442695, %v13703_v62  ;;  %v13705_v31 = vadd.f32 %v6514_v63, %v17432_v37 }
 0xa77   :  { %v18297_v46 = vpop.eup %14886  ;;  %14896 = vrcp.f32 %v6692_v45 }
 0xa78   :  { %v6781_v57 = vmul.f32 2.0, %v18297_v46  ;;  %14898 = vpow2.f32 %v12511_v58  ;;  %v12513_v47 = vmul.f32 -1.442695, %v13705_v31 }
 0xa79   :  { %v18301_v35 = vpop.eup %14888 }
 0xa7a   :  { %v12530_v34 = vadd.f32 -1.0, %v6781_v57  ;;  %v6782_v28 = vmul.f32 2.0, %v18301_v35  ;;  %v14891_v38 = vpop.eup %14890  ;;  %14900 = vpow2.f32 %v12513_v47  ;;  %v18304_v14 = vpop.f32.mrb[40].mxu1 }
 0xa7b   :  { %v6694_v1 = vadd.f32 1.0, %v14891_v38  ;;  %v6520_v44 = vpop.f32.mrb[41].mxu1 }
 0xa7c   :  { %6845 = vrot.lane.b32.xlu0 %v12530_v34, %s15900_s5  ;;  %v12531_v61 = vadd.f32 -1.0, %v6782_v28  ;;  %v14893_v36 = vpop.eup %14892  ;;  %v13707_v62 = vadd.f32 %v6520_v44, %v17432_v37  ;;  %v18308_v63 = vpop.f32.mrb[42].mxu1 }
 0xa7d   :  { %14902 = vrcp.f32 %v6694_v1  ;;  %v6696_v45 = vadd.f32 1.0, %v14893_v36  ;;  %v6524_v31 = vpop.f32.mrb[43].mxu1 }
 0xa7e   :  { %6847 = vrot.lane.b32.xlu1 %v12531_v61, %s15900_s5  ;;  %v12515_v57 = vmul.f32 -1.442695, %v13707_v62  ;;  %v13709_v47 = vadd.f32 %v6524_v31, %v17432_v37 }
 0xa7f   :  { %v18311_v58 = vpop.eup %14894  ;;  %14904 = vrcp.f32 %v6696_v45 }
 0xa80   :  { %v6783_v34 = vmul.f32 2.0, %v18311_v58  ;;  %14906 = vpow2.f32 %v12515_v57  ;;  %v12517_v38 = vmul.f32 -1.442695, %v13709_v47 }
 0xa81   :  { %v18315_v28 = vpop.eup %14896 }
 0xa82   :  { %v12532_v1 = vadd.f32 -1.0, %v6783_v34  ;;  %v6784_v36 = vmul.f32 2.0, %v18315_v28  ;;  %v14899_v44 = vpop.eup %14898  ;;  %14908 = vpow2.f32 %v12517_v38  ;;  %v18318_v61 = vpop.f32.mrb[44].mxu1 }
 0xa83   :  { %v6698_v8 = vadd.f32 1.0, %v14899_v44  ;;  %v6530_v30 = vpop.f32.mrb[45].mxu1 }
 0xa84   :  { %6849 = vrot.lane.b32.xlu0 %v12532_v1, %s15900_s5  ;;  %v12533_v45 = vadd.f32 -1.0, %v6784_v36  ;;  %v14901_v62 = vpop.eup %14900  ;;  %v13711_v21 = vadd.f32 %v6530_v30, %v17432_v37  ;;  %v18322_v20 = vpop.f32.mrb[46].mxu1 }
 0xa85   :  { %14910 = vrcp.f32 %v6698_v8  ;;  %v6700_v31 = vadd.f32 1.0, %v14901_v62  ;;  %v6534_v57 = vpop.f32.mrb[47].mxu1 }
 0xa86   :  { %6851 = vrot.lane.b32.xlu1 %v12533_v45, %s15900_s5  ;;  %v12519_v34 = vmul.f32 -1.442695, %v13711_v21  ;;  %v13713_v38 = vadd.f32 %v6534_v57, %v17432_v37 }
 0xa87   :  { %v18325_v47 = vpop.eup %14902  ;;  %14912 = vrcp.f32 %v6700_v31 }
 0xa88   :  { %v6785_v1 = vmul.f32 2.0, %v18325_v47  ;;  %14914 = vpow2.f32 %v12519_v34  ;;  %v12521_v8 = vmul.f32 -1.442695, %v13713_v38 }
 0xa89   :  { %v18329_v36 = vpop.eup %14904 }
 0xa8a   :  { %v12534_v44 = vadd.f32 -1.0, %v6785_v1  ;;  %v6786_v30 = vmul.f32 2.0, %v18329_v36  ;;  %v14907_v62 = vpop.eup %14906  ;;  %14916 = vpow2.f32 %v12521_v8  ;;  %v18332_v45 = vpop.f32.mrb[48].mxu1 }
 0xa8b   :  { %v6702_v48 = vadd.f32 1.0, %v14907_v62  ;;  %v6540_v12 = vpop.f32.mrb[49].mxu1 }
 0xa8c   :  { %6853 = vrot.lane.b32.xlu0 %v12534_v44, %s15900_s5  ;;  %v12535_v31 = vadd.f32 -1.0, %v6786_v30  ;;  %v14909_v21 = vpop.eup %14908  ;;  %v13715_v55 = vadd.f32 %v6540_v12, %v17432_v37  ;;  %v18336_v13 = vpop.f32.mrb[50].mxu1 }
 0xa8d   :  { %14918 = vrcp.f32 %v6702_v48  ;;  %v6704_v57 = vadd.f32 1.0, %v14909_v21  ;;  %v6544_v38 = vpop.f32.mrb[51].mxu1 }
 0xa8e   :  { %6855 = vrot.lane.b32.xlu1 %v12535_v31, %s15900_s5  ;;  %v12523_v1 = vmul.f32 -1.442695, %v13715_v55  ;;  %v13717_v8 = vadd.f32 %v6544_v38, %v17432_v37 }
 0xa8f   :  { %v18339_v34 = vpop.eup %14910  ;;  %14920 = vrcp.f32 %v6704_v57 }
 0xa90   :  { %v6787_v44 = vmul.f32 2.0, %v18339_v34  ;;  %14922 = vpow2.f32 %v12523_v1  ;;  %v12525_v48 = vmul.f32 -1.442695, %v13717_v8 }
 0xa91   :  { %v18343_v30 = vpop.eup %14912 }
 0xa92   :  { %v12536_v62 = vadd.f32 -1.0, %v6787_v44  ;;  %v6788_v12 = vmul.f32 2.0, %v18343_v30  ;;  %v14915_v21 = vpop.eup %14914  ;;  %14924 = vpow2.f32 %v12525_v48  ;;  %v18346_v31 = vpop.f32.mrb[52].mxu1 }
 0xa93   :  { %v6706_v17 = vadd.f32 1.0, %v14915_v21  ;;  %v6550_v0 = vpop.f32.mrb[53].mxu1 }
 0xa94   :  { %6857 = vrot.lane.b32.xlu0 %v12536_v62, %s15900_s5  ;;  %v12537_v57 = vadd.f32 -1.0, %v6788_v12  ;;  %v14917_v55 = vpop.eup %14916  ;;  %v13719_v49 = vadd.f32 %v6550_v0, %v17432_v37  ;;  %v18350_v50 = vpop.f32.mrb[54].mxu1 }
 0xa95   :  { %14926 = vrcp.f32 %v6706_v17  ;;  %v6708_v38 = vadd.f32 1.0, %v14917_v55  ;;  %v6554_v1 = vpop.f32.mrb[55].mxu1 }
 0xa96   :  { %6859 = vrot.lane.b32.xlu1 %v12537_v57, %s15900_s5  ;;  %v12527_v44 = vmul.f32 -1.442695, %v13719_v49  ;;  %v13721_v48 = vadd.f32 %v6554_v1, %v17432_v37 }
 0xa97   :  { %v18353_v8 = vpop.eup %14918  ;;  %14928 = vrcp.f32 %v6708_v38 }
 0xa98   :  { %v6789_v62 = vmul.f32 2.0, %v18353_v8  ;;  %14930 = vpow2.f32 %v12527_v44  ;;  %v12529_v17 = vmul.f32 -1.442695, %v13721_v48 }
 0xa99   :  { %v18357_v12 = vpop.eup %14920 }
 0xa9a   :  { %v12538_v21 = vadd.f32 -1.0, %v6789_v62  ;;  %v6790_v0 = vmul.f32 2.0, %v18357_v12  ;;  %v14923_v55 = vpop.eup %14922  ;;  %14932 = vpow2.f32 %v12529_v17 }
 0xa9b   :  { %v6710_v43 = vadd.f32 1.0, %v14923_v55 }
 0xa9c   :  { %6861 = vrot.lane.b32.xlu0 %v12538_v21, %s15900_s5  ;;  %v12539_v57 = vadd.f32 -1.0, %v6790_v0  ;;  %v14925_v52 = vpop.eup %14924 }
 0xa9d   :  { %14934 = vrcp.f32 %v6710_v43  ;;  %v6712_v49 = vadd.f32 1.0, %v14925_v52 }
 0xa9e   :  { %6863 = vrot.lane.b32.xlu1 %v12539_v57, %s15900_s5 }
 0xa9f   :  { %v18362_v38 = vpop.eup %14926  ;;  %14936 = vrcp.f32 %v6712_v49 }
 0xaa0   :  { %v6791_v1 = vmul.f32 2.0, %v18362_v38 }
 0xaa1   :  { %v18365_v44 = vpop.eup %14928 }
 0xaa2   :  { %v12540_v48 = vadd.f32 -1.0, %v6791_v1  ;;  %v6792_v62 = vmul.f32 2.0, %v18365_v44  ;;  %v14931_v17 = vpop.eup %14930 }
 0xaa3   :  { %v6714_v55 = vadd.f32 1.0, %v14931_v17 }
 0xaa4   :  { %6865 = vrot.lane.b32.xlu0 %v12540_v48, %s15900_s5  ;;  %v12541_v21 = vadd.f32 -1.0, %v6792_v62  ;;  %v14933_v0 = vpop.eup %14932 }
 0xaa5   :  { %14938 = vrcp.f32 %v6714_v55  ;;  %v6716_v43 = vadd.f32 1.0, %v14933_v0 }
 0xaa6   :  { %6867 = vrot.lane.b32.xlu1 %v12541_v21, %s15900_s5 }
 0xaa7   :  { %v18370_v52 = vpop.eup %14934  ;;  %14940 = vrcp.f32 %v6716_v43 }
 0xaa8   :  { %v6793_v57 = vmul.f32 2.0, %v18370_v52 }
 0xaa9   :  { %v18373_v49 = vpop.eup %14936 }
 0xaaa   :  { %v12542_v1 = vadd.f32 -1.0, %v6793_v57  ;;  %v6794_v10 = vmul.f32 2.0, %v18373_v49  ;;  %v13690_v57 = vadd.f32 %v18274_v51, %v17033_v6  ;;  %v13698_v51 = vadd.f32 %v18286_v7, %v17033_v6 }
 0xaab   :  { %v13704_v7 = vadd.f32 %v18295_v3, %v17033_v6 }
 0xaac   :  { %6869 = vrot.lane.b32.xlu0 %v12542_v1, %s15900_s5  ;;  %v12543_v17 = vadd.f32 -1.0, %v6794_v10  ;;  %v13692_v10 = vadd.f32 %v18277_v19, %v17033_v6  ;;  %v12498_v1 = vmul.f32 -1.442695, %v13690_v57  ;;  %v13700_v19 = vadd.f32 %v18289_v29, %v17033_v6 }
 0xaad   :  { %v12512_v29 = vmul.f32 -1.442695, %v13704_v7 }
 0xaae   :  { %6871 = vrot.lane.b32.xlu1 %v12543_v17, %s15900_s5  ;;  %v12500_v17 = vmul.f32 -1.442695, %v13692_v10  ;;  %14942 = vpow2.f32 %v12498_v1  ;;  %v12506_v10 = vmul.f32 -1.442695, %v13698_v51  ;;  %v12508_v59 = vmul.f32 -1.442695, %v13700_v19 }
 0xaaf   :  { %v18378_v48 = vpop.eup %14938 }
 0xab0   :  { %v6795_v62 = vmul.f32 2.0, %v18378_v48  ;;  %14944 = vpow2.f32 %v12500_v17 }
 0xab1   :  { %v18381_v55 = vpop.eup %14940 }
 0xab2   :  { %v12544_v21 = vadd.f32 -1.0, %v6795_v62  ;;  %v6796_v0 = vmul.f32 2.0, %v18381_v55  ;;  %v13696_v62 = vadd.f32 %v18283_v2, %v17033_v6 }
 0xab4   :  { %6873 = vrot.lane.b32.xlu0 %v12544_v21, %s15900_s5  ;;  %v12545_v43 = vadd.f32 -1.0, %v6796_v0  ;;  %v12502_v21 = vmul.f32 -1.442695, %v13694_v53  ;;  %v12504_v0 = vmul.f32 -1.442695, %v13696_v62  ;;  %v13702_v53 = vadd.f32 %v18292_v39, %v17033_v6 }
 0xab5   :  { %v13708_v39 = vadd.f32 %v18308_v63, %v17033_v6  ;;  %v13710_v63 = vadd.f32 %v18318_v61, %v17033_v6 }
 0xab6   :  { %6875 = vrot.lane.b32.xlu1 %v12545_v43, %s15900_s5  ;;  %14946 = vpow2.f32 %v12502_v21  ;;  %v12510_v21 = vmul.f32 -1.442695, %v13702_v53 }
 0xab7   :  { %14948 = vpow2.f32 %v12504_v0 }
 0xab8   :  { %v14943_v43 = vpop.eup %14942 }
 0xab9   :  { %v6685_v57 = vadd.f32 1.0, %v14943_v43 }
 0xaba   :  { %v14945_v11 = vpop.eup %14944 }
 0xabb   :  { %v6687_v1 = vadd.f32 1.0, %v14945_v11  ;;  %14950 = vrcp.f32 %v6685_v57  ;;  %v13706_v11 = vadd.f32 %v18304_v14, %v17033_v6  ;;  %v12516_v14 = vmul.f32 -1.442695, %v13708_v39 }
 0xabc   :  { %14952 = vpow2.f32 %v12506_v10  ;;  %v12518_v39 = vmul.f32 -1.442695, %v13710_v63 }
 0xabd   :  { %14954 = vrcp.f32 %v6687_v1  ;;  %v12514_v1 = vmul.f32 -1.442695, %v13706_v11 }
 0xabe   :  { %14956 = vpow2.f32 %v12508_v59 }
 0xac0   :  { %v14947_v17 = vpop.eup %14946 }
 0xac1   :  { %v14949_v2 = vpop.eup %14948  ;;  %v6689_v62 = vadd.f32 1.0, %v14947_v17 }
 0xac2   :  { %v6691_v0 = vadd.f32 1.0, %v14949_v2 }
 0xac3   :  { %14958 = vrcp.f32 %v6689_v62 }
 0xac4   :  { %14960 = vpow2.f32 %v12510_v21  ;;  %v13712_v21 = vadd.f32 %v18322_v20, %v17033_v6 }
 0xac5   :  { %v18404_v43 = vpop.eup %14950  ;;  %14962 = vrcp.f32 %v6691_v0 }
 0xac6   :  { %v14953_v51 = vpop.eup %14952  ;;  %14964 = vpow2.f32 %v12512_v29 }
 0xac7   :  { %v18408_v57 = vpop.eup %14954  ;;  %v6693_v17 = vadd.f32 1.0, %v14953_v51  ;;  %14966 = vpow2.f32 %v12514_v1 }
 0xac8   :  { %v14957_v10 = vpop.eup %14956 }
 0xac9   :  { %v6695_v2 = vadd.f32 1.0, %v14957_v10  ;;  %14968 = vrcp.f32 %v6693_v17  ;;  %v12520_v10 = vmul.f32 -1.442695, %v13712_v21 }
 0xaca   :  { %14970 = vpow2.f32 %v12516_v14 }
 0xacb   :  { %14972 = vrcp.f32 %v6695_v2  ;;  %v13716_v2 = vadd.f32 %v18336_v13, %v17033_v6  ;;  %v13718_v13 = vadd.f32 %v18346_v31, %v17033_v6 }
 0xacc   :  { %14974 = vpow2.f32 %v12518_v39 }
 0xacd   :  { %v18416_v7 = vpop.eup %14958  ;;  %v12524_v39 = vmul.f32 -1.442695, %v13716_v2  ;;  %v12526_v2 = vmul.f32 -1.442695, %v13718_v13 }
 0xace   :  { %v14961_v62 = vpop.eup %14960 }
 0xacf   :  { %v18420_v29 = vpop.eup %14962 }
 0xad0   :  { %v14965_v51 = vpop.eup %14964 }
 0xad1   :  { %v6699_v1 = vadd.f32 1.0, %v14965_v51  ;;  %v14967_v20 = vpop.eup %14966 }
 0xad2   :  { %v6701_v21 = vadd.f32 1.0, %v14967_v20 }
 0xad3   :  { %v18428_v17 = vpop.eup %14968 }
 0xad4   :  { %v14971_v14 = vpop.eup %14970 }
 0xaee   :  { %v6846_v19 = vpop.permute.xlu0 %6845 }
 0xaef   :  { %v6893_v3 = vmul.f32 %v18404_v43, %v6846_v19 }
 0xaf0   :  { %v6848_v59 = vpop.permute.xlu1 %6847 }
 0xaf1   :  { %v6894_v53 = vmul.f32 %v18408_v57, %v6848_v59  ;;  %6925 = vrot.lane.b32.xlu0 %v6893_v3, %s15900_s5  ;;  %v6697_v3 = vadd.f32 1.0, %v14961_v62  ;;  %v13714_v59 = vadd.f32 %v18332_v45, %v17033_v6  ;;  %v18433_v62 = vpop.eup %14972  ;;  %v6703_v45 = vadd.f32 1.0, %v14971_v14 }
 0xaf3   :  { %6927 = vrot.lane.b32.xlu1 %v6894_v53, %s15900_s5  ;;  %14976 = vrcp.f32 %v6697_v3 }
 0xaf4   :  { %14978 = vpow2.f32 %v12520_v10 }
 0xaf5   :  { %14980 = vrcp.f32 %v6699_v1  ;;  %v13720_v1 = vadd.f32 %v18350_v50, %v17033_v6 }
 0xaf6   :  { %v6850_v0 = vpop.permute.xlu0 %6849  ;;  %14982 = vrcp.f32 %v6701_v21 }
 0xaf7   :  { %v6895_v11 = vmul.f32 %v18416_v7, %v6850_v0  ;;  %v12528_v21 = vmul.f32 -1.442695, %v13720_v1 }
 0xaf8   :  { %v6852_v19 = vpop.permute.xlu1 %6851 }
 0xaf9   :  { %v6896_v61 = vmul.f32 %v18420_v29, %v6852_v19  ;;  %6929 = vrot.lane.b32.xlu0 %v6895_v11, %s15900_s5  ;;  %v12522_v11 = vmul.f32 -1.442695, %v13714_v59  ;;  %v14975_v19 = vpop.eup %14974 }
 0xafb   :  { %6931 = vrot.lane.b32.xlu1 %v6896_v61, %s15900_s5  ;;  %14984 = vpow2.f32 %v12522_v11 }
 0xafc   :  { %14986 = vrcp.f32 %v6703_v45 }
 0xafd   :  { %v18440_v3 = vpop.eup %14976  ;;  %14988 = vpow2.f32 %v12524_v39 }
 0xafe   :  { %v6854_v53 = vpop.permute.xlu0 %6853  ;;  %v14979_v10 = vpop.eup %14978 }
 0xaff   :  { %v6897_v63 = vmul.f32 %v18428_v17, %v6854_v53  ;;  %v18445_v59 = vpop.eup %14980  ;;  %v6705_v53 = vadd.f32 1.0, %v14975_v19  ;;  %v6707_v31 = vadd.f32 1.0, %v14979_v10 }
 0xb00   :  { %v6856_v0 = vpop.permute.xlu1 %6855 }
 0xb01   :  { %v6898_v51 = vmul.f32 %v18433_v62, %v6856_v0  ;;  %6933 = vrot.lane.b32.xlu0 %v6897_v63, %s15900_s5  ;;  %14990 = vrcp.f32 %v6705_v53  ;;  %v18450_v0 = vpop.eup %14982 }
 0xb02   :  { %14992 = vpow2.f32 %v12526_v2 }
 0xb03   :  { %6935 = vrot.lane.b32.xlu1 %v6898_v51, %s15900_s5  ;;  %14994 = vrcp.f32 %v6707_v31 }
 0xb04   :  { %14996 = vpow2.f32 %v12528_v21 }
 0xb05   :  { %v14985_v50 = vpop.eup %14984 }
 0xb06   :  { %v6858_v61 = vpop.permute.xlu0 %6857  ;;  %v18452_v51 = vpop.eup %14986  ;;  %v6709_v13 = vadd.f32 1.0, %v14985_v50 }
 0xb07   :  { %v6899_v20 = vmul.f32 %v18440_v3, %v6858_v61  ;;  %v14989_v39 = vpop.eup %14988 }
 0xb08   :  { %v6860_v14 = vpop.permute.xlu1 %6859  ;;  %v6711_v10 = vadd.f32 1.0, %v14989_v39  ;;  %14998 = vrcp.f32 %v6709_v13 }
 0xb09   :  { %v6900_v63 = vmul.f32 %v18445_v59, %v6860_v14  ;;  %6937 = vrot.lane.b32.xlu0 %v6899_v20, %s15900_s5 }
 0xb0a   :  { %15000 = vrcp.f32 %v6711_v10 }
 0xb0b   :  { %6939 = vrot.lane.b32.xlu1 %v6900_v63, %s15900_s5  ;;  %v18458_v1 = vpop.eup %14990 }
 0xb0c   :  { %v14993_v20 = vpop.eup %14992 }
 0xb0d   :  { %v18460_v14 = vpop.eup %14994  ;;  %v6713_v21 = vadd.f32 1.0, %v14993_v20 }
 0xb0e   :  { %v6862_v11 = vpop.permute.xlu0 %6861  ;;  %v14997_v63 = vpop.eup %14996 }
 0xb0f   :  { %v6901_v45 = vmul.f32 %v18450_v0, %v6862_v11  ;;  %v6715_v11 = vadd.f32 1.0, %v14997_v63  ;;  %15002 = vrcp.f32 %v6713_v21 }
 0xb10   :  { %v6864_v19 = vpop.permute.xlu1 %6863 }
 0xb11   :  { %v6902_v61 = vmul.f32 %v18452_v51, %v6864_v19  ;;  %6941 = vrot.lane.b32.xlu0 %v6901_v45, %s15900_s5  ;;  %15004 = vrcp.f32 %v6715_v11 }
 0xb12   :  { %v18466_v45 = vpop.eup %14998 }
 0xb13   :  { %6943 = vrot.lane.b32.xlu1 %v6902_v61, %s15900_s5 }
 0xb14   :  { %v18469_v13 = vpop.eup %15000 }
 0xb16   :  { %v6866_v53 = vpop.permute.xlu0 %6865 }
 0xb17   :  { %v6903_v2 = vmul.f32 %v18458_v1, %v6866_v53 }
 0xb18   :  { %v6868_v31 = vpop.permute.xlu1 %6867 }
 0xb19   :  { %v6904_v50 = vmul.f32 %v18460_v14, %v6868_v31  ;;  %6945 = vrot.lane.b32.xlu0 %v6903_v2, %s15900_s5  ;;  %v18474_v20 = vpop.eup %15002 }
 0xb1b   :  { %6947 = vrot.lane.b32.xlu1 %v6904_v50, %s15900_s5  ;;  %v18477_v63 = vpop.eup %15004  ;;  %v6813_v50 = vmul.f32 %v18404_v43, %v18076_v4  ;;  %v6816_v4 = vmul.f32 %v18420_v29, %v18091_v40  ;;  %v6818_v40 = vmul.f32 %v18433_v62, %v18103_v5  ;;  %v6820_v5 = vmul.f32 %v18445_v59, %v18115_v33 }
 0xb1c   :  { %v6822_v33 = vmul.f32 %v18452_v51, %v18127_v25  ;;  %v6824_v25 = vmul.f32 %v18460_v14, %v18139_v56  ;;  %v6826_v56 = vmul.f32 %v18469_v13, %v18151_v41  ;;  %v6828_v41 = vmul.f32 %v18477_v63, %v18163_v15 }
 0xb1e   :  { %v6870_v39 = vpop.permute.xlu0 %6869 }
 0xb1f   :  { %v6905_v19 = vmul.f32 %v18466_v45, %v6870_v39 }
 0xb20   :  { %v6872_v61 = vpop.permute.xlu1 %6871 }
 0xb21   :  { %v6906_v10 = vmul.f32 %v18469_v13, %v6872_v61  ;;  %6949 = vrot.lane.b32.xlu0 %v6905_v19, %s15900_s5  ;;  %v6814_v19 = vmul.f32 %v18408_v57, %v18081_v16 }
 0xb23   :  { %6951 = vrot.lane.b32.xlu1 %v6906_v10, %s15900_s5 }
 0xb26   :  { %v6874_v53 = vpop.permute.xlu0 %6873 }
 0xb27   :  { %v6907_v2 = vmul.f32 %v18474_v20, %v6874_v53  ;;  %v6815_v53 = vmul.f32 %v18416_v7, %v18086_v9  ;;  %v6817_v9 = vmul.f32 %v18428_v17, %v18098_v42  ;;  %v6819_v42 = vmul.f32 %v18440_v3, %v18110_v60 }
 0xb28   :  { %v6876_v31 = vpop.permute.xlu1 %6875  ;;  %v6821_v60 = vmul.f32 %v18450_v0, %v18122_v22  ;;  %v6823_v22 = vmul.f32 %v18458_v1, %v18134_v54  ;;  %v6825_v54 = vmul.f32 %v18466_v45, %v18146_v27  ;;  %v6827_v27 = vmul.f32 %v18474_v20, %v18158_v24 }
 0xb29   :  { %v6908_v21 = vmul.f32 %v18477_v63, %v6876_v31  ;;  %6953 = vrot.lane.b32.xlu0 %v6907_v2, %s15900_s5 }
 0xb2b   :  { %6955 = vrot.lane.b32.xlu1 %v6908_v21, %s15900_s5 }
 0xb63   :  { %v6926_v11 = vpop.permute.xlu0 %6925 }
 0xb64   :  { %v18484_v39 = vadd.f32 %v6926_v11, %v6813_v50 }
 0xb65   :  { %v6928_v61 = vpop.permute.xlu1 %6927 }
 0xb66   :  { %15006 = vtanh.f32 %v18484_v39  ;;  %v18489_v10 = vadd.f32 %v6928_v61, %v6814_v19 }
 0xb68   :  { %15008 = vtanh.f32 %v18489_v10 }
 0xb6b   :  { %v6930_v2 = vpop.permute.xlu0 %6929 }
 0xb6c   :  { %v18494_v31 = vadd.f32 %v6930_v2, %v6815_v53 }
 0xb6d   :  { %v6932_v43 = vpop.permute.xlu1 %6931 }
 0xb6e   :  { %15010 = vtanh.f32 %v18494_v31  ;;  %v18499_v16 = vadd.f32 %v6932_v43, %v6816_v4 }
 0xb70   :  { %v15007_v57 = vpop.eup %15006  ;;  %15012 = vtanh.f32 %v18499_v16 }
 0xb71   :  { %7021 = vrot.lane.b32.xlu0 %v15007_v57, %s15900_s5 }
 0xb72   :  { %v15009_v21 = vpop.eup %15008 }
 0xb73   :  { %7023 = vrot.lane.b32.xlu1 %v15009_v21, %s15900_s5  ;;  %v6934_v7 = vpop.permute.xlu0 %6933 }
 0xb74   :  { %v18506_v50 = vadd.f32 %v6934_v7, %v6817_v9 }
 0xb75   :  { %v6936_v29 = vpop.permute.xlu1 %6935 }
 0xb76   :  { %15014 = vtanh.f32 %v18506_v50  ;;  %v18511_v11 = vadd.f32 %v6936_v29, %v6818_v40 }
 0xb78   :  { %v15011_v19 = vpop.eup %15010  ;;  %15016 = vtanh.f32 %v18511_v11 }
 0xb79   :  { %7025 = vrot.lane.b32.xlu0 %v15011_v19, %s15900_s5 }
 0xb7a   :  { %v15013_v61 = vpop.eup %15012 }
 0xb7b   :  { %7027 = vrot.lane.b32.xlu1 %v15013_v61, %s15900_s5  ;;  %v6938_v17 = vpop.permute.xlu0 %6937 }
 0xb7c   :  { %v18518_v53 = vadd.f32 %v6938_v17, %v6819_v42 }
 0xb7d   :  { %v6940_v62 = vpop.permute.xlu1 %6939 }
 0xb7e   :  { %15018 = vtanh.f32 %v18518_v53  ;;  %v18523_v2 = vadd.f32 %v6940_v62, %v6820_v5 }
 0xb80   :  { %v15015_v4 = vpop.eup %15014  ;;  %15020 = vtanh.f32 %v18523_v2 }
 0xb81   :  { %7029 = vrot.lane.b32.xlu0 %v15015_v4, %s15900_s5 }
 0xb82   :  { %v15017_v43 = vpop.eup %15016 }
 0xb83   :  { %7031 = vrot.lane.b32.xlu1 %v15017_v43, %s15900_s5  ;;  %v6942_v3 = vpop.permute.xlu0 %6941 }
 0xb84   :  { %v18530_v57 = vadd.f32 %v6942_v3, %v6821_v60 }
 0xb85   :  { %v6944_v59 = vpop.permute.xlu1 %6943 }
 0xb86   :  { %15022 = vtanh.f32 %v18530_v57  ;;  %v18535_v21 = vadd.f32 %v6944_v59, %v6822_v33 }
 0xb88   :  { %v15019_v9 = vpop.eup %15018  ;;  %15024 = vtanh.f32 %v18535_v21 }
 0xb89   :  { %7033 = vrot.lane.b32.xlu0 %v15019_v9, %s15900_s5 }
 0xb8a   :  { %v15021_v7 = vpop.eup %15020 }
 0xb8b   :  { %7035 = vrot.lane.b32.xlu1 %v15021_v7, %s15900_s5  ;;  %v6946_v0 = vpop.permute.xlu0 %6945 }
 0xb8c   :  { %v18542_v40 = vadd.f32 %v6946_v0, %v6823_v22  ;;  %v15859_v22 = vld [vmem:[%s21565_s8] ss:$8 sps:$4 sm:$0xff]  }
 0xb8d   :  { %v6948_v51 = vpop.permute.xlu1 %6947 }
 0xb8e   :  { %15026 = vtanh.f32 %v18542_v40  ;;  %v18547_v29 = vadd.f32 %v6948_v51, %v6824_v25  ;;  %v15861_v51 = vld [vmem:[%s21565_s8 + $0x10] ss:$8 sps:$4 sm:$0xff]  }
 0xb90   :  { %v15023_v19 = vpop.eup %15022  ;;  %15028 = vtanh.f32 %v18547_v29 }
 0xb91   :  { %7037 = vrot.lane.b32.xlu0 %v15023_v19, %s15900_s5 }
 0xb92   :  { %v15025_v61 = vpop.eup %15024 }
 0xb93   :  { %7039 = vrot.lane.b32.xlu1 %v15025_v61, %s15900_s5  ;;  %v6950_v1 = vpop.permute.xlu0 %6949  ;;  %v15862_v61 = vld [vmem:[%s21565_s8 + $0x24] ss:$8 sps:$4 sm:$0xff]  }
 0xb94   :  { %v18554_v42 = vadd.f32 %v6950_v1, %v6825_v54  ;;  %v15864_v54 = vld [vmem:[%s21565_s8 + $0x34] ss:$8 sps:$4 sm:$0xff]  }
 0xb95   :  { %v6952_v14 = vpop.permute.xlu1 %6951 }
 0xb96   :  { %15030 = vtanh.f32 %v18554_v42  ;;  %v18559_v17 = vadd.f32 %v6952_v14, %v6826_v56 }
 0xb98   :  { %v15027_v5 = vpop.eup %15026  ;;  %15032 = vtanh.f32 %v18559_v17 }
 0xb99   :  { %7041 = vrot.lane.b32.xlu0 %v15027_v5, %s15900_s5  ;;  %v15865_v5 = vld [vmem:[%s21565_s8 + $0x30] ss:$8 sps:$4 sm:$0xff]  }
 0xb9a   :  { %v15029_v62 = vpop.eup %15028 }
 0xb9b   :  { %7043 = vrot.lane.b32.xlu1 %v15029_v62, %s15900_s5  ;;  %v6954_v45 = vpop.permute.xlu0 %6953  ;;  %v15866_v62 = vld [vmem:[%s21565_s8 + $0x4] ss:$8 sps:$4 sm:$0xff]  }
 0xb9c   :  { %v18566_v4 = vadd.f32 %v6954_v45, %v6827_v27 }
 0xb9d   :  { %v6956_v13 = vpop.permute.xlu1 %6955 }
 0xb9e   :  { %15034 = vtanh.f32 %v18566_v4  ;;  %v18571_v43 = vadd.f32 %v6956_v13, %v6828_v41 }
 0xba0   :  { %v15031_v60 = vpop.eup %15030  ;;  %15036 = vtanh.f32 %v18571_v43 }
 0xba1   :  { %7045 = vrot.lane.b32.xlu0 %v15031_v60, %s15900_s5 }
 0xba2   :  { %v15033_v3 = vpop.eup %15032 }
 0xba3   :  { %7047 = vrot.lane.b32.xlu1 %v15033_v3, %s15900_s5 }
 0xba8   :  { %v15035_v24 = vpop.eup %15034 }
 0xba9   :  { %7049 = vrot.lane.b32.xlu0 %v15035_v24, %s15900_s5 }
 0xbaa   :  { %v15037_v20 = vpop.eup %15036 }
 0xbab   :  { %7051 = vrot.lane.b32.xlu1 %v15037_v20, %s15900_s5 }
 0xbe3   :  { %v7022_v15 = vpop.permute.xlu0 %7021 }
 0xbe4   :  { %v18579_v33 = vmul.f32 %v18297_v46, %v7022_v15  ;;  %v15860_v46 = vld [vmem:[%s21565_s8 + $0x14] ss:$8 sps:$4 sm:$0xff]  }
 0xbe5   :  { %v7024_v63 = vpop.permute.xlu1 %7023 }
 0xbe6   :  { %21742 = vst [vmem:[#allocation32_spill] sm:$0xff] %v18579_v33  ;;  %v18582_v59 = vmul.f32 %v18301_v35, %v7024_v63 }
 0xbe8   :  { %21743 = vst [vmem:[#allocation33_spill] sm:$0xff] %v18582_v59  ;;  %v7229_v9 = vpack.c.bf16 %v18582_v59, %v18579_v33 }
 0xbea   :  { %12546 = vmatmul.mubr.msk.bf16.vlgmr.msra.gmra.mrb[56].mxu1 %vm4806_vm1, %v7229_v9 }
 0xbeb   :  { %v7026_v7 = vpop.permute.xlu0 %7025  ;;  %7303 = vmatprep.mubr.bf16.mxu1 %v21727_v23  ;;  %8079 = vmatpush1.bf16.msra.mxu1 %v15859_v22 }
 0xbec   :  { %8080 = vmatprep.subr.bf16.mxu1 %v15860_v46  ;;  %v18595_v0 = vmul.f32 %v18311_v58, %v7026_v7  ;;  %v15863_v58 = vld [vmem:[%s21565_s8 + $0x20] ss:$8 sps:$4 sm:$0xff]  }
 0xbed   :  { %v7028_v35 = vpop.permute.xlu1 %7027 }
 0xbee   :  { %21744 = vst [vmem:[#allocation34_spill] sm:$0xff] %v18595_v0  ;;  %v18598_v25 = vmul.f32 %v18315_v28, %v7028_v35 }
 0xbef   :  { %8081 = vmatpush1.bf16.msra.mxu1 %v15861_v51 }
 0xbf0   :  { %21745 = vst [vmem:[#allocation35_spill] sm:$0xff] %v18598_v25  ;;  %v7230_v19 = vpack.c.bf16 %v18598_v25, %v18595_v0  ;;  %8082 = vmatprep.subr.bf16.mxu1 %v15862_v61 }
 0xbf2   :  { %12547 = vmatmul.mubr.msk.bf16.gmra.mrb[60].mxu1 %vm4806_vm1, %v7230_v19 }
 0xbf3   :  { %7313 = vmatprep.mubr.bf16.mxu1 %v21727_v23  ;;  %8083 = vmatpush1.bf16.msra.mxu1 %v15863_v58  ;;  %v7030_v28 = vpop.permute.xlu0 %7029 }
 0xbf4   :  { %8084 = vmatprep.subr.bf16.mxu1 %v15864_v54  ;;  %v18617_v56 = vmul.f32 %v18325_v47, %v7030_v28 }
 0xbf5   :  { %v7032_v1 = vpop.permute.xlu1 %7031 }
 0xbf6   :  { %21746 = vst [vmem:[#allocation36_spill] sm:$0xff] %v18617_v56  ;;  %v18620_v14 = vmul.f32 %v18329_v36, %v7032_v1 }
 0xbf7   :  { %8085 = vmatpush1.bf16.msra.mxu1 %v15865_v5 }
 0xbf8   :  { %21747 = vst [vmem:[#allocation37_spill] sm:$0xff] %v18620_v14  ;;  %8895 = vmatprep.subr.bf16.mxu1 %v15866_v62  ;;  %v7231_v27 = vpack.c.bf16 %v18620_v14, %v18617_v56 }
 0xbfa   :  { %12548 = vmatmul.mubr.msk.bf16.gmra.mrb[64].mxu1 %vm4806_vm1, %v7231_v27 }
 0xbfb   :  { %v7034_v47 = vpop.permute.xlu0 %7033  ;;  %7323 = vmatprep.mubr.bf16.mxu1 %v21727_v23 }
 0xbfc   :  { %v18633_v45 = vmul.f32 %v18339_v34, %v7034_v47 }
 0xbfd   :  { %v7036_v36 = vpop.permute.xlu1 %7035 }
 0xbfe   :  { %21748 = vst [vmem:[#allocation38_spill] sm:$0xff] %v18633_v45  ;;  %v18636_v41 = vmul.f32 %v18343_v30, %v7036_v36 }
 0xc00   :  { %21749 = vst [vmem:[#allocation39_spill] sm:$0xff] %v18636_v41  ;;  %v7232_v13 = vpack.c.bf16 %v18636_v41, %v18633_v45 }
 0xc02   :  { %12549 = vmatmul.mubr.msk.bf16.gmra.mrb[68].mxu1 %vm4806_vm1, %v7232_v13 }
 0xc03   :  { %7333 = vmatprep.mubr.bf16.mxu1 %v21727_v23  ;;  %v7038_v60 = vpop.permute.xlu0 %7037 }
 0xc04   :  { %v18643_v24 = vmul.f32 %v18353_v8, %v7038_v60 }
 0xc05   :  { %v7040_v3 = vpop.permute.xlu1 %7039 }
 0xc06   :  { %21750 = vst [vmem:[#allocation40_spill] sm:$0xff] %v18643_v24  ;;  %v18646_v20 = vmul.f32 %v18357_v12, %v7040_v3 }
 0xc08   :  { %21751 = vst [vmem:[#allocation41_spill] sm:$0xff] %v18646_v20  ;;  %v7233_v34 = vpack.c.bf16 %v18646_v20, %v18643_v24 }
 0xc0a   :  { %12550 = vmatmul.mubr.msk.bf16.gmra.mrb[72].mxu1 %vm4806_vm1, %v7233_v34 }
 0xc0b   :  { %v7042_v30 = vpop.permute.xlu0 %7041  ;;  %7343 = vmatprep.mubr.bf16.mxu1 %v21727_v23 }
 0xc0c   :  { %v18653_v63 = vmul.f32 %v18362_v38, %v7042_v30 }
 0xc0d   :  { %v7044_v15 = vpop.permute.xlu1 %7043 }
 0xc0e   :  { %21752 = vst [vmem:[#allocation42_spill] sm:$0xff] %v18653_v63  ;;  %v18656_v9 = vmul.f32 %v18365_v44, %v7044_v15 }
 0xc10   :  { %21753 = vst [vmem:[#allocation43_spill] sm:$0xff] %v18656_v9  ;;  %v7234_v8 = vpack.c.bf16 %v18656_v9, %v18653_v63 }
 0xc12   :  { %12551 = vmatmul.mubr.msk.bf16.gmra.mrb[76].mxu1 %vm4806_vm1, %v7234_v8 }
 0xc13   :  { %7353 = vmatprep.mubr.bf16.mxu1 %v21727_v23  ;;  %v7046_v12 = vpop.permute.xlu0 %7045 }
 0xc14   :  { %v18663_v22 = vmul.f32 %v18370_v52, %v7046_v12 }
 0xc15   :  { %v7048_v7 = vpop.permute.xlu1 %7047 }
 0xc16   :  { %21754 = vst [vmem:[#allocation44_spill] sm:$0xff] %v18663_v22  ;;  %v18666_v46 = vmul.f32 %v18373_v49, %v7048_v7 }
 0xc18   :  { %21755 = vst [vmem:[#allocation45_spill] sm:$0xff] %v18666_v46  ;;  %v7235_v38 = vpack.c.bf16 %v18666_v46, %v18663_v22 }
 0xc1a   :  { %12552 = vmatmul.mubr.msk.bf16.gmra.mrb[80].mxu1 %vm4806_vm1, %v7235_v38 }
 0xc1b   :  { %v7050_v44 = vpop.permute.xlu0 %7049  ;;  %7363 = vmatprep.mubr.bf16.mxu1 %v21727_v23 }
 0xc1c   :  { %v18673_v51 = vmul.f32 %v18378_v48, %v7050_v44 }
 0xc1d   :  { %v7052_v35 = vpop.permute.xlu1 %7051 }
 0xc1e   :  { %21756 = vst [vmem:[#allocation46_spill] sm:$0xff] %v18673_v51  ;;  %v18676_v19 = vmul.f32 %v18381_v55, %v7052_v35 }
 0xc20   :  { %21757 = vst [vmem:[#allocation47_spill] sm:$0xff] %v18676_v19  ;;  %v7236_v52 = vpack.c.bf16 %v18676_v19, %v18673_v51 }
 0xc22   :  { %12553 = vmatmul.mubr.msk.bf16.gmra.mrb[84].mxu1 %vm4806_vm1, %v7236_v52 }
 0xc23   :  { %8110 = vmatprep.mubr.bf16.mxu1 %v21727_v23 }
 0xcbd   :  { %v18682_v49 = vpop.f32.mrb[56].mxu1 }
 0xcbe   :  { %v7297_v61 = vpop.f32.mrb[57].mxu1 }
 0xcbf   :  { %v13723_v58 = vadd.f32 %v7297_v61, %v17432_v37  ;;  %v18685_v28 = vpop.f32.mrb[58].mxu1 }
 0xcc0   :  { %v7301_v54 = vpop.f32.mrb[59].mxu1 }
 0xcc1   :  { %v12555_v48 = vmul.f32 -1.442695, %v13723_v58  ;;  %v13725_v1 = vadd.f32 %v7301_v54, %v17432_v37 }
 0xcc3   :  { %15038 = vpow2.f32 %v12555_v48  ;;  %v12557_v55 = vmul.f32 -1.442695, %v13725_v1 }
 0xcc5   :  { %15040 = vpow2.f32 %v12557_v55  ;;  %v18688_v5 = vpop.f32.mrb[60].mxu1 }
 0xcc6   :  { %v7307_v62 = vpop.f32.mrb[61].mxu1  ;;  %v13726_v20 = vadd.f32 %v18688_v5, %v17033_v6 }
 0xcc7   :  { %v13727_v27 = vadd.f32 %v7307_v62, %v17432_v37  ;;  %v18691_v47 = vpop.f32.mrb[62].mxu1 }
 0xcc8   :  { %v7311_v36 = vpop.f32.mrb[63].mxu1 }
 0xcc9   :  { %v12559_v13 = vmul.f32 -1.442695, %v13727_v27  ;;  %v13729_v60 = vadd.f32 %v7311_v36, %v17432_v37 }
 0xccb   :  { %15042 = vpow2.f32 %v12559_v13  ;;  %v12561_v3 = vmul.f32 -1.442695, %v13729_v60 }
 0xccd   :  { %v15039_v34 = vpop.eup %15038  ;;  %15044 = vpow2.f32 %v12561_v3  ;;  %v18694_v15 = vpop.f32.mrb[64].mxu1 }
 0xcce   :  { %v7503_v30 = vadd.f32 1.0, %v15039_v34  ;;  %v7317_v12 = vpop.f32.mrb[65].mxu1 }
 0xccf   :  { %v15041_v8 = vpop.eup %15040  ;;  %v13731_v38 = vadd.f32 %v7317_v12, %v17432_v37  ;;  %v18697_v44 = vpop.f32.mrb[66].mxu1 }
 0xcd0   :  { %15046 = vrcp.f32 %v7503_v30  ;;  %v7505_v7 = vadd.f32 1.0, %v15041_v8  ;;  %v7321_v35 = vpop.f32.mrb[67].mxu1 }
 0xcd1   :  { %v12563_v52 = vmul.f32 -1.442695, %v13731_v38  ;;  %v13733_v61 = vadd.f32 %v7321_v35, %v17432_v37 }
 0xcd2   :  { %15048 = vrcp.f32 %v7505_v7 }
 0xcd3   :  { %15050 = vpow2.f32 %v12563_v52  ;;  %v12565_v58 = vmul.f32 -1.442695, %v13733_v61 }
 0xcd5   :  { %v15043_v54 = vpop.eup %15042  ;;  %15052 = vpow2.f32 %v12565_v58  ;;  %v18700_v1 = vpop.f32.mrb[68].mxu1 }
 0xcd6   :  { %v7507_v48 = vadd.f32 1.0, %v15043_v54  ;;  %v7327_v62 = vpop.f32.mrb[69].mxu1 }
 0xcd7   :  { %v15045_v55 = vpop.eup %15044  ;;  %v13735_v36 = vadd.f32 %v7327_v62, %v17432_v37  ;;  %v18703_v13 = vpop.f32.mrb[70].mxu1 }
 0xcd8   :  { %15054 = vrcp.f32 %v7507_v48  ;;  %v7509_v27 = vadd.f32 1.0, %v15045_v55  ;;  %v7331_v60 = vpop.f32.mrb[71].mxu1 }
 0xcd9   :  { %v12567_v34 = vmul.f32 -1.442695, %v13735_v36  ;;  %v13737_v30 = vadd.f32 %v7331_v60, %v17432_v37 }
 0xcda   :  { %v18705_v3 = vpop.eup %15046  ;;  %15056 = vrcp.f32 %v7509_v27 }
 0xcdb   :  { %v7598_v8 = vmul.f32 2.0, %v18705_v3  ;;  %15058 = vpow2.f32 %v12567_v34  ;;  %v12569_v7 = vmul.f32 -1.442695, %v13737_v30 }
 0xcdc   :  { %v18709_v12 = vpop.eup %15048 }
 0xcdd   :  { %v12586_v38 = vadd.f32 -1.0, %v7598_v8  ;;  %v7599_v35 = vmul.f32 2.0, %v18709_v12  ;;  %v15051_v52 = vpop.eup %15050  ;;  %15060 = vpow2.f32 %v12569_v7  ;;  %v18712_v58 = vpop.f32.mrb[72].mxu1 }
 0xcde   :  { %v7511_v61 = vadd.f32 1.0, %v15051_v52  ;;  %v7337_v55 = vpop.f32.mrb[73].mxu1 }
 0xcdf   :  { %7662 = vrot.lane.b32.xlu0 %v12586_v38, %s15900_s5  ;;  %v12587_v54 = vadd.f32 -1.0, %v7599_v35  ;;  %v15053_v48 = vpop.eup %15052  ;;  %v13739_v27 = vadd.f32 %v7337_v55, %v17432_v37  ;;  %v18716_v36 = vpop.f32.mrb[74].mxu1 }
 0xce0   :  { %15062 = vrcp.f32 %v7511_v61  ;;  %v7513_v62 = vadd.f32 1.0, %v15053_v48  ;;  %v7341_v34 = vpop.f32.mrb[75].mxu1 }
 0xce1   :  { %7664 = vrot.lane.b32.xlu1 %v12587_v54, %s15900_s5  ;;  %v12571_v30 = vmul.f32 -1.442695, %v13739_v27  ;;  %v13741_v8 = vadd.f32 %v7341_v34, %v17432_v37 }
 0xce2   :  { %v18719_v60 = vpop.eup %15054  ;;  %15064 = vrcp.f32 %v7513_v62 }
 0xce3   :  { %v7600_v7 = vmul.f32 2.0, %v18719_v60  ;;  %15066 = vpow2.f32 %v12571_v30  ;;  %v12573_v35 = vmul.f32 -1.442695, %v13741_v8 }
 0xce4   :  { %v18723_v38 = vpop.eup %15056 }
 0xce5   :  { %v12588_v52 = vadd.f32 -1.0, %v7600_v7  ;;  %v7601_v61 = vmul.f32 2.0, %v18723_v38  ;;  %v15059_v48 = vpop.eup %15058  ;;  %15068 = vpow2.f32 %v12573_v35  ;;  %v18726_v54 = vpop.f32.mrb[76].mxu1 }
 0xce6   :  { %v7515_v55 = vadd.f32 1.0, %v15059_v48  ;;  %v7347_v45 = vpop.f32.mrb[77].mxu1 }
 0xce7   :  { %7666 = vrot.lane.b32.xlu0 %v12588_v52, %s15900_s5  ;;  %v12589_v62 = vadd.f32 -1.0, %v7601_v61  ;;  %v15061_v27 = vpop.eup %15060  ;;  %v13743_v41 = vadd.f32 %v7347_v45, %v17432_v37  ;;  %v18730_v56 = vpop.f32.mrb[78].mxu1 }
 0xce8   :  { %15070 = vrcp.f32 %v7515_v55  ;;  %v7517_v34 = vadd.f32 1.0, %v15061_v27  ;;  %v7351_v30 = vpop.f32.mrb[79].mxu1 }
 0xce9   :  { %7668 = vrot.lane.b32.xlu1 %v12589_v62, %s15900_s5  ;;  %v12575_v7 = vmul.f32 -1.442695, %v13743_v41  ;;  %v13745_v35 = vadd.f32 %v7351_v30, %v17432_v37 }
 0xcea   :  { %v18733_v8 = vpop.eup %15062  ;;  %15072 = vrcp.f32 %v7517_v34 }
 0xceb   :  { %v7602_v52 = vmul.f32 2.0, %v18733_v8  ;;  %15074 = vpow2.f32 %v12575_v7  ;;  %v12577_v48 = vmul.f32 -1.442695, %v13745_v35 }
 0xcec   :  { %v18737_v61 = vpop.eup %15064 }
 0xced   :  { %v12590_v55 = vadd.f32 -1.0, %v7602_v52  ;;  %v7603_v45 = vmul.f32 2.0, %v18737_v61  ;;  %v15067_v27 = vpop.eup %15066  ;;  %15076 = vpow2.f32 %v12577_v48  ;;  %v18740_v62 = vpop.f32.mrb[80].mxu1 }
 0xcee   :  { %v7519_v14 = vadd.f32 1.0, %v15067_v27  ;;  %v7357_v0 = vpop.f32.mrb[81].mxu1 }
 0xcef   :  { %7670 = vrot.lane.b32.xlu0 %v12590_v55, %s15900_s5  ;;  %v12591_v34 = vadd.f32 -1.0, %v7603_v45  ;;  %v15069_v41 = vpop.eup %15068  ;;  %v13747_v25 = vadd.f32 %v7357_v0, %v17432_v37  ;;  %v18744_v33 = vpop.f32.mrb[82].mxu1 }
 0xcf0   :  { %15078 = vrcp.f32 %v7519_v14  ;;  %v7521_v30 = vadd.f32 1.0, %v15069_v41  ;;  %v7361_v35 = vpop.f32.mrb[83].mxu1 }
 0xcf1   :  { %7672 = vrot.lane.b32.xlu1 %v12591_v34, %s15900_s5  ;;  %v12579_v52 = vmul.f32 -1.442695, %v13747_v25  ;;  %v13749_v48 = vadd.f32 %v7361_v35, %v17432_v37 }
 0xcf2   :  { %v18747_v7 = vpop.eup %15070  ;;  %15080 = vrcp.f32 %v7521_v30 }
 0xcf3   :  { %v7604_v55 = vmul.f32 2.0, %v18747_v7  ;;  %15082 = vpow2.f32 %v12579_v52  ;;  %v12581_v14 = vmul.f32 -1.442695, %v13749_v48 }
 0xcf4   :  { %v18751_v45 = vpop.eup %15072 }
 0xcf5   :  { %v12592_v27 = vadd.f32 -1.0, %v7604_v55  ;;  %v7605_v0 = vmul.f32 2.0, %v18751_v45  ;;  %v15075_v41 = vpop.eup %15074  ;;  %15084 = vpow2.f32 %v12581_v14  ;;  %v18754_v34 = vpop.f32.mrb[84].mxu1 }
 0xcf6   :  { %v7523_v59 = vadd.f32 1.0, %v15075_v41  ;;  %v7367_v51 = vpop.f32.mrb[85].mxu1 }
 0xcf7   :  { %7674 = vrot.lane.b32.xlu0 %v12592_v27, %s15900_s5  ;;  %v12593_v30 = vadd.f32 -1.0, %v7605_v0  ;;  %v15077_v25 = vpop.eup %15076  ;;  %v13751_v19 = vadd.f32 %v7367_v51, %v17432_v37  ;;  %v18758_v22 = vpop.f32.mrb[86].mxu1 }
 0xcf8   :  { %15086 = vrcp.f32 %v7523_v59  ;;  %v7525_v35 = vadd.f32 1.0, %v15077_v25  ;;  %v7371_v52 = vpop.f32.mrb[87].mxu1 }
 0xcf9   :  { %7676 = vrot.lane.b32.xlu1 %v12593_v30, %s15900_s5  ;;  %v12583_v55 = vmul.f32 -1.442695, %v13751_v19  ;;  %v13753_v14 = vadd.f32 %v7371_v52, %v17432_v37 }
 0xcfa   :  { %v18761_v48 = vpop.eup %15078  ;;  %15088 = vrcp.f32 %v7525_v35 }
 0xcfb   :  { %v7606_v27 = vmul.f32 2.0, %v18761_v48  ;;  %15090 = vpow2.f32 %v12583_v55  ;;  %v12585_v59 = vmul.f32 -1.442695, %v13753_v14 }
 0xcfc   :  { %v18765_v0 = vpop.eup %15080 }
 0xcfd   :  { %v12594_v41 = vadd.f32 -1.0, %v7606_v27  ;;  %v7607_v51 = vmul.f32 2.0, %v18765_v0  ;;  %v15083_v25 = vpop.eup %15082  ;;  %15092 = vpow2.f32 %v12585_v59 }
 0xcfe   :  { %v7527_v46 = vadd.f32 1.0, %v15083_v25 }
 0xcff   :  { %7678 = vrot.lane.b32.xlu0 %v12594_v41, %s15900_s5  ;;  %v12595_v30 = vadd.f32 -1.0, %v7607_v51  ;;  %v15085_v24 = vpop.eup %15084 }
 0xd00   :  { %15094 = vrcp.f32 %v7527_v46  ;;  %v7529_v19 = vadd.f32 1.0, %v15085_v24 }
 0xd01   :  { %7680 = vrot.lane.b32.xlu1 %v12595_v30, %s15900_s5 }
 0xd02   :  { %v18770_v35 = vpop.eup %15086  ;;  %15096 = vrcp.f32 %v7529_v19 }
 0xd03   :  { %v7608_v52 = vmul.f32 2.0, %v18770_v35 }
 0xd04   :  { %v18773_v55 = vpop.eup %15088 }
 0xd05   :  { %v12596_v14 = vadd.f32 -1.0, %v7608_v52  ;;  %v7609_v27 = vmul.f32 2.0, %v18773_v55  ;;  %v15091_v59 = vpop.eup %15090 }
 0xd06   :  { %v7531_v25 = vadd.f32 1.0, %v15091_v59 }
 0xd07   :  { %7682 = vrot.lane.b32.xlu0 %v12596_v14, %s15900_s5  ;;  %v12597_v41 = vadd.f32 -1.0, %v7609_v27  ;;  %v15093_v51 = vpop.eup %15092 }
 0xd08   :  { %15098 = vrcp.f32 %v7531_v25  ;;  %v7533_v24 = vadd.f32 1.0, %v15093_v51 }
 0xd09   :  { %7684 = vrot.lane.b32.xlu1 %v12597_v41, %s15900_s5 }
 0xd0a   :  { %v18778_v46 = vpop.eup %15094  ;;  %15100 = vrcp.f32 %v7533_v24 }
 0xd0b   :  { %v7610_v30 = vmul.f32 2.0, %v18778_v46 }
 0xd0c   :  { %v18781_v19 = vpop.eup %15096 }
 0xd0d   :  { %v12598_v52 = vadd.f32 -1.0, %v7610_v30  ;;  %v7611_v63 = vmul.f32 2.0, %v18781_v19  ;;  %v13722_v30 = vadd.f32 %v18682_v49, %v17033_v6  ;;  %v13730_v49 = vadd.f32 %v18694_v15, %v17033_v6 }
 0xd0e   :  { %v13736_v15 = vadd.f32 %v18703_v13, %v17033_v6 }
 0xd0f   :  { %7686 = vrot.lane.b32.xlu0 %v12598_v52, %s15900_s5  ;;  %v12599_v59 = vadd.f32 -1.0, %v7611_v63  ;;  %v13724_v63 = vadd.f32 %v18685_v28, %v17033_v6  ;;  %v12554_v52 = vmul.f32 -1.442695, %v13722_v30  ;;  %v13732_v28 = vadd.f32 %v18697_v44, %v17033_v6 }
 0xd10   :  { %v12568_v44 = vmul.f32 -1.442695, %v13736_v15 }
 0xd11   :  { %7688 = vrot.lane.b32.xlu1 %v12599_v59, %s15900_s5  ;;  %v12556_v59 = vmul.f32 -1.442695, %v13724_v63  ;;  %15102 = vpow2.f32 %v12554_v52  ;;  %v12562_v63 = vmul.f32 -1.442695, %v13730_v49  ;;  %v12564_v5 = vmul.f32 -1.442695, %v13732_v28 }
 0xd12   :  { %v18786_v14 = vpop.eup %15098 }
 0xd13   :  { %v7612_v27 = vmul.f32 2.0, %v18786_v14  ;;  %15104 = vpow2.f32 %v12556_v59 }
 0xd14   :  { %v18789_v25 = vpop.eup %15100 }
 0xd15   :  { %v12600_v41 = vadd.f32 -1.0, %v7612_v27  ;;  %v7613_v51 = vmul.f32 2.0, %v18789_v25  ;;  %v13728_v27 = vadd.f32 %v18691_v47, %v17033_v6 }
 0xd17   :  { %7690 = vrot.lane.b32.xlu0 %v12600_v41, %s15900_s5  ;;  %v12601_v24 = vadd.f32 -1.0, %v7613_v51  ;;  %v12558_v41 = vmul.f32 -1.442695, %v13726_v20  ;;  %v12560_v51 = vmul.f32 -1.442695, %v13728_v27  ;;  %v13734_v20 = vadd.f32 %v18700_v1, %v17033_v6 }
 0xd18   :  { %v13740_v1 = vadd.f32 %v18716_v36, %v17033_v6  ;;  %v13742_v36 = vadd.f32 %v18726_v54, %v17033_v6 }
 0xd19   :  { %7692 = vrot.lane.b32.xlu1 %v12601_v24, %s15900_s5  ;;  %15106 = vpow2.f32 %v12558_v41  ;;  %v12566_v41 = vmul.f32 -1.442695, %v13734_v20 }
 0xd1a   :  { %15108 = vpow2.f32 %v12560_v51 }
 0xd1b   :  { %v15103_v24 = vpop.eup %15102 }
 0xd1c   :  { %v7502_v30 = vadd.f32 1.0, %v15103_v24 }
 0xd1d   :  { %v15105_v9 = vpop.eup %15104 }
 0xd1e   :  { %v7504_v52 = vadd.f32 1.0, %v15105_v9  ;;  %15110 = vrcp.f32 %v7502_v30  ;;  %v13738_v9 = vadd.f32 %v18712_v58, %v17033_v6  ;;  %v12572_v58 = vmul.f32 -1.442695, %v13740_v1 }
 0xd1f   :  { %15112 = vpow2.f32 %v12562_v63  ;;  %v12574_v1 = vmul.f32 -1.442695, %v13742_v36 }
 0xd20   :  { %15114 = vrcp.f32 %v7504_v52  ;;  %v12570_v52 = vmul.f32 -1.442695, %v13738_v9 }
 0xd21   :  { %15116 = vpow2.f32 %v12564_v5 }
 0xd23   :  { %v15107_v59 = vpop.eup %15106 }
 0xd24   :  { %v15109_v47 = vpop.eup %15108  ;;  %v7506_v27 = vadd.f32 1.0, %v15107_v59 }
 0xd25   :  { %v7508_v51 = vadd.f32 1.0, %v15109_v47 }
 0xd26   :  { %15118 = vrcp.f32 %v7506_v27 }
 0xd27   :  { %15120 = vpow2.f32 %v12566_v41  ;;  %v13744_v41 = vadd.f32 %v18730_v56, %v17033_v6 }
 0xd28   :  { %v18812_v24 = vpop.eup %15110  ;;  %15122 = vrcp.f32 %v7508_v51 }
 0xd29   :  { %v15113_v49 = vpop.eup %15112  ;;  %15124 = vpow2.f32 %v12568_v44 }
 0xd2a   :  { %v18816_v30 = vpop.eup %15114  ;;  %v7510_v59 = vadd.f32 1.0, %v15113_v49  ;;  %15126 = vpow2.f32 %v12570_v52 }
 0xd2b   :  { %v15117_v63 = vpop.eup %15116 }
 0xd2c   :  { %v7512_v47 = vadd.f32 1.0, %v15117_v63  ;;  %15128 = vrcp.f32 %v7510_v59  ;;  %v12576_v63 = vmul.f32 -1.442695, %v13744_v41 }
 0xd2d   :  { %15130 = vpow2.f32 %v12572_v58 }
 0xd2e   :  { %15132 = vrcp.f32 %v7512_v47  ;;  %v13748_v47 = vadd.f32 %v18744_v33, %v17033_v6  ;;  %v13750_v33 = vadd.f32 %v18754_v34, %v17033_v6 }
 0xd2f   :  { %15134 = vpow2.f32 %v12574_v1 }
 0xd30   :  { %v18824_v15 = vpop.eup %15118  ;;  %v12580_v1 = vmul.f32 -1.442695, %v13748_v47  ;;  %v12582_v47 = vmul.f32 -1.442695, %v13750_v33 }
 0xd31   :  { %v15121_v27 = vpop.eup %15120 }
 0xd32   :  { %v18828_v44 = vpop.eup %15122 }
 0xd33   :  { %v15125_v49 = vpop.eup %15124 }
 0xd34   :  { %v7516_v52 = vadd.f32 1.0, %v15125_v49  ;;  %v15127_v56 = vpop.eup %15126 }
 0xd35   :  { %v7518_v41 = vadd.f32 1.0, %v15127_v56 }
 0xd36   :  { %v18836_v59 = vpop.eup %15128 }
 0xd37   :  { %v15131_v58 = vpop.eup %15130 }
 0xd51   :  { %v7663_v28 = vpop.permute.xlu0 %7662 }
 0xd52   :  { %v7710_v13 = vmul.f32 %v18812_v24, %v7663_v28 }
 0xd53   :  { %v7665_v5 = vpop.permute.xlu1 %7664 }
 0xd54   :  { %v7711_v20 = vmul.f32 %v18816_v30, %v7665_v5  ;;  %7742 = vrot.lane.b32.xlu0 %v7710_v13, %s15900_s5  ;;  %v7514_v13 = vadd.f32 1.0, %v15121_v27  ;;  %v13746_v5 = vadd.f32 %v18740_v62, %v17033_v6  ;;  %v18841_v27 = vpop.eup %15132  ;;  %v7520_v62 = vadd.f32 1.0, %v15131_v58 }
 0xd56   :  { %7744 = vrot.lane.b32.xlu1 %v7711_v20, %s15900_s5  ;;  %15136 = vrcp.f32 %v7514_v13 }
 0xd57   :  { %15138 = vpow2.f32 %v12576_v63 }
 0xd58   :  { %15140 = vrcp.f32 %v7516_v52  ;;  %v13752_v52 = vadd.f32 %v18758_v22, %v17033_v6 }
 0xd59   :  { %v7667_v51 = vpop.permute.xlu0 %7666  ;;  %15142 = vrcp.f32 %v7518_v41 }
 0xd5a   :  { %v7712_v9 = vmul.f32 %v18824_v15, %v7667_v51  ;;  %v12584_v41 = vmul.f32 -1.442695, %v13752_v52 }
 0xd5b   :  { %v7669_v28 = vpop.permute.xlu1 %7668 }
 0xd5c   :  { %v7713_v54 = vmul.f32 %v18828_v44, %v7669_v28  ;;  %7746 = vrot.lane.b32.xlu0 %v7712_v9, %s15900_s5  ;;  %v12578_v9 = vmul.f32 -1.442695, %v13746_v5  ;;  %v15135_v28 = vpop.eup %15134 }
 0xd5e   :  { %7748 = vrot.lane.b32.xlu1 %v7713_v54, %s15900_s5  ;;  %15144 = vpow2.f32 %v12578_v9 }
 0xd5f   :  { %15146 = vrcp.f32 %v7520_v62 }
 0xd60   :  { %v18848_v13 = vpop.eup %15136  ;;  %15148 = vpow2.f32 %v12580_v1 }
 0xd61   :  { %v7671_v20 = vpop.permute.xlu0 %7670  ;;  %v15139_v63 = vpop.eup %15138 }
 0xd62   :  { %v7714_v36 = vmul.f32 %v18836_v59, %v7671_v20  ;;  %v18853_v5 = vpop.eup %15140  ;;  %v7522_v20 = vadd.f32 1.0, %v15135_v28  ;;  %v7524_v34 = vadd.f32 1.0, %v15139_v63 }
 0xd63   :  { %v7673_v51 = vpop.permute.xlu1 %7672 }
 0xd64   :  { %v7715_v49 = vmul.f32 %v18841_v27, %v7673_v51  ;;  %7750 = vrot.lane.b32.xlu0 %v7714_v36, %s15900_s5  ;;  %15150 = vrcp.f32 %v7522_v20  ;;  %v18858_v51 = vpop.eup %15142 }
 0xd65   :  { %15152 = vpow2.f32 %v12582_v47 }
 0xd66   :  { %7752 = vrot.lane.b32.xlu1 %v7715_v49, %s15900_s5  ;;  %15154 = vrcp.f32 %v7524_v34 }
 0xd67   :  { %15156 = vpow2.f32 %v12584_v41 }
 0xd68   :  { %v15145_v22 = vpop.eup %15144 }
 0xd69   :  { %v7675_v54 = vpop.permute.xlu0 %7674  ;;  %v18860_v49 = vpop.eup %15146  ;;  %v7526_v33 = vadd.f32 1.0, %v15145_v22 }
 0xd6a   :  { %v7716_v56 = vmul.f32 %v18848_v13, %v7675_v54  ;;  %v15149_v1 = vpop.eup %15148 }
 0xd6b   :  { %v7677_v58 = vpop.permute.xlu1 %7676  ;;  %v7528_v63 = vadd.f32 1.0, %v15149_v1  ;;  %15158 = vrcp.f32 %v7526_v33 }
 0xd6c   :  { %v7717_v36 = vmul.f32 %v18853_v5, %v7677_v58  ;;  %7754 = vrot.lane.b32.xlu0 %v7716_v56, %s15900_s5 }
 0xd6d   :  { %15160 = vrcp.f32 %v7528_v63 }
 0xd6e   :  { %7756 = vrot.lane.b32.xlu1 %v7717_v36, %s15900_s5  ;;  %v18866_v52 = vpop.eup %15150 }
 0xd6f   :  { %v15153_v56 = vpop.eup %15152 }
 0xd70   :  { %v18868_v58 = vpop.eup %15154  ;;  %v7530_v41 = vadd.f32 1.0, %v15153_v56 }
 0xd71   :  { %v7679_v9 = vpop.permute.xlu0 %7678  ;;  %v15157_v36 = vpop.eup %15156 }
 0xd72   :  { %v7718_v62 = vmul.f32 %v18858_v51, %v7679_v9  ;;  %v7532_v9 = vadd.f32 1.0, %v15157_v36  ;;  %15162 = vrcp.f32 %v7530_v41 }
 0xd73   :  { %v7681_v28 = vpop.permute.xlu1 %7680 }
 0xd74   :  { %v7719_v54 = vmul.f32 %v18860_v49, %v7681_v28  ;;  %7758 = vrot.lane.b32.xlu0 %v7718_v62, %s15900_s5  ;;  %15164 = vrcp.f32 %v7532_v9 }
 0xd75   :  { %v18874_v62 = vpop.eup %15158 }
 0xd76   :  { %7760 = vrot.lane.b32.xlu1 %v7719_v54, %s15900_s5 }
 0xd77   :  { %v18877_v33 = vpop.eup %15160 }
 0xd79   :  { %v7683_v20 = vpop.permute.xlu0 %7682 }
 0xd7a   :  { %v7720_v47 = vmul.f32 %v18866_v52, %v7683_v20 }
 0xd7b   :  { %v7685_v34 = vpop.permute.xlu1 %7684 }
 0xd7c   :  { %v7721_v22 = vmul.f32 %v18868_v58, %v7685_v34  ;;  %7762 = vrot.lane.b32.xlu0 %v7720_v47, %s15900_s5  ;;  %v18882_v56 = vpop.eup %15162 }
 0xd7e   :  { %7764 = vrot.lane.b32.xlu1 %v7721_v22, %s15900_s5  ;;  %v18885_v36 = vpop.eup %15164  ;;  %v7630_v22 = vmul.f32 %v18812_v24, %v18484_v39  ;;  %v7633_v39 = vmul.f32 %v18828_v44, %v18499_v16  ;;  %v7635_v16 = vmul.f32 %v18841_v27, %v18511_v11  ;;  %v7637_v11 = vmul.f32 %v18853_v5, %v18523_v2 }
 0xd7f   :  { %v7639_v2 = vmul.f32 %v18860_v49, %v18535_v21  ;;  %v7641_v21 = vmul.f32 %v18868_v58, %v18547_v29  ;;  %v7643_v29 = vmul.f32 %v18877_v33, %v18559_v17  ;;  %v7645_v17 = vmul.f32 %v18885_v36, %v18571_v43 }
 0xd81   :  { %v7687_v1 = vpop.permute.xlu0 %7686 }
 0xd82   :  { %v7722_v28 = vmul.f32 %v18874_v62, %v7687_v1 }
 0xd83   :  { %v7689_v54 = vpop.permute.xlu1 %7688 }
 0xd84   :  { %v7723_v63 = vmul.f32 %v18877_v33, %v7689_v54  ;;  %7766 = vrot.lane.b32.xlu0 %v7722_v28, %s15900_s5  ;;  %v7631_v28 = vmul.f32 %v18816_v30, %v18489_v10 }
 0xd86   :  { %7768 = vrot.lane.b32.xlu1 %v7723_v63, %s15900_s5 }
 0xd89   :  { %v7691_v20 = vpop.permute.xlu0 %7690 }
 0xd8a   :  { %v7724_v47 = vmul.f32 %v18882_v56, %v7691_v20  ;;  %v7632_v20 = vmul.f32 %v18824_v15, %v18494_v31  ;;  %v7634_v31 = vmul.f32 %v18836_v59, %v18506_v50  ;;  %v7636_v50 = vmul.f32 %v18848_v13, %v18518_v53 }
 0xd8b   :  { %v7693_v34 = vpop.permute.xlu1 %7692  ;;  %v7638_v53 = vmul.f32 %v18858_v51, %v18530_v57  ;;  %v7640_v57 = vmul.f32 %v18866_v52, %v18542_v40  ;;  %v7642_v40 = vmul.f32 %v18874_v62, %v18554_v42  ;;  %v7644_v42 = vmul.f32 %v18882_v56, %v18566_v4 }
 0xd8c   :  { %v7725_v41 = vmul.f32 %v18885_v36, %v7693_v34  ;;  %7770 = vrot.lane.b32.xlu0 %v7724_v47, %s15900_s5 }
 0xd8e   :  { %7772 = vrot.lane.b32.xlu1 %v7725_v41, %s15900_s5 }
 0xdc6   :  { %v7743_v9 = vpop.permute.xlu0 %7742 }
 0xdc7   :  { %v18892_v1 = vadd.f32 %v7743_v9, %v7630_v22 }
 0xdc8   :  { %v7745_v54 = vpop.permute.xlu1 %7744 }
 0xdc9   :  { %15166 = vtanh.f32 %v18892_v1  ;;  %v18897_v63 = vadd.f32 %v7745_v54, %v7631_v28 }
 0xdcb   :  { %15168 = vtanh.f32 %v18897_v63 }
 0xdce   :  { %v7747_v47 = vpop.permute.xlu0 %7746 }
 0xdcf   :  { %v18902_v34 = vadd.f32 %v7747_v47, %v7632_v20 }
 0xdd0   :  { %v7749_v24 = vpop.permute.xlu1 %7748 }
 0xdd1   :  { %15170 = vtanh.f32 %v18902_v34  ;;  %v18907_v10 = vadd.f32 %v7749_v24, %v7633_v39 }
 0xdd3   :  { %v15167_v30 = vpop.eup %15166  ;;  %15172 = vtanh.f32 %v18907_v10 }
 0xdd4   :  { %7838 = vrot.lane.b32.xlu0 %v15167_v30, %s15900_s5 }
 0xdd5   :  { %v15169_v41 = vpop.eup %15168 }
 0xdd6   :  { %7840 = vrot.lane.b32.xlu1 %v15169_v41, %s15900_s5  ;;  %v7751_v15 = vpop.permute.xlu0 %7750 }
 0xdd7   :  { %v18914_v22 = vadd.f32 %v7751_v15, %v7634_v31 }
 0xdd8   :  { %v7753_v44 = vpop.permute.xlu1 %7752 }
 0xdd9   :  { %15174 = vtanh.f32 %v18914_v22  ;;  %v18919_v9 = vadd.f32 %v7753_v44, %v7635_v16 }
 0xddb   :  { %v15171_v28 = vpop.eup %15170  ;;  %15176 = vtanh.f32 %v18919_v9 }
 0xddc   :  { %7842 = vrot.lane.b32.xlu0 %v15171_v28, %s15900_s5 }
 0xddd   :  { %v15173_v54 = vpop.eup %15172 }
 0xdde   :  { %7844 = vrot.lane.b32.xlu1 %v15173_v54, %s15900_s5  ;;  %v7755_v59 = vpop.permute.xlu0 %7754 }
 0xddf   :  { %v18926_v20 = vadd.f32 %v7755_v59, %v7636_v50 }
 0xde0   :  { %v7757_v27 = vpop.permute.xlu1 %7756 }
 0xde1   :  { %15178 = vtanh.f32 %v18926_v20  ;;  %v18931_v47 = vadd.f32 %v7757_v27, %v7637_v11 }
 0xde3   :  { %v15175_v39 = vpop.eup %15174  ;;  %15180 = vtanh.f32 %v18931_v47 }
 0xde4   :  { %7846 = vrot.lane.b32.xlu0 %v15175_v39, %s15900_s5 }
 0xde5   :  { %v15177_v24 = vpop.eup %15176 }
 0xde6   :  { %7848 = vrot.lane.b32.xlu1 %v15177_v24, %s15900_s5  ;;  %v7759_v13 = vpop.permute.xlu0 %7758 }
 0xde7   :  { %v18938_v30 = vadd.f32 %v7759_v13, %v7638_v53 }
 0xde8   :  { %v7761_v5 = vpop.permute.xlu1 %7760 }
 0xde9   :  { %15182 = vtanh.f32 %v18938_v30  ;;  %v18943_v41 = vadd.f32 %v7761_v5, %v7639_v2 }
 0xdeb   :  { %v15179_v31 = vpop.eup %15178  ;;  %15184 = vtanh.f32 %v18943_v41 }
 0xdec   :  { %7850 = vrot.lane.b32.xlu0 %v15179_v31, %s15900_s5 }
 0xded   :  { %v15181_v15 = vpop.eup %15180 }
 0xdee   :  { %7852 = vrot.lane.b32.xlu1 %v15181_v15, %s15900_s5  ;;  %v7763_v51 = vpop.permute.xlu0 %7762 }
 0xdef   :  { %v18950_v16 = vadd.f32 %v7763_v51, %v7640_v57  ;;  %v15867_v57 = vld [vmem:[%s21565_s8] ss:$8 sps:$4 sm:$0xff]  }
 0xdf0   :  { %v7765_v49 = vpop.permute.xlu1 %7764 }
 0xdf1   :  { %15186 = vtanh.f32 %v18950_v16  ;;  %v18955_v44 = vadd.f32 %v7765_v49, %v7641_v21  ;;  %v15869_v49 = vld [vmem:[%s21565_s8 + $0x10] ss:$8 sps:$4 sm:$0xff]  }
 0xdf3   :  { %v15183_v28 = vpop.eup %15182  ;;  %15188 = vtanh.f32 %v18955_v44 }
 0xdf4   :  { %7854 = vrot.lane.b32.xlu0 %v15183_v28, %s15900_s5 }
 0xdf5   :  { %v15185_v54 = vpop.eup %15184 }
 0xdf6   :  { %7856 = vrot.lane.b32.xlu1 %v15185_v54, %s15900_s5  ;;  %v7767_v52 = vpop.permute.xlu0 %7766  ;;  %v15870_v54 = vld [vmem:[%s21565_s8 + $0x24] ss:$8 sps:$4 sm:$0xff]  }
 0xdf7   :  { %v18962_v50 = vadd.f32 %v7767_v52, %v7642_v40  ;;  %v15872_v40 = vld [vmem:[%s21565_s8 + $0x34] ss:$8 sps:$4 sm:$0xff]  }
 0xdf8   :  { %v7769_v58 = vpop.permute.xlu1 %7768 }
 0xdf9   :  { %15190 = vtanh.f32 %v18962_v50  ;;  %v18967_v59 = vadd.f32 %v7769_v58, %v7643_v29 }
 0xdfb   :  { %v15187_v11 = vpop.eup %15186  ;;  %15192 = vtanh.f32 %v18967_v59 }
 0xdfc   :  { %7858 = vrot.lane.b32.xlu0 %v15187_v11, %s15900_s5  ;;  %v15873_v11 = vld [vmem:[%s21565_s8 + $0x30] ss:$8 sps:$4 sm:$0xff]  }
 0xdfd   :  { %v15189_v27 = vpop.eup %15188 }
 0xdfe   :  { %7860 = vrot.lane.b32.xlu1 %v15189_v27, %s15900_s5  ;;  %v7771_v62 = vpop.permute.xlu0 %7770  ;;  %v15874_v27 = vld [vmem:[%s21565_s8 + $0x4] ss:$8 sps:$4 sm:$0xff]  }
 0xdff   :  { %v18974_v39 = vadd.f32 %v7771_v62, %v7644_v42 }
 0xe00   :  { %v7773_v33 = vpop.permute.xlu1 %7772 }
 0xe01   :  { %15194 = vtanh.f32 %v18974_v39  ;;  %v18979_v24 = vadd.f32 %v7773_v33, %v7645_v17 }
 0xe03   :  { %v15191_v53 = vpop.eup %15190  ;;  %15196 = vtanh.f32 %v18979_v24 }
 0xe04   :  { %7862 = vrot.lane.b32.xlu0 %v15191_v53, %s15900_s5 }
 0xe05   :  { %v15193_v13 = vpop.eup %15192 }
 0xe06   :  { %7864 = vrot.lane.b32.xlu1 %v15193_v13, %s15900_s5 }
 0xe0b   :  { %v15195_v4 = vpop.eup %15194 }
 0xe0c   :  { %7866 = vrot.lane.b32.xlu0 %v15195_v4, %s15900_s5 }
 0xe0d   :  { %v15197_v56 = vpop.eup %15196 }
 0xe0e   :  { %7868 = vrot.lane.b32.xlu1 %v15197_v56, %s15900_s5 }
 0xe46   :  { %v7839_v43 = vpop.permute.xlu0 %7838 }
 0xe47   :  { %v18987_v2 = vmul.f32 %v18705_v3, %v7839_v43  ;;  %v15868_v3 = vld [vmem:[%s21565_s8 + $0x14] ss:$8 sps:$4 sm:$0xff]  }
 0xe48   :  { %v7841_v36 = vpop.permute.xlu1 %7840 }
 0xe49   :  { %21758 = vst [vmem:[#allocation48_spill] sm:$0xff] %v18987_v2  ;;  %v18990_v5 = vmul.f32 %v18709_v12, %v7841_v36 }
 0xe4b   :  { %21759 = vst [vmem:[#allocation49_spill] sm:$0xff] %v18990_v5  ;;  %v8046_v31 = vpack.c.bf16 %v18990_v5, %v18987_v2 }
 0xe4d   :  { %12602 = vmatmul.mubr.msk.bf16.vlgmr.msra.gmra.mrb[88].mxu1 %vm4806_vm1, %v8046_v31 }
 0xe4e   :  { %v7843_v15 = vpop.permute.xlu0 %7842  ;;  %8120 = vmatprep.mubr.bf16.mxu1 %v21727_v23  ;;  %8896 = vmatpush1.bf16.msra.mxu1 %v15867_v57 }
 0xe4f   :  { %8897 = vmatprep.subr.bf16.mxu1 %v15868_v3  ;;  %v19003_v51 = vmul.f32 %v18719_v60, %v7843_v15  ;;  %v15871_v60 = vld [vmem:[%s21565_s8 + $0x20] ss:$8 sps:$4 sm:$0xff]  }
 0xe50   :  { %v7845_v12 = vpop.permute.xlu1 %7844 }
 0xe51   :  { %21760 = vst [vmem:[#allocation50_spill] sm:$0xff] %v19003_v51  ;;  %v19006_v21 = vmul.f32 %v18723_v38, %v7845_v12 }
 0xe52   :  { %8898 = vmatpush1.bf16.msra.mxu1 %v15869_v49 }
 0xe53   :  { %21761 = vst [vmem:[#allocation51_spill] sm:$0xff] %v19006_v21  ;;  %v8047_v28 = vpack.c.bf16 %v19006_v21, %v19003_v51  ;;  %8899 = vmatprep.subr.bf16.mxu1 %v15870_v54 }
 0xe55   :  { %12603 = vmatmul.mubr.msk.bf16.gmra.mrb[92].mxu1 %vm4806_vm1, %v8047_v28 }
 0xe56   :  { %8130 = vmatprep.mubr.bf16.mxu1 %v21727_v23  ;;  %8900 = vmatpush1.bf16.msra.mxu1 %v15871_v60  ;;  %v7847_v38 = vpop.permute.xlu0 %7846 }
 0xe57   :  { %8901 = vmatprep.subr.bf16.mxu1 %v15872_v40  ;;  %v19025_v29 = vmul.f32 %v18733_v8, %v7847_v38 }
 0xe58   :  { %v7849_v52 = vpop.permute.xlu1 %7848 }
 0xe59   :  { %21762 = vst [vmem:[#allocation52_spill] sm:$0xff] %v19025_v29  ;;  %v19028_v58 = vmul.f32 %v18737_v61, %v7849_v52 }
 0xe5a   :  { %8902 = vmatpush1.bf16.msra.mxu1 %v15873_v11 }
 0xe5b   :  { %21763 = vst [vmem:[#allocation53_spill] sm:$0xff] %v19028_v58  ;;  %9712 = vmatprep.subr.bf16.mxu1 %v15874_v27  ;;  %v8048_v42 = vpack.c.bf16 %v19028_v58, %v19025_v29 }
 0xe5d   :  { %12604 = vmatmul.mubr.msk.bf16.gmra.mrb[96].mxu1 %vm4806_vm1, %v8048_v42 }
 0xe5e   :  { %v7851_v8 = vpop.permute.xlu0 %7850  ;;  %8140 = vmatprep.mubr.bf16.mxu1 %v21727_v23 }
 0xe5f   :  { %v19041_v62 = vmul.f32 %v18747_v7, %v7851_v8 }
 0xe60   :  { %v7853_v61 = vpop.permute.xlu1 %7852 }
 0xe61   :  { %21764 = vst [vmem:[#allocation54_spill] sm:$0xff] %v19041_v62  ;;  %v19044_v17 = vmul.f32 %v18751_v45, %v7853_v61 }
 0xe63   :  { %21765 = vst [vmem:[#allocation55_spill] sm:$0xff] %v19044_v17  ;;  %v8049_v33 = vpack.c.bf16 %v19044_v17, %v19041_v62 }
 0xe65   :  { %12605 = vmatmul.mubr.msk.bf16.gmra.mrb[100].mxu1 %vm4806_vm1, %v8049_v33 }
 0xe66   :  { %8150 = vmatprep.mubr.bf16.mxu1 %v21727_v23  ;;  %v7855_v53 = vpop.permute.xlu0 %7854 }
 0xe67   :  { %v19051_v4 = vmul.f32 %v18761_v48, %v7855_v53 }
 0xe68   :  { %v7857_v13 = vpop.permute.xlu1 %7856 }
 0xe69   :  { %21766 = vst [vmem:[#allocation56_spill] sm:$0xff] %v19051_v4  ;;  %v19054_v56 = vmul.f32 %v18765_v0, %v7857_v13 }
 0xe6b   :  { %21767 = vst [vmem:[#allocation57_spill] sm:$0xff] %v19054_v56  ;;  %v8050_v7 = vpack.c.bf16 %v19054_v56, %v19051_v4 }
 0xe6d   :  { %12606 = vmatmul.mubr.msk.bf16.gmra.mrb[104].mxu1 %vm4806_vm1, %v8050_v7 }
 0xe6e   :  { %v7859_v45 = vpop.permute.xlu0 %7858  ;;  %8160 = vmatprep.mubr.bf16.mxu1 %v21727_v23 }
 0xe6f   :  { %v19061_v36 = vmul.f32 %v18770_v35, %v7859_v45 }
 0xe70   :  { %v7861_v43 = vpop.permute.xlu1 %7860 }
 0xe71   :  { %21768 = vst [vmem:[#allocation58_spill] sm:$0xff] %v19061_v36  ;;  %v19064_v31 = vmul.f32 %v18773_v55, %v7861_v43 }
 0xe73   :  { %21769 = vst [vmem:[#allocation59_spill] sm:$0xff] %v19064_v31  ;;  %v8051_v48 = vpack.c.bf16 %v19064_v31, %v19061_v36 }
 0xe75   :  { %12607 = vmatmul.mubr.msk.bf16.gmra.mrb[108].mxu1 %vm4806_vm1, %v8051_v48 }
 0xe76   :  { %8170 = vmatprep.mubr.bf16.mxu1 %v21727_v23  ;;  %v7863_v0 = vpop.permute.xlu0 %7862 }
 0xe77   :  { %v19071_v57 = vmul.f32 %v18778_v46, %v7863_v0 }
 0xe78   :  { %v7865_v15 = vpop.permute.xlu1 %7864 }
 0xe79   :  { %21770 = vst [vmem:[#allocation60_spill] sm:$0xff] %v19071_v57  ;;  %v19074_v3 = vmul.f32 %v18781_v19, %v7865_v15 }
 0xe7b   :  { %21771 = vst [vmem:[#allocation61_spill] sm:$0xff] %v19074_v3  ;;  %v8052_v35 = vpack.c.bf16 %v19074_v3, %v19071_v57 }
 0xe7d   :  { %12608 = vmatmul.mubr.msk.bf16.gmra.mrb[112].mxu1 %vm4806_vm1, %v8052_v35 }
 0xe7e   :  { %v7867_v55 = vpop.permute.xlu0 %7866  ;;  %8180 = vmatprep.mubr.bf16.mxu1 %v21727_v23 }
 0xe7f   :  { %v19081_v49 = vmul.f32 %v18786_v14, %v7867_v55 }
 0xe80   :  { %v7869_v12 = vpop.permute.xlu1 %7868 }
 0xe81   :  { %21772 = vst [vmem:[#allocation62_spill] sm:$0xff] %v19081_v49  ;;  %v19084_v28 = vmul.f32 %v18789_v25, %v7869_v12 }
 0xe83   :  { %21773 = vst [vmem:[#allocation63_spill] sm:$0xff] %v19084_v28  ;;  %v8053_v46 = vpack.c.bf16 %v19084_v28, %v19081_v49 }
 0xe85   :  { %12609 = vmatmul.mubr.msk.bf16.gmra.mrb[116].mxu1 %vm4806_vm1, %v8053_v46 }
 0xe86   :  { %8927 = vmatprep.mubr.bf16.mxu1 %v21727_v23 }
 0xf20   :  { %v19090_v19 = vpop.f32.mrb[88].mxu1 }
 0xf21   :  { %v8114_v54 = vpop.f32.mrb[89].mxu1 }
 0xf22   :  { %v13755_v60 = vadd.f32 %v8114_v54, %v17432_v37  ;;  %v19093_v38 = vpop.f32.mrb[90].mxu1 }
 0xf23   :  { %v8118_v40 = vpop.f32.mrb[91].mxu1 }
 0xf24   :  { %v12611_v14 = vmul.f32 -1.442695, %v13755_v60  ;;  %v13757_v52 = vadd.f32 %v8118_v40, %v17432_v37 }
 0xf26   :  { %15198 = vpow2.f32 %v12611_v14  ;;  %v12613_v25 = vmul.f32 -1.442695, %v13757_v52 }
 0xf28   :  { %15200 = vpow2.f32 %v12613_v25  ;;  %v19096_v11 = vpop.f32.mrb[92].mxu1 }
 0xf29   :  { %v8124_v27 = vpop.f32.mrb[93].mxu1  ;;  %v13758_v56 = vadd.f32 %v19096_v11, %v17033_v6 }
 0xf2a   :  { %v13759_v42 = vadd.f32 %v8124_v27, %v17432_v37  ;;  %v19099_v8 = vpop.f32.mrb[94].mxu1 }
 0xf2b   :  { %v8128_v61 = vpop.f32.mrb[95].mxu1 }
 0xf2c   :  { %v12615_v33 = vmul.f32 -1.442695, %v13759_v42  ;;  %v13761_v53 = vadd.f32 %v8128_v61, %v17432_v37 }
 0xf2e   :  { %15202 = vpow2.f32 %v12615_v33  ;;  %v12617_v13 = vmul.f32 -1.442695, %v13761_v53 }
 0xf30   :  { %v15199_v7 = vpop.eup %15198  ;;  %15204 = vpow2.f32 %v12617_v13  ;;  %v19102_v43 = vpop.f32.mrb[96].mxu1 }
 0xf31   :  { %v8320_v45 = vadd.f32 1.0, %v15199_v7  ;;  %v8134_v0 = vpop.f32.mrb[97].mxu1 }
 0xf32   :  { %v15201_v48 = vpop.eup %15200  ;;  %v13763_v35 = vadd.f32 %v8134_v0, %v17432_v37  ;;  %v19105_v55 = vpop.f32.mrb[98].mxu1 }
 0xf33   :  { %15206 = vrcp.f32 %v8320_v45  ;;  %v8322_v15 = vadd.f32 1.0, %v15201_v48  ;;  %v8138_v12 = vpop.f32.mrb[99].mxu1 }
 0xf34   :  { %v12619_v46 = vmul.f32 -1.442695, %v13763_v35  ;;  %v13765_v54 = vadd.f32 %v8138_v12, %v17432_v37 }
 0xf35   :  { %15208 = vrcp.f32 %v8322_v15 }
 0xf36   :  { %15210 = vpow2.f32 %v12619_v46  ;;  %v12621_v60 = vmul.f32 -1.442695, %v13765_v54 }
 0xf38   :  { %v15203_v40 = vpop.eup %15202  ;;  %15212 = vpow2.f32 %v12621_v60  ;;  %v19108_v52 = vpop.f32.mrb[100].mxu1 }
 0xf39   :  { %v8324_v14 = vadd.f32 1.0, %v15203_v40  ;;  %v8144_v27 = vpop.f32.mrb[101].mxu1 }
 0xf3a   :  { %v15205_v25 = vpop.eup %15204  ;;  %v13767_v61 = vadd.f32 %v8144_v27, %v17432_v37  ;;  %v19111_v33 = vpop.f32.mrb[102].mxu1 }
 0xf3b   :  { %15214 = vrcp.f32 %v8324_v14  ;;  %v8326_v42 = vadd.f32 1.0, %v15205_v25  ;;  %v8148_v53 = vpop.f32.mrb[103].mxu1 }
 0xf3c   :  { %v12623_v7 = vmul.f32 -1.442695, %v13767_v61  ;;  %v13769_v45 = vadd.f32 %v8148_v53, %v17432_v37 }
 0xf3d   :  { %v19113_v13 = vpop.eup %15206  ;;  %15216 = vrcp.f32 %v8326_v42 }
 0xf3e   :  { %v8415_v48 = vmul.f32 2.0, %v19113_v13  ;;  %15218 = vpow2.f32 %v12623_v7  ;;  %v12625_v15 = vmul.f32 -1.442695, %v13769_v45 }
 0xf3f   :  { %v19117_v0 = vpop.eup %15208 }
 0xf40   :  { %v12642_v35 = vadd.f32 -1.0, %v8415_v48  ;;  %v8416_v12 = vmul.f32 2.0, %v19117_v0  ;;  %v15211_v46 = vpop.eup %15210  ;;  %15220 = vpow2.f32 %v12625_v15  ;;  %v19120_v60 = vpop.f32.mrb[104].mxu1 }
 0xf41   :  { %v8328_v54 = vadd.f32 1.0, %v15211_v46  ;;  %v8154_v25 = vpop.f32.mrb[105].mxu1 }
 0xf42   :  { %8479 = vrot.lane.b32.xlu0 %v12642_v35, %s15900_s5  ;;  %v12643_v40 = vadd.f32 -1.0, %v8416_v12  ;;  %v15213_v14 = vpop.eup %15212  ;;  %v13771_v42 = vadd.f32 %v8154_v25, %v17432_v37  ;;  %v19124_v61 = vpop.f32.mrb[106].mxu1 }
 0xf43   :  { %15222 = vrcp.f32 %v8328_v54  ;;  %v8330_v27 = vadd.f32 1.0, %v15213_v14  ;;  %v8158_v7 = vpop.f32.mrb[107].mxu1 }
 0xf44   :  { %8481 = vrot.lane.b32.xlu1 %v12643_v40, %s15900_s5  ;;  %v12627_v45 = vmul.f32 -1.442695, %v13771_v42  ;;  %v13773_v48 = vadd.f32 %v8158_v7, %v17432_v37 }
 0xf45   :  { %v19127_v53 = vpop.eup %15214  ;;  %15224 = vrcp.f32 %v8330_v27 }
 0xf46   :  { %v8417_v15 = vmul.f32 2.0, %v19127_v53  ;;  %15226 = vpow2.f32 %v12627_v45  ;;  %v12629_v12 = vmul.f32 -1.442695, %v13773_v48 }
 0xf47   :  { %v19131_v35 = vpop.eup %15216 }
 0xf48   :  { %v12644_v46 = vadd.f32 -1.0, %v8417_v15  ;;  %v8418_v54 = vmul.f32 2.0, %v19131_v35  ;;  %v15219_v14 = vpop.eup %15218  ;;  %15228 = vpow2.f32 %v12629_v12  ;;  %v19134_v40 = vpop.f32.mrb[108].mxu1 }
 0xf49   :  { %v8332_v25 = vadd.f32 1.0, %v15219_v14  ;;  %v8164_v62 = vpop.f32.mrb[109].mxu1 }
 0xf4a   :  { %8483 = vrot.lane.b32.xlu0 %v12644_v46, %s15900_s5  ;;  %v12645_v27 = vadd.f32 -1.0, %v8418_v54  ;;  %v15221_v42 = vpop.eup %15220  ;;  %v13775_v17 = vadd.f32 %v8164_v62, %v17432_v37  ;;  %v19138_v29 = vpop.f32.mrb[110].mxu1 }
 0xf4b   :  { %15230 = vrcp.f32 %v8332_v25  ;;  %v8334_v7 = vadd.f32 1.0, %v15221_v42  ;;  %v8168_v45 = vpop.f32.mrb[111].mxu1 }
 0xf4c   :  { %8485 = vrot.lane.b32.xlu1 %v12645_v27, %s15900_s5  ;;  %v12631_v15 = vmul.f32 -1.442695, %v13775_v17  ;;  %v13777_v12 = vadd.f32 %v8168_v45, %v17432_v37 }
 0xf4d   :  { %v19141_v48 = vpop.eup %15222  ;;  %15232 = vrcp.f32 %v8334_v7 }
 0xf4e   :  { %v8419_v46 = vmul.f32 2.0, %v19141_v48  ;;  %15234 = vpow2.f32 %v12631_v15  ;;  %v12633_v14 = vmul.f32 -1.442695, %v13777_v12 }
 0xf4f   :  { %v19145_v54 = vpop.eup %15224 }
 0xf50   :  { %v12646_v25 = vadd.f32 -1.0, %v8419_v46  ;;  %v8420_v62 = vmul.f32 2.0, %v19145_v54  ;;  %v15227_v42 = vpop.eup %15226  ;;  %15236 = vpow2.f32 %v12633_v14  ;;  %v19148_v27 = vpop.f32.mrb[112].mxu1 }
 0xf51   :  { %v8336_v58 = vadd.f32 1.0, %v15227_v42  ;;  %v8174_v51 = vpop.f32.mrb[113].mxu1 }
 0xf52   :  { %8487 = vrot.lane.b32.xlu0 %v12646_v25, %s15900_s5  ;;  %v12647_v7 = vadd.f32 -1.0, %v8420_v62  ;;  %v15229_v17 = vpop.eup %15228  ;;  %v13779_v21 = vadd.f32 %v8174_v51, %v17432_v37  ;;  %v19152_v2 = vpop.f32.mrb[114].mxu1 }
 0xf53   :  { %15238 = vrcp.f32 %v8336_v58  ;;  %v8338_v45 = vadd.f32 1.0, %v15229_v17  ;;  %v8178_v12 = vpop.f32.mrb[115].mxu1 }
 0xf54   :  { %8489 = vrot.lane.b32.xlu1 %v12647_v7, %s15900_s5  ;;  %v12635_v46 = vmul.f32 -1.442695, %v13779_v21  ;;  %v13781_v14 = vadd.f32 %v8178_v12, %v17432_v37 }
 0xf55   :  { %v19155_v15 = vpop.eup %15230  ;;  %15240 = vrcp.f32 %v8338_v45 }
 0xf56   :  { %v8421_v25 = vmul.f32 2.0, %v19155_v15  ;;  %15242 = vpow2.f32 %v12635_v46  ;;  %v12637_v58 = vmul.f32 -1.442695, %v13781_v14 }
 0xf57   :  { %v19159_v62 = vpop.eup %15232 }
 0xf58   :  { %v12648_v42 = vadd.f32 -1.0, %v8421_v25  ;;  %v8422_v51 = vmul.f32 2.0, %v19159_v62  ;;  %v15235_v17 = vpop.eup %15234  ;;  %15244 = vpow2.f32 %v12637_v58  ;;  %v19162_v7 = vpop.f32.mrb[116].mxu1 }
 0xf59   :  { %v8340_v5 = vadd.f32 1.0, %v15235_v17  ;;  %v8184_v49 = vpop.f32.mrb[117].mxu1 }
 0xf5a   :  { %8491 = vrot.lane.b32.xlu0 %v12648_v42, %s15900_s5  ;;  %v12649_v45 = vadd.f32 -1.0, %v8422_v51  ;;  %v15237_v21 = vpop.eup %15236  ;;  %v13783_v28 = vadd.f32 %v8184_v49, %v17432_v37  ;;  %v19166_v57 = vpop.f32.mrb[118].mxu1 }
 0xf5b   :  { %15246 = vrcp.f32 %v8340_v5  ;;  %v8342_v12 = vadd.f32 1.0, %v15237_v21  ;;  %v8188_v46 = vpop.f32.mrb[119].mxu1 }
 0xf5c   :  { %8493 = vrot.lane.b32.xlu1 %v12649_v45, %s15900_s5  ;;  %v12639_v25 = vmul.f32 -1.442695, %v13783_v28  ;;  %v13785_v58 = vadd.f32 %v8188_v46, %v17432_v37 }
 0xf5d   :  { %v19169_v14 = vpop.eup %15238  ;;  %15248 = vrcp.f32 %v8342_v12 }
 0xf5e   :  { %v8423_v42 = vmul.f32 2.0, %v19169_v14  ;;  %15250 = vpow2.f32 %v12639_v25  ;;  %v12641_v5 = vmul.f32 -1.442695, %v13785_v58 }
 0xf5f   :  { %v19173_v51 = vpop.eup %15240 }
 0xf60   :  { %v12650_v17 = vadd.f32 -1.0, %v8423_v42  ;;  %v8424_v49 = vmul.f32 2.0, %v19173_v51  ;;  %v15243_v21 = vpop.eup %15242  ;;  %15252 = vpow2.f32 %v12641_v5 }
 0xf61   :  { %v8344_v3 = vadd.f32 1.0, %v15243_v21 }
 0xf62   :  { %8495 = vrot.lane.b32.xlu0 %v12650_v17, %s15900_s5  ;;  %v12651_v45 = vadd.f32 -1.0, %v8424_v49  ;;  %v15245_v4 = vpop.eup %15244 }
 0xf63   :  { %15254 = vrcp.f32 %v8344_v3  ;;  %v8346_v28 = vadd.f32 1.0, %v15245_v4 }
 0xf64   :  { %8497 = vrot.lane.b32.xlu1 %v12651_v45, %s15900_s5 }
 0xf65   :  { %v19178_v12 = vpop.eup %15246  ;;  %15256 = vrcp.f32 %v8346_v28 }
 0xf66   :  { %v8425_v46 = vmul.f32 2.0, %v19178_v12 }
 0xf67   :  { %v19181_v25 = vpop.eup %15248 }
 0xf68   :  { %v12652_v58 = vadd.f32 -1.0, %v8425_v46  ;;  %v8426_v42 = vmul.f32 2.0, %v19181_v25  ;;  %v15251_v5 = vpop.eup %15250 }
 0xf69   :  { %v8348_v21 = vadd.f32 1.0, %v15251_v5 }
 0xf6a   :  { %8499 = vrot.lane.b32.xlu0 %v12652_v58, %s15900_s5  ;;  %v12653_v17 = vadd.f32 -1.0, %v8426_v42  ;;  %v15253_v49 = vpop.eup %15252 }
 0xf6b   :  { %15258 = vrcp.f32 %v8348_v21  ;;  %v8350_v4 = vadd.f32 1.0, %v15253_v49 }
 0xf6c   :  { %8501 = vrot.lane.b32.xlu1 %v12653_v17, %s15900_s5 }
 0xf6d   :  { %v19186_v3 = vpop.eup %15254  ;;  %15260 = vrcp.f32 %v8350_v4 }
 0xf6e   :  { %v8427_v45 = vmul.f32 2.0, %v19186_v3 }
 0xf6f   :  { %v19189_v28 = vpop.eup %15256 }
 0xf70   :  { %v12654_v46 = vadd.f32 -1.0, %v8427_v45  ;;  %v8428_v36 = vmul.f32 2.0, %v19189_v28  ;;  %v13754_v45 = vadd.f32 %v19090_v19, %v17033_v6  ;;  %v13762_v19 = vadd.f32 %v19102_v43, %v17033_v6 }
 0xf71   :  { %v13768_v43 = vadd.f32 %v19111_v33, %v17033_v6 }
 0xf72   :  { %8503 = vrot.lane.b32.xlu0 %v12654_v46, %s15900_s5  ;;  %v12655_v5 = vadd.f32 -1.0, %v8428_v36  ;;  %v13756_v36 = vadd.f32 %v19093_v38, %v17033_v6  ;;  %v12610_v46 = vmul.f32 -1.442695, %v13754_v45  ;;  %v13764_v38 = vadd.f32 %v19105_v55, %v17033_v6 }
 0xf73   :  { %v12624_v55 = vmul.f32 -1.442695, %v13768_v43 }
 0xf74   :  { %8505 = vrot.lane.b32.xlu1 %v12655_v5, %s15900_s5  ;;  %v12612_v5 = vmul.f32 -1.442695, %v13756_v36  ;;  %15262 = vpow2.f32 %v12610_v46  ;;  %v12618_v36 = vmul.f32 -1.442695, %v13762_v19  ;;  %v12620_v11 = vmul.f32 -1.442695, %v13764_v38 }
 0xf75   :  { %v19194_v58 = vpop.eup %15258 }
 0xf76   :  { %v8429_v42 = vmul.f32 2.0, %v19194_v58  ;;  %15264 = vpow2.f32 %v12612_v5 }
 0xf77   :  { %v19197_v21 = vpop.eup %15260 }
 0xf78   :  { %v12656_v17 = vadd.f32 -1.0, %v8429_v42  ;;  %v8430_v49 = vmul.f32 2.0, %v19197_v21  ;;  %v13760_v42 = vadd.f32 %v19099_v8, %v17033_v6 }
 0xf7a   :  { %8507 = vrot.lane.b32.xlu0 %v12656_v17, %s15900_s5  ;;  %v12657_v4 = vadd.f32 -1.0, %v8430_v49  ;;  %v12614_v17 = vmul.f32 -1.442695, %v13758_v56  ;;  %v12616_v49 = vmul.f32 -1.442695, %v13760_v42  ;;  %v13766_v56 = vadd.f32 %v19108_v52, %v17033_v6 }
 0xf7b   :  { %v13772_v52 = vadd.f32 %v19124_v61, %v17033_v6  ;;  %v13774_v61 = vadd.f32 %v19134_v40, %v17033_v6 }
 0xf7c   :  { %8509 = vrot.lane.b32.xlu1 %v12657_v4, %s15900_s5  ;;  %15266 = vpow2.f32 %v12614_v17  ;;  %v12622_v17 = vmul.f32 -1.442695, %v13766_v56 }
 0xf7d   :  { %15268 = vpow2.f32 %v12616_v49 }
 0xf7e   :  { %v15263_v4 = vpop.eup %15262 }
 0xf7f   :  { %v8319_v45 = vadd.f32 1.0, %v15263_v4 }
 0xf80   :  { %v15265_v31 = vpop.eup %15264 }
 0xf81   :  { %v8321_v46 = vadd.f32 1.0, %v15265_v31  ;;  %15270 = vrcp.f32 %v8319_v45  ;;  %v13770_v31 = vadd.f32 %v19120_v60, %v17033_v6  ;;  %v12628_v60 = vmul.f32 -1.442695, %v13772_v52 }
 0xf82   :  { %15272 = vpow2.f32 %v12618_v36  ;;  %v12630_v52 = vmul.f32 -1.442695, %v13774_v61 }
 0xf83   :  { %15274 = vrcp.f32 %v8321_v46  ;;  %v12626_v46 = vmul.f32 -1.442695, %v13770_v31 }
 0xf84   :  { %15276 = vpow2.f32 %v12620_v11 }
 0xf86   :  { %v15267_v5 = vpop.eup %15266 }
 0xf87   :  { %v15269_v8 = vpop.eup %15268  ;;  %v8323_v42 = vadd.f32 1.0, %v15267_v5 }
 0xf88   :  { %v8325_v49 = vadd.f32 1.0, %v15269_v8 }
 0xf89   :  { %15278 = vrcp.f32 %v8323_v42 }
 0xf8a   :  { %15280 = vpow2.f32 %v12622_v17  ;;  %v13776_v17 = vadd.f32 %v19138_v29, %v17033_v6 }
 0xf8b   :  { %v19220_v4 = vpop.eup %15270  ;;  %15282 = vrcp.f32 %v8325_v49 }
 0xf8c   :  { %v15273_v19 = vpop.eup %15272  ;;  %15284 = vpow2.f32 %v12624_v55 }
 0xf8d   :  { %v19224_v45 = vpop.eup %15274  ;;  %v8327_v5 = vadd.f32 1.0, %v15273_v19  ;;  %15286 = vpow2.f32 %v12626_v46 }
 0xf8e   :  { %v15277_v36 = vpop.eup %15276 }
 0xf8f   :  { %v8329_v8 = vadd.f32 1.0, %v15277_v36  ;;  %15288 = vrcp.f32 %v8327_v5  ;;  %v12632_v36 = vmul.f32 -1.442695, %v13776_v17 }
 0xf90   :  { %15290 = vpow2.f32 %v12628_v60 }
 0xf91   :  { %15292 = vrcp.f32 %v8329_v8  ;;  %v13780_v8 = vadd.f32 %v19152_v2, %v17033_v6  ;;  %v13782_v2 = vadd.f32 %v19162_v7, %v17033_v6 }
 0xf92   :  { %15294 = vpow2.f32 %v12630_v52 }
 0xf93   :  { %v19232_v43 = vpop.eup %15278  ;;  %v12636_v52 = vmul.f32 -1.442695, %v13780_v8  ;;  %v12638_v8 = vmul.f32 -1.442695, %v13782_v2 }
 0xf94   :  { %v15281_v42 = vpop.eup %15280 }
 0xf95   :  { %v19236_v55 = vpop.eup %15282 }
 0xf96   :  { %v15285_v19 = vpop.eup %15284 }
 0xf97   :  { %v8333_v46 = vadd.f32 1.0, %v15285_v19  ;;  %v15287_v29 = vpop.eup %15286 }
 0xf98   :  { %v8335_v17 = vadd.f32 1.0, %v15287_v29 }
 0xf99   :  { %v19244_v5 = vpop.eup %15288 }
 0xf9a   :  { %v15291_v60 = vpop.eup %15290 }
 0xfb4   :  { %v8480_v38 = vpop.permute.xlu0 %8479 }
 0xfb5   :  { %v8527_v33 = vmul.f32 %v19220_v4, %v8480_v38 }
 0xfb6   :  { %v8482_v11 = vpop.permute.xlu1 %8481 }
 0xfb7   :  { %v8528_v56 = vmul.f32 %v19224_v45, %v8482_v11  ;;  %8559 = vrot.lane.b32.xlu0 %v8527_v33, %s15900_s5  ;;  %v8331_v33 = vadd.f32 1.0, %v15281_v42  ;;  %v13778_v11 = vadd.f32 %v19148_v27, %v17033_v6  ;;  %v19249_v42 = vpop.eup %15292  ;;  %v8337_v27 = vadd.f32 1.0, %v15291_v60 }
 0xfb9   :  { %8561 = vrot.lane.b32.xlu1 %v8528_v56, %s15900_s5  ;;  %15296 = vrcp.f32 %v8331_v33 }
 0xfba   :  { %15298 = vpow2.f32 %v12632_v36 }
 0xfbb   :  { %15300 = vrcp.f32 %v8333_v46  ;;  %v13784_v46 = vadd.f32 %v19166_v57, %v17033_v6 }
 0xfbc   :  { %v8484_v49 = vpop.permute.xlu0 %8483  ;;  %15302 = vrcp.f32 %v8335_v17 }
 0xfbd   :  { %v8529_v31 = vmul.f32 %v19232_v43, %v8484_v49  ;;  %v12640_v17 = vmul.f32 -1.442695, %v13784_v46 }
 0xfbe   :  { %v8486_v38 = vpop.permute.xlu1 %8485 }
 0xfbf   :  { %v8530_v40 = vmul.f32 %v19236_v55, %v8486_v38  ;;  %8563 = vrot.lane.b32.xlu0 %v8529_v31, %s15900_s5  ;;  %v12634_v31 = vmul.f32 -1.442695, %v13778_v11  ;;  %v15295_v38 = vpop.eup %15294 }
 0xfc1   :  { %8565 = vrot.lane.b32.xlu1 %v8530_v40, %s15900_s5  ;;  %15304 = vpow2.f32 %v12634_v31 }
 0xfc2   :  { %15306 = vrcp.f32 %v8337_v27 }
 0xfc3   :  { %v19256_v33 = vpop.eup %15296  ;;  %15308 = vpow2.f32 %v12636_v52 }
 0xfc4   :  { %v8488_v56 = vpop.permute.xlu0 %8487  ;;  %v15299_v36 = vpop.eup %15298 }
 0xfc5   :  { %v8531_v61 = vmul.f32 %v19244_v5, %v8488_v56  ;;  %v19261_v11 = vpop.eup %15300  ;;  %v8339_v56 = vadd.f32 1.0, %v15295_v38  ;;  %v8341_v7 = vadd.f32 1.0, %v15299_v36 }
 0xfc6   :  { %v8490_v49 = vpop.permute.xlu1 %8489 }
 0xfc7   :  { %v8532_v19 = vmul.f32 %v19249_v42, %v8490_v49  ;;  %8567 = vrot.lane.b32.xlu0 %v8531_v61, %s15900_s5  ;;  %15310 = vrcp.f32 %v8339_v56  ;;  %v19266_v49 = vpop.eup %15302 }
 0xfc8   :  { %15312 = vpow2.f32 %v12638_v8 }
 0xfc9   :  { %8569 = vrot.lane.b32.xlu1 %v8532_v19, %s15900_s5  ;;  %15314 = vrcp.f32 %v8341_v7 }
 0xfca   :  { %15316 = vpow2.f32 %v12640_v17 }
 0xfcb   :  { %v15305_v57 = vpop.eup %15304 }
 0xfcc   :  { %v8492_v40 = vpop.permute.xlu0 %8491  ;;  %v19268_v19 = vpop.eup %15306  ;;  %v8343_v2 = vadd.f32 1.0, %v15305_v57 }
 0xfcd   :  { %v8533_v29 = vmul.f32 %v19256_v33, %v8492_v40  ;;  %v15309_v52 = vpop.eup %15308 }
 0xfce   :  { %v8494_v60 = vpop.permute.xlu1 %8493  ;;  %v8345_v36 = vadd.f32 1.0, %v15309_v52  ;;  %15318 = vrcp.f32 %v8343_v2 }
 0xfcf   :  { %v8534_v61 = vmul.f32 %v19261_v11, %v8494_v60  ;;  %8571 = vrot.lane.b32.xlu0 %v8533_v29, %s15900_s5 }
 0xfd0   :  { %15320 = vrcp.f32 %v8345_v36 }
 0xfd1   :  { %8573 = vrot.lane.b32.xlu1 %v8534_v61, %s15900_s5  ;;  %v19274_v46 = vpop.eup %15310 }
 0xfd2   :  { %v15313_v29 = vpop.eup %15312 }
 0xfd3   :  { %v19276_v60 = vpop.eup %15314  ;;  %v8347_v17 = vadd.f32 1.0, %v15313_v29 }
 0xfd4   :  { %v8496_v31 = vpop.permute.xlu0 %8495  ;;  %v15317_v61 = vpop.eup %15316 }
 0xfd5   :  { %v8535_v27 = vmul.f32 %v19266_v49, %v8496_v31  ;;  %v8349_v31 = vadd.f32 1.0, %v15317_v61  ;;  %15322 = vrcp.f32 %v8347_v17 }
 0xfd6   :  { %v8498_v38 = vpop.permute.xlu1 %8497 }
 0xfd7   :  { %v8536_v40 = vmul.f32 %v19268_v19, %v8498_v38  ;;  %8575 = vrot.lane.b32.xlu0 %v8535_v27, %s15900_s5  ;;  %15324 = vrcp.f32 %v8349_v31 }
 0xfd8   :  { %v19282_v27 = vpop.eup %15318 }
 0xfd9   :  { %8577 = vrot.lane.b32.xlu1 %v8536_v40, %s15900_s5 }
 0xfda   :  { %v19285_v2 = vpop.eup %15320 }
 0xfdc   :  { %v8500_v56 = vpop.permute.xlu0 %8499 }
 0xfdd   :  { %v8537_v8 = vmul.f32 %v19274_v46, %v8500_v56 }
 0xfde   :  { %v8502_v7 = vpop.permute.xlu1 %8501 }
 0xfdf   :  { %v8538_v57 = vmul.f32 %v19276_v60, %v8502_v7  ;;  %8579 = vrot.lane.b32.xlu0 %v8537_v8, %s15900_s5  ;;  %v19290_v29 = vpop.eup %15322 }
 0xfe1   :  { %8581 = vrot.lane.b32.xlu1 %v8538_v57, %s15900_s5  ;;  %v19293_v61 = vpop.eup %15324  ;;  %v8447_v57 = vmul.f32 %v19220_v4, %v18892_v1  ;;  %v8450_v1 = vmul.f32 %v19236_v55, %v18907_v10  ;;  %v8452_v10 = vmul.f32 %v19249_v42, %v18919_v9  ;;  %v8454_v9 = vmul.f32 %v19261_v11, %v18931_v47 }
 0xfe2   :  { %v8456_v47 = vmul.f32 %v19268_v19, %v18943_v41  ;;  %v8458_v41 = vmul.f32 %v19276_v60, %v18955_v44  ;;  %v8460_v44 = vmul.f32 %v19285_v2, %v18967_v59  ;;  %v8462_v59 = vmul.f32 %v19293_v61, %v18979_v24 }
 0xfe4   :  { %v8504_v52 = vpop.permute.xlu0 %8503 }
 0xfe5   :  { %v8539_v38 = vmul.f32 %v19282_v27, %v8504_v52 }
 0xfe6   :  { %v8506_v40 = vpop.permute.xlu1 %8505 }
 0xfe7   :  { %v8540_v36 = vmul.f32 %v19285_v2, %v8506_v40  ;;  %8583 = vrot.lane.b32.xlu0 %v8539_v38, %s15900_s5  ;;  %v8448_v38 = vmul.f32 %v19224_v45, %v18897_v63 }
 0xfe9   :  { %8585 = vrot.lane.b32.xlu1 %v8540_v36, %s15900_s5 }
 0xfec   :  { %v8508_v56 = vpop.permute.xlu0 %8507 }
 0xfed   :  { %v8541_v8 = vmul.f32 %v19290_v29, %v8508_v56  ;;  %v8449_v56 = vmul.f32 %v19232_v43, %v18902_v34  ;;  %v8451_v34 = vmul.f32 %v19244_v5, %v18914_v22  ;;  %v8453_v22 = vmul.f32 %v19256_v33, %v18926_v20 }
 0xfee   :  { %v8510_v7 = vpop.permute.xlu1 %8509  ;;  %v8455_v20 = vmul.f32 %v19266_v49, %v18938_v30  ;;  %v8457_v30 = vmul.f32 %v19274_v46, %v18950_v16  ;;  %v8459_v16 = vmul.f32 %v19282_v27, %v18962_v50  ;;  %v8461_v50 = vmul.f32 %v19290_v29, %v18974_v39 }
 0xfef   :  { %v8542_v17 = vmul.f32 %v19293_v61, %v8510_v7  ;;  %8587 = vrot.lane.b32.xlu0 %v8541_v8, %s15900_s5 }
 0xff1   :  { %8589 = vrot.lane.b32.xlu1 %v8542_v17, %s15900_s5 }
0x1029   :  { %v8560_v31 = vpop.permute.xlu0 %8559 }
0x102a   :  { %v19300_v52 = vadd.f32 %v8560_v31, %v8447_v57 }
0x102b   :  { %v8562_v40 = vpop.permute.xlu1 %8561 }
0x102c   :  { %15326 = vtanh.f32 %v19300_v52  ;;  %v19305_v36 = vadd.f32 %v8562_v40, %v8448_v38 }
0x102e   :  { %15328 = vtanh.f32 %v19305_v36 }
0x1031   :  { %v8564_v8 = vpop.permute.xlu0 %8563 }
0x1032   :  { %v19310_v7 = vadd.f32 %v8564_v8, %v8449_v56 }
0x1033   :  { %v8566_v4 = vpop.permute.xlu1 %8565 }
0x1034   :  { %15330 = vtanh.f32 %v19310_v7  ;;  %v19315_v63 = vadd.f32 %v8566_v4, %v8450_v1 }
0x1036   :  { %v15327_v45 = vpop.eup %15326  ;;  %15332 = vtanh.f32 %v19315_v63 }
0x1037   :  { %8655 = vrot.lane.b32.xlu0 %v15327_v45, %s15900_s5 }
0x1038   :  { %v15329_v17 = vpop.eup %15328 }
0x1039   :  { %8657 = vrot.lane.b32.xlu1 %v15329_v17, %s15900_s5  ;;  %v8568_v43 = vpop.permute.xlu0 %8567 }
0x103a   :  { %v19322_v57 = vadd.f32 %v8568_v43, %v8451_v34 }
0x103b   :  { %v8570_v55 = vpop.permute.xlu1 %8569 }
0x103c   :  { %15334 = vtanh.f32 %v19322_v57  ;;  %v19327_v31 = vadd.f32 %v8570_v55, %v8452_v10 }
0x103e   :  { %v15331_v38 = vpop.eup %15330  ;;  %15336 = vtanh.f32 %v19327_v31 }
0x103f   :  { %8659 = vrot.lane.b32.xlu0 %v15331_v38, %s15900_s5 }
0x1040   :  { %v15333_v40 = vpop.eup %15332 }
0x1041   :  { %8661 = vrot.lane.b32.xlu1 %v15333_v40, %s15900_s5  ;;  %v8572_v5 = vpop.permute.xlu0 %8571 }
0x1042   :  { %v19334_v56 = vadd.f32 %v8572_v5, %v8453_v22 }
0x1043   :  { %v8574_v42 = vpop.permute.xlu1 %8573 }
0x1044   :  { %15338 = vtanh.f32 %v19334_v56  ;;  %v19339_v8 = vadd.f32 %v8574_v42, %v8454_v9 }
0x1046   :  { %v15335_v1 = vpop.eup %15334  ;;  %15340 = vtanh.f32 %v19339_v8 }
0x1047   :  { %8663 = vrot.lane.b32.xlu0 %v15335_v1, %s15900_s5 }
0x1048   :  { %v15337_v4 = vpop.eup %15336 }
0x1049   :  { %8665 = vrot.lane.b32.xlu1 %v15337_v4, %s15900_s5  ;;  %v8576_v33 = vpop.permute.xlu0 %8575 }
0x104a   :  { %v19346_v45 = vadd.f32 %v8576_v33, %v8455_v20 }
0x104b   :  { %v8578_v11 = vpop.permute.xlu1 %8577 }
0x104c   :  { %15342 = vtanh.f32 %v19346_v45  ;;  %v19351_v17 = vadd.f32 %v8578_v11, %v8456_v47 }
0x104e   :  { %v15339_v34 = vpop.eup %15338  ;;  %15344 = vtanh.f32 %v19351_v17 }
0x104f   :  { %8667 = vrot.lane.b32.xlu0 %v15339_v34, %s15900_s5 }
0x1050   :  { %v15341_v43 = vpop.eup %15340 }
0x1051   :  { %8669 = vrot.lane.b32.xlu1 %v15341_v43, %s15900_s5  ;;  %v8580_v49 = vpop.permute.xlu0 %8579 }
0x1052   :  { %v19358_v10 = vadd.f32 %v8580_v49, %v8457_v30  ;;  %v15875_v30 = vld [vmem:[%s21565_s8] ss:$8 sps:$4 sm:$0xff]  }
0x1053   :  { %v8582_v19 = vpop.permute.xlu1 %8581 }
0x1054   :  { %15346 = vtanh.f32 %v19358_v10  ;;  %v19363_v55 = vadd.f32 %v8582_v19, %v8458_v41  ;;  %v15877_v19 = vld [vmem:[%s21565_s8 + $0x10] ss:$8 sps:$4 sm:$0xff]  }
0x1056   :  { %v15343_v38 = vpop.eup %15342  ;;  %15348 = vtanh.f32 %v19363_v55 }
0x1057   :  { %8671 = vrot.lane.b32.xlu0 %v15343_v38, %s15900_s5 }
0x1058   :  { %v15345_v40 = vpop.eup %15344 }
0x1059   :  { %8673 = vrot.lane.b32.xlu1 %v15345_v40, %s15900_s5  ;;  %v8584_v46 = vpop.permute.xlu0 %8583  ;;  %v15878_v40 = vld [vmem:[%s21565_s8 + $0x24] ss:$8 sps:$4 sm:$0xff]  }
0x105a   :  { %v19370_v22 = vadd.f32 %v8584_v46, %v8459_v16  ;;  %v15880_v16 = vld [vmem:[%s21565_s8 + $0x34] ss:$8 sps:$4 sm:$0xff]  }
0x105b   :  { %v8586_v60 = vpop.permute.xlu1 %8585 }
0x105c   :  { %15350 = vtanh.f32 %v19370_v22  ;;  %v19375_v5 = vadd.f32 %v8586_v60, %v8460_v44 }
0x105e   :  { %v15347_v9 = vpop.eup %15346  ;;  %15352 = vtanh.f32 %v19375_v5 }
0x105f   :  { %8675 = vrot.lane.b32.xlu0 %v15347_v9, %s15900_s5  ;;  %v15881_v9 = vld [vmem:[%s21565_s8 + $0x30] ss:$8 sps:$4 sm:$0xff]  }
0x1060   :  { %v15349_v42 = vpop.eup %15348 }
0x1061   :  { %8677 = vrot.lane.b32.xlu1 %v15349_v42, %s15900_s5  ;;  %v8588_v27 = vpop.permute.xlu0 %8587  ;;  %v15882_v42 = vld [vmem:[%s21565_s8 + $0x4] ss:$8 sps:$4 sm:$0xff]  }
0x1062   :  { %v19382_v1 = vadd.f32 %v8588_v27, %v8461_v50 }
0x1063   :  { %v8590_v2 = vpop.permute.xlu1 %8589 }
0x1064   :  { %15354 = vtanh.f32 %v19382_v1  ;;  %v19387_v4 = vadd.f32 %v8590_v2, %v8462_v59 }
0x1066   :  { %v15351_v20 = vpop.eup %15350  ;;  %15356 = vtanh.f32 %v19387_v4 }
0x1067   :  { %8679 = vrot.lane.b32.xlu0 %v15351_v20, %s15900_s5 }
0x1068   :  { %v15353_v33 = vpop.eup %15352 }
0x1069   :  { %8681 = vrot.lane.b32.xlu1 %v15353_v33, %s15900_s5 }
0x106e   :  { %v15355_v39 = vpop.eup %15354 }
0x106f   :  { %8683 = vrot.lane.b32.xlu0 %v15355_v39, %s15900_s5 }
0x1070   :  { %v15357_v29 = vpop.eup %15356 }
0x1071   :  { %8685 = vrot.lane.b32.xlu1 %v15357_v29, %s15900_s5 }
0x10a9   :  { %v8656_v24 = vpop.permute.xlu0 %8655 }
0x10aa   :  { %v19395_v47 = vmul.f32 %v19113_v13, %v8656_v24  ;;  %v15876_v13 = vld [vmem:[%s21565_s8 + $0x14] ss:$8 sps:$4 sm:$0xff]  }
0x10ab   :  { %v8658_v61 = vpop.permute.xlu1 %8657 }
0x10ac   :  { %21774 = vst [vmem:[#allocation64_spill] sm:$0xff] %v19395_v47  ;;  %v19398_v11 = vmul.f32 %v19117_v0, %v8658_v61 }
0x10ae   :  { %21775 = vst [vmem:[#allocation65_spill] sm:$0xff] %v19398_v11  ;;  %v8863_v34 = vpack.c.bf16 %v19398_v11, %v19395_v47 }
0x10b0   :  { %12658 = vmatmul.mubr.msk.bf16.vlgmr.msra.gmra.mrb[120].mxu1 %vm4806_vm1, %v8863_v34 }
0x10b1   :  { %v8660_v43 = vpop.permute.xlu0 %8659  ;;  %8937 = vmatprep.mubr.bf16.mxu1 %v21727_v23  ;;  %9713 = vmatpush1.bf16.msra.mxu1 %v15875_v30 }
0x10b2   :  { %9714 = vmatprep.subr.bf16.mxu1 %v15876_v13  ;;  %v19411_v49 = vmul.f32 %v19127_v53, %v8660_v43  ;;  %v15879_v53 = vld [vmem:[%s21565_s8 + $0x20] ss:$8 sps:$4 sm:$0xff]  }
0x10b3   :  { %v8662_v0 = vpop.permute.xlu1 %8661 }
0x10b4   :  { %21776 = vst [vmem:[#allocation66_spill] sm:$0xff] %v19411_v49  ;;  %v19414_v41 = vmul.f32 %v19131_v35, %v8662_v0 }
0x10b5   :  { %9715 = vmatpush1.bf16.msra.mxu1 %v15877_v19 }
0x10b6   :  { %21777 = vst [vmem:[#allocation67_spill] sm:$0xff] %v19414_v41  ;;  %v8864_v38 = vpack.c.bf16 %v19414_v41, %v19411_v49  ;;  %9716 = vmatprep.subr.bf16.mxu1 %v15878_v40 }
0x10b8   :  { %12659 = vmatmul.mubr.msk.bf16.gmra.mrb[124].mxu1 %vm4806_vm1, %v8864_v38 }
0x10b9   :  { %8947 = vmatprep.mubr.bf16.mxu1 %v21727_v23  ;;  %9717 = vmatpush1.bf16.msra.mxu1 %v15879_v53  ;;  %v8664_v35 = vpop.permute.xlu0 %8663 }
0x10ba   :  { %9718 = vmatprep.subr.bf16.mxu1 %v15880_v16  ;;  %v19433_v44 = vmul.f32 %v19141_v48, %v8664_v35 }
0x10bb   :  { %v8666_v46 = vpop.permute.xlu1 %8665 }
0x10bc   :  { %21778 = vst [vmem:[#allocation68_spill] sm:$0xff] %v19433_v44  ;;  %v19436_v60 = vmul.f32 %v19145_v54, %v8666_v46 }
0x10bd   :  { %9719 = vmatpush1.bf16.msra.mxu1 %v15881_v9 }
0x10be   :  { %21779 = vst [vmem:[#allocation69_spill] sm:$0xff] %v19436_v60  ;;  %10529 = vmatprep.subr.bf16.mxu1 %v15882_v42  ;;  %v8865_v50 = vpack.c.bf16 %v19436_v60, %v19433_v44 }
0x10c0   :  { %12660 = vmatmul.mubr.msk.bf16.gmra.mrb[128].mxu1 %vm4806_vm1, %v8865_v50 }
0x10c1   :  { %v8668_v48 = vpop.permute.xlu0 %8667  ;;  %8957 = vmatprep.mubr.bf16.mxu1 %v21727_v23 }
0x10c2   :  { %v19449_v27 = vmul.f32 %v19155_v15, %v8668_v48 }
0x10c3   :  { %v8670_v54 = vpop.permute.xlu1 %8669 }
0x10c4   :  { %21780 = vst [vmem:[#allocation70_spill] sm:$0xff] %v19449_v27  ;;  %v19452_v59 = vmul.f32 %v19159_v62, %v8670_v54 }
0x10c6   :  { %21781 = vst [vmem:[#allocation71_spill] sm:$0xff] %v19452_v59  ;;  %v8866_v2 = vpack.c.bf16 %v19452_v59, %v19449_v27 }
0x10c8   :  { %12661 = vmatmul.mubr.msk.bf16.gmra.mrb[132].mxu1 %vm4806_vm1, %v8866_v2 }
0x10c9   :  { %8967 = vmatprep.mubr.bf16.mxu1 %v21727_v23  ;;  %v8672_v20 = vpop.permute.xlu0 %8671 }
0x10ca   :  { %v19459_v39 = vmul.f32 %v19169_v14, %v8672_v20 }
0x10cb   :  { %v8674_v33 = vpop.permute.xlu1 %8673 }
0x10cc   :  { %21782 = vst [vmem:[#allocation72_spill] sm:$0xff] %v19459_v39  ;;  %v19462_v29 = vmul.f32 %v19173_v51, %v8674_v33 }
0x10ce   :  { %21783 = vst [vmem:[#allocation73_spill] sm:$0xff] %v19462_v29  ;;  %v8867_v15 = vpack.c.bf16 %v19462_v29, %v19459_v39 }
0x10d0   :  { %12662 = vmatmul.mubr.msk.bf16.gmra.mrb[136].mxu1 %vm4806_vm1, %v8867_v15 }
0x10d1   :  { %v8676_v62 = vpop.permute.xlu0 %8675  ;;  %8977 = vmatprep.mubr.bf16.mxu1 %v21727_v23 }
0x10d2   :  { %v19469_v61 = vmul.f32 %v19178_v12, %v8676_v62 }
0x10d3   :  { %v8678_v24 = vpop.permute.xlu1 %8677 }
0x10d4   :  { %21784 = vst [vmem:[#allocation74_spill] sm:$0xff] %v19469_v61  ;;  %v19472_v34 = vmul.f32 %v19181_v25, %v8678_v24 }
0x10d6   :  { %21785 = vst [vmem:[#allocation75_spill] sm:$0xff] %v19472_v34  ;;  %v8868_v14 = vpack.c.bf16 %v19472_v34, %v19469_v61 }
0x10d8   :  { %12663 = vmatmul.mubr.msk.bf16.gmra.mrb[140].mxu1 %vm4806_vm1, %v8868_v14 }
0x10d9   :  { %8987 = vmatprep.mubr.bf16.mxu1 %v21727_v23  ;;  %v8680_v51 = vpop.permute.xlu0 %8679 }
0x10da   :  { %v19479_v30 = vmul.f32 %v19186_v3, %v8680_v51 }
0x10db   :  { %v8682_v43 = vpop.permute.xlu1 %8681 }
0x10dc   :  { %21786 = vst [vmem:[#allocation76_spill] sm:$0xff] %v19479_v30  ;;  %v19482_v13 = vmul.f32 %v19189_v28, %v8682_v43 }
0x10de   :  { %21787 = vst [vmem:[#allocation77_spill] sm:$0xff] %v19482_v13  ;;  %v8869_v12 = vpack.c.bf16 %v19482_v13, %v19479_v30 }
0x10e0   :  { %12664 = vmatmul.mubr.msk.bf16.gmra.mrb[144].mxu1 %vm4806_vm1, %v8869_v12 }
0x10e1   :  { %v8684_v25 = vpop.permute.xlu0 %8683  ;;  %8997 = vmatprep.mubr.bf16.mxu1 %v21727_v23 }
0x10e2   :  { %v19489_v19 = vmul.f32 %v19194_v58, %v8684_v25 }
0x10e3   :  { %v8686_v0 = vpop.permute.xlu1 %8685 }
0x10e4   :  { %21788 = vst [vmem:[#allocation78_spill] sm:$0xff] %v19489_v19  ;;  %v19492_v38 = vmul.f32 %v19197_v21, %v8686_v0 }
0x10e6   :  { %21789 = vst [vmem:[#allocation79_spill] sm:$0xff] %v19492_v38  ;;  %v8870_v3 = vpack.c.bf16 %v19492_v38, %v19489_v19 }
0x10e8   :  { %12665 = vmatmul.mubr.msk.bf16.gmra.mrb[148].mxu1 %vm4806_vm1, %v8870_v3 }
0x10e9   :  { %9744 = vmatprep.mubr.bf16.mxu1 %v21727_v23 }
0x1183   :  { %v19498_v28 = vpop.f32.mrb[120].mxu1 }
0x1184   :  { %v8931_v40 = vpop.f32.mrb[121].mxu1 }
0x1185   :  { %v13787_v53 = vadd.f32 %v8931_v40, %v17432_v37  ;;  %v19501_v35 = vpop.f32.mrb[122].mxu1 }
0x1186   :  { %v8935_v16 = vpop.f32.mrb[123].mxu1 }
0x1187   :  { %v12667_v58 = vmul.f32 -1.442695, %v13787_v53  ;;  %v13789_v46 = vadd.f32 %v8935_v16, %v17432_v37 }
0x1189   :  { %15358 = vpow2.f32 %v12667_v58  ;;  %v12669_v21 = vmul.f32 -1.442695, %v13789_v46 }
0x118b   :  { %15360 = vpow2.f32 %v12669_v21  ;;  %v19504_v9 = vpop.f32.mrb[124].mxu1 }
0x118c   :  { %v8941_v42 = vpop.f32.mrb[125].mxu1  ;;  %v13790_v29 = vadd.f32 %v19504_v9, %v17033_v6 }
0x118d   :  { %v13791_v50 = vadd.f32 %v8941_v42, %v17432_v37  ;;  %v19507_v48 = vpop.f32.mrb[126].mxu1 }
0x118e   :  { %v8945_v54 = vpop.f32.mrb[127].mxu1 }
0x118f   :  { %v12671_v2 = vmul.f32 -1.442695, %v13791_v50  ;;  %v13793_v20 = vadd.f32 %v8945_v54, %v17432_v37 }
0x1191   :  { %15362 = vpow2.f32 %v12671_v2  ;;  %v12673_v33 = vmul.f32 -1.442695, %v13793_v20 }
0x1193   :  { %v15359_v15 = vpop.eup %15358  ;;  %15364 = vpow2.f32 %v12673_v33  ;;  %v19510_v24 = vpop.f32.mrb[128].mxu1 }
0x1194   :  { %v9137_v62 = vadd.f32 1.0, %v15359_v15  ;;  %v8951_v51 = vpop.f32.mrb[129].mxu1 }
0x1195   :  { %v15361_v14 = vpop.eup %15360  ;;  %v13795_v12 = vadd.f32 %v8951_v51, %v17432_v37  ;;  %v19513_v25 = vpop.f32.mrb[130].mxu1 }
0x1196   :  { %15366 = vrcp.f32 %v9137_v62  ;;  %v9139_v43 = vadd.f32 1.0, %v15361_v14  ;;  %v8955_v0 = vpop.f32.mrb[131].mxu1 }
0x1197   :  { %v12675_v3 = vmul.f32 -1.442695, %v13795_v12  ;;  %v13797_v40 = vadd.f32 %v8955_v0, %v17432_v37 }
0x1198   :  { %15368 = vrcp.f32 %v9139_v43 }
0x1199   :  { %15370 = vpow2.f32 %v12675_v3  ;;  %v12677_v53 = vmul.f32 -1.442695, %v13797_v40 }
0x119b   :  { %v15363_v16 = vpop.eup %15362  ;;  %15372 = vpow2.f32 %v12677_v53  ;;  %v19516_v46 = vpop.f32.mrb[132].mxu1 }
0x119c   :  { %v9141_v58 = vadd.f32 1.0, %v15363_v16  ;;  %v8961_v42 = vpop.f32.mrb[133].mxu1 }
0x119d   :  { %v15365_v21 = vpop.eup %15364  ;;  %v13799_v54 = vadd.f32 %v8961_v42, %v17432_v37  ;;  %v19519_v2 = vpop.f32.mrb[134].mxu1 }
0x119e   :  { %15374 = vrcp.f32 %v9141_v58  ;;  %v9143_v50 = vadd.f32 1.0, %v15365_v21  ;;  %v8965_v20 = vpop.f32.mrb[135].mxu1 }
0x119f   :  { %v12679_v15 = vmul.f32 -1.442695, %v13799_v54  ;;  %v13801_v62 = vadd.f32 %v8965_v20, %v17432_v37 }
0x11a0   :  { %v19521_v33 = vpop.eup %15366  ;;  %15376 = vrcp.f32 %v9143_v50 }
0x11a1   :  { %v9232_v14 = vmul.f32 2.0, %v19521_v33  ;;  %15378 = vpow2.f32 %v12679_v15  ;;  %v12681_v43 = vmul.f32 -1.442695, %v13801_v62 }
0x11a2   :  { %v19525_v51 = vpop.eup %15368 }
0x11a3   :  { %v12698_v12 = vadd.f32 -1.0, %v9232_v14  ;;  %v9233_v0 = vmul.f32 2.0, %v19525_v51  ;;  %v15371_v3 = vpop.eup %15370  ;;  %15380 = vpow2.f32 %v12681_v43  ;;  %v19528_v53 = vpop.f32.mrb[136].mxu1 }
0x11a4   :  { %v9145_v40 = vadd.f32 1.0, %v15371_v3  ;;  %v8971_v21 = vpop.f32.mrb[137].mxu1 }
0x11a5   :  { %9296 = vrot.lane.b32.xlu0 %v12698_v12, %s15900_s5  ;;  %v12699_v16 = vadd.f32 -1.0, %v9233_v0  ;;  %v15373_v58 = vpop.eup %15372  ;;  %v13803_v50 = vadd.f32 %v8971_v21, %v17432_v37  ;;  %v19532_v54 = vpop.f32.mrb[138].mxu1 }
0x11a6   :  { %15382 = vrcp.f32 %v9145_v40  ;;  %v9147_v42 = vadd.f32 1.0, %v15373_v58  ;;  %v8975_v15 = vpop.f32.mrb[139].mxu1 }
0x11a7   :  { %9298 = vrot.lane.b32.xlu1 %v12699_v16, %s15900_s5  ;;  %v12683_v62 = vmul.f32 -1.442695, %v13803_v50  ;;  %v13805_v14 = vadd.f32 %v8975_v15, %v17432_v37 }
0x11a8   :  { %v19535_v20 = vpop.eup %15374  ;;  %15384 = vrcp.f32 %v9147_v42 }
0x11a9   :  { %v9234_v43 = vmul.f32 2.0, %v19535_v20  ;;  %15386 = vpow2.f32 %v12683_v62  ;;  %v12685_v0 = vmul.f32 -1.442695, %v13805_v14 }
0x11aa   :  { %v19539_v12 = vpop.eup %15376 }
0x11ab   :  { %v12700_v3 = vadd.f32 -1.0, %v9234_v43  ;;  %v9235_v40 = vmul.f32 2.0, %v19539_v12  ;;  %v15379_v58 = vpop.eup %15378  ;;  %15388 = vpow2.f32 %v12685_v0  ;;  %v19542_v16 = vpop.f32.mrb[140].mxu1 }
0x11ac   :  { %v9149_v21 = vadd.f32 1.0, %v15379_v58  ;;  %v8981_v27 = vpop.f32.mrb[141].mxu1 }
0x11ad   :  { %9300 = vrot.lane.b32.xlu0 %v12700_v3, %s15900_s5  ;;  %v12701_v42 = vadd.f32 -1.0, %v9235_v40  ;;  %v15381_v50 = vpop.eup %15380  ;;  %v13807_v59 = vadd.f32 %v8981_v27, %v17432_v37  ;;  %v19546_v44 = vpop.f32.mrb[142].mxu1 }
0x11ae   :  { %15390 = vrcp.f32 %v9149_v21  ;;  %v9151_v15 = vadd.f32 1.0, %v15381_v50  ;;  %v8985_v62 = vpop.f32.mrb[143].mxu1 }
0x11af   :  { %9302 = vrot.lane.b32.xlu1 %v12701_v42, %s15900_s5  ;;  %v12687_v43 = vmul.f32 -1.442695, %v13807_v59  ;;  %v13809_v0 = vadd.f32 %v8985_v62, %v17432_v37 }
0x11b0   :  { %v19549_v14 = vpop.eup %15382  ;;  %15392 = vrcp.f32 %v9151_v15 }
0x11b1   :  { %v9236_v3 = vmul.f32 2.0, %v19549_v14  ;;  %15394 = vpow2.f32 %v12687_v43  ;;  %v12689_v58 = vmul.f32 -1.442695, %v13809_v0 }
0x11b2   :  { %v19553_v40 = vpop.eup %15384 }
0x11b3   :  { %v12702_v21 = vadd.f32 -1.0, %v9236_v3  ;;  %v9237_v27 = vmul.f32 2.0, %v19553_v40  ;;  %v15387_v50 = vpop.eup %15386  ;;  %15396 = vpow2.f32 %v12689_v58  ;;  %v19556_v42 = vpop.f32.mrb[144].mxu1 }
0x11b4   :  { %v9153_v60 = vadd.f32 1.0, %v15387_v50  ;;  %v8991_v49 = vpop.f32.mrb[145].mxu1 }
0x11b5   :  { %9304 = vrot.lane.b32.xlu0 %v12702_v21, %s15900_s5  ;;  %v12703_v15 = vadd.f32 -1.0, %v9237_v27  ;;  %v15389_v59 = vpop.eup %15388  ;;  %v13811_v41 = vadd.f32 %v8991_v49, %v17432_v37  ;;  %v19560_v47 = vpop.f32.mrb[146].mxu1 }
0x11b6   :  { %15398 = vrcp.f32 %v9153_v60  ;;  %v9155_v62 = vadd.f32 1.0, %v15389_v59  ;;  %v8995_v0 = vpop.f32.mrb[147].mxu1 }
0x11b7   :  { %9306 = vrot.lane.b32.xlu1 %v12703_v15, %s15900_s5  ;;  %v12691_v3 = vmul.f32 -1.442695, %v13811_v41  ;;  %v13813_v58 = vadd.f32 %v8995_v0, %v17432_v37 }
0x11b8   :  { %v19563_v43 = vpop.eup %15390  ;;  %15400 = vrcp.f32 %v9155_v62 }
0x11b9   :  { %v9238_v21 = vmul.f32 2.0, %v19563_v43  ;;  %15402 = vpow2.f32 %v12691_v3  ;;  %v12693_v60 = vmul.f32 -1.442695, %v13813_v58 }
0x11ba   :  { %v19567_v27 = vpop.eup %15392 }
0x11bb   :  { %v12704_v50 = vadd.f32 -1.0, %v9238_v21  ;;  %v9239_v49 = vmul.f32 2.0, %v19567_v27  ;;  %v15395_v59 = vpop.eup %15394  ;;  %15404 = vpow2.f32 %v12693_v60  ;;  %v19570_v15 = vpop.f32.mrb[148].mxu1 }
0x11bc   :  { %v9157_v11 = vadd.f32 1.0, %v15395_v59  ;;  %v9001_v19 = vpop.f32.mrb[149].mxu1 }
0x11bd   :  { %9308 = vrot.lane.b32.xlu0 %v12704_v50, %s15900_s5  ;;  %v12705_v62 = vadd.f32 -1.0, %v9239_v49  ;;  %v15397_v41 = vpop.eup %15396  ;;  %v13815_v38 = vadd.f32 %v9001_v19, %v17432_v37  ;;  %v19574_v30 = vpop.f32.mrb[150].mxu1 }
0x11be   :  { %15406 = vrcp.f32 %v9157_v11  ;;  %v9159_v0 = vadd.f32 1.0, %v15397_v41  ;;  %v9005_v3 = vpop.f32.mrb[151].mxu1 }
0x11bf   :  { %9310 = vrot.lane.b32.xlu1 %v12705_v62, %s15900_s5  ;;  %v12695_v21 = vmul.f32 -1.442695, %v13815_v38  ;;  %v13817_v60 = vadd.f32 %v9005_v3, %v17432_v37 }
0x11c0   :  { %v19577_v58 = vpop.eup %15398  ;;  %15408 = vrcp.f32 %v9159_v0 }
0x11c1   :  { %v9240_v50 = vmul.f32 2.0, %v19577_v58  ;;  %15410 = vpow2.f32 %v12695_v21  ;;  %v12697_v11 = vmul.f32 -1.442695, %v13817_v60 }
0x11c2   :  { %v19581_v49 = vpop.eup %15400 }
0x11c3   :  { %v12706_v59 = vadd.f32 -1.0, %v9240_v50  ;;  %v9241_v19 = vmul.f32 2.0, %v19581_v49  ;;  %v15403_v41 = vpop.eup %15402  ;;  %15412 = vpow2.f32 %v12697_v11 }
0x11c4   :  { %v9161_v13 = vadd.f32 1.0, %v15403_v41 }
0x11c5   :  { %9312 = vrot.lane.b32.xlu0 %v12706_v59, %s15900_s5  ;;  %v12707_v62 = vadd.f32 -1.0, %v9241_v19  ;;  %v15405_v39 = vpop.eup %15404 }
0x11c6   :  { %15414 = vrcp.f32 %v9161_v13  ;;  %v9163_v38 = vadd.f32 1.0, %v15405_v39 }
0x11c7   :  { %9314 = vrot.lane.b32.xlu1 %v12707_v62, %s15900_s5 }
0x11c8   :  { %v19586_v0 = vpop.eup %15406  ;;  %15416 = vrcp.f32 %v9163_v38 }
0x11c9   :  { %v9242_v3 = vmul.f32 2.0, %v19586_v0 }
0x11ca   :  { %v19589_v21 = vpop.eup %15408 }
0x11cb   :  { %v12708_v60 = vadd.f32 -1.0, %v9242_v3  ;;  %v9243_v50 = vmul.f32 2.0, %v19589_v21  ;;  %v15411_v11 = vpop.eup %15410 }
0x11cc   :  { %v9165_v41 = vadd.f32 1.0, %v15411_v11 }
0x11cd   :  { %9316 = vrot.lane.b32.xlu0 %v12708_v60, %s15900_s5  ;;  %v12709_v59 = vadd.f32 -1.0, %v9243_v50  ;;  %v15413_v19 = vpop.eup %15412 }
0x11ce   :  { %15418 = vrcp.f32 %v9165_v41  ;;  %v9167_v39 = vadd.f32 1.0, %v15413_v19 }
0x11cf   :  { %9318 = vrot.lane.b32.xlu1 %v12709_v59, %s15900_s5 }
0x11d0   :  { %v19594_v13 = vpop.eup %15414  ;;  %15420 = vrcp.f32 %v9167_v39 }
0x11d1   :  { %v9244_v62 = vmul.f32 2.0, %v19594_v13 }
0x11d2   :  { %v19597_v38 = vpop.eup %15416 }
0x11d3   :  { %v12710_v3 = vadd.f32 -1.0, %v9244_v62  ;;  %v9245_v61 = vmul.f32 2.0, %v19597_v38  ;;  %v13786_v62 = vadd.f32 %v19498_v28, %v17033_v6  ;;  %v13794_v28 = vadd.f32 %v19510_v24, %v17033_v6 }
0x11d4   :  { %v13800_v24 = vadd.f32 %v19519_v2, %v17033_v6 }
0x11d5   :  { %9320 = vrot.lane.b32.xlu0 %v12710_v3, %s15900_s5  ;;  %v12711_v11 = vadd.f32 -1.0, %v9245_v61  ;;  %v13788_v61 = vadd.f32 %v19501_v35, %v17033_v6  ;;  %v12666_v3 = vmul.f32 -1.442695, %v13786_v62  ;;  %v13796_v35 = vadd.f32 %v19513_v25, %v17033_v6 }
0x11d6   :  { %v12680_v25 = vmul.f32 -1.442695, %v13800_v24 }
0x11d7   :  { %9322 = vrot.lane.b32.xlu1 %v12711_v11, %s15900_s5  ;;  %v12668_v11 = vmul.f32 -1.442695, %v13788_v61  ;;  %15422 = vpow2.f32 %v12666_v3  ;;  %v12674_v61 = vmul.f32 -1.442695, %v13794_v28  ;;  %v12676_v9 = vmul.f32 -1.442695, %v13796_v35 }
0x11d8   :  { %v19602_v60 = vpop.eup %15418 }
0x11d9   :  { %v9246_v50 = vmul.f32 2.0, %v19602_v60  ;;  %15424 = vpow2.f32 %v12668_v11 }
0x11da   :  { %v19605_v41 = vpop.eup %15420 }
0x11db   :  { %v12712_v59 = vadd.f32 -1.0, %v9246_v50  ;;  %v9247_v19 = vmul.f32 2.0, %v19605_v41  ;;  %v13792_v50 = vadd.f32 %v19507_v48, %v17033_v6 }
0x11dd   :  { %9324 = vrot.lane.b32.xlu0 %v12712_v59, %s15900_s5  ;;  %v12713_v39 = vadd.f32 -1.0, %v9247_v19  ;;  %v12670_v59 = vmul.f32 -1.442695, %v13790_v29  ;;  %v12672_v19 = vmul.f32 -1.442695, %v13792_v50  ;;  %v13798_v29 = vadd.f32 %v19516_v46, %v17033_v6 }
0x11de   :  { %v13804_v46 = vadd.f32 %v19532_v54, %v17033_v6  ;;  %v13806_v54 = vadd.f32 %v19542_v16, %v17033_v6 }
0x11df   :  { %9326 = vrot.lane.b32.xlu1 %v12713_v39, %s15900_s5  ;;  %15426 = vpow2.f32 %v12670_v59  ;;  %v12678_v59 = vmul.f32 -1.442695, %v13798_v29 }
0x11e0   :  { %15428 = vpow2.f32 %v12672_v19 }
0x11e1   :  { %v15423_v39 = vpop.eup %15422 }
0x11e2   :  { %v9136_v62 = vadd.f32 1.0, %v15423_v39 }
0x11e3   :  { %v15425_v34 = vpop.eup %15424 }
0x11e4   :  { %v9138_v3 = vadd.f32 1.0, %v15425_v34  ;;  %15430 = vrcp.f32 %v9136_v62  ;;  %v13802_v34 = vadd.f32 %v19528_v53, %v17033_v6  ;;  %v12684_v53 = vmul.f32 -1.442695, %v13804_v46 }
0x11e5   :  { %15432 = vpow2.f32 %v12674_v61  ;;  %v12686_v46 = vmul.f32 -1.442695, %v13806_v54 }
0x11e6   :  { %15434 = vrcp.f32 %v9138_v3  ;;  %v12682_v3 = vmul.f32 -1.442695, %v13802_v34 }
0x11e7   :  { %15436 = vpow2.f32 %v12676_v9 }
0x11e9   :  { %v15427_v11 = vpop.eup %15426 }
0x11ea   :  { %v15429_v48 = vpop.eup %15428  ;;  %v9140_v50 = vadd.f32 1.0, %v15427_v11 }
0x11eb   :  { %v9142_v19 = vadd.f32 1.0, %v15429_v48 }
0x11ec   :  { %15438 = vrcp.f32 %v9140_v50 }
0x11ed   :  { %15440 = vpow2.f32 %v12678_v59  ;;  %v13808_v59 = vadd.f32 %v19546_v44, %v17033_v6 }
0x11ee   :  { %v19628_v39 = vpop.eup %15430  ;;  %15442 = vrcp.f32 %v9142_v19 }
0x11ef   :  { %v15433_v28 = vpop.eup %15432  ;;  %15444 = vpow2.f32 %v12680_v25 }
0x11f0   :  { %v19632_v62 = vpop.eup %15434  ;;  %v9144_v11 = vadd.f32 1.0, %v15433_v28  ;;  %15446 = vpow2.f32 %v12682_v3 }
0x11f1   :  { %v15437_v61 = vpop.eup %15436 }
0x11f2   :  { %v9146_v48 = vadd.f32 1.0, %v15437_v61  ;;  %15448 = vrcp.f32 %v9144_v11  ;;  %v12688_v61 = vmul.f32 -1.442695, %v13808_v59 }
0x11f3   :  { %15450 = vpow2.f32 %v12684_v53 }
0x11f4   :  { %15452 = vrcp.f32 %v9146_v48  ;;  %v13812_v48 = vadd.f32 %v19560_v47, %v17033_v6  ;;  %v13814_v47 = vadd.f32 %v19570_v15, %v17033_v6 }
0x11f5   :  { %15454 = vpow2.f32 %v12686_v46 }
0x11f6   :  { %v19640_v24 = vpop.eup %15438  ;;  %v12692_v46 = vmul.f32 -1.442695, %v13812_v48  ;;  %v12694_v48 = vmul.f32 -1.442695, %v13814_v47 }
0x11f7   :  { %v15441_v50 = vpop.eup %15440 }
0x11f8   :  { %v19644_v25 = vpop.eup %15442 }
0x11f9   :  { %v15445_v28 = vpop.eup %15444 }
0x11fa   :  { %v9150_v3 = vadd.f32 1.0, %v15445_v28  ;;  %v15447_v44 = vpop.eup %15446 }
0x11fb   :  { %v9152_v59 = vadd.f32 1.0, %v15447_v44 }
0x11fc   :  { %v19652_v11 = vpop.eup %15448 }
0x11fd   :  { %v15451_v53 = vpop.eup %15450 }
0x1217   :  { %v9297_v35 = vpop.permute.xlu0 %9296 }
0x1218   :  { %v9344_v2 = vmul.f32 %v19628_v39, %v9297_v35 }
0x1219   :  { %v9299_v9 = vpop.permute.xlu1 %9298 }
0x121a   :  { %v9345_v29 = vmul.f32 %v19632_v62, %v9299_v9  ;;  %9376 = vrot.lane.b32.xlu0 %v9344_v2, %s15900_s5  ;;  %v9148_v2 = vadd.f32 1.0, %v15441_v50  ;;  %v13810_v9 = vadd.f32 %v19556_v42, %v17033_v6  ;;  %v19657_v50 = vpop.eup %15452  ;;  %v9154_v42 = vadd.f32 1.0, %v15451_v53 }
0x121c   :  { %9378 = vrot.lane.b32.xlu1 %v9345_v29, %s15900_s5  ;;  %15456 = vrcp.f32 %v9148_v2 }
0x121d   :  { %15458 = vpow2.f32 %v12688_v61 }
0x121e   :  { %15460 = vrcp.f32 %v9150_v3  ;;  %v13816_v3 = vadd.f32 %v19574_v30, %v17033_v6 }
0x121f   :  { %v9301_v19 = vpop.permute.xlu0 %9300  ;;  %15462 = vrcp.f32 %v9152_v59 }
0x1220   :  { %v9346_v34 = vmul.f32 %v19640_v24, %v9301_v19  ;;  %v12696_v59 = vmul.f32 -1.442695, %v13816_v3 }
0x1221   :  { %v9303_v35 = vpop.permute.xlu1 %9302 }
0x1222   :  { %v9347_v16 = vmul.f32 %v19644_v25, %v9303_v35  ;;  %9380 = vrot.lane.b32.xlu0 %v9346_v34, %s15900_s5  ;;  %v12690_v34 = vmul.f32 -1.442695, %v13810_v9  ;;  %v15455_v35 = vpop.eup %15454 }
0x1224   :  { %9382 = vrot.lane.b32.xlu1 %v9347_v16, %s15900_s5  ;;  %15464 = vpow2.f32 %v12690_v34 }
0x1225   :  { %15466 = vrcp.f32 %v9154_v42 }
0x1226   :  { %v19664_v2 = vpop.eup %15456  ;;  %15468 = vpow2.f32 %v12692_v46 }
0x1227   :  { %v9305_v29 = vpop.permute.xlu0 %9304  ;;  %v15459_v61 = vpop.eup %15458 }
0x1228   :  { %v9348_v54 = vmul.f32 %v19652_v11, %v9305_v29  ;;  %v19669_v9 = vpop.eup %15460  ;;  %v9156_v29 = vadd.f32 1.0, %v15455_v35  ;;  %v9158_v15 = vadd.f32 1.0, %v15459_v61 }
0x1229   :  { %v9307_v19 = vpop.permute.xlu1 %9306 }
0x122a   :  { %v9349_v28 = vmul.f32 %v19657_v50, %v9307_v19  ;;  %9384 = vrot.lane.b32.xlu0 %v9348_v54, %s15900_s5  ;;  %15470 = vrcp.f32 %v9156_v29  ;;  %v19674_v19 = vpop.eup %15462 }
0x122b   :  { %15472 = vpow2.f32 %v12694_v48 }
0x122c   :  { %9386 = vrot.lane.b32.xlu1 %v9349_v28, %s15900_s5  ;;  %15474 = vrcp.f32 %v9158_v15 }
0x122d   :  { %15476 = vpow2.f32 %v12696_v59 }
0x122e   :  { %v15465_v30 = vpop.eup %15464 }
0x122f   :  { %v9309_v16 = vpop.permute.xlu0 %9308  ;;  %v19676_v28 = vpop.eup %15466  ;;  %v9160_v47 = vadd.f32 1.0, %v15465_v30 }
0x1230   :  { %v9350_v44 = vmul.f32 %v19664_v2, %v9309_v16  ;;  %v15469_v46 = vpop.eup %15468 }
0x1231   :  { %v9311_v53 = vpop.permute.xlu1 %9310  ;;  %v9162_v61 = vadd.f32 1.0, %v15469_v46  ;;  %15478 = vrcp.f32 %v9160_v47 }
0x1232   :  { %v9351_v54 = vmul.f32 %v19669_v9, %v9311_v53  ;;  %9388 = vrot.lane.b32.xlu0 %v9350_v44, %s15900_s5 }
0x1233   :  { %15480 = vrcp.f32 %v9162_v61 }
0x1234   :  { %9390 = vrot.lane.b32.xlu1 %v9351_v54, %s15900_s5  ;;  %v19682_v3 = vpop.eup %15470 }
0x1235   :  { %v15473_v44 = vpop.eup %15472 }
0x1236   :  { %v19684_v53 = vpop.eup %15474  ;;  %v9164_v59 = vadd.f32 1.0, %v15473_v44 }
0x1237   :  { %v9313_v34 = vpop.permute.xlu0 %9312  ;;  %v15477_v54 = vpop.eup %15476 }
0x1238   :  { %v9352_v42 = vmul.f32 %v19674_v19, %v9313_v34  ;;  %v9166_v34 = vadd.f32 1.0, %v15477_v54  ;;  %15482 = vrcp.f32 %v9164_v59 }
0x1239   :  { %v9315_v35 = vpop.permute.xlu1 %9314 }
0x123a   :  { %v9353_v16 = vmul.f32 %v19676_v28, %v9315_v35  ;;  %9392 = vrot.lane.b32.xlu0 %v9352_v42, %s15900_s5  ;;  %15484 = vrcp.f32 %v9166_v34 }
0x123b   :  { %v19690_v42 = vpop.eup %15478 }
0x123c   :  { %9394 = vrot.lane.b32.xlu1 %v9353_v16, %s15900_s5 }
0x123d   :  { %v19693_v47 = vpop.eup %15480 }
0x123f   :  { %v9317_v29 = vpop.permute.xlu0 %9316 }
0x1240   :  { %v9354_v48 = vmul.f32 %v19682_v3, %v9317_v29 }
0x1241   :  { %v9319_v15 = vpop.permute.xlu1 %9318 }
0x1242   :  { %v9355_v30 = vmul.f32 %v19684_v53, %v9319_v15  ;;  %9396 = vrot.lane.b32.xlu0 %v9354_v48, %s15900_s5  ;;  %v19698_v44 = vpop.eup %15482 }
0x1244   :  { %9398 = vrot.lane.b32.xlu1 %v9355_v30, %s15900_s5  ;;  %v19701_v54 = vpop.eup %15484  ;;  %v9264_v30 = vmul.f32 %v19628_v39, %v19300_v52  ;;  %v9267_v52 = vmul.f32 %v19644_v25, %v19315_v63  ;;  %v9269_v63 = vmul.f32 %v19657_v50, %v19327_v31  ;;  %v9271_v31 = vmul.f32 %v19669_v9, %v19339_v8 }
0x1245   :  { %v9273_v8 = vmul.f32 %v19676_v28, %v19351_v17  ;;  %v9275_v17 = vmul.f32 %v19684_v53, %v19363_v55  ;;  %v9277_v55 = vmul.f32 %v19693_v47, %v19375_v5  ;;  %v9279_v5 = vmul.f32 %v19701_v54, %v19387_v4 }
0x1247   :  { %v9321_v46 = vpop.permute.xlu0 %9320 }
0x1248   :  { %v9356_v35 = vmul.f32 %v19690_v42, %v9321_v46 }
0x1249   :  { %v9323_v16 = vpop.permute.xlu1 %9322 }
0x124a   :  { %v9357_v61 = vmul.f32 %v19693_v47, %v9323_v16  ;;  %9400 = vrot.lane.b32.xlu0 %v9356_v35, %s15900_s5  ;;  %v9265_v35 = vmul.f32 %v19632_v62, %v19305_v36 }
0x124c   :  { %9402 = vrot.lane.b32.xlu1 %v9357_v61, %s15900_s5 }
0x124f   :  { %v9325_v29 = vpop.permute.xlu0 %9324 }
0x1250   :  { %v9358_v48 = vmul.f32 %v19698_v44, %v9325_v29  ;;  %v9266_v29 = vmul.f32 %v19640_v24, %v19310_v7  ;;  %v9268_v7 = vmul.f32 %v19652_v11, %v19322_v57  ;;  %v9270_v57 = vmul.f32 %v19664_v2, %v19334_v56 }
0x1251   :  { %v9327_v15 = vpop.permute.xlu1 %9326  ;;  %v9272_v56 = vmul.f32 %v19674_v19, %v19346_v45  ;;  %v9274_v45 = vmul.f32 %v19682_v3, %v19358_v10  ;;  %v9276_v10 = vmul.f32 %v19690_v42, %v19370_v22  ;;  %v9278_v22 = vmul.f32 %v19698_v44, %v19382_v1 }
0x1252   :  { %v9359_v59 = vmul.f32 %v19701_v54, %v9327_v15  ;;  %9404 = vrot.lane.b32.xlu0 %v9358_v48, %s15900_s5 }
0x1254   :  { %9406 = vrot.lane.b32.xlu1 %v9359_v59, %s15900_s5 }
0x128c   :  { %v9377_v34 = vpop.permute.xlu0 %9376 }
0x128d   :  { %v19708_v46 = vadd.f32 %v9377_v34, %v9264_v30 }
0x128e   :  { %v9379_v16 = vpop.permute.xlu1 %9378 }
0x128f   :  { %15486 = vtanh.f32 %v19708_v46  ;;  %v19713_v61 = vadd.f32 %v9379_v16, %v9265_v35 }
0x1291   :  { %15488 = vtanh.f32 %v19713_v61 }
0x1294   :  { %v9381_v48 = vpop.permute.xlu0 %9380 }
0x1295   :  { %v19718_v15 = vadd.f32 %v9381_v48, %v9266_v29 }
0x1296   :  { %v9383_v39 = vpop.permute.xlu1 %9382 }
0x1297   :  { %15490 = vtanh.f32 %v19718_v15  ;;  %v19723_v36 = vadd.f32 %v9383_v39, %v9267_v52 }
0x1299   :  { %v15487_v62 = vpop.eup %15486  ;;  %15492 = vtanh.f32 %v19723_v36 }
0x129a   :  { %9472 = vrot.lane.b32.xlu0 %v15487_v62, %s15900_s5 }
0x129b   :  { %v15489_v59 = vpop.eup %15488 }
0x129c   :  { %9474 = vrot.lane.b32.xlu1 %v15489_v59, %s15900_s5  ;;  %v9385_v24 = vpop.permute.xlu0 %9384 }
0x129d   :  { %v19730_v30 = vadd.f32 %v9385_v24, %v9268_v7 }
0x129e   :  { %v9387_v25 = vpop.permute.xlu1 %9386 }
0x129f   :  { %15494 = vtanh.f32 %v19730_v30  ;;  %v19735_v34 = vadd.f32 %v9387_v25, %v9269_v63 }
0x12a1   :  { %v15491_v35 = vpop.eup %15490  ;;  %15496 = vtanh.f32 %v19735_v34 }
0x12a2   :  { %9476 = vrot.lane.b32.xlu0 %v15491_v35, %s15900_s5 }
0x12a3   :  { %v15493_v16 = vpop.eup %15492 }
0x12a4   :  { %9478 = vrot.lane.b32.xlu1 %v15493_v16, %s15900_s5  ;;  %v9389_v11 = vpop.permute.xlu0 %9388 }
0x12a5   :  { %v19742_v29 = vadd.f32 %v9389_v11, %v9270_v57 }
0x12a6   :  { %v9391_v50 = vpop.permute.xlu1 %9390 }
0x12a7   :  { %15498 = vtanh.f32 %v19742_v29  ;;  %v19747_v48 = vadd.f32 %v9391_v50, %v9271_v31 }
0x12a9   :  { %v15495_v52 = vpop.eup %15494  ;;  %15500 = vtanh.f32 %v19747_v48 }
0x12aa   :  { %9480 = vrot.lane.b32.xlu0 %v15495_v52, %s15900_s5 }
0x12ab   :  { %v15497_v39 = vpop.eup %15496 }
0x12ac   :  { %9482 = vrot.lane.b32.xlu1 %v15497_v39, %s15900_s5  ;;  %v9393_v2 = vpop.permute.xlu0 %9392 }
0x12ad   :  { %v19754_v62 = vadd.f32 %v9393_v2, %v9272_v56 }
0x12ae   :  { %v9395_v9 = vpop.permute.xlu1 %9394 }
0x12af   :  { %15502 = vtanh.f32 %v19754_v62  ;;  %v19759_v59 = vadd.f32 %v9395_v9, %v9273_v8 }
0x12b1   :  { %v15499_v7 = vpop.eup %15498  ;;  %15504 = vtanh.f32 %v19759_v59 }
0x12b2   :  { %9484 = vrot.lane.b32.xlu0 %v15499_v7, %s15900_s5 }
0x12b3   :  { %v15501_v24 = vpop.eup %15500 }
0x12b4   :  { %9486 = vrot.lane.b32.xlu1 %v15501_v24, %s15900_s5  ;;  %v9397_v19 = vpop.permute.xlu0 %9396 }
0x12b5   :  { %v19766_v63 = vadd.f32 %v9397_v19, %v9274_v45  ;;  %v15883_v45 = vld [vmem:[%s21565_s8] ss:$8 sps:$4 sm:$0xff]  }
0x12b6   :  { %v9399_v28 = vpop.permute.xlu1 %9398 }
0x12b7   :  { %15506 = vtanh.f32 %v19766_v63  ;;  %v19771_v25 = vadd.f32 %v9399_v28, %v9275_v17  ;;  %v15885_v28 = vld [vmem:[%s21565_s8 + $0x10] ss:$8 sps:$4 sm:$0xff]  }
0x12b9   :  { %v15503_v35 = vpop.eup %15502  ;;  %15508 = vtanh.f32 %v19771_v25 }
0x12ba   :  { %9488 = vrot.lane.b32.xlu0 %v15503_v35, %s15900_s5 }
0x12bb   :  { %v15505_v16 = vpop.eup %15504 }
0x12bc   :  { %9490 = vrot.lane.b32.xlu1 %v15505_v16, %s15900_s5  ;;  %v9401_v3 = vpop.permute.xlu0 %9400  ;;  %v15886_v16 = vld [vmem:[%s21565_s8 + $0x24] ss:$8 sps:$4 sm:$0xff]  }
0x12bd   :  { %v19778_v57 = vadd.f32 %v9401_v3, %v9276_v10  ;;  %v15888_v10 = vld [vmem:[%s21565_s8 + $0x34] ss:$8 sps:$4 sm:$0xff]  }
0x12be   :  { %v9403_v53 = vpop.permute.xlu1 %9402 }
0x12bf   :  { %15510 = vtanh.f32 %v19778_v57  ;;  %v19783_v11 = vadd.f32 %v9403_v53, %v9277_v55 }
0x12c1   :  { %v15507_v31 = vpop.eup %15506  ;;  %15512 = vtanh.f32 %v19783_v11 }
0x12c2   :  { %9492 = vrot.lane.b32.xlu0 %v15507_v31, %s15900_s5  ;;  %v15889_v31 = vld [vmem:[%s21565_s8 + $0x30] ss:$8 sps:$4 sm:$0xff]  }
0x12c3   :  { %v15509_v50 = vpop.eup %15508 }
0x12c4   :  { %9494 = vrot.lane.b32.xlu1 %v15509_v50, %s15900_s5  ;;  %v9405_v42 = vpop.permute.xlu0 %9404 }
0x12c5   :  { %v19790_v52 = vadd.f32 %v9405_v42, %v9278_v22 }
0x12c6   :  { %v9407_v47 = vpop.permute.xlu1 %9406 }
0x12c7   :  { %15514 = vtanh.f32 %v19790_v52  ;;  %v19795_v39 = vadd.f32 %v9407_v47, %v9279_v5 }
0x12c9   :  { %v15511_v56 = vpop.eup %15510  ;;  %15516 = vtanh.f32 %v19795_v39 }
0x12ca   :  { %9496 = vrot.lane.b32.xlu0 %v15511_v56, %s15900_s5 }
0x12cb   :  { %v15513_v2 = vpop.eup %15512 }
0x12cc   :  { %9498 = vrot.lane.b32.xlu1 %v15513_v2, %s15900_s5 }
0x12d1   :  { %v15515_v1 = vpop.eup %15514 }
0x12d2   :  { %9500 = vrot.lane.b32.xlu0 %v15515_v1, %s15900_s5 }
0x12d3   :  { %v15517_v44 = vpop.eup %15516 }
0x12d4   :  { %9502 = vrot.lane.b32.xlu1 %v15517_v44, %s15900_s5 }
0x130c   :  { %v9473_v4 = vpop.permute.xlu0 %9472 }
0x130d   :  { %v19803_v8 = vmul.f32 %v19521_v33, %v9473_v4  ;;  %v15884_v33 = vld [vmem:[%s21565_s8 + $0x14] ss:$8 sps:$4 sm:$0xff]  }
0x130e   :  { %v9475_v54 = vpop.permute.xlu1 %9474 }
0x130f   :  { %21790 = vst [vmem:[#allocation80_spill] sm:$0xff] %v19803_v8  ;;  %v19806_v9 = vmul.f32 %v19525_v51, %v9475_v54 }
0x1311   :  { %21791 = vst [vmem:[#allocation81_spill] sm:$0xff] %v19806_v9  ;;  %v9680_v7 = vpack.c.bf16 %v19806_v9, %v19803_v8 }
0x1313   :  { %12714 = vmatmul.mubr.msk.bf16.vlgmr.msra.gmra.mrb[152].mxu1 %vm4806_vm1, %v9680_v7 }
0x1314   :  { %v9477_v24 = vpop.permute.xlu0 %9476  ;;  %9754 = vmatprep.mubr.bf16.mxu1 %v21727_v23  ;;  %10530 = vmatpush1.bf16.msra.mxu1 %v15883_v45 }
0x1315   :  { %10531 = vmatprep.subr.bf16.mxu1 %v15884_v33  ;;  %v19819_v19 = vmul.f32 %v19535_v20, %v9477_v24  ;;  %v15887_v20 = vld [vmem:[%s21565_s8 + $0x20] ss:$8 sps:$4 sm:$0xff]  }
0x1316   :  { %v9479_v51 = vpop.permute.xlu1 %9478 }
0x1317   :  { %21792 = vst [vmem:[#allocation82_spill] sm:$0xff] %v19819_v19  ;;  %v19822_v17 = vmul.f32 %v19539_v12, %v9479_v51 }
0x1318   :  { %10532 = vmatpush1.bf16.msra.mxu1 %v15885_v28 }
0x1319   :  { %21793 = vst [vmem:[#allocation83_spill] sm:$0xff] %v19822_v17  ;;  %v9681_v35 = vpack.c.bf16 %v19822_v17, %v19819_v19  ;;  %10533 = vmatprep.subr.bf16.mxu1 %v15886_v16 }
0x131b   :  { %12715 = vmatmul.mubr.msk.bf16.gmra.mrb[156].mxu1 %vm4806_vm1, %v9681_v35 }
0x131c   :  { %9764 = vmatprep.mubr.bf16.mxu1 %v21727_v23  ;;  %10534 = vmatpush1.bf16.msra.mxu1 %v15887_v20  ;;  %v9481_v12 = vpop.permute.xlu0 %9480 }
0x131d   :  { %10535 = vmatprep.subr.bf16.mxu1 %v15888_v10  ;;  %v19841_v55 = vmul.f32 %v19549_v14, %v9481_v12 }
0x131e   :  { %v9483_v3 = vpop.permute.xlu1 %9482 }
0x131f   :  { %21794 = vst [vmem:[#allocation84_spill] sm:$0xff] %v19841_v55  ;;  %v19844_v53 = vmul.f32 %v19553_v40, %v9483_v3 }
0x1320   :  { %10536 = vmatpush1.bf16.msra.mxu1 %v15889_v31 }
0x1321   :  { %21795 = vst [vmem:[#allocation85_spill] sm:$0xff] %v19844_v53  ;;  %v9682_v50 = vpack.c.bf16 %v19844_v53, %v19841_v55 }
0x1323   :  { %12716 = vmatmul.mubr.msk.bf16.gmra.mrb[160].mxu1 %vm4806_vm1, %v9682_v50 }
0x1324   :  { %v9485_v22 = vpop.permute.xlu0 %9484  ;;  %9774 = vmatprep.mubr.bf16.mxu1 %v21727_v23 }
0x1325   :  { %v19854_v14 = vmul.f32 %v19563_v43, %v9485_v22 }
0x1326   :  { %v9487_v42 = vpop.permute.xlu1 %9486 }
0x1327   :  { %21796 = vst [vmem:[#allocation86_spill] sm:$0xff] %v19854_v14  ;;  %v19857_v40 = vmul.f32 %v19567_v27, %v9487_v42 }
0x1329   :  { %21797 = vst [vmem:[#allocation87_spill] sm:$0xff] %v19857_v40  ;;  %v9683_v5 = vpack.c.bf16 %v19857_v40, %v19854_v14 }
0x132b   :  { %12717 = vmatmul.mubr.msk.bf16.gmra.mrb[164].mxu1 %vm4806_vm1, %v9683_v5 }
0x132c   :  { %9784 = vmatprep.mubr.bf16.mxu1 %v21727_v23  ;;  %v9489_v47 = vpop.permute.xlu0 %9488 }
0x132d   :  { %v19864_v2 = vmul.f32 %v19577_v58, %v9489_v47 }
0x132e   :  { %v9491_v56 = vpop.permute.xlu1 %9490 }
0x132f   :  { %21798 = vst [vmem:[#allocation88_spill] sm:$0xff] %v19864_v2  ;;  %v19867_v1 = vmul.f32 %v19581_v49, %v9491_v56 }
0x1331   :  { %21799 = vst [vmem:[#allocation89_spill] sm:$0xff] %v19867_v1  ;;  %v9684_v43 = vpack.c.bf16 %v19867_v1, %v19864_v2 }
0x1333   :  { %12718 = vmatmul.mubr.msk.bf16.gmra.mrb[168].mxu1 %vm4806_vm1, %v9684_v43 }
0x1334   :  { %v9493_v27 = vpop.permute.xlu0 %9492  ;;  %9794 = vmatprep.mubr.bf16.mxu1 %v21727_v23 }
0x1335   :  { %v19874_v4 = vmul.f32 %v19586_v0, %v9493_v27 }
0x1336   :  { %v9495_v44 = vpop.permute.xlu1 %9494 }
0x1337   :  { %21800 = vst [vmem:[#allocation90_spill] sm:$0xff] %v19874_v4  ;;  %v19877_v54 = vmul.f32 %v19589_v21, %v9495_v44 }
0x1339   :  { %21801 = vst [vmem:[#allocation91_spill] sm:$0xff] %v19877_v54  ;;  %v9685_v58 = vpack.c.bf16 %v19877_v54, %v19874_v4 }
0x133b   :  { %12719 = vmatmul.mubr.msk.bf16.gmra.mrb[172].mxu1 %vm4806_vm1, %v9685_v58 }
0x133c   :  { %9804 = vmatprep.mubr.bf16.mxu1 %v21727_v23  ;;  %v9497_v49 = vpop.permute.xlu0 %9496 }
0x133d   :  { %v19884_v24 = vmul.f32 %v19594_v13, %v9497_v49 }
0x133e   :  { %v9499_v7 = vpop.permute.xlu1 %9498 }
0x133f   :  { %21802 = vst [vmem:[#allocation92_spill] sm:$0xff] %v19884_v24  ;;  %v19887_v45 = vmul.f32 %v19597_v38, %v9499_v7 }
0x1341   :  { %21803 = vst [vmem:[#allocation93_spill] sm:$0xff] %v19887_v45  ;;  %v9686_v0 = vpack.c.bf16 %v19887_v45, %v19884_v24 }
0x1343   :  { %12720 = vmatmul.mubr.msk.bf16.gmra.mrb[176].mxu1 %vm4806_vm1, %v9686_v0 }
0x1344   :  { %v9501_v21 = vpop.permute.xlu0 %9500  ;;  %9814 = vmatprep.mubr.bf16.mxu1 %v21727_v23 }
0x1345   :  { %v19894_v51 = vmul.f32 %v19602_v60, %v9501_v21 }
0x1346   :  { %v9503_v33 = vpop.permute.xlu1 %9502 }
0x1347   :  { %21804 = vst [vmem:[#allocation94_spill] sm:$0xff] %v19894_v51  ;;  %v19897_v28 = vmul.f32 %v19605_v41, %v9503_v33 }
0x1349   :  { %21805 = vst [vmem:[#allocation95_spill] sm:$0xff] %v19897_v28  ;;  %v9687_v13 = vpack.c.bf16 %v19897_v28, %v19894_v51 }
0x134b   :  { %12721 = vmatmul.mubr.msk.bf16.gmra.mrb[180].mxu1 %vm4806_vm1, %v9687_v13 }
0x134c   :  { %10561 = vmatprep.mubr.bf16.mxu1 %v21727_v23 }
0x13e6   :  { %v19903_v38 = vpop.f32.mrb[152].mxu1 }
0x13e7   :  { %v9748_v35 = vpop.f32.mrb[153].mxu1 }
0x13e8   :  { %v13819_v16 = vadd.f32 %v9748_v35, %v17432_v37  ;;  %v19906_v20 = vpop.f32.mrb[154].mxu1 }
0x13e9   :  { %v9752_v12 = vpop.f32.mrb[155].mxu1 }
0x13ea   :  { %v12723_v60 = vmul.f32 -1.442695, %v13819_v16  ;;  %v13821_v10 = vadd.f32 %v9752_v12, %v17432_v37 }
0x13ec   :  { %15518 = vpow2.f32 %v12723_v60  ;;  %v12725_v41 = vmul.f32 -1.442695, %v13821_v10 }
0x13ee   :  { %15520 = vpow2.f32 %v12725_v41  ;;  %v19909_v3 = vpop.f32.mrb[156].mxu1 }
0x13ef   :  { %v9758_v31 = vpop.f32.mrb[157].mxu1  ;;  %v13822_v2 = vadd.f32 %v19909_v3, %v17033_v6 }
0x13f0   :  { %v13823_v50 = vadd.f32 %v9758_v31, %v17432_v37  ;;  %v19912_v22 = vpop.f32.mrb[158].mxu1 }
0x13f1   :  { %v9762_v42 = vpop.f32.mrb[159].mxu1 }
0x13f2   :  { %v12727_v5 = vmul.f32 -1.442695, %v13823_v50  ;;  %v13825_v47 = vadd.f32 %v9762_v42, %v17432_v37 }
0x13f4   :  { %15522 = vpow2.f32 %v12727_v5  ;;  %v12729_v56 = vmul.f32 -1.442695, %v13825_v47 }
0x13f6   :  { %v15519_v43 = vpop.eup %15518  ;;  %15524 = vpow2.f32 %v12729_v56  ;;  %v19915_v44 = vpop.f32.mrb[160].mxu1 }
0x13f7   :  { %v9954_v27 = vadd.f32 1.0, %v15519_v43  ;;  %v9768_v49 = vpop.f32.mrb[161].mxu1 }
0x13f8   :  { %v15521_v58 = vpop.eup %15520  ;;  %v13827_v0 = vadd.f32 %v9768_v49, %v17432_v37  ;;  %v19918_v21 = vpop.f32.mrb[162].mxu1 }
0x13f9   :  { %15526 = vrcp.f32 %v9954_v27  ;;  %v9956_v7 = vadd.f32 1.0, %v15521_v58  ;;  %v9772_v33 = vpop.f32.mrb[163].mxu1 }
0x13fa   :  { %v12731_v13 = vmul.f32 -1.442695, %v13827_v0  ;;  %v13829_v35 = vadd.f32 %v9772_v33, %v17432_v37 }
0x13fb   :  { %15528 = vrcp.f32 %v9956_v7 }
0x13fc   :  { %15530 = vpow2.f32 %v12731_v13  ;;  %v12733_v16 = vmul.f32 -1.442695, %v13829_v35 }
0x13fe   :  { %v15523_v12 = vpop.eup %15522  ;;  %15532 = vpow2.f32 %v12733_v16  ;;  %v19921_v10 = vpop.f32.mrb[164].mxu1 }
0x13ff   :  { %v9958_v60 = vadd.f32 1.0, %v15523_v12  ;;  %v9778_v31 = vpop.f32.mrb[165].mxu1 }
0x1400   :  { %v15525_v41 = vpop.eup %15524  ;;  %v13831_v42 = vadd.f32 %v9778_v31, %v17432_v37  ;;  %v19924_v5 = vpop.f32.mrb[166].mxu1 }
0x1401   :  { %15534 = vrcp.f32 %v9958_v60  ;;  %v9960_v50 = vadd.f32 1.0, %v15525_v41  ;;  %v9782_v47 = vpop.f32.mrb[167].mxu1 }
0x1402   :  { %v12735_v43 = vmul.f32 -1.442695, %v13831_v42  ;;  %v13833_v27 = vadd.f32 %v9782_v47, %v17432_v37 }
0x1403   :  { %v19926_v56 = vpop.eup %15526  ;;  %15536 = vrcp.f32 %v9960_v50 }
0x1404   :  { %v10049_v58 = vmul.f32 2.0, %v19926_v56  ;;  %15538 = vpow2.f32 %v12735_v43  ;;  %v12737_v7 = vmul.f32 -1.442695, %v13833_v27 }
0x1405   :  { %v19930_v49 = vpop.eup %15528 }
0x1406   :  { %v12754_v0 = vadd.f32 -1.0, %v10049_v58  ;;  %v10050_v33 = vmul.f32 2.0, %v19930_v49  ;;  %v15531_v13 = vpop.eup %15530  ;;  %15540 = vpow2.f32 %v12737_v7  ;;  %v19933_v16 = vpop.f32.mrb[168].mxu1 }
0x1407   :  { %v9962_v35 = vadd.f32 1.0, %v15531_v13  ;;  %v9788_v41 = vpop.f32.mrb[169].mxu1 }
0x1408   :  { %10113 = vrot.lane.b32.xlu0 %v12754_v0, %s15900_s5  ;;  %v12755_v12 = vadd.f32 -1.0, %v10050_v33  ;;  %v15533_v60 = vpop.eup %15532  ;;  %v13835_v50 = vadd.f32 %v9788_v41, %v17432_v37  ;;  %v19937_v42 = vpop.f32.mrb[170].mxu1 }
0x1409   :  { %15542 = vrcp.f32 %v9962_v35  ;;  %v9964_v31 = vadd.f32 1.0, %v15533_v60  ;;  %v9792_v43 = vpop.f32.mrb[171].mxu1 }
0x140a   :  { %10115 = vrot.lane.b32.xlu1 %v12755_v12, %s15900_s5  ;;  %v12739_v27 = vmul.f32 -1.442695, %v13835_v50  ;;  %v13837_v58 = vadd.f32 %v9792_v43, %v17432_v37 }
0x140b   :  { %v19940_v47 = vpop.eup %15534  ;;  %15544 = vrcp.f32 %v9964_v31 }
0x140c   :  { %v10051_v7 = vmul.f32 2.0, %v19940_v47  ;;  %15546 = vpow2.f32 %v12739_v27  ;;  %v12741_v33 = vmul.f32 -1.442695, %v13837_v58 }
0x140d   :  { %v19944_v0 = vpop.eup %15536 }
0x140e   :  { %v12756_v13 = vadd.f32 -1.0, %v10051_v7  ;;  %v10052_v35 = vmul.f32 2.0, %v19944_v0  ;;  %v15539_v60 = vpop.eup %15538  ;;  %15548 = vpow2.f32 %v12741_v33  ;;  %v19947_v12 = vpop.f32.mrb[172].mxu1 }
0x140f   :  { %v9966_v41 = vadd.f32 1.0, %v15539_v60  ;;  %v9798_v14 = vpop.f32.mrb[173].mxu1 }
0x1410   :  { %10117 = vrot.lane.b32.xlu0 %v12756_v13, %s15900_s5  ;;  %v12757_v31 = vadd.f32 -1.0, %v10052_v35  ;;  %v15541_v50 = vpop.eup %15540  ;;  %v13839_v40 = vadd.f32 %v9798_v14, %v17432_v37  ;;  %v19951_v55 = vpop.f32.mrb[174].mxu1 }
0x1411   :  { %15550 = vrcp.f32 %v9966_v41  ;;  %v9968_v43 = vadd.f32 1.0, %v15541_v50  ;;  %v9802_v27 = vpop.f32.mrb[175].mxu1 }
0x1412   :  { %10119 = vrot.lane.b32.xlu1 %v12757_v31, %s15900_s5  ;;  %v12743_v7 = vmul.f32 -1.442695, %v13839_v40  ;;  %v13841_v33 = vadd.f32 %v9802_v27, %v17432_v37 }
0x1413   :  { %v19954_v58 = vpop.eup %15542  ;;  %15552 = vrcp.f32 %v9968_v43 }
0x1414   :  { %v10053_v13 = vmul.f32 2.0, %v19954_v58  ;;  %15554 = vpow2.f32 %v12743_v7  ;;  %v12745_v60 = vmul.f32 -1.442695, %v13841_v33 }
0x1415   :  { %v19958_v35 = vpop.eup %15544 }
0x1416   :  { %v12758_v41 = vadd.f32 -1.0, %v10053_v13  ;;  %v10054_v14 = vmul.f32 2.0, %v19958_v35  ;;  %v15547_v50 = vpop.eup %15546  ;;  %15556 = vpow2.f32 %v12745_v60  ;;  %v19961_v31 = vpop.f32.mrb[176].mxu1 }
0x1417   :  { %v9970_v53 = vadd.f32 1.0, %v15547_v50  ;;  %v9808_v19 = vpop.f32.mrb[177].mxu1 }
0x1418   :  { %10121 = vrot.lane.b32.xlu0 %v12758_v41, %s15900_s5  ;;  %v12759_v43 = vadd.f32 -1.0, %v10054_v14  ;;  %v15549_v40 = vpop.eup %15548  ;;  %v13843_v17 = vadd.f32 %v9808_v19, %v17432_v37  ;;  %v19965_v8 = vpop.f32.mrb[178].mxu1 }
0x1419   :  { %15558 = vrcp.f32 %v9970_v53  ;;  %v9972_v27 = vadd.f32 1.0, %v15549_v40  ;;  %v9812_v33 = vpop.f32.mrb[179].mxu1 }
0x141a   :  { %10123 = vrot.lane.b32.xlu1 %v12759_v43, %s15900_s5  ;;  %v12747_v13 = vmul.f32 -1.442695, %v13843_v17  ;;  %v13845_v60 = vadd.f32 %v9812_v33, %v17432_v37 }
0x141b   :  { %v19968_v7 = vpop.eup %15550  ;;  %15560 = vrcp.f32 %v9972_v27 }
0x141c   :  { %v10055_v41 = vmul.f32 2.0, %v19968_v7  ;;  %15562 = vpow2.f32 %v12747_v13  ;;  %v12749_v53 = vmul.f32 -1.442695, %v13845_v60 }
0x141d   :  { %v19972_v14 = vpop.eup %15552 }
0x141e   :  { %v12760_v50 = vadd.f32 -1.0, %v10055_v41  ;;  %v10056_v19 = vmul.f32 2.0, %v19972_v14  ;;  %v15555_v40 = vpop.eup %15554  ;;  %15564 = vpow2.f32 %v12749_v53  ;;  %v19975_v43 = vpop.f32.mrb[180].mxu1 }
0x141f   :  { %v9974_v9 = vadd.f32 1.0, %v15555_v40  ;;  %v9818_v51 = vpop.f32.mrb[181].mxu1 }
0x1420   :  { %10125 = vrot.lane.b32.xlu0 %v12760_v50, %s15900_s5  ;;  %v12761_v27 = vadd.f32 -1.0, %v10056_v19  ;;  %v15557_v17 = vpop.eup %15556  ;;  %v13847_v28 = vadd.f32 %v9818_v51, %v17432_v37  ;;  %v19979_v24 = vpop.f32.mrb[182].mxu1 }
0x1421   :  { %15566 = vrcp.f32 %v9974_v9  ;;  %v9976_v33 = vadd.f32 1.0, %v15557_v17  ;;  %v9822_v13 = vpop.f32.mrb[183].mxu1 }
0x1422   :  { %10127 = vrot.lane.b32.xlu1 %v12761_v27, %s15900_s5  ;;  %v12751_v41 = vmul.f32 -1.442695, %v13847_v28  ;;  %v13849_v53 = vadd.f32 %v9822_v13, %v17432_v37 }
0x1423   :  { %v19982_v60 = vpop.eup %15558  ;;  %15568 = vrcp.f32 %v9976_v33 }
0x1424   :  { %v10057_v50 = vmul.f32 2.0, %v19982_v60  ;;  %15570 = vpow2.f32 %v12751_v41  ;;  %v12753_v9 = vmul.f32 -1.442695, %v13849_v53 }
0x1425   :  { %v19986_v19 = vpop.eup %15560 }
0x1426   :  { %v12762_v40 = vadd.f32 -1.0, %v10057_v50  ;;  %v10058_v51 = vmul.f32 2.0, %v19986_v19  ;;  %v15563_v17 = vpop.eup %15562  ;;  %15572 = vpow2.f32 %v12753_v9 }
0x1427   :  { %v9978_v45 = vadd.f32 1.0, %v15563_v17 }
0x1428   :  { %10129 = vrot.lane.b32.xlu0 %v12762_v40, %s15900_s5  ;;  %v12763_v27 = vadd.f32 -1.0, %v10058_v51  ;;  %v15565_v4 = vpop.eup %15564 }
0x1429   :  { %15574 = vrcp.f32 %v9978_v45  ;;  %v9980_v28 = vadd.f32 1.0, %v15565_v4 }
0x142a   :  { %10131 = vrot.lane.b32.xlu1 %v12763_v27, %s15900_s5 }
0x142b   :  { %v19991_v33 = vpop.eup %15566  ;;  %15576 = vrcp.f32 %v9980_v28 }
0x142c   :  { %v10059_v13 = vmul.f32 2.0, %v19991_v33 }
0x142d   :  { %v19994_v41 = vpop.eup %15568 }
0x142e   :  { %v12764_v53 = vadd.f32 -1.0, %v10059_v13  ;;  %v10060_v50 = vmul.f32 2.0, %v19994_v41  ;;  %v15571_v9 = vpop.eup %15570 }
0x142f   :  { %v9982_v17 = vadd.f32 1.0, %v15571_v9 }
0x1430   :  { %10133 = vrot.lane.b32.xlu0 %v12764_v53, %s15900_s5  ;;  %v12765_v40 = vadd.f32 -1.0, %v10060_v50  ;;  %v15573_v51 = vpop.eup %15572 }
0x1431   :  { %15578 = vrcp.f32 %v9982_v17  ;;  %v9984_v4 = vadd.f32 1.0, %v15573_v51 }
0x1432   :  { %10135 = vrot.lane.b32.xlu1 %v12765_v40, %s15900_s5 }
0x1433   :  { %v19999_v45 = vpop.eup %15574  ;;  %15580 = vrcp.f32 %v9984_v4 }
0x1434   :  { %v10061_v27 = vmul.f32 2.0, %v19999_v45 }
0x1435   :  { %v20002_v28 = vpop.eup %15576 }
0x1436   :  { %v12766_v13 = vadd.f32 -1.0, %v10061_v27  ;;  %v10062_v54 = vmul.f32 2.0, %v20002_v28  ;;  %v13818_v27 = vadd.f32 %v19903_v38, %v17033_v6  ;;  %v13826_v38 = vadd.f32 %v19915_v44, %v17033_v6 }
0x1437   :  { %v13832_v44 = vadd.f32 %v19924_v5, %v17033_v6 }
0x1438   :  { %10137 = vrot.lane.b32.xlu0 %v12766_v13, %s15900_s5  ;;  %v12767_v9 = vadd.f32 -1.0, %v10062_v54  ;;  %v13820_v54 = vadd.f32 %v19906_v20, %v17033_v6  ;;  %v12722_v13 = vmul.f32 -1.442695, %v13818_v27  ;;  %v13828_v20 = vadd.f32 %v19918_v21, %v17033_v6 }
0x1439   :  { %v12736_v21 = vmul.f32 -1.442695, %v13832_v44 }
0x143a   :  { %10139 = vrot.lane.b32.xlu1 %v12767_v9, %s15900_s5  ;;  %v12724_v9 = vmul.f32 -1.442695, %v13820_v54  ;;  %15582 = vpow2.f32 %v12722_v13  ;;  %v12730_v54 = vmul.f32 -1.442695, %v13826_v38  ;;  %v12732_v3 = vmul.f32 -1.442695, %v13828_v20 }
0x143b   :  { %v20007_v53 = vpop.eup %15578 }
0x143c   :  { %v10063_v50 = vmul.f32 2.0, %v20007_v53  ;;  %15584 = vpow2.f32 %v12724_v9 }
0x143d   :  { %v20010_v17 = vpop.eup %15580 }
0x143e   :  { %v12768_v40 = vadd.f32 -1.0, %v10063_v50  ;;  %v10064_v51 = vmul.f32 2.0, %v20010_v17  ;;  %v13824_v50 = vadd.f32 %v19912_v22, %v17033_v6 }
0x1440   :  { %10141 = vrot.lane.b32.xlu0 %v12768_v40, %s15900_s5  ;;  %v12769_v4 = vadd.f32 -1.0, %v10064_v51  ;;  %v12726_v40 = vmul.f32 -1.442695, %v13822_v2  ;;  %v12728_v51 = vmul.f32 -1.442695, %v13824_v50  ;;  %v13830_v2 = vadd.f32 %v19921_v10, %v17033_v6 }
0x1441   :  { %v13836_v10 = vadd.f32 %v19937_v42, %v17033_v6  ;;  %v13838_v42 = vadd.f32 %v19947_v12, %v17033_v6 }
0x1442   :  { %10143 = vrot.lane.b32.xlu1 %v12769_v4, %s15900_s5  ;;  %15586 = vpow2.f32 %v12726_v40  ;;  %v12734_v40 = vmul.f32 -1.442695, %v13830_v2 }
0x1443   :  { %15588 = vpow2.f32 %v12728_v51 }
0x1444   :  { %v15583_v4 = vpop.eup %15582 }
0x1445   :  { %v9953_v27 = vadd.f32 1.0, %v15583_v4 }
0x1446   :  { %v15585_v1 = vpop.eup %15584 }
0x1447   :  { %v9955_v13 = vadd.f32 1.0, %v15585_v1  ;;  %15590 = vrcp.f32 %v9953_v27  ;;  %v13834_v1 = vadd.f32 %v19933_v16, %v17033_v6  ;;  %v12740_v16 = vmul.f32 -1.442695, %v13836_v10 }
0x1448   :  { %15592 = vpow2.f32 %v12730_v54  ;;  %v12742_v10 = vmul.f32 -1.442695, %v13838_v42 }
0x1449   :  { %15594 = vrcp.f32 %v9955_v13  ;;  %v12738_v13 = vmul.f32 -1.442695, %v13834_v1 }
0x144a   :  { %15596 = vpow2.f32 %v12732_v3 }
0x144c   :  { %v15587_v9 = vpop.eup %15586 }
0x144d   :  { %v15589_v22 = vpop.eup %15588  ;;  %v9957_v50 = vadd.f32 1.0, %v15587_v9 }
0x144e   :  { %v9959_v51 = vadd.f32 1.0, %v15589_v22 }
0x144f   :  { %15598 = vrcp.f32 %v9957_v50 }
0x1450   :  { %15600 = vpow2.f32 %v12734_v40  ;;  %v13840_v40 = vadd.f32 %v19951_v55, %v17033_v6 }
0x1451   :  { %v20033_v4 = vpop.eup %15590  ;;  %15602 = vrcp.f32 %v9959_v51 }
0x1452   :  { %v15593_v38 = vpop.eup %15592  ;;  %15604 = vpow2.f32 %v12736_v21 }
0x1453   :  { %v20037_v27 = vpop.eup %15594  ;;  %v9961_v9 = vadd.f32 1.0, %v15593_v38  ;;  %15606 = vpow2.f32 %v12738_v13 }
0x1454   :  { %v15597_v54 = vpop.eup %15596 }
0x1455   :  { %v9963_v22 = vadd.f32 1.0, %v15597_v54  ;;  %15608 = vrcp.f32 %v9961_v9  ;;  %v12744_v54 = vmul.f32 -1.442695, %v13840_v40 }
0x1456   :  { %15610 = vpow2.f32 %v12740_v16 }
0x1457   :  { %15612 = vrcp.f32 %v9963_v22  ;;  %v13844_v22 = vadd.f32 %v19965_v8, %v17033_v6  ;;  %v13846_v8 = vadd.f32 %v19975_v43, %v17033_v6 }
0x1458   :  { %15614 = vpow2.f32 %v12742_v10 }
0x1459   :  { %v20045_v44 = vpop.eup %15598  ;;  %v12748_v10 = vmul.f32 -1.442695, %v13844_v22  ;;  %v12750_v22 = vmul.f32 -1.442695, %v13846_v8 }
0x145a   :  { %v15601_v50 = vpop.eup %15600 }
0x145b   :  { %v20049_v21 = vpop.eup %15602 }
0x145c   :  { %v15605_v38 = vpop.eup %15604 }
0x145d   :  { %v9967_v13 = vadd.f32 1.0, %v15605_v38  ;;  %v15607_v55 = vpop.eup %15606 }
0x145e   :  { %v9969_v40 = vadd.f32 1.0, %v15607_v55 }
0x145f   :  { %v20057_v9 = vpop.eup %15608 }
0x1460   :  { %v15611_v16 = vpop.eup %15610 }
0x147a   :  { %v10114_v20 = vpop.permute.xlu0 %10113 }
0x147b   :  { %v10161_v5 = vmul.f32 %v20033_v4, %v10114_v20 }
0x147c   :  { %v10116_v3 = vpop.permute.xlu1 %10115 }
0x147d   :  { %v10162_v2 = vmul.f32 %v20037_v27, %v10116_v3  ;;  %10193 = vrot.lane.b32.xlu0 %v10161_v5, %s15900_s5  ;;  %v9965_v5 = vadd.f32 1.0, %v15601_v50  ;;  %v13842_v3 = vadd.f32 %v19961_v31, %v17033_v6  ;;  %v20062_v50 = vpop.eup %15612  ;;  %v9971_v31 = vadd.f32 1.0, %v15611_v16 }
0x147f   :  { %10195 = vrot.lane.b32.xlu1 %v10162_v2, %s15900_s5  ;;  %15616 = vrcp.f32 %v9965_v5 }
0x1480   :  { %15618 = vpow2.f32 %v12744_v54 }
0x1481   :  { %15620 = vrcp.f32 %v9967_v13  ;;  %v13848_v13 = vadd.f32 %v19979_v24, %v17033_v6 }
0x1482   :  { %v10118_v51 = vpop.permute.xlu0 %10117  ;;  %15622 = vrcp.f32 %v9969_v40 }
0x1483   :  { %v10163_v1 = vmul.f32 %v20045_v44, %v10118_v51  ;;  %v12752_v40 = vmul.f32 -1.442695, %v13848_v13 }
0x1484   :  { %v10120_v20 = vpop.permute.xlu1 %10119 }
0x1485   :  { %v10164_v12 = vmul.f32 %v20049_v21, %v10120_v20  ;;  %10197 = vrot.lane.b32.xlu0 %v10163_v1, %s15900_s5  ;;  %v12746_v1 = vmul.f32 -1.442695, %v13842_v3  ;;  %v15615_v20 = vpop.eup %15614 }
0x1487   :  { %10199 = vrot.lane.b32.xlu1 %v10164_v12, %s15900_s5  ;;  %15624 = vpow2.f32 %v12746_v1 }
0x1488   :  { %15626 = vrcp.f32 %v9971_v31 }
0x1489   :  { %v20069_v5 = vpop.eup %15616  ;;  %15628 = vpow2.f32 %v12748_v10 }
0x148a   :  { %v10122_v2 = vpop.permute.xlu0 %10121  ;;  %v15619_v54 = vpop.eup %15618 }
0x148b   :  { %v10165_v42 = vmul.f32 %v20057_v9, %v10122_v2  ;;  %v20074_v3 = vpop.eup %15620  ;;  %v9973_v2 = vadd.f32 1.0, %v15615_v20  ;;  %v9975_v43 = vadd.f32 1.0, %v15619_v54 }
0x148c   :  { %v10124_v51 = vpop.permute.xlu1 %10123 }
0x148d   :  { %v10166_v38 = vmul.f32 %v20062_v50, %v10124_v51  ;;  %10201 = vrot.lane.b32.xlu0 %v10165_v42, %s15900_s5  ;;  %15630 = vrcp.f32 %v9973_v2  ;;  %v20079_v51 = vpop.eup %15622 }
0x148e   :  { %15632 = vpow2.f32 %v12750_v22 }
0x148f   :  { %10203 = vrot.lane.b32.xlu1 %v10166_v38, %s15900_s5  ;;  %15634 = vrcp.f32 %v9975_v43 }
0x1490   :  { %15636 = vpow2.f32 %v12752_v40 }
0x1491   :  { %v15625_v24 = vpop.eup %15624 }
0x1492   :  { %v10126_v12 = vpop.permute.xlu0 %10125  ;;  %v20081_v38 = vpop.eup %15626  ;;  %v9977_v8 = vadd.f32 1.0, %v15625_v24 }
0x1493   :  { %v10167_v55 = vmul.f32 %v20069_v5, %v10126_v12  ;;  %v15629_v10 = vpop.eup %15628 }
0x1494   :  { %v10128_v16 = vpop.permute.xlu1 %10127  ;;  %v9979_v54 = vadd.f32 1.0, %v15629_v10  ;;  %15638 = vrcp.f32 %v9977_v8 }
0x1495   :  { %v10168_v42 = vmul.f32 %v20074_v3, %v10128_v16  ;;  %10205 = vrot.lane.b32.xlu0 %v10167_v55, %s15900_s5 }
0x1496   :  { %15640 = vrcp.f32 %v9979_v54 }
0x1497   :  { %10207 = vrot.lane.b32.xlu1 %v10168_v42, %s15900_s5  ;;  %v20087_v13 = vpop.eup %15630 }
0x1498   :  { %v15633_v55 = vpop.eup %15632 }
0x1499   :  { %v20089_v16 = vpop.eup %15634  ;;  %v9981_v40 = vadd.f32 1.0, %v15633_v55 }
0x149a   :  { %v10130_v1 = vpop.permute.xlu0 %10129  ;;  %v15637_v42 = vpop.eup %15636 }
0x149b   :  { %v10169_v31 = vmul.f32 %v20079_v51, %v10130_v1  ;;  %v9983_v1 = vadd.f32 1.0, %v15637_v42  ;;  %15642 = vrcp.f32 %v9981_v40 }
0x149c   :  { %v10132_v20 = vpop.permute.xlu1 %10131 }
0x149d   :  { %v10170_v12 = vmul.f32 %v20081_v38, %v10132_v20  ;;  %10209 = vrot.lane.b32.xlu0 %v10169_v31, %s15900_s5  ;;  %15644 = vrcp.f32 %v9983_v1 }
0x149e   :  { %v20095_v31 = vpop.eup %15638 }
0x149f   :  { %10211 = vrot.lane.b32.xlu1 %v10170_v12, %s15900_s5 }
0x14a0   :  { %v20098_v8 = vpop.eup %15640 }
0x14a2   :  { %v10134_v2 = vpop.permute.xlu0 %10133 }
0x14a3   :  { %v10171_v22 = vmul.f32 %v20087_v13, %v10134_v2 }
0x14a4   :  { %v10136_v43 = vpop.permute.xlu1 %10135 }
0x14a5   :  { %v10172_v24 = vmul.f32 %v20089_v16, %v10136_v43  ;;  %10213 = vrot.lane.b32.xlu0 %v10171_v22, %s15900_s5  ;;  %v20103_v55 = vpop.eup %15642 }
0x14a7   :  { %10215 = vrot.lane.b32.xlu1 %v10172_v24, %s15900_s5  ;;  %v20106_v42 = vpop.eup %15644  ;;  %v10081_v24 = vmul.f32 %v20033_v4, %v19708_v46  ;;  %v10084_v46 = vmul.f32 %v20049_v21, %v19723_v36  ;;  %v10086_v36 = vmul.f32 %v20062_v50, %v19735_v34  ;;  %v10088_v34 = vmul.f32 %v20074_v3, %v19747_v48 }
0x14a8   :  { %v10090_v48 = vmul.f32 %v20081_v38, %v19759_v59  ;;  %v10092_v59 = vmul.f32 %v20089_v16, %v19771_v25  ;;  %v10094_v25 = vmul.f32 %v20098_v8, %v19783_v11  ;;  %v10096_v11 = vmul.f32 %v20106_v42, %v19795_v39  ;;  %v20213_v39 = vld [vmem:[%s21568_s1 + $0x8] sm:$0xff] }
0x14a9   :  { %vm5452_vm3 = vcmp.eq.s32.totalorder %v20213_v39, 1  ;;  %vm6269_vm6 = vcmp.eq.s32.totalorder %v20213_v39, 2  ;;  %vm7086_vm10 = vcmp.eq.s32.totalorder %v20213_v39, 3  ;;  %vm7903_vm14 = vcmp.eq.s32.totalorder %v20213_v39, 4 }
0x14aa   :  { %v10138_v10 = vpop.permute.xlu0 %10137 }
0x14ab   :  { %v10173_v20 = vmul.f32 %v20095_v31, %v10138_v10 }
0x14ac   :  { %v10140_v12 = vpop.permute.xlu1 %10139 }
0x14ad   :  { %v10174_v54 = vmul.f32 %v20098_v8, %v10140_v12  ;;  %10217 = vrot.lane.b32.xlu0 %v10173_v20, %s15900_s5  ;;  %v10082_v20 = vmul.f32 %v20037_v27, %v19713_v61 }
0x14af   :  { %10219 = vrot.lane.b32.xlu1 %v10174_v54, %s15900_s5 }
0x14b2   :  { %v10142_v2 = vpop.permute.xlu0 %10141 }
0x14b3   :  { %v10175_v22 = vmul.f32 %v20103_v55, %v10142_v2  ;;  %v10083_v2 = vmul.f32 %v20045_v44, %v19718_v15  ;;  %v10085_v15 = vmul.f32 %v20057_v9, %v19730_v30  ;;  %v10087_v30 = vmul.f32 %v20069_v5, %v19742_v29 }
0x14b4   :  { %v10144_v43 = vpop.permute.xlu1 %10143  ;;  %v10089_v29 = vmul.f32 %v20079_v51, %v19754_v62  ;;  %v10091_v62 = vmul.f32 %v20087_v13, %v19766_v63  ;;  %v10093_v63 = vmul.f32 %v20095_v31, %v19778_v57  ;;  %v10095_v57 = vmul.f32 %v20103_v55, %v19790_v52  ;;  %v20208_v52 = vld [vmem:[%s21568_s1] sm:$0xff] }
0x14b5   :  { %v10176_v40 = vmul.f32 %v20106_v42, %v10144_v43  ;;  %10221 = vrot.lane.b32.xlu0 %v10175_v22, %s15900_s5  ;;  %vm5451_vm2 = vcmp.eq.s32.totalorder %v20208_v52, 1  ;;  %v20219_v42 = vld [vmem:[%s21568_s1 + $0x18] sm:$0xff]  ;;  %vm6268_vm7 = vcmp.eq.s32.totalorder %v20208_v52, 2  ;;  %vm7085_vm11 = vcmp.eq.s32.totalorder %v20208_v52, 3 }
0x14b6   :  { %vm5454_vm4 = vcmp.eq.s32.totalorder %v20219_v42, 1  ;;  %vm6271_vm8 = vcmp.eq.s32.totalorder %v20219_v42, 2  ;;  %vm7088_vm12 = vcmp.eq.s32.totalorder %v20219_v42, 3  ;;  %vm7902_vm15 = vcmp.eq.s32.totalorder %v20208_v52, 4 }
0x14b7   :  { %10223 = vrot.lane.b32.xlu1 %v10176_v40, %s15900_s5  ;;  %vm7905_vm0 = vcmp.eq.s32.totalorder %v20219_v42, 4 }
0x14ef   :  { %v10194_v1 = vpop.permute.xlu0 %10193 }
0x14f0   :  { %v20113_v10 = vadd.f32 %v10194_v1, %v10081_v24 }
0x14f1   :  { %v10196_v12 = vpop.permute.xlu1 %10195 }
0x14f2   :  { %15646 = vtanh.f32 %v20113_v10  ;;  %v20118_v54 = vadd.f32 %v10196_v12, %v10082_v20 }
0x14f4   :  { %15648 = vtanh.f32 %v20118_v54 }
0x14f7   :  { %v10198_v22 = vpop.permute.xlu0 %10197 }
0x14f8   :  { %v20123_v43 = vadd.f32 %v10198_v22, %v10083_v2 }
0x14f9   :  { %v10200_v4 = vpop.permute.xlu1 %10199 }
0x14fa   :  { %15650 = vtanh.f32 %v20123_v43  ;;  %v20128_v61 = vadd.f32 %v10200_v4, %v10084_v46 }
0x14fc   :  { %v15647_v27 = vpop.eup %15646  ;;  %15652 = vtanh.f32 %v20128_v61 }
0x14fd   :  { %10289 = vrot.lane.b32.xlu0 %v15647_v27, %s15900_s5 }
0x14fe   :  { %v15649_v40 = vpop.eup %15648 }
0x14ff   :  { %10291 = vrot.lane.b32.xlu1 %v15649_v40, %s15900_s5  ;;  %v10202_v44 = vpop.permute.xlu0 %10201 }
0x1500   :  { %v20135_v24 = vadd.f32 %v10202_v44, %v10085_v15 }
0x1501   :  { %v10204_v21 = vpop.permute.xlu1 %10203 }
0x1502   :  { %15654 = vtanh.f32 %v20135_v24  ;;  %v20140_v1 = vadd.f32 %v10204_v21, %v10086_v36 }
0x1504   :  { %v15651_v20 = vpop.eup %15650  ;;  %15656 = vtanh.f32 %v20140_v1 }
0x1505   :  { %10293 = vrot.lane.b32.xlu0 %v15651_v20, %s15900_s5 }
0x1506   :  { %v15653_v12 = vpop.eup %15652 }
0x1507   :  { %10295 = vrot.lane.b32.xlu1 %v15653_v12, %s15900_s5  ;;  %v10206_v9 = vpop.permute.xlu0 %10205 }
0x1508   :  { %v20147_v2 = vadd.f32 %v10206_v9, %v10087_v30 }
0x1509   :  { %v10208_v50 = vpop.permute.xlu1 %10207 }
0x150a   :  { %15658 = vtanh.f32 %v20147_v2  ;;  %v20152_v22 = vadd.f32 %v10208_v50, %v10088_v34 }
0x150c   :  { %v15655_v46 = vpop.eup %15654  ;;  %15660 = vtanh.f32 %v20152_v22 }
0x150d   :  { %10297 = vrot.lane.b32.xlu0 %v15655_v46, %s15900_s5 }
0x150e   :  { %v15657_v4 = vpop.eup %15656 }
0x150f   :  { %10299 = vrot.lane.b32.xlu1 %v15657_v4, %s15900_s5  ;;  %v10210_v5 = vpop.permute.xlu0 %10209 }
0x1510   :  { %v20159_v27 = vadd.f32 %v10210_v5, %v10089_v29 }
0x1511   :  { %v10212_v3 = vpop.permute.xlu1 %10211 }
0x1512   :  { %15662 = vtanh.f32 %v20159_v27  ;;  %v20164_v40 = vadd.f32 %v10212_v3, %v10090_v48  ;;  %v5467_v3 = vsel %vm5451_vm2, 1, %v21727_v23 }
0x1514   :  { %v15659_v15 = vpop.eup %15658  ;;  %15664 = vtanh.f32 %v20164_v40 }
0x1515   :  { %10301 = vrot.lane.b32.xlu0 %v15659_v15, %s15900_s5  ;;  %v20227_v15 = vld [vmem:[%s21568_s1 + $0x10] sm:$0xff] }
0x1516   :  { %v15661_v44 = vpop.eup %15660  ;;  %vm5453_vm5 = vcmp.eq.s32.totalorder %v20227_v15, 1  ;;  %vm6270_vm9 = vcmp.eq.s32.totalorder %v20227_v15, 2  ;;  %vm7087_vm13 = vcmp.eq.s32.totalorder %v20227_v15, 3  ;;  %vm7904_vm2 = vcmp.eq.s32.totalorder %v20227_v15, 4 }
0x1517   :  { %10303 = vrot.lane.b32.xlu1 %v15661_v44, %s15900_s5  ;;  %v10214_v51 = vpop.permute.xlu0 %10213  ;;  %v5468_v44 = vsel %vm5452_vm3, 1, %v21727_v23  ;;  %vm8720_vm3 = vcmp.eq.s32.totalorder %v20213_v39, 5 }
0x1518   :  { %v20171_v36 = vadd.f32 %v10214_v51, %v10091_v62  ;;  %v5470_v62 = vsel %vm5454_vm4, 1, %v21727_v23  ;;  %v5469_v51 = vsel %vm5453_vm5, 1, %v21727_v23  ;;  %vm8719_vm4 = vcmp.eq.s32.totalorder %v20208_v52, 5 }
0x1519   :  { %v10216_v38 = vpop.permute.xlu1 %10215  ;;  %vm8722_vm5 = vcmp.eq.s32.totalorder %v20219_v42, 5 }
0x151a   :  { %15666 = vtanh.f32 %v20171_v36  ;;  %v20176_v21 = vadd.f32 %v10216_v38, %v10092_v59  ;;  %v6285_v59 = vsel %vm6269_vm6, 1, %v21727_v23  ;;  %v6284_v38 = vsel %vm6268_vm7, 1, %v21727_v23 }
0x151b   :  { %vm8721_vm6 = vcmp.eq.s32.totalorder %v20227_v15, 5  ;;  %vm9537_vm7 = vcmp.eq.s32.totalorder %v20213_v39, 6 }
0x151c   :  { %v15663_v20 = vpop.eup %15662  ;;  %15668 = vtanh.f32 %v20176_v21 }
0x151d   :  { %10305 = vrot.lane.b32.xlu0 %v15663_v20, %s15900_s5  ;;  %v6287_v20 = vsel %vm6271_vm8, 1, %v21727_v23  ;;  %vm9536_vm8 = vcmp.eq.s32.totalorder %v20208_v52, 6 }
0x151e   :  { %v15665_v12 = vpop.eup %15664 }
0x151f   :  { %10307 = vrot.lane.b32.xlu1 %v15665_v12, %s15900_s5  ;;  %v10218_v13 = vpop.permute.xlu0 %10217  ;;  %v6286_v12 = vsel %vm6270_vm9, 1, %v21727_v23  ;;  %vm9539_vm9 = vcmp.eq.s32.totalorder %v20219_v42, 6 }
0x1520   :  { %v20183_v30 = vadd.f32 %v10218_v13, %v10093_v63  ;;  %v7102_v63 = vsel %vm7086_vm10, 1, %v21727_v23  ;;  %v7101_v13 = vsel %vm7085_vm11, 1, %v21727_v23  ;;  %vm9538_vm10 = vcmp.eq.s32.totalorder %v20227_v15, 6 }
0x1521   :  { %v10220_v16 = vpop.permute.xlu1 %10219  ;;  %vm10354_vm11 = vcmp.eq.s32.totalorder %v20213_v39, 7 }
0x1522   :  { %15670 = vtanh.f32 %v20183_v30  ;;  %v20188_v9 = vadd.f32 %v10220_v16, %v10094_v25  ;;  %v7104_v25 = vsel %vm7088_vm12, 1, %v21727_v23  ;;  %v7103_v16 = vsel %vm7087_vm13, 1, %v21727_v23 }
0x1523   :  { %vm10353_vm12 = vcmp.eq.s32.totalorder %v20208_v52, 7  ;;  %vm10356_vm13 = vcmp.eq.s32.totalorder %v20219_v42, 7 }
0x1524   :  { %v15667_v34 = vpop.eup %15666  ;;  %15672 = vtanh.f32 %v20188_v9 }
0x1525   :  { %10309 = vrot.lane.b32.xlu0 %v15667_v34, %s15900_s5  ;;  %v7919_v34 = vsel %vm7903_vm14, 1, %v21727_v23  ;;  %vm10355_vm14 = vcmp.eq.s32.totalorder %v20227_v15, 7 }
0x1526   :  { %v15669_v50 = vpop.eup %15668 }
0x1527   :  { %10311 = vrot.lane.b32.xlu1 %v15669_v50, %s15900_s5  ;;  %v10222_v31 = vpop.permute.xlu0 %10221  ;;  %v7918_v50 = vsel %vm7902_vm15, 1, %v21727_v23  ;;  %vm11171_vm15 = vcmp.eq.s32.totalorder %v20213_v39, 8 }
0x1528   :  { %v20195_v46 = vadd.f32 %v10222_v31, %v10095_v57  ;;  %v7921_v57 = vsel %vm7905_vm0, 1, %v21727_v23  ;;  %v7920_v31 = vsel %vm7904_vm2, 1, %v21727_v23  ;;  %vm11170_vm0 = vcmp.eq.s32.totalorder %v20208_v52, 8 }
0x1529   :  { %v10224_v8 = vpop.permute.xlu1 %10223 }
0x152a   :  { %15674 = vtanh.f32 %v20195_v46  ;;  %v20200_v4 = vadd.f32 %v10224_v8, %v10096_v11  ;;  %v8736_v11 = vsel %vm8720_vm3, 1, %v21727_v23  ;;  %v8735_v8 = vsel %vm8719_vm4, 1, %v21727_v23 }
0x152b   :  { %vm11173_vm4 = vcmp.eq.s32.totalorder %v20219_v42, 8  ;;  %v20322_v42 = vld [vmem:[%s21568_s1 + $0x30] sm:$0xff] }
0x152c   :  { %v15671_v29 = vpop.eup %15670  ;;  %15676 = vtanh.f32 %v20200_v4 }
0x152d   :  { %10313 = vrot.lane.b32.xlu0 %v15671_v29, %s15900_s5  ;;  %v8738_v29 = vsel %vm8722_vm5, 1, %v21727_v23  ;;  %vm11172_vm5 = vcmp.eq.s32.totalorder %v20227_v15, 8 }
0x152e   :  { %v15673_v5 = vpop.eup %15672 }
0x152f   :  { %10315 = vrot.lane.b32.xlu1 %v15673_v5, %s15900_s5  ;;  %v8737_v5 = vsel %vm8721_vm6, 1, %v21727_v23 }
0x1534   :  { %v15675_v55 = vpop.eup %15674 }
0x1535   :  { %10317 = vrot.lane.b32.xlu0 %v15675_v55, %s15900_s5  ;;  %v9553_v55 = vsel %vm9537_vm7, 1, %v21727_v23  ;;  %vm5457_vm7 = vcmp.eq.s32.totalorder %v20322_v42, 1 }
0x1536   :  { %v15677_v48 = vpop.eup %15676 }
0x1537   :  { %10319 = vrot.lane.b32.xlu1 %v15677_v48, %s15900_s5  ;;  %v9552_v48 = vsel %vm9536_vm8, 1, %v21727_v23 }
0x1539   :  { %5484 = vperm.xlu0 %14372, %v5467_v3   ;;  %v9555_v3 = vsel %vm9539_vm9, 1, %v21727_v23 }
0x153b   :  { %5487 = vperm.xlu1 %14373, %v5468_v44   ;;  %v9554_v44 = vsel %vm9538_vm10, 1, %v21727_v23 }
0x153d   :  { %5493 = vperm.xlu0 %14372, %v5470_v62   ;;  %v10370_v62 = vsel %vm10354_vm11, 1, %v21727_v23  ;;  %vm6274_vm11 = vcmp.eq.s32.totalorder %v20322_v42, 2 }
0x153f   :  { %5490 = vperm.xlu1 %14373, %v5469_v51   ;;  %v10369_v51 = vsel %vm10353_vm12, 1, %v21727_v23 }
0x1541   :  { %6304 = vperm.xlu0 %14372, %v6285_v59   ;;  %v10372_v59 = vsel %vm10356_vm13, 1, %v21727_v23 }
0x1543   :  { %6301 = vperm.xlu1 %14373, %v6284_v38  }
0x1545   :  { %6310 = vperm.xlu0 %14372, %v6287_v20   ;;  %v10371_v20 = vsel %vm10355_vm14, 1, %v21727_v23 }
0x1547   :  { %6307 = vperm.xlu1 %14373, %v6286_v12   ;;  %v20287_v12 = vld [vmem:[%s21568_s1 + $0x28] sm:$0xff] }
0x1548   :  { %vm5456_vm2 = vcmp.eq.s32.totalorder %v20287_v12, 1  ;;  %vm6273_vm8 = vcmp.eq.s32.totalorder %v20287_v12, 2  ;;  %vm7090_vm12 = vcmp.eq.s32.totalorder %v20287_v12, 3 }
0x1549   :  { %7121 = vperm.xlu0 %14372, %v7102_v63   ;;  %v11187_v63 = vsel %vm11171_vm15, 1, %v21727_v23  ;;  %vm7091_vm15 = vcmp.eq.s32.totalorder %v20322_v42, 3 }
0x154b   :  { %7118 = vperm.xlu1 %14373, %v7101_v13  }
0x154d   :  { %7127 = vperm.xlu0 %14372, %v7104_v25   ;;  %v20294_v25 = vld [vmem:[%s21568_s1 + $0x20] sm:$0xff] }
0x154e   :  { %vm5455_vm3 = vcmp.eq.s32.totalorder %v20294_v25, 1  ;;  %vm6272_vm9 = vcmp.eq.s32.totalorder %v20294_v25, 2  ;;  %vm7089_vm13 = vcmp.eq.s32.totalorder %v20294_v25, 3 }
0x154f   :  { %7124 = vperm.xlu1 %14373, %v7103_v16  }
0x1551   :  { %7938 = vperm.xlu0 %14372, %v7919_v34   ;;  %v11186_v34 = vsel %vm11170_vm0, 1, %v21727_v23  ;;  %vm7907_vm0 = vcmp.eq.s32.totalorder %v20287_v12, 4 }
0x1553   :  { %7935 = vperm.xlu1 %14373, %v7918_v50   ;;  %v5472_v50 = vsel %vm5456_vm2, 1, %v21727_v23  ;;  %vm7906_vm2 = vcmp.eq.s32.totalorder %v20294_v25, 4 }
0x1555   :  { %7944 = vperm.xlu0 %14372, %v7921_v57   ;;  %v20314_v57 = vld [vmem:[%s21568_s1 + $0x38] sm:$0xff] }
0x1556   :  { %vm5458_vm6 = vcmp.eq.s32.totalorder %v20314_v57, 1  ;;  %vm6275_vm10 = vcmp.eq.s32.totalorder %v20314_v57, 2  ;;  %vm7092_vm14 = vcmp.eq.s32.totalorder %v20314_v57, 3 }
0x1557   :  { %7941 = vperm.xlu1 %14373, %v7920_v31   ;;  %v11189_v31 = vsel %vm11173_vm4, 1, %v21727_v23  ;;  %vm7908_vm4 = vcmp.eq.s32.totalorder %v20322_v42, 4 }
0x1559   :  { %8755 = vperm.xlu0 %14372, %v8736_v11  }
0x155b   :  { %8752 = vperm.xlu1 %14373, %v8735_v8  }
0x155d   :  { %8761 = vperm.xlu0 %14372, %v8738_v29  }
0x155f   :  { %8758 = vperm.xlu1 %14373, %v8737_v5   ;;  %v11188_v5 = vsel %vm11172_vm5, 1, %v21727_v23  ;;  %vm8724_vm5 = vcmp.eq.s32.totalorder %v20287_v12, 5 }
0x1561   :  { %9572 = vperm.xlu0 %14372, %v9553_v55   ;;  %v5474_v55 = vsel %vm5458_vm6, 1, %v21727_v23  ;;  %vm8723_vm6 = vcmp.eq.s32.totalorder %v20294_v25, 5 }
0x1563   :  { %9569 = vperm.xlu1 %14373, %v9552_v48   ;;  %v6289_v48 = vsel %vm6273_vm8, 1, %v21727_v23  ;;  %vm8725_vm8 = vcmp.eq.s32.totalorder %v20322_v42, 5 }
0x1565   :  { %9578 = vperm.xlu0 %14372, %v9555_v3  }
0x1567   :  { %9575 = vperm.xlu1 %14373, %v9554_v44  }
0x1569   :  { %10389 = vperm.xlu0 %14372, %v10370_v62  }
0x156b   :  { %10386 = vperm.xlu1 %14373, %v10369_v51   ;;  %v6288_v51 = vsel %vm6272_vm9, 1, %v21727_v23  ;;  %vm9541_vm9 = vcmp.eq.s32.totalorder %v20287_v12, 6 }
0x156d   :  { %10395 = vperm.xlu0 %14372, %v10372_v59  }
0x156f   :  { %v10290_v38 = vpop.permute.xlu0 %10289  ;;  %10392 = vperm.xlu1 %14373, %v10371_v20   ;;  %v7106_v20 = vsel %vm7090_vm12, 1, %v21727_v23  ;;  %vm9542_vm12 = vcmp.eq.s32.totalorder %v20322_v42, 6 }
0x1570   :  { %v20297_v39 = vmul.f32 %v19926_v56, %v10290_v38  ;;  %v6291_v38 = vsel %vm6275_vm10, 1, %v21727_v23  ;;  %vm9540_vm10 = vcmp.eq.s32.totalorder %v20294_v25, 6 }
0x1571   :  { %v10292_v13 = vpop.permute.xlu1 %10291  ;;  %11206 = vperm.xlu0 %14372, %v11187_v63  }
0x1572   :  { %21806 = vst [vmem:[#allocation96_spill] sm:$0xff] %v20297_v39  ;;  %v20300_v16 = vmul.f32 %v19930_v49, %v10292_v13  ;;  %v5471_v49 = vsel %vm5455_vm3, 1, %v21727_v23  ;;  %vm7909_vm3 = vcmp.eq.s32.totalorder %v20314_v57, 4 }
0x1573   :  { %11203 = vperm.xlu1 %14373, %v11186_v34  }
0x1574   :  { %21807 = vst [vmem:[#allocation97_spill] sm:$0xff] %v20300_v16  ;;  %v10497_v52 = vpack.c.bf16 %v20300_v16, %v20297_v39 }
0x1575   :  { %5499 = vperm.xlu0 %14372, %v5472_v50  }
0x1576   :  { %12770 = vmatmul.mubr.msk.bf16.vlgmr.msra.gmra.mrb[184].mxu1 %vm4806_vm1, %v10497_v52  ;;  %v7105_v52 = vsel %vm7089_vm13, 1, %v21727_v23  ;;  %vm10358_vm13 = vcmp.eq.s32.totalorder %v20287_v12, 7 }
0x1577   :  { %v10294_v56 = vpop.permute.xlu0 %10293  ;;  %10571 = vmatprep.mubr.bf16.mxu1 %v21727_v23  ;;  %5496 = vperm.xlu1 %14373, %v5471_v49   ;;  %v7923_v49 = vsel %vm7907_vm0, 1, %v21727_v23  ;;  %vm10359_vm0 = vcmp.eq.s32.totalorder %v20322_v42, 7 }
0x1578   :  { %v20325_v8 = vmul.f32 %v19940_v47, %v10294_v56  ;;  %v5473_v47 = vsel %vm5457_vm7, 1, %v21727_v23  ;;  %v7108_v56 = vsel %vm7092_vm14, 1, %v21727_v23  ;;  %vm8726_vm7 = vcmp.eq.s32.totalorder %v20314_v57, 5 }
0x1579   :  { %v10296_v11 = vpop.permute.xlu1 %10295  ;;  %11212 = vperm.xlu0 %14372, %v11189_v31   ;;  %vm10357_vm14 = vcmp.eq.s32.totalorder %v20294_v25, 7 }
0x157a   :  { %21808 = vst [vmem:[#allocation98_spill] sm:$0xff] %v20325_v8  ;;  %v20328_v29 = vmul.f32 %v19944_v0, %v10296_v11  ;;  %v7922_v11 = vsel %vm7906_vm2, 1, %v21727_v23  ;;  %vm11175_vm2 = vcmp.eq.s32.totalorder %v20287_v12, 8 }
0x157b   :  { %11209 = vperm.xlu1 %14373, %v11188_v5  }
0x157c   :  { %21809 = vst [vmem:[#allocation99_spill] sm:$0xff] %v20328_v29  ;;  %v10498_v15 = vpack.c.bf16 %v20328_v29, %v20325_v8 }
0x157d   :  { %5505 = vperm.xlu0 %14372, %v5474_v55   ;;  %v7925_v55 = vsel %vm7909_vm3, 1, %v21727_v23  ;;  %vm11174_vm3 = vcmp.eq.s32.totalorder %v20294_v25, 8 }
0x157e   :  { %12771 = vmatmul.mubr.msk.bf16.gmra.mrb[188].mxu1 %vm4806_vm1, %v10498_v15  ;;  %v11190_v12 = vsel %vm11174_vm3, 1, %v21727_v23 }
0x157f   :  { %10581 = vmatprep.mubr.bf16.mxu1 %v21727_v23  ;;  %v10298_v0 = vpop.permute.xlu0 %10297  ;;  %5502 = vperm.xlu1 %14373, %v5473_v47  }
0x1580   :  { %v20344_v44 = vmul.f32 %v19954_v58, %v10298_v0  ;;  %v6290_v58 = vsel %vm6274_vm11, 1, %v21727_v23  ;;  %v7924_v0 = vsel %vm7908_vm4, 1, %v21727_v23  ;;  %vm9543_vm11 = vcmp.eq.s32.totalorder %v20314_v57, 6 }
0x1581   :  { %v10300_v3 = vpop.permute.xlu1 %10299  ;;  %6316 = vperm.xlu0 %14372, %v6289_v48  }
0x1582   :  { %21810 = vst [vmem:[#allocation100_spill] sm:$0xff] %v20344_v44  ;;  %v20347_v62 = vmul.f32 %v19958_v35, %v10300_v3  ;;  %v8739_v3 = vsel %vm8723_vm6, 1, %v21727_v23  ;;  %vm11177_vm6 = vcmp.eq.s32.totalorder %v20314_v57, 8 }
0x1583   :  { %6313 = vperm.xlu1 %14373, %v6288_v51  }
0x1584   :  { %21811 = vst [vmem:[#allocation101_spill] sm:$0xff] %v20347_v62  ;;  %v10499_v59 = vpack.c.bf16 %v20347_v62, %v20344_v44 }
0x1585   :  { %6322 = vperm.xlu0 %14372, %v6291_v38   ;;  %v8742_v38 = vsel %vm8726_vm7, 1, %v21727_v23  ;;  %vm11176_vm7 = vcmp.eq.s32.totalorder %v20322_v42, 8 }
0x1586   :  { %12772 = vmatmul.mubr.msk.bf16.gmra.mrb[192].mxu1 %vm4806_vm1, %v10499_v59 }
0x1587   :  { %v10302_v35 = vpop.permute.xlu0 %10301  ;;  %10591 = vmatprep.mubr.bf16.mxu1 %v21727_v23  ;;  %6319 = vperm.xlu1 %14373, %v6290_v58  }
0x1588   :  { %v20362_v13 = vmul.f32 %v19968_v7, %v10302_v35  ;;  %v7107_v7 = vsel %vm7091_vm15, 1, %v21727_v23  ;;  %v8741_v35 = vsel %vm8725_vm8, 1, %v21727_v23  ;;  %vm10360_vm15 = vcmp.eq.s32.totalorder %v20314_v57, 7 }
0x1589   :  { %v10304_v63 = vpop.permute.xlu1 %10303  ;;  %7133 = vperm.xlu0 %14372, %v7106_v20   ;;  %v9556_v20 = vsel %vm9540_vm10, 1, %v21727_v23 }
0x158a   :  { %21812 = vst [vmem:[#allocation102_spill] sm:$0xff] %v20362_v13  ;;  %v20365_v34 = vmul.f32 %v19972_v14, %v10304_v63 }
0x158b   :  { %7130 = vperm.xlu1 %14373, %v7105_v52  }
0x158c   :  { %21813 = vst [vmem:[#allocation103_spill] sm:$0xff] %v20365_v34  ;;  %v10500_v50 = vpack.c.bf16 %v20365_v34, %v20362_v13 }
0x158d   :  { %7139 = vperm.xlu0 %14372, %v7108_v56   ;;  %v9559_v56 = vsel %vm9543_vm11, 1, %v21727_v23 }
0x158e   :  { %12773 = vmatmul.mubr.msk.bf16.gmra.mrb[196].mxu1 %vm4806_vm1, %v10500_v50 }
0x158f   :  { %10601 = vmatprep.mubr.bf16.mxu1 %v21727_v23  ;;  %v10306_v14 = vpop.permute.xlu0 %10305  ;;  %7136 = vperm.xlu1 %14373, %v7107_v7  }
0x1590   :  { %v20381_v5 = vmul.f32 %v19982_v60, %v10306_v14  ;;  %v9558_v14 = vsel %vm9542_vm12, 1, %v21727_v23 }
0x1591   :  { %v10308_v31 = vpop.permute.xlu1 %10307  ;;  %7950 = vperm.xlu0 %14372, %v7923_v49  }
0x1592   :  { %v20384_v15 = vmul.f32 %v19986_v19, %v10308_v31  ;;  %v8740_v19 = vsel %vm8724_vm5, 1, %v21727_v23 }
0x1593   :  { %7947 = vperm.xlu1 %14373, %v7922_v11  }
0x1594   :  { %v10501_v47 = vpack.c.bf16 %v20384_v15, %v20381_v5 }
0x1595   :  { %7956 = vperm.xlu0 %14372, %v7925_v55  }
0x1596   :  { %12774 = vmatmul.mubr.msk.bf16.gmra.mrb[200].mxu1 %vm4806_vm1, %v10501_v47  ;;  %v10376_v47 = vsel %vm10360_vm15, 1, %v21727_v23 }
0x1597   :  { %v10310_v60 = vpop.permute.xlu0 %10309  ;;  %10611 = vmatprep.mubr.bf16.mxu1 %v21727_v23  ;;  %7953 = vperm.xlu1 %14373, %v7924_v0  }
0x1598   :  { %v20399_v51 = vmul.f32 %v19991_v33, %v10310_v60  ;;  %v9557_v33 = vsel %vm9541_vm9, 1, %v21727_v23  ;;  %v10375_v60 = vsel %vm10359_vm0, 1, %v21727_v23 }
0x1599   :  { %v10312_v48 = vpop.permute.xlu1 %10311  ;;  %8767 = vperm.xlu0 %14372, %v8740_v19   ;;  %v20449_v19 = vld [vmem:[%s21568_s1 + $0x48] sm:$0xff] }
0x159a   :  { %v20402_v59 = vmul.f32 %v19994_v41, %v10312_v48  ;;  %vm5460_vm4 = vcmp.eq.s32.totalorder %v20449_v19, 1  ;;  %vm6277_vm10 = vcmp.eq.s32.totalorder %v20449_v19, 2  ;;  %vm7911_vm3 = vcmp.eq.s32.totalorder %v20449_v19, 4 }
0x159b   :  { %8764 = vperm.xlu1 %14373, %v8739_v3   ;;  %v5476_v48 = vsel %vm5460_vm4, 1, %v21727_v23  ;;  %v20468_v3 = vld [vmem:[%s21568_s1 + $0x58] sm:$0xff] }
0x159c   :  { %v10502_v58 = vpack.c.bf16 %v20402_v59, %v20399_v51  ;;  %vm5462_vm8 = vcmp.eq.s32.totalorder %v20468_v3, 1  ;;  %vm6279_vm12 = vcmp.eq.s32.totalorder %v20468_v3, 2  ;;  %vm7096_vm0 = vcmp.eq.s32.totalorder %v20468_v3, 3 }
0x159d   :  { %8773 = vperm.xlu0 %14372, %v8742_v38   ;;  %v11193_v38 = vsel %vm11177_vm6, 1, %v21727_v23  ;;  %v5478_v42 = vsel %vm5462_vm8, 1, %v21727_v23 }
0x159e   :  { %12775 = vmatmul.mubr.msk.bf16.gmra.mrb[204].mxu1 %vm4806_vm1, %v10502_v58  ;;  %v20475_v58 = vld [vmem:[%s21568_s1 + $0x50] sm:$0xff] }
0x159f   :  { %10621 = vmatprep.mubr.bf16.mxu1 %v21727_v23  ;;  %v10314_v41 = vpop.permute.xlu0 %10313  ;;  %8770 = vperm.xlu1 %14373, %v8741_v35   ;;  %v11192_v35 = vsel %vm11176_vm7, 1, %v21727_v23  ;;  %vm5461_vm9 = vcmp.eq.s32.totalorder %v20475_v58, 1  ;;  %vm7912_vm6 = vcmp.eq.s32.totalorder %v20475_v58, 4  ;;  %vm8728_vm7 = vcmp.eq.s32.totalorder %v20449_v19, 5 }
0x15a0   :  { %v20418_v52 = vmul.f32 %v19999_v45, %v10314_v41  ;;  %v10374_v45 = vsel %vm10358_vm13, 1, %v21727_v23  ;;  %vm6278_vm13 = vcmp.eq.s32.totalorder %v20475_v58, 2 }
0x15a1   :  { %9584 = vperm.xlu0 %14372, %v9557_v33   ;;  %v10316_v63 = vpop.permute.xlu1 %10315 }
0x15a2   :  { %v20421_v50 = vmul.f32 %v20002_v28, %v10316_v63  ;;  %v10373_v28 = vsel %vm10357_vm14, 1, %v21727_v23  ;;  %vm7094_vm14 = vcmp.eq.s32.totalorder %v20449_v19, 3 }
0x15a3   :  { %9581 = vperm.xlu1 %14373, %v9556_v20   ;;  %v5477_v20 = vsel %vm5461_vm9, 1, %v21727_v23  ;;  %vm8730_vm9 = vcmp.eq.s32.totalorder %v20468_v3, 5 }
0x15a4   :  { %v10503_v7 = vpack.c.bf16 %v20421_v50, %v20418_v52 }
0x15a5   :  { %9590 = vperm.xlu0 %14372, %v9559_v56   ;;  %v6293_v56 = vsel %vm6277_vm10, 1, %v21727_v23  ;;  %vm8729_vm10 = vcmp.eq.s32.totalorder %v20475_v58, 5 }
0x15a6   :  { %12776 = vmatmul.mubr.msk.bf16.gmra.mrb[208].mxu1 %vm4806_vm1, %v10503_v7 }
0x15a7   :  { %v10318_v49 = vpop.permute.xlu0 %10317  ;;  %9587 = vperm.xlu1 %14373, %v9558_v14   ;;  %10631 = vmatprep.mubr.bf16.mxu1 %v21727_v23 }
0x15a8   :  { %v20436_v11 = vmul.f32 %v20007_v53, %v10318_v49  ;;  %v11191_v53 = vsel %vm11175_vm2, 1, %v21727_v23  ;;  %v6295_v49 = vsel %vm6279_vm12, 1, %v21727_v23  ;;  %vm7095_vm2 = vcmp.eq.s32.totalorder %v20475_v58, 3 }
0x15a9   :  { %10401 = vperm.xlu0 %14372, %v10374_v45   ;;  %v10320_v31 = vpop.permute.xlu1 %10319 }
0x15aa   :  { %v20439_v55 = vmul.f32 %v20010_v17, %v10320_v31  ;;  %v20457_v17 = vld [vmem:[%s21568_s1 + $0x40] sm:$0xff]  ;;  %v6294_v31 = vsel %vm6278_vm13, 1, %v21727_v23  ;;  %vm9547_vm13 = vcmp.eq.s32.totalorder %v20468_v3, 6 }
0x15ab   :  { %10398 = vperm.xlu1 %14373, %v10373_v28   ;;  %vm5459_vm5 = vcmp.eq.s32.totalorder %v20457_v17, 1  ;;  %vm6276_vm11 = vcmp.eq.s32.totalorder %v20457_v17, 2  ;;  %vm7093_vm15 = vcmp.eq.s32.totalorder %v20457_v17, 3  ;;  %vm7910_vm4 = vcmp.eq.s32.totalorder %v20457_v17, 4 }
0x15ac   :  { %v10504_v0 = vpack.c.bf16 %v20439_v55, %v20436_v11  ;;  %v5475_v25 = vsel %vm5459_vm5, 1, %v21727_v23  ;;  %v6292_v14 = vsel %vm6276_vm11, 1, %v21727_v23  ;;  %vm7913_vm5 = vcmp.eq.s32.totalorder %v20468_v3, 4 }
0x15ad   :  { %10407 = vperm.xlu0 %14372, %v10376_v47   ;;  %vm8727_vm8 = vcmp.eq.s32.totalorder %v20457_v17, 5  ;;  %vm9545_vm11 = vcmp.eq.s32.totalorder %v20449_v19, 6  ;;  %vm9544_vm12 = vcmp.eq.s32.totalorder %v20457_v17, 6 }
0x15ae   :  { %12777 = vmatmul.mubr.msk.bf16.gmra.mrb[212].mxu1 %vm4806_vm1, %v10504_v0  ;;  %v7110_v0 = vsel %vm7094_vm14, 1, %v21727_v23  ;;  %vm9546_vm14 = vcmp.eq.s32.totalorder %v20475_v58, 6 }
0x15af   :  { %10404 = vperm.xlu1 %14373, %v10375_v60  }
0x15b1   :  { %11218 = vperm.xlu0 %14372, %v11191_v53   ;;  %v7109_v53 = vsel %vm7093_vm15, 1, %v21727_v23  ;;  %vm10362_vm15 = vcmp.eq.s32.totalorder %v20449_v19, 7 }
0x15b3   :  { %11215 = vperm.xlu1 %14373, %v11190_v12  }
0x15b5   :  { %5511 = vperm.xlu0 %14372, %v5476_v48   ;;  %v7112_v48 = vsel %vm7096_vm0, 1, %v21727_v23  ;;  %vm10361_vm0 = vcmp.eq.s32.totalorder %v20457_v17, 7 }
0x15b7   :  { %5508 = vperm.xlu1 %14373, %v5475_v25  }
0x15b8   :  { %v20478_v57 = vpop.permute.xlu0 %5484 }
0x15b9   :  { %11224 = vperm.xlu0 %14372, %v11193_v38   ;;  %v7111_v38 = vsel %vm7095_vm2, 1, %v21727_v23  ;;  %vm10364_vm2 = vcmp.eq.s32.totalorder %v20468_v3, 7 }
0x15ba   :  { %v20482_v33 = vpop.permute.xlu1 %5487 }
0x15bb   :  { %11221 = vperm.xlu1 %14373, %v11192_v35  }
0x15bc   :  { %v20486_v41 = vpop.permute.xlu0 %5493 }
0x15bd   :  { %5517 = vperm.xlu0 %14372, %v5478_v42   ;;  %v7927_v42 = vsel %vm7911_vm3, 1, %v21727_v23  ;;  %vm10363_vm3 = vcmp.eq.s32.totalorder %v20475_v58, 7 }
0x15be   :  { %v20490_v63 = vpop.permute.xlu1 %5490 }
0x15bf   :  { %21814 = vst [vmem:[#allocation104_spill] sm:$0xff] %v20490_v63  ;;  %5514 = vperm.xlu1 %14373, %v5477_v20  }
0x15c0   :  { %v20494_v7 = vpop.permute.xlu0 %6304 }
0x15c1   :  { %21815 = vst [vmem:[#allocation105_spill] sm:$0xff] %v20494_v7  ;;  %6328 = vperm.xlu0 %14372, %v6293_v56   ;;  %v7926_v56 = vsel %vm7910_vm4, 1, %v21727_v23  ;;  %vm11179_vm4 = vcmp.eq.s32.totalorder %v20449_v19, 8 }
0x15c2   :  { %v20498_v45 = vpop.permute.xlu1 %6301 }
0x15c3   :  { %21816 = vst [vmem:[#allocation106_spill] sm:$0xff] %v20498_v45  ;;  %6325 = vperm.xlu1 %14373, %v6292_v14  }
0x15c4   :  { %v20502_v28 = vpop.permute.xlu0 %6310 }
0x15c5   :  { %21817 = vst [vmem:[#allocation107_spill] sm:$0xff] %v20502_v28  ;;  %6334 = vperm.xlu0 %14372, %v6295_v49   ;;  %v7929_v49 = vsel %vm7913_vm5, 1, %v21727_v23  ;;  %vm11178_vm5 = vcmp.eq.s32.totalorder %v20457_v17, 8 }
0x15c6   :  { %v20506_v47 = vpop.permute.xlu1 %6307  ;;  %v11194_v39 = vsel %vm11178_vm5, 1, %v21727_v23 }
0x15c7   :  { %21818 = vst [vmem:[#allocation108_spill] sm:$0xff] %v20506_v47  ;;  %6331 = vperm.xlu1 %14373, %v6294_v31  }
0x15c8   :  { %v20510_v60 = vpop.permute.xlu0 %7121 }
0x15c9   :  { %21819 = vst [vmem:[#allocation109_spill] sm:$0xff] %v20510_v60  ;;  %7145 = vperm.xlu0 %14372, %v7110_v0   ;;  %v7928_v0 = vsel %vm7912_vm6, 1, %v21727_v23 }
0x15ca   :  { %v20514_v12 = vpop.permute.xlu1 %7118 }
0x15cb   :  { %21820 = vst [vmem:[#allocation110_spill] sm:$0xff] %v20514_v12  ;;  %7142 = vperm.xlu1 %14373, %v7109_v53  }
0x15cc   :  { %v20518_v25 = vpop.permute.xlu0 %7127 }
0x15cd   :  { %21821 = vst [vmem:[#allocation111_spill] sm:$0xff] %v20518_v25  ;;  %7151 = vperm.xlu0 %14372, %v7112_v48   ;;  %v8744_v48 = vsel %vm8728_vm7, 1, %v21727_v23 }
0x15ce   :  { %v20522_v35 = vpop.permute.xlu1 %7124 }
0x15cf   :  { %21822 = vst [vmem:[#allocation112_spill] sm:$0xff] %v20522_v35  ;;  %7148 = vperm.xlu1 %14373, %v7111_v38  }
0x15d0   :  { %v20526_v20 = vpop.permute.xlu0 %7938 }
0x15d1   :  { %21823 = vst [vmem:[#allocation113_spill] sm:$0xff] %v20526_v20  ;;  %7962 = vperm.xlu0 %14372, %v7927_v42   ;;  %v8743_v42 = vsel %vm8727_vm8, 1, %v21727_v23 }
0x15d2   :  { %v20530_v14 = vpop.permute.xlu1 %7935 }
0x15d3   :  { %21824 = vst [vmem:[#allocation114_spill] sm:$0xff] %v20530_v14  ;;  %7959 = vperm.xlu1 %14373, %v7926_v56  }
0x15d4   :  { %v20534_v31 = vpop.permute.xlu0 %7944 }
0x15d5   :  { %21825 = vst [vmem:[#allocation115_spill] sm:$0xff] %v20534_v31  ;;  %7968 = vperm.xlu0 %14372, %v7929_v49   ;;  %v8746_v49 = vsel %vm8730_vm9, 1, %v21727_v23 }
0x15d6   :  { %v20538_v53 = vpop.permute.xlu1 %7941 }
0x15d7   :  { %21826 = vst [vmem:[#allocation116_spill] sm:$0xff] %v20538_v53  ;;  %7965 = vperm.xlu1 %14373, %v7928_v0   ;;  %v8745_v0 = vsel %vm8729_vm10, 1, %v21727_v23 }
0x15d8   :  { %v20542_v38 = vpop.permute.xlu0 %8755 }
0x15d9   :  { %21827 = vst [vmem:[#allocation117_spill] sm:$0xff] %v20542_v38  ;;  %8779 = vperm.xlu0 %14372, %v8744_v48   ;;  %v9561_v48 = vsel %vm9545_vm11, 1, %v21727_v23 }
0x15da   :  { %v20546_v56 = vpop.permute.xlu1 %8752 }
0x15db   :  { %21828 = vst [vmem:[#allocation118_spill] sm:$0xff] %v20546_v56  ;;  %8776 = vperm.xlu1 %14373, %v8743_v42   ;;  %v9560_v42 = vsel %vm9544_vm12, 1, %v21727_v23 }
0x15dc   :  { %v20550_v13 = vpop.permute.xlu0 %8761 }
0x15dd   :  { %21829 = vst [vmem:[#allocation119_spill] sm:$0xff] %v20550_v13  ;;  %8785 = vperm.xlu0 %14372, %v8746_v49   ;;  %v9563_v49 = vsel %vm9547_vm13, 1, %v21727_v23 }
0x15de   :  { %v20554_v34 = vpop.permute.xlu1 %8758 }
0x15df   :  { %21830 = vst [vmem:[#allocation120_spill] sm:$0xff] %v20554_v34  ;;  %8782 = vperm.xlu1 %14373, %v8745_v0   ;;  %v9562_v0 = vsel %vm9546_vm14, 1, %v21727_v23 }
0x15e0   :  { %v20558_v44 = vpop.permute.xlu0 %9572 }
0x15e1   :  { %21831 = vst [vmem:[#allocation121_spill] sm:$0xff] %v20558_v44  ;;  %9596 = vperm.xlu0 %14372, %v9561_v48   ;;  %v10378_v48 = vsel %vm10362_vm15, 1, %v21727_v23 }
0x15e2   :  { %v20562_v62 = vpop.permute.xlu1 %9569 }
0x15e3   :  { %21832 = vst [vmem:[#allocation122_spill] sm:$0xff] %v20562_v62  ;;  %9593 = vperm.xlu1 %14373, %v9560_v42   ;;  %v10377_v42 = vsel %vm10361_vm0, 1, %v21727_v23 }
0x15e4   :  { %v20566_v8 = vpop.permute.xlu0 %9578 }
0x15e5   :  { %21833 = vst [vmem:[#allocation123_spill] sm:$0xff] %v20566_v8  ;;  %9602 = vperm.xlu0 %14372, %v9563_v49   ;;  %v10380_v49 = vsel %vm10364_vm2, 1, %v21727_v23 }
0x15e6   :  { %v20570_v29 = vpop.permute.xlu1 %9575 }
0x15e7   :  { %21834 = vst [vmem:[#allocation124_spill] sm:$0xff] %v20570_v29  ;;  %9599 = vperm.xlu1 %14373, %v9562_v0   ;;  %v10379_v0 = vsel %vm10363_vm3, 1, %v21727_v23 }
0x15e8   :  { %v20574_v34 = vpop.permute.xlu0 %10389 }
0x15e9   :  { %21835 = vst [vmem:[#allocation125_spill] sm:$0xff] %v20574_v34  ;;  %10413 = vperm.xlu0 %14372, %v10378_v48   ;;  %v11195_v48 = vsel %vm11179_vm4, 1, %v21727_v23 }
0x15ea   :  { %v20578_v8 = vpop.permute.xlu1 %10386 }
0x15eb   :  { %21836 = vst [vmem:[#allocation126_spill] sm:$0xff] %v20578_v8  ;;  %10410 = vperm.xlu1 %14373, %v10377_v42  }
0x15ec   :  { %v20582_v29 = vpop.permute.xlu0 %10395 }
0x15ed   :  { %21837 = vst [vmem:[#allocation127_spill] sm:$0xff] %v20582_v29  ;;  %10419 = vperm.xlu0 %14372, %v10380_v49  }
0x15ee   :  { %v20586_v13 = vpop.permute.xlu1 %10392 }
0x15ef   :  { %21838 = vst [vmem:[#allocation128_spill] sm:$0xff] %v20586_v13  ;;  %10416 = vperm.xlu1 %14373, %v10379_v0  }
0x15f0   :  { %v20589_v53 = vpop.permute.xlu0 %11206 }
0x15f1   :  { %21839 = vst [vmem:[#allocation129_spill] sm:$0xff] %v20589_v53  ;;  %11230 = vperm.xlu0 %14372, %v11195_v48  }
0x15f2   :  { %v20592_v42 = vpop.permute.xlu1 %11203 }
0x15f3   :  { %21840 = vst [vmem:[#allocation130_spill] sm:$0xff] %v20592_v42  ;;  %11227 = vperm.xlu1 %14373, %v11194_v39  }
0x15f4   :  { %v20594_v19 = vpop.permute.xlu0 %5499 }
0x15f5   :  { %21841 = vst [vmem:[#allocation131_spill] sm:$0xff] %v20594_v19 }
0x15f6   :  { %v20596_v29 = vpop.permute.xlu1 %5496 }
0x15f7   :  { %21842 = vst [vmem:[#allocation132_spill] sm:$0xff] %v20596_v29 }
0x15f8   :  { %v20598_v49 = vpop.permute.xlu0 %11212 }
0x15f9   :  { %21843 = vst [vmem:[#allocation133_spill] sm:$0xff] %v20598_v49 }
0x15fa   :  { %v20600_v17 = vpop.permute.xlu1 %11209 }
0x15fb   :  { %21844 = vst [vmem:[#allocation134_spill] sm:$0xff] %v20600_v17 }
0x15fc   :  { %v20602_v13 = vpop.permute.xlu0 %5505 }
0x15fd   :  { %21845 = vst [vmem:[#allocation135_spill] sm:$0xff] %v20602_v13 }
0x15fe   :  { %v20604_v16 = vpop.permute.xlu1 %5502 }
0x15ff   :  { %21846 = vst [vmem:[#allocation136_spill] sm:$0xff] %v20604_v16 }
0x1600   :  { %v20606_v0 = vpop.permute.xlu0 %6316 }
0x1601   :  { %21847 = vst [vmem:[#allocation137_spill] sm:$0xff] %v20606_v0 }
0x1602   :  { %v20608_v53 = vpop.permute.xlu1 %6313 }
0x1603   :  { %21848 = vst [vmem:[#allocation138_spill] sm:$0xff] %v20608_v53 }
0x1604   :  { %v20610_v48 = vpop.permute.xlu0 %6322 }
0x1605   :  { %21849 = vst [vmem:[#allocation139_spill] sm:$0xff] %v20610_v48 }
0x1606   :  { %v20612_v42 = vpop.permute.xlu1 %6319 }
0x1607   :  { %21850 = vst [vmem:[#allocation140_spill] sm:$0xff] %v20612_v42 }
0x1608   :  { %v20614_v39 = vpop.permute.xlu0 %7133 }
0x1609   :  { %21851 = vst [vmem:[#allocation141_spill] sm:$0xff] %v20614_v39 }
0x160a   :  { %v20616_v19 = vpop.permute.xlu1 %7130 }
0x160b   :  { %21852 = vst [vmem:[#allocation142_spill] sm:$0xff] %v20616_v19 }
0x160c   :  { %v20618_v29 = vpop.permute.xlu0 %7139 }
0x160d   :  { %21853 = vst [vmem:[#allocation143_spill] sm:$0xff] %v20618_v29 }
0x160e   :  { %v20620_v49 = vpop.permute.xlu1 %7136 }
0x160f   :  { %21854 = vst [vmem:[#allocation144_spill] sm:$0xff] %v20620_v49 }
0x1610   :  { %v20622_v17 = vpop.permute.xlu0 %7950 }
0x1611   :  { %21855 = vst [vmem:[#allocation145_spill] sm:$0xff] %v20622_v17 }
0x1612   :  { %v20624_v13 = vpop.permute.xlu1 %7947 }
0x1613   :  { %21856 = vst [vmem:[#allocation146_spill] sm:$0xff] %v20624_v13 }
0x1614   :  { %v20626_v16 = vpop.permute.xlu0 %7956 }
0x1615   :  { %21857 = vst [vmem:[#allocation147_spill] sm:$0xff] %v20626_v16 }
0x1616   :  { %v20628_v0 = vpop.permute.xlu1 %7953 }
0x1617   :  { %21858 = vst [vmem:[#allocation148_spill] sm:$0xff] %v20628_v0 }
0x1618   :  { %v20630_v53 = vpop.permute.xlu0 %8767 }
0x1619   :  { %21859 = vst [vmem:[#allocation149_spill] sm:$0xff] %v20630_v53 }
0x161a   :  { %v20632_v48 = vpop.permute.xlu1 %8764 }
0x161b   :  { %21860 = vst [vmem:[#allocation150_spill] sm:$0xff] %v20632_v48 }
0x161c   :  { %v20634_v42 = vpop.permute.xlu0 %8773 }
0x161d   :  { %21861 = vst [vmem:[#allocation151_spill] sm:$0xff] %v20634_v42 }
0x161e   :  { %v20636_v39 = vpop.permute.xlu1 %8770 }
0x161f   :  { %21862 = vst [vmem:[#allocation152_spill] sm:$0xff] %v20636_v39 }
0x1620   :  { %v20638_v19 = vpop.permute.xlu0 %9584 }
0x1621   :  { %21863 = vst [vmem:[#allocation153_spill] sm:$0xff] %v20638_v19 }
0x1622   :  { %v20640_v29 = vpop.permute.xlu1 %9581 }
0x1623   :  { %21864 = vst [vmem:[#allocation154_spill] sm:$0xff] %v20640_v29 }
0x1624   :  { %v20642_v49 = vpop.permute.xlu0 %9590 }
0x1625   :  { %21865 = vst [vmem:[#allocation155_spill] sm:$0xff] %v20642_v49 }
0x1626   :  { %v20644_v17 = vpop.permute.xlu1 %9587 }
0x1627   :  { %21866 = vst [vmem:[#allocation156_spill] sm:$0xff] %v20644_v17 }
0x1628   :  { %v20646_v13 = vpop.permute.xlu0 %10401 }
0x1629   :  { %21867 = vst [vmem:[#allocation157_spill] sm:$0xff] %v20646_v13 }
0x162a   :  { %v20648_v16 = vpop.permute.xlu1 %10398 }
0x162b   :  { %21868 = vst [vmem:[#allocation158_spill] sm:$0xff] %v20648_v16 }
0x162c   :  { %v20650_v0 = vpop.permute.xlu0 %10407 }
0x162d   :  { %21869 = vst [vmem:[#allocation159_spill] sm:$0xff] %v20650_v0 }
0x162e   :  { %v20652_v53 = vpop.permute.xlu1 %10404 }
0x162f   :  { %21870 = vst [vmem:[#allocation160_spill] sm:$0xff] %v20652_v53 }
0x1630   :  { %v20654_v48 = vpop.permute.xlu0 %11218 }
0x1631   :  { %21871 = vst [vmem:[#allocation161_spill] sm:$0xff] %v20654_v48 }
0x1632   :  { %v20656_v42 = vpop.permute.xlu1 %11215 }
0x1633   :  { %21872 = vst [vmem:[#allocation162_spill] sm:$0xff] %v20656_v42 }
0x1634   :  { %v5512_v39 = vpop.permute.xlu0 %5511 }
0x1635   :  { %vm5540_vm6 = vcmp.eq.s32.totalorder %v5512_v39, 1 }
0x1636   :  { %v5509_v19 = vpop.permute.xlu1 %5508 }
0x1637   :  { %vm5539_vm7 = vcmp.eq.s32.totalorder %v5509_v19, 1  ;;  %v21876_v19 = vld [vmem:[#allocation25_spill] sm:$0xff] }
0x1638   :  { %v20658_v31 = vpop.permute.xlu0 %11224  ;;  %v5555_v45 = vsel %vm5539_vm7, %v17822_v32, 0.0 }
0x1639   :  { %21873 = vst [vmem:[#allocation163_spill] sm:$0xff] %v20658_v31 }
0x163a   :  { %v20660_v29 = vpop.permute.xlu1 %11221 }
0x163b   :  { %21874 = vst [vmem:[#allocation164_spill] sm:$0xff] %v20660_v29 }
0x163c   :  { %v5518_v49 = vpop.permute.xlu0 %5517 }
0x163d   :  { %vm5542_vm8 = vcmp.eq.s32.totalorder %v5518_v49, 1 }
0x163e   :  { %v5515_v17 = vpop.permute.xlu1 %5514  ;;  %v5558_v39 = vsel %vm5542_vm8, %v17829_v26, 0.0 }
0x163f   :  { %vm5541_vm9 = vcmp.eq.s32.totalorder %v5515_v17, 1 }
0x1640   :  { %v6329_v35 = vpop.permute.xlu0 %6328 }
0x1641   :  { %vm6357_vm10 = vcmp.eq.s32.totalorder %v6329_v35, 1 }
0x1642   :  { %v6326_v13 = vpop.permute.xlu1 %6325 }
0x1643   :  { %vm6356_vm11 = vcmp.eq.s32.totalorder %v6326_v13, 1 }
0x1644   :  { %v6335_v25 = vpop.permute.xlu0 %6334 }
0x1645   :  { %vm6359_vm12 = vcmp.eq.s32.totalorder %v6335_v25, 1  ;;  %v21878_v25 = vld [vmem:[#allocation27_spill] sm:$0xff] }
0x1646   :  { %v6332_v16 = vpop.permute.xlu1 %6331 }
0x1647   :  { %vm6358_vm13 = vcmp.eq.s32.totalorder %v6332_v16, 1  ;;  %v21882_v16 = vld [vmem:[#allocation42_spill] sm:$0xff] }
0x1648   :  { %v20664_v53 = vpop.permute.xlu0 %7145 }
0x1649   :  { %v20662_v8 = vpop.f32.mrb[184].mxu1  ;;  %vm7174_vm15 = vcmp.eq.s32.totalorder %v20664_v53, 1  ;;  %v21885_v53 = vld [vmem:[#allocation57_spill] sm:$0xff] }
0x164a   :  { %v10565_v0 = vpop.f32.mrb[185].mxu1  ;;  %v20669_v31 = vpop.permute.xlu1 %7142 }
0x164b   :  { %v13851_v48 = vadd.f32 %v10565_v0, %v17432_v37  ;;  %v20667_v42 = vpop.f32.mrb[186].mxu1  ;;  %vm7173_vm3 = vcmp.eq.s32.totalorder %v20669_v31, 1 }
0x164c   :  { %v10569_v34 = vpop.f32.mrb[187].mxu1  ;;  %v7152_v44 = vpop.permute.xlu0 %7151 }
0x164d   :  { %v12779_v62 = vmul.f32 -1.442695, %v13851_v48  ;;  %v13853_v29 = vadd.f32 %v10569_v34, %v17432_v37  ;;  %vm7176_vm14 = vcmp.eq.s32.totalorder %v7152_v44, 1  ;;  %v21883_v44 = vld [vmem:[#allocation59_spill] sm:$0xff] }
0x164e   :  { %v7149_v38 = vpop.permute.xlu1 %7148 }
0x164f   :  { %15678 = vpow2.f32 %v12779_v62  ;;  %v12781_v56 = vmul.f32 -1.442695, %v13853_v29  ;;  %vm7175_vm0 = vcmp.eq.s32.totalorder %v7149_v38, 1 }
0x1650   :  { %v20674_v12 = vpop.permute.xlu0 %7962 }
0x1651   :  { %15680 = vpow2.f32 %v12781_v56  ;;  %v20672_v14 = vpop.f32.mrb[188].mxu1  ;;  %v5556_v56 = vsel %vm5540_vm6, %v17819_v18, 0.0  ;;  %v21877_v18 = vld [vmem:[#allocation24_spill] sm:$0xff]  ;;  %vm7991_vm4 = vcmp.eq.s32.totalorder %v20674_v12, 1 }
0x1652   :  { %v10575_v20 = vpop.f32.mrb[189].mxu1  ;;  %v20679_v28 = vpop.permute.xlu1 %7959  ;;  %v6373_v49 = vsel %vm6357_vm10, %v21876_v19, %v5556_v56  ;;  %v6372_v13 = vsel %vm6356_vm11, %v21877_v18, %v5555_v45  ;;  %v21880_v45 = vld [vmem:[#allocation43_spill] sm:$0xff] }
0x1653   :  { %v13855_v0 = vadd.f32 %v10575_v20, %v17432_v37  ;;  %v20677_v60 = vpop.f32.mrb[190].mxu1  ;;  %vm7990_vm6 = vcmp.eq.s32.totalorder %v20679_v28, 1 }
0x1654   :  { %v10579_v47 = vpop.f32.mrb[191].mxu1  ;;  %v7969_v29 = vpop.permute.xlu0 %7968 }
0x1655   :  { %v12783_v48 = vmul.f32 -1.442695, %v13855_v0  ;;  %v13857_v62 = vadd.f32 %v10579_v47, %v17432_v37  ;;  %v21875_v0 = vld [vmem:[#allocation12_spill] sm:$0xff]  ;;  %vm7993_vm2 = vcmp.eq.s32.totalorder %v7969_v29, 1 }
0x1656   :  { %v5557_v7 = vsel %vm5541_vm9, %v21875_v0, 0.0  ;;  %v7966_v47 = vpop.permute.xlu1 %7965 }
0x1657   :  { %15682 = vpow2.f32 %v12783_v48  ;;  %v12785_v34 = vmul.f32 -1.442695, %v13857_v62  ;;  %v6375_v62 = vsel %vm6359_vm12, %v21878_v25, %v5558_v39  ;;  %vm7992_vm5 = vcmp.eq.s32.totalorder %v7966_v47, 1 }
0x1658   :  { %v8780_v32 = vpop.permute.xlu0 %8779  ;;  %v7192_v39 = vsel %vm7176_vm14, %v21880_v45, %v6375_v62 }
0x1659   :  { %v15679_v20 = vpop.eup %15678  ;;  %15684 = vpow2.f32 %v12785_v34  ;;  %v20687_v17 = vpop.f32.mrb[192].mxu1  ;;  %v8009_v62 = vsel %vm7993_vm2, %v21883_v44, %v7192_v39  ;;  %vm8808_vm7 = vcmp.eq.s32.totalorder %v8780_v32, 1 }
0x165a   :  { %v10771_v35 = vadd.f32 1.0, %v15679_v20  ;;  %v10585_v26 = vpop.f32.mrb[193].mxu1  ;;  %v21879_v20 = vld [vmem:[#allocation26_spill] sm:$0xff]  ;;  %v8777_v18 = vpop.permute.xlu1 %8776 }
0x165b   :  { %v15681_v48 = vpop.eup %15680  ;;  %v13859_v56 = vadd.f32 %v10585_v26, %v17432_v37  ;;  %v20693_v0 = vpop.f32.mrb[194].mxu1  ;;  %v6374_v19 = vsel %vm6358_vm13, %v21879_v20, %v5557_v7  ;;  %v21881_v26 = vld [vmem:[#allocation41_spill] sm:$0xff]  ;;  %vm8807_vm9 = vcmp.eq.s32.totalorder %v8777_v18, 1 }
0x165c   :  { %15686 = vrcp.f32 %v10771_v35  ;;  %v10773_v34 = vadd.f32 1.0, %v15681_v48  ;;  %v10589_v25 = vpop.f32.mrb[195].mxu1  ;;  %v7190_v63 = vsel %vm7174_vm15, %v21881_v26, %v6373_v49  ;;  %v7191_v7 = vsel %vm7175_vm0, %v21882_v16, %v6374_v19  ;;  %v8786_v20 = vpop.permute.xlu0 %8785  ;;  %v21886_v49 = vld [vmem:[#allocation58_spill] sm:$0xff]  ;;  %v21888_v16 = vld [vmem:[#allocation56_spill] sm:$0xff] }
0x165d   :  { %v12787_v35 = vmul.f32 -1.442695, %v13859_v56  ;;  %v13861_v48 = vadd.f32 %v10589_v25, %v17432_v37  ;;  %vm8810_vm8 = vcmp.eq.s32.totalorder %v8786_v20, 1  ;;  %v21884_v56 = vld [vmem:[#allocation40_spill] sm:$0xff]  ;;  %v8007_v38 = vsel %vm7991_vm4, %v21885_v53, %v7190_v63  ;;  %v21887_v25 = vld [vmem:[#allocation75_spill] sm:$0xff]  ;;  %v21890_v63 = vld [vmem:[#allocation74_spill] sm:$0xff] }
0x165e   :  { %15688 = vrcp.f32 %v10773_v34  ;;  %v7189_v45 = vsel %vm7173_vm3, %v21884_v56, %v6372_v13  ;;  %v8008_v19 = vsel %vm7992_vm5, %v21886_v49, %v7191_v7  ;;  %v8826_v26 = vsel %vm8810_vm8, %v21887_v25, %v8009_v62  ;;  %v8783_v29 = vpop.permute.xlu1 %8782  ;;  %v21889_v13 = vld [vmem:[#allocation73_spill] sm:$0xff] }
0x165f   :  { %15690 = vpow2.f32 %v12787_v35  ;;  %v12789_v47 = vmul.f32 -1.442695, %v13861_v48  ;;  %vm8809_vm10 = vcmp.eq.s32.totalorder %v8783_v29, 1  ;;  %v8006_v31 = vsel %vm7990_vm6, %v21888_v16, %v7189_v45  ;;  %v21892_v53 = vld [vmem:[#allocation89_spill] sm:$0xff] }
0x1660   :  { %v8824_v12 = vsel %vm8808_vm7, %v21889_v13, %v8007_v38  ;;  %v8825_v44 = vsel %vm8809_vm10, %v21890_v63, %v8008_v19  ;;  %v9597_v7 = vpop.permute.xlu0 %9596  ;;  %v21893_v19 = vld [vmem:[#allocation88_spill] sm:$0xff]  ;;  %v21894_v13 = vld [vmem:[#allocation91_spill] sm:$0xff]  ;;  %vm11181_vm6 = vcmp.eq.s32.totalorder %v20468_v3, 8  ;;  %vm11180_vm7 = vcmp.eq.s32.totalorder %v20475_v58, 8 }
0x1661   :  { %v15683_v34 = vpop.eup %15682  ;;  %15692 = vpow2.f32 %v12789_v47  ;;  %v20718_v35 = vpop.f32.mrb[196].mxu1  ;;  %vm9625_vm11 = vcmp.eq.s32.totalorder %v9597_v7, 1  ;;  %v11196_v3 = vsel %vm11180_vm7, 1, %v21727_v23 }
0x1662   :  { %v10775_v39 = vadd.f32 1.0, %v15683_v34  ;;  %v10595_v20 = vpop.f32.mrb[197].mxu1  ;;  %v21891_v34 = vld [vmem:[#allocation72_spill] sm:$0xff]  ;;  %v9641_v49 = vsel %vm9625_vm11, %v21892_v53, %v8824_v12  ;;  %v9594_v28 = vpop.permute.xlu1 %9593 }
0x1663   :  { %v15685_v48 = vpop.eup %15684  ;;  %v13863_v18 = vadd.f32 %v10595_v20, %v17432_v37  ;;  %v20727_v47 = vpop.f32.mrb[198].mxu1  ;;  %v8823_v56 = vsel %vm8807_vm9, %v21891_v34, %v8006_v31  ;;  %vm9624_vm12 = vcmp.eq.s32.totalorder %v9594_v28, 1  ;;  %v21895_v34 = vld [vmem:[#allocation90_spill] sm:$0xff] }
0x1664   :  { %15694 = vrcp.f32 %v10775_v39  ;;  %v10777_v62 = vadd.f32 1.0, %v15685_v48  ;;  %v10599_v45 = vpop.f32.mrb[199].mxu1  ;;  %v9640_v29 = vsel %vm9624_vm12, %v21893_v19, %v8823_v56  ;;  %v9603_v39 = vpop.permute.xlu0 %9602 }
0x1665   :  { %v12791_v32 = vmul.f32 -1.442695, %v13863_v18  ;;  %v13865_v38 = vadd.f32 %v10599_v45, %v17432_v37  ;;  %vm9627_vm13 = vcmp.eq.s32.totalorder %v9603_v39, 1 }
0x1666   :  { %v20731_v25 = vpop.eup %15686  ;;  %15696 = vrcp.f32 %v10777_v62  ;;  %v9643_v12 = vsel %vm9627_vm13, %v21894_v13, %v8826_v26  ;;  %v9600_v63 = vpop.permute.xlu1 %9599 }
0x1667   :  { %v10866_v48 = vmul.f32 2.0, %v20731_v25  ;;  %15698 = vpow2.f32 %v12791_v32  ;;  %v12793_v31 = vmul.f32 -1.442695, %v13865_v38  ;;  %vm9626_vm14 = vcmp.eq.s32.totalorder %v9600_v63, 1 }
0x1668   :  { %v20736_v16 = vpop.eup %15688  ;;  %v9642_v56 = vsel %vm9626_vm14, %v21895_v34, %v8825_v44  ;;  %v10414_v53 = vpop.permute.xlu0 %10413 }
0x1669   :  { %v12810_v7 = vadd.f32 -1.0, %v10866_v48  ;;  %v10867_v20 = vmul.f32 2.0, %v20736_v16  ;;  %v15691_v62 = vpop.eup %15690  ;;  %15700 = vpow2.f32 %v12793_v31  ;;  %v20741_v28 = vpop.f32.mrb[200].mxu1  ;;  %vm10442_vm15 = vcmp.eq.s32.totalorder %v10414_v53, 1 }
0x166a   :  { %v10779_v18 = vadd.f32 1.0, %v15691_v62  ;;  %v10605_v38 = vpop.f32.mrb[201].mxu1  ;;  %v20745_v19 = vsel %vm10442_vm15, %v20384_v15, %v9641_v49  ;;  %v10411_v48 = vpop.permute.xlu1 %10410 }
0x166b   :  { %10930 = vrot.lane.b32.xlu0 %v12810_v7, %s15900_s5  ;;  %v12811_v45 = vadd.f32 -1.0, %v10867_v20  ;;  %v15693_v32 = vpop.eup %15692  ;;  %21896 = vst [vmem:[#allocation12_spill] sm:$0xff] %v20745_v19  ;;  %v13867_v39 = vadd.f32 %v10605_v38, %v17432_v37  ;;  %v20748_v31 = vpop.f32.mrb[202].mxu1  ;;  %vm10441_vm0 = vcmp.eq.s32.totalorder %v10411_v48, 1 }
0x166c   :  { %15702 = vrcp.f32 %v10779_v18  ;;  %v10781_v26 = vadd.f32 1.0, %v15693_v32  ;;  %v10609_v13 = vpop.f32.mrb[203].mxu1  ;;  %v20754_v7 = vsel %vm10441_vm0, %v20381_v5, %v9640_v29  ;;  %v10420_v20 = vpop.permute.xlu0 %10419 }
0x166d   :  { %10932 = vrot.lane.b32.xlu1 %v12811_v45, %s15900_s5  ;;  %v12795_v63 = vmul.f32 -1.442695, %v13867_v39  ;;  %21897 = vst [vmem:[#allocation25_spill] sm:$0xff] %v20754_v7  ;;  %v13869_v15 = vadd.f32 %v10609_v13, %v17432_v37  ;;  %vm10444_vm2 = vcmp.eq.s32.totalorder %v10420_v20, 1 }
0x166e   :  { %v20751_v44 = vpop.eup %15694  ;;  %15704 = vrcp.f32 %v10781_v26  ;;  %v20761_v18 = vsel %vm10444_vm2, %v20402_v59, %v9643_v12  ;;  %v10417_v53 = vpop.permute.xlu1 %10416 }
0x166f   :  { %v10868_v62 = vmul.f32 2.0, %v20751_v44  ;;  %15706 = vpow2.f32 %v12795_v63  ;;  %21898 = vst [vmem:[#allocation24_spill] sm:$0xff] %v20761_v18  ;;  %v12797_v34 = vmul.f32 -1.442695, %v13869_v15  ;;  %vm10443_vm3 = vcmp.eq.s32.totalorder %v10417_v53, 1 }
0x1670   :  { %v20757_v49 = vpop.eup %15696  ;;  %v20765_v38 = vsel %vm10443_vm3, %v20399_v51, %v9642_v56 }
0x1671   :  { %v10869_v45 = vmul.f32 2.0, %v20757_v49  ;;  %v15699_v32 = vpop.eup %15698  ;;  %v12812_v5 = vadd.f32 -1.0, %v10868_v62  ;;  %15708 = vpow2.f32 %v12797_v34  ;;  %21899 = vst [vmem:[#allocation27_spill] sm:$0xff] %v20765_v38  ;;  %v20767_v26 = vpop.f32.mrb[204].mxu1 }
0x1672   :  { %v10783_v29 = vadd.f32 1.0, %v15699_v32  ;;  %v10615_v13 = vpop.f32.mrb[205].mxu1 }
0x1673   :  { %v12813_v39 = vadd.f32 -1.0, %v10869_v45  ;;  %v15701_v48 = vpop.eup %15700  ;;  %10934 = vrot.lane.b32.xlu0 %v12812_v5, %s15900_s5  ;;  %v13871_v12 = vadd.f32 %v10615_v13, %v17432_v37  ;;  %v20771_v63 = vpop.f32.mrb[206].mxu1 }
0x1674   :  { %15710 = vrcp.f32 %v10783_v29  ;;  %v10785_v59 = vadd.f32 1.0, %v15701_v48  ;;  %v10619_v20 = vpop.f32.mrb[207].mxu1 }
0x1675   :  { %10936 = vrot.lane.b32.xlu1 %v12813_v39, %s15900_s5  ;;  %v12799_v51 = vmul.f32 -1.442695, %v13871_v12  ;;  %v13873_v56 = vadd.f32 %v10619_v20, %v17432_v37 }
0x1676   :  { %v20774_v15 = vpop.eup %15702  ;;  %15712 = vrcp.f32 %v10785_v59 }
0x1677   :  { %21900 = vst [vmem:[#allocation26_spill] sm:$0xff] %v20774_v15  ;;  %v10870_v62 = vmul.f32 2.0, %v20774_v15  ;;  %15714 = vpow2.f32 %v12799_v51  ;;  %v12801_v53 = vmul.f32 -1.442695, %v13873_v56 }
0x1678   :  { %v20778_v34 = vpop.eup %15704 }
0x1679   :  { %21901 = vst [vmem:[#allocation43_spill] sm:$0xff] %v20778_v34  ;;  %v12814_v45 = vadd.f32 -1.0, %v10870_v62  ;;  %v10871_v32 = vmul.f32 2.0, %v20778_v34  ;;  %v15707_v5 = vpop.eup %15706  ;;  %15716 = vpow2.f32 %v12801_v53  ;;  %v20781_v39 = vpop.f32.mrb[208].mxu1 }
0x167a   :  { %v10787_v29 = vadd.f32 1.0, %v15707_v5  ;;  %v10625_v59 = vpop.f32.mrb[209].mxu1 }
0x167b   :  { %10938 = vrot.lane.b32.xlu0 %v12814_v45, %s15900_s5  ;;  %v12815_v48 = vadd.f32 -1.0, %v10871_v32  ;;  %v15709_v13 = vpop.eup %15708  ;;  %v13875_v20 = vadd.f32 %v10625_v59, %v17432_v37  ;;  %v20785_v18 = vpop.f32.mrb[210].mxu1 }
0x167c   :  { %15718 = vrcp.f32 %v10787_v29  ;;  %v10789_v12 = vadd.f32 1.0, %v15709_v13  ;;  %v10629_v56 = vpop.f32.mrb[211].mxu1 }
0x167d   :  { %10940 = vrot.lane.b32.xlu1 %v12815_v48, %s15900_s5  ;;  %v12803_v62 = vmul.f32 -1.442695, %v13875_v20  ;;  %v13877_v53 = vadd.f32 %v10629_v56, %v17432_v37 }
0x167e   :  { %v20788_v51 = vpop.eup %15710  ;;  %15720 = vrcp.f32 %v10789_v12 }
0x167f   :  { %21902 = vst [vmem:[#allocation41_spill] sm:$0xff] %v20788_v51  ;;  %v10872_v45 = vmul.f32 2.0, %v20788_v51  ;;  %15722 = vpow2.f32 %v12803_v62  ;;  %v12805_v5 = vmul.f32 -1.442695, %v13877_v53 }
0x1680   :  { %v20792_v32 = vpop.eup %15712 }
0x1681   :  { %21903 = vst [vmem:[#allocation42_spill] sm:$0xff] %v20792_v32  ;;  %v12816_v29 = vadd.f32 -1.0, %v10872_v45  ;;  %v10873_v13 = vmul.f32 2.0, %v20792_v32  ;;  %v15715_v59 = vpop.eup %15714  ;;  %15724 = vpow2.f32 %v12805_v5  ;;  %v20795_v48 = vpop.f32.mrb[212].mxu1 }
0x1682   :  { %v10791_v38 = vadd.f32 1.0, %v15715_v59  ;;  %v10635_v19 = vpop.f32.mrb[213].mxu1 }
0x1683   :  { %10942 = vrot.lane.b32.xlu0 %v12816_v29, %s15900_s5  ;;  %v12817_v12 = vadd.f32 -1.0, %v10873_v13  ;;  %v15717_v20 = vpop.eup %15716  ;;  %v13879_v7 = vadd.f32 %v10635_v19, %v17432_v37  ;;  %v20799_v51 = vpop.f32.mrb[214].mxu1 }
0x1684   :  { %15726 = vrcp.f32 %v10791_v38  ;;  %v10793_v56 = vadd.f32 1.0, %v15717_v20  ;;  %v10639_v62 = vpop.f32.mrb[215].mxu1 }
0x1685   :  { %10944 = vrot.lane.b32.xlu1 %v12817_v12, %s15900_s5  ;;  %v12807_v45 = vmul.f32 -1.442695, %v13879_v7  ;;  %v13881_v5 = vadd.f32 %v10639_v62, %v17432_v37 }
0x1686   :  { %v20802_v53 = vpop.eup %15718  ;;  %15728 = vrcp.f32 %v10793_v56 }
0x1687   :  { %21904 = vst [vmem:[#allocation59_spill] sm:$0xff] %v20802_v53  ;;  %v10874_v29 = vmul.f32 2.0, %v20802_v53  ;;  %15730 = vpow2.f32 %v12807_v45  ;;  %v12809_v38 = vmul.f32 -1.442695, %v13881_v5 }
0x1688   :  { %v20806_v13 = vpop.eup %15720 }
0x1689   :  { %21905 = vst [vmem:[#allocation40_spill] sm:$0xff] %v20806_v13  ;;  %v12818_v59 = vadd.f32 -1.0, %v10874_v29  ;;  %v10875_v19 = vmul.f32 2.0, %v20806_v13  ;;  %v15723_v20 = vpop.eup %15722  ;;  %15732 = vpow2.f32 %v12809_v38  ;;  %v21918_v13 = vld [vmem:[#allocation13_spill] sm:$0xff] }
0x168a   :  { %v10795_v32 = vadd.f32 1.0, %v15723_v20 }
0x168b   :  { %10946 = vrot.lane.b32.xlu0 %v12818_v59, %s15900_s5  ;;  %v12819_v12 = vadd.f32 -1.0, %v10875_v19  ;;  %v15725_v34 = vpop.eup %15724 }
0x168c   :  { %15734 = vrcp.f32 %v10795_v32  ;;  %v10797_v7 = vadd.f32 1.0, %v15725_v34 }
0x168d   :  { %10948 = vrot.lane.b32.xlu1 %v12819_v12, %s15900_s5 }
0x168e   :  { %v20811_v37 = vpop.eup %15726  ;;  %15736 = vrcp.f32 %v10797_v7 }
0x168f   :  { %21906 = vst [vmem:[#allocation57_spill] sm:$0xff] %v20811_v37  ;;  %v10876_v56 = vmul.f32 2.0, %v20811_v37 }
0x1690   :  { %v20814_v62 = vpop.eup %15728 }
0x1691   :  { %21907 = vst [vmem:[#allocation58_spill] sm:$0xff] %v20814_v62  ;;  %v12820_v45 = vadd.f32 -1.0, %v10876_v56  ;;  %v10877_v5 = vmul.f32 2.0, %v20814_v62  ;;  %v15731_v29 = vpop.eup %15730 }
0x1692   :  { %v10799_v38 = vadd.f32 1.0, %v15731_v29 }
0x1693   :  { %10950 = vrot.lane.b32.xlu0 %v12820_v45, %s15900_s5  ;;  %v12821_v59 = vadd.f32 -1.0, %v10877_v5  ;;  %v15733_v19 = vpop.eup %15732  ;;  %v20832_v5 = vld [vmem:[%s21568_s1 + $0x68] sm:$0xff] }
0x1694   :  { %15738 = vrcp.f32 %v10799_v38  ;;  %v10801_v34 = vadd.f32 1.0, %v15733_v19  ;;  %v20840_v19 = vld [vmem:[%s21568_s1 + $0x60] sm:$0xff]  ;;  %vm5464_vm4 = vcmp.eq.s32.totalorder %v20832_v5, 1  ;;  %vm6281_vm10 = vcmp.eq.s32.totalorder %v20832_v5, 2 }
0x1695   :  { %10952 = vrot.lane.b32.xlu1 %v12821_v59, %s15900_s5  ;;  %vm5463_vm5 = vcmp.eq.s32.totalorder %v20840_v19, 1  ;;  %vm6280_vm11 = vcmp.eq.s32.totalorder %v20840_v19, 2  ;;  %vm7098_vm14 = vcmp.eq.s32.totalorder %v20832_v5, 3  ;;  %vm7097_vm15 = vcmp.eq.s32.totalorder %v20840_v19, 3 }
0x1696   :  { %v20819_v32 = vpop.eup %15734  ;;  %15740 = vrcp.f32 %v10801_v34  ;;  %vm7915_vm3 = vcmp.eq.s32.totalorder %v20832_v5, 4  ;;  %vm8732_vm7 = vcmp.eq.s32.totalorder %v20832_v5, 5 }
0x1697   :  { %21908 = vst [vmem:[#allocation75_spill] sm:$0xff] %v20819_v32  ;;  %v10878_v20 = vmul.f32 2.0, %v20819_v32 }
0x1698   :  { %v20822_v12 = vpop.eup %15736 }
0x1699   :  { %21909 = vst [vmem:[#allocation56_spill] sm:$0xff] %v20822_v12  ;;  %v12822_v7 = vadd.f32 -1.0, %v10878_v20  ;;  %v10879_v56 = vmul.f32 2.0, %v20822_v12 }
0x169b   :  { %10954 = vrot.lane.b32.xlu0 %v12822_v7, %s15900_s5  ;;  %v12823_v29 = vadd.f32 -1.0, %v10879_v56  ;;  %v5480_v56 = vsel %vm5464_vm4, 1, %v21727_v23  ;;  %vm7914_vm4 = vcmp.eq.s32.totalorder %v20840_v19, 4 }
0x169d   :  { %10956 = vrot.lane.b32.xlu1 %v12823_v29, %s15900_s5  ;;  %v5479_v29 = vsel %vm5463_vm5, 1, %v21727_v23 }
0x169e   :  { %v20827_v45 = vpop.eup %15738 }
0x169f   :  { %21910 = vst [vmem:[#allocation73_spill] sm:$0xff] %v20827_v45  ;;  %v10880_v38 = vmul.f32 2.0, %v20827_v45 }
0x16a0   :  { %v20835_v59 = vpop.eup %15740 }
0x16a1   :  { %21911 = vst [vmem:[#allocation74_spill] sm:$0xff] %v20835_v59  ;;  %v12824_v34 = vadd.f32 -1.0, %v10880_v38  ;;  %v10881_v20 = vmul.f32 2.0, %v20835_v59  ;;  %v20853_v38 = vld [vmem:[%s21568_s1 + $0x78] sm:$0xff] }
0x16a2   :  { %vm5466_vm8 = vcmp.eq.s32.totalorder %v20853_v38, 1  ;;  %vm6283_vm12 = vcmp.eq.s32.totalorder %v20853_v38, 2  ;;  %vm7100_vm0 = vcmp.eq.s32.totalorder %v20853_v38, 3  ;;  %vm7917_vm5 = vcmp.eq.s32.totalorder %v20853_v38, 4 }
0x16a3   :  { %10958 = vrot.lane.b32.xlu0 %v12824_v34, %s15900_s5  ;;  %v12825_v7 = vadd.f32 -1.0, %v10881_v20  ;;  %v11197_v34 = vsel %vm11181_vm6, 1, %v21727_v23  ;;  %v20860_v20 = vld [vmem:[%s21568_s1 + $0x70] sm:$0xff]  ;;  %v7116_v45 = vsel %vm7100_vm0, 1, %v21727_v23 }
0x16a4   :  { %vm5465_vm9 = vcmp.eq.s32.totalorder %v20860_v20, 1  ;;  %vm6282_vm13 = vcmp.eq.s32.totalorder %v20860_v20, 2  ;;  %vm7099_vm2 = vcmp.eq.s32.totalorder %v20860_v20, 3  ;;  %vm7916_vm6 = vcmp.eq.s32.totalorder %v20860_v20, 4 }
0x16a5   :  { %10960 = vrot.lane.b32.xlu1 %v12825_v7, %s15900_s5  ;;  %v5482_v7 = vsel %vm5466_vm8, 1, %v21727_v23  ;;  %v5481_v58 = vsel %vm5465_vm9, 1, %v21727_v23  ;;  %vm8731_vm8 = vcmp.eq.s32.totalorder %v20840_v19, 5  ;;  %vm8734_vm9 = vcmp.eq.s32.totalorder %v20853_v38, 5 }
0x16a7   :  { %5523 = vperm.xlu0 %14372, %v5480_v56   ;;  %v6297_v56 = vsel %vm6281_vm10, 1, %v21727_v23  ;;  %vm8733_vm10 = vcmp.eq.s32.totalorder %v20860_v20, 5 }
0x16a9   :  { %5520 = vperm.xlu1 %14373, %v5479_v29   ;;  %v6296_v29 = vsel %vm6280_vm11, 1, %v21727_v23  ;;  %vm9549_vm11 = vcmp.eq.s32.totalorder %v20832_v5, 6 }
0x16ab   :  { %11236 = vperm.xlu0 %14372, %v11197_v34   ;;  %v6299_v34 = vsel %vm6283_vm12, 1, %v21727_v23  ;;  %vm9548_vm12 = vcmp.eq.s32.totalorder %v20840_v19, 6 }
0x16ad   :  { %11233 = vperm.xlu1 %14373, %v11196_v3   ;;  %v13850_v3 = vadd.f32 %v20662_v8, %v17033_v6 }
0x16af   :  { %5529 = vperm.xlu0 %14372, %v5482_v7   ;;  %v6298_v7 = vsel %vm6282_vm13, 1, %v21727_v23  ;;  %v12778_v59 = vmul.f32 -1.442695, %v13850_v3  ;;  %v13856_v3 = vadd.f32 %v20677_v60, %v17033_v6  ;;  %v13862_v60 = vadd.f32 %v20718_v35, %v17033_v6 }
0x16b0   :  { %vm9551_vm13 = vcmp.eq.s32.totalorder %v20853_v38, 6 }
0x16b1   :  { %5526 = vperm.xlu1 %14373, %v5481_v58   ;;  %v13852_v58 = vadd.f32 %v20667_v42, %v17033_v6  ;;  %15742 = vpow2.f32 %v12778_v59  ;;  %v7115_v42 = vsel %vm7099_vm2, 1, %v21727_v23  ;;  %vm10365_vm2 = vcmp.eq.s32.totalorder %v20840_v19, 7 }
0x16b3   :  { %6340 = vperm.xlu0 %14372, %v6297_v56   ;;  %v7114_v56 = vsel %vm7098_vm14, 1, %v21727_v23  ;;  %v12780_v8 = vmul.f32 -1.442695, %v13852_v58  ;;  %v13858_v58 = vadd.f32 %v20687_v17, %v17033_v6  ;;  %vm9550_vm14 = vcmp.eq.s32.totalorder %v20860_v20, 6 }
0x16b5   :  { %6337 = vperm.xlu1 %14373, %v6296_v29   ;;  %v7113_v29 = vsel %vm7097_vm15, 1, %v21727_v23  ;;  %15744 = vpow2.f32 %v12780_v8  ;;  %v12786_v32 = vmul.f32 -1.442695, %v13858_v58  ;;  %vm10366_vm15 = vcmp.eq.s32.totalorder %v20832_v5, 7 }
0x16b7   :  { %6346 = vperm.xlu0 %14372, %v6299_v34   ;;  %v13854_v34 = vadd.f32 %v20672_v14, %v17033_v6  ;;  %v13860_v14 = vadd.f32 %v20693_v0, %v17033_v6 }
0x16b9   :  { %6343 = vperm.xlu1 %14373, %v6298_v7   ;;  %v12782_v7 = vmul.f32 -1.442695, %v13854_v34  ;;  %v12788_v8 = vmul.f32 -1.442695, %v13860_v14  ;;  %v13864_v34 = vadd.f32 %v20727_v47, %v17033_v6  ;;  %v13868_v47 = vadd.f32 %v20748_v31, %v17033_v6 }
0x16ba   :  { %v13870_v31 = vadd.f32 %v20767_v26, %v17033_v6 }
0x16bb   :  { %7157 = vperm.xlu0 %14372, %v7114_v56   ;;  %v12784_v56 = vmul.f32 -1.442695, %v13856_v3  ;;  %15746 = vpow2.f32 %v12782_v7  ;;  %v15743_v12 = vpop.eup %15742  ;;  %v12790_v3 = vmul.f32 -1.442695, %v13862_v60  ;;  %v12792_v7 = vmul.f32 -1.442695, %v13864_v34 }
0x16bc   :  { %v12796_v34 = vmul.f32 -1.442695, %v13868_v47  ;;  %v12798_v47 = vmul.f32 -1.442695, %v13870_v31  ;;  %v13876_v31 = vadd.f32 %v20785_v18, %v17033_v6  ;;  %v13878_v18 = vadd.f32 %v20795_v48, %v17033_v6 }
0x16bd   :  { %7154 = vperm.xlu1 %14373, %v7113_v29   ;;  %15748 = vpow2.f32 %v12784_v56  ;;  %v10770_v29 = vadd.f32 1.0, %v15743_v12  ;;  %v20899_v12 = vpop.permute.xlu0 %11230  ;;  %v20903_v56 = vpop.permute.xlu1 %11227 }
0x16be   :  { %21912 = vst [vmem:[#allocation72_spill] sm:$0xff] %v20899_v12  ;;  %21913 = vst [vmem:[#allocation89_spill] sm:$0xff] %v20903_v56 }
0x16bf   :  { %7163 = vperm.xlu0 %14372, %v7116_v45   ;;  %v15745_v59 = vpop.eup %15744  ;;  %15750 = vrcp.f32 %v10770_v29 }
0x16c0   :  { %v10772_v45 = vadd.f32 1.0, %v15745_v59  ;;  %15752 = vpow2.f32 %v12786_v32  ;;  %v13866_v32 = vadd.f32 %v20741_v28, %v17033_v6 }
0x16c1   :  { %7160 = vperm.xlu1 %14373, %v7115_v42  }
0x16c2   :  { %15754 = vrcp.f32 %v10772_v45  ;;  %v12794_v45 = vmul.f32 -1.442695, %v13866_v32 }
0x16c3   :  { %15756 = vpow2.f32 %v12788_v8 }
0x16c5   :  { %v15747_v62 = vpop.eup %15746 }
0x16c6   :  { %v10774_v42 = vadd.f32 1.0, %v15747_v62 }
0x16c7   :  { %v15749_v17 = vpop.eup %15748 }
0x16c8   :  { %v10776_v0 = vadd.f32 1.0, %v15749_v17  ;;  %15758 = vrcp.f32 %v10774_v42 }
0x16c9   :  { %15760 = vpow2.f32 %v12790_v3  ;;  %v20905_v35 = vpop.eup %15750 }
0x16ca   :  { %15762 = vpow2.f32 %v12792_v7  ;;  %v15753_v58 = vpop.eup %15752 }
0x16cb   :  { %15764 = vrcp.f32 %v10776_v0  ;;  %v10778_v60 = vadd.f32 1.0, %v15753_v58  ;;  %v13872_v0 = vadd.f32 %v20771_v63, %v17033_v6  ;;  %v13874_v63 = vadd.f32 %v20781_v39, %v17033_v6 }
0x16cc   :  { %v20909_v59 = vpop.eup %15754  ;;  %15766 = vpow2.f32 %v12794_v45 }
0x16cd   :  { %v15757_v29 = vpop.eup %15756  ;;  %15768 = vrcp.f32 %v10778_v60 }
0x16ce   :  { %v10780_v17 = vadd.f32 1.0, %v15757_v29  ;;  %15770 = vpow2.f32 %v12796_v34 }
0x16d0   :  { %15772 = vrcp.f32 %v10780_v17 }
0x16d1   :  { %15774 = vpow2.f32 %v12798_v47  ;;  %v12802_v47 = vmul.f32 -1.442695, %v13874_v63 }
0x16d2   :  { %v20917_v42 = vpop.eup %15758 }
0x16d3   :  { %v15761_v3 = vpop.eup %15760 }
0x16d4   :  { %v15763_v7 = vpop.eup %15762  ;;  %v10782_v29 = vadd.f32 1.0, %v15761_v3 }
0x16d5   :  { %v20921_v58 = vpop.eup %15764  ;;  %v10784_v45 = vadd.f32 1.0, %v15763_v7 }
0x16d6   :  { %15776 = vrcp.f32 %v10782_v29  ;;  %v15767_v60 = vpop.eup %15766 }
0x16d7   :  { %15778 = vrcp.f32 %v10784_v45  ;;  %v13880_v45 = vadd.f32 %v20799_v51, %v17033_v6 }
0x16d9   :  { %v12808_v48 = vmul.f32 -1.442695, %v13880_v45 }
0x16dd   :  { %v10931_v62 = vpop.permute.xlu0 %10930 }
0x16de   :  { %v10978_v14 = vmul.f32 %v20905_v35, %v10931_v62 }
0x16df   :  { %v10933_v8 = vpop.permute.xlu1 %10932 }
0x16e0   :  { %v10979_v28 = vmul.f32 %v20909_v59, %v10933_v8  ;;  %11010 = vrot.lane.b32.xlu0 %v10978_v14, %s15900_s5  ;;  %v12800_v8 = vmul.f32 -1.442695, %v13872_v0  ;;  %v10786_v0 = vadd.f32 1.0, %v15767_v60 }
0x16e2   :  { %11012 = vrot.lane.b32.xlu1 %v10979_v28, %s15900_s5  ;;  %v20929_v28 = vpop.eup %15768  ;;  %15780 = vpow2.f32 %v12800_v8 }
0x16e3   :  { %v15771_v17 = vpop.eup %15770  ;;  %15782 = vrcp.f32 %v10786_v0 }
0x16e4   :  { %v20934_v7 = vpop.eup %15772  ;;  %v10788_v39 = vadd.f32 1.0, %v15771_v17  ;;  %15784 = vpow2.f32 %v12802_v47 }
0x16e5   :  { %v10935_v32 = vpop.permute.xlu0 %10934  ;;  %v15775_v29 = vpop.eup %15774 }
0x16e6   :  { %v10980_v62 = vmul.f32 %v20917_v42, %v10935_v32  ;;  %15786 = vrcp.f32 %v10788_v39  ;;  %v10790_v17 = vadd.f32 1.0, %v15775_v29 }
0x16e7   :  { %v10937_v14 = vpop.permute.xlu1 %10936 }
0x16e8   :  { %v10981_v26 = vmul.f32 %v20921_v58, %v10937_v14  ;;  %11014 = vrot.lane.b32.xlu0 %v10980_v62, %s15900_s5  ;;  %v12804_v14 = vmul.f32 -1.442695, %v13876_v31 }
0x16ea   :  { %11016 = vrot.lane.b32.xlu1 %v10981_v26, %s15900_s5  ;;  %v20941_v26 = vpop.eup %15776  ;;  %15788 = vpow2.f32 %v12804_v14 }
0x16eb   :  { %v20945_v60 = vpop.eup %15778  ;;  %15790 = vrcp.f32 %v10790_v17 }
0x16ed   :  { %v10939_v34 = vpop.permute.xlu0 %10938 }
0x16ee   :  { %v10982_v3 = vmul.f32 %v20929_v28, %v10939_v34  ;;  %v15781_v34 = vpop.eup %15780 }
0x16ef   :  { %v10941_v32 = vpop.permute.xlu1 %10940  ;;  %v20951_v6 = vpop.eup %15782 }
0x16f0   :  { %v10983_v62 = vmul.f32 %v20934_v7, %v10941_v32  ;;  %11018 = vrot.lane.b32.xlu0 %v10982_v3, %s15900_s5  ;;  %v12806_v3 = vmul.f32 -1.442695, %v13878_v18  ;;  %v10792_v32 = vadd.f32 1.0, %v15781_v34  ;;  %v15785_v51 = vpop.eup %15784 }
0x16f1   :  { %v10794_v18 = vadd.f32 1.0, %v15785_v51 }
0x16f2   :  { %11020 = vrot.lane.b32.xlu1 %v10983_v62, %s15900_s5  ;;  %15792 = vpow2.f32 %v12806_v3  ;;  %v20953_v62 = vpop.eup %15786 }
0x16f3   :  { %15794 = vpow2.f32 %v12808_v48 }
0x16f4   :  { %15796 = vrcp.f32 %v10792_v32  ;;  %v15789_v14 = vpop.eup %15788 }
0x16f5   :  { %v10943_v8 = vpop.permute.xlu0 %10942  ;;  %15798 = vrcp.f32 %v10794_v18 }
0x16f6   :  { %v10984_v63 = vmul.f32 %v20941_v26, %v10943_v8  ;;  %v10796_v8 = vadd.f32 1.0, %v15789_v14 }
0x16f7   :  { %v10945_v31 = vpop.permute.xlu1 %10944 }
0x16f8   :  { %v10985_v0 = vmul.f32 %v20945_v60, %v10945_v31  ;;  %11022 = vrot.lane.b32.xlu0 %v10984_v63, %s15900_s5  ;;  %v20959_v63 = vpop.eup %15790  ;;  %15800 = vrcp.f32 %v10796_v8 }
0x16fa   :  { %11024 = vrot.lane.b32.xlu1 %v10985_v0, %s15900_s5 }
0x16fc   :  { %v15793_v34 = vpop.eup %15792 }
0x16fd   :  { %v10947_v47 = vpop.permute.xlu0 %10946  ;;  %v15795_v31 = vpop.eup %15794  ;;  %v10798_v32 = vadd.f32 1.0, %v15793_v34 }
0x16fe   :  { %v10986_v39 = vmul.f32 %v20951_v6, %v10947_v47  ;;  %v20962_v0 = vpop.eup %15796  ;;  %v10800_v47 = vadd.f32 1.0, %v15795_v31 }
0x16ff   :  { %v10949_v29 = vpop.permute.xlu1 %10948  ;;  %15802 = vrcp.f32 %v10798_v32  ;;  %v20970_v14 = vpop.eup %15798 }
0x1700   :  { %v10987_v45 = vmul.f32 %v20953_v62, %v10949_v29  ;;  %11026 = vrot.lane.b32.xlu0 %v10986_v39, %s15900_s5  ;;  %v14534_v39 = vld [vmem:[%s21569_s11] sm:$0xff]   ;;  %15804 = vrcp.f32 %v10800_v47 }
0x1701   :  { %13502 = vmatprep.subr.bf16.mxu0 %v14534_v39 }
0x1702   :  { %11028 = vrot.lane.b32.xlu1 %v10987_v45, %s15900_s5  ;;  %13503 = vmatpush3.bf16.msra.mxu0 %v14534_v39  ;;  %v20973_v45 = vpop.eup %15800  ;;  %v7931_v39 = vsel %vm7915_vm3, 1, %v21727_v23 }
0x1705   :  { %v10951_v17 = vpop.permute.xlu0 %10950 }
0x1706   :  { %v10988_v3 = vmul.f32 %v20959_v63, %v10951_v17  ;;  %v14535_v17 = vld [vmem:[%s21569_s11 + $0x8] sm:$0xff]  }
0x1707   :  { %v10953_v48 = vpop.permute.xlu1 %10952  ;;  %13504 = vmatprep.subr.bf16.mxu0 %v14535_v17 }
0x1708   :  { %v10989_v51 = vmul.f32 %v20962_v0, %v10953_v48  ;;  %11030 = vrot.lane.b32.xlu0 %v10988_v3, %s15900_s5  ;;  %13505 = vmatpush3.bf16.msra.mxu0 %v14535_v17  ;;  %v8748_v17 = vsel %vm8732_vm7, 1, %v21727_v23  ;;  %vm10367_vm7 = vcmp.eq.s32.totalorder %v20860_v20, 7 }
0x1709   :  { %v20981_v31 = vpop.eup %15802 }
0x170a   :  { %11032 = vrot.lane.b32.xlu1 %v10989_v51, %s15900_s5  ;;  %v20985_v32 = vpop.eup %15804 }
0x170d   :  { %v10955_v29 = vpop.permute.xlu0 %10954 }
0x170e   :  { %v10990_v18 = vmul.f32 %v20970_v14, %v10955_v29  ;;  %v7930_v29 = vsel %vm7914_vm4, 1, %v21727_v23  ;;  %vm10368_vm4 = vcmp.eq.s32.totalorder %v20853_v38, 7 }
0x170f   :  { %v10957_v8 = vpop.permute.xlu1 %10956 }
0x1710   :  { %v10991_v34 = vmul.f32 %v20973_v45, %v10957_v8  ;;  %11034 = vrot.lane.b32.xlu0 %v10990_v18, %s15900_s5  ;;  %v7933_v18 = vsel %vm7917_vm5, 1, %v21727_v23  ;;  %v7932_v8 = vsel %vm7916_vm6, 1, %v21727_v23 }
0x1712   :  { %11036 = vrot.lane.b32.xlu1 %v10991_v34, %s15900_s5  ;;  %v14536_v34 = vld [vmem:[%s21569_s11 + $0x10] sm:$0xff]  }
0x1713   :  { %13506 = vmatprep.subr.bf16.mxu0 %v14536_v34 }
0x1714   :  { %13507 = vmatpush3.bf16.msra.mxu0 %v14536_v34  ;;  %v9564_v34 = vsel %vm9548_vm12, 1, %v21727_v23  ;;  %vm11182_vm12 = vcmp.eq.s32.totalorder %v20840_v19, 8  ;;  %v21924_v19 = vld [vmem:[#allocation45_spill] sm:$0xff] }
0x1715   :  { %v10959_v3 = vpop.permute.xlu0 %10958 }
0x1716   :  { %v10992_v48 = vmul.f32 %v20981_v31, %v10959_v3  ;;  %v8747_v3 = vsel %vm8731_vm8, 1, %v21727_v23 }
0x1717   :  { %v10961_v51 = vpop.permute.xlu1 %10960 }
0x1718   :  { %v10993_v47 = vmul.f32 %v20985_v32, %v10961_v51  ;;  %11038 = vrot.lane.b32.xlu0 %v10992_v48, %s15900_s5  ;;  %v8750_v48 = vsel %vm8734_vm9, 1, %v21727_v23 }
0x171a   :  { %11040 = vrot.lane.b32.xlu1 %v10993_v47, %s15900_s5  ;;  %v8749_v47 = vsel %vm8733_vm10, 1, %v21727_v23  ;;  %vm11183_vm10 = vcmp.eq.s32.totalorder %v20832_v5, 8  ;;  %v14540_v5 = vld [vmem:[%s21569_s11 + $0x30] sm:$0xff]  }
0x171c   :  { %7974 = vperm.xlu0 %14372, %v7931_v39  }
0x171e   :  { %7971 = vperm.xlu1 %14373, %v7930_v29   ;;  %v9565_v29 = vsel %vm9549_vm11, 1, %v21727_v23 }
0x1720   :  { %7980 = vperm.xlu0 %14372, %v7933_v18   ;;  %v14537_v18 = vld [vmem:[%s21569_s11 + $0x18] sm:$0xff]  }
0x1721   :  { %13508 = vmatprep.subr.bf16.mxu0 %v14537_v18 }
0x1722   :  { %7977 = vperm.xlu1 %14373, %v7932_v8   ;;  %13509 = vmatpush3.bf16.msra.mxu0 %v14537_v18 }
0x1724   :  { %8791 = vperm.xlu0 %14372, %v8748_v17  }
0x1726   :  { %v5524_v51 = vpop.permute.xlu0 %5523  ;;  %8788 = vperm.xlu1 %14373, %v8747_v3   ;;  %v9567_v3 = vsel %vm9551_vm13, 1, %v21727_v23 }
0x1727   :  { %vm5544_vm0 = vcmp.eq.s32.totalorder %v5524_v51, 1  ;;  %v10381_v51 = vsel %vm10365_vm2, 1, %v21727_v23 }
0x1728   :  { %8797 = vperm.xlu0 %14372, %v8750_v48   ;;  %v5521_v39 = vpop.permute.xlu1 %5520 }
0x1729   :  { %vm5543_vm3 = vcmp.eq.s32.totalorder %v5521_v39, 1 }
0x172a   :  { %v21014_v8 = vpop.permute.xlu0 %11236  ;;  %8794 = vperm.xlu1 %14373, %v8749_v47   ;;  %v5559_v39 = vsel %vm5543_vm3, %v21918_v13, 0.0  ;;  %v21921_v13 = vld [vmem:[#allocation31_spill] sm:$0xff] }
0x172b   :  { %21914 = vst [vmem:[#allocation88_spill] sm:$0xff] %v21014_v8  ;;  %v9566_v8 = vsel %vm9550_vm14, 1, %v21727_v23  ;;  %vm11185_vm14 = vcmp.eq.s32.totalorder %v20853_v38, 8  ;;  %v21925_v38 = vld [vmem:[#allocation44_spill] sm:$0xff] }
0x172c   :  { %9608 = vperm.xlu0 %14372, %v9565_v29   ;;  %v21018_v17 = vpop.permute.xlu1 %11233  ;;  %v10382_v29 = vsel %vm10366_vm15, 1, %v21727_v23 }
0x172d   :  { %21915 = vst [vmem:[#allocation91_spill] sm:$0xff] %v21018_v17  ;;  %v14538_v17 = vld [vmem:[%s21569_s11 + $0x20] sm:$0xff]  }
0x172e   :  { %v5530_v48 = vpop.permute.xlu0 %5529  ;;  %9605 = vperm.xlu1 %14373, %v9564_v34   ;;  %v21916_v34 = vld [vmem:[#allocation14_spill] sm:$0xff]  ;;  %13510 = vmatprep.subr.bf16.mxu0 %v14538_v17 }
0x172f   :  { %v5560_v37 = vsel %vm5544_vm0, %v21916_v34, 0.0  ;;  %vm5546_vm6 = vcmp.eq.s32.totalorder %v5530_v48, 1  ;;  %13511 = vmatpush3.bf16.msra.mxu0 %v14538_v17  ;;  %v21919_v34 = vld [vmem:[#allocation28_spill] sm:$0xff]  ;;  %v10383_v17 = vsel %vm10367_vm7, 1, %v21727_v23  ;;  %vm11184_vm0 = vcmp.eq.s32.totalorder %v20860_v20, 8 }
0x1730   :  { %9614 = vperm.xlu0 %14372, %v9567_v3   ;;  %v5527_v47 = vpop.permute.xlu1 %5526  ;;  %v21917_v3 = vld [vmem:[#allocation29_spill] sm:$0xff] }
0x1731   :  { %vm5545_vm9 = vcmp.eq.s32.totalorder %v5527_v47, 1  ;;  %v21922_v47 = vld [vmem:[#allocation15_spill] sm:$0xff] }
0x1732   :  { %v6341_v18 = vpop.permute.xlu0 %6340  ;;  %9611 = vperm.xlu1 %14373, %v9566_v8   ;;  %v10384_v8 = vsel %vm10368_vm4, 1, %v21727_v23  ;;  %v5561_v15 = vsel %vm5545_vm9, %v21922_v47, 0.0 }
0x1733   :  { %vm6361_vm5 = vcmp.eq.s32.totalorder %v6341_v18, 1  ;;  %v14539_v18 = vld [vmem:[%s21569_s11 + $0x28] sm:$0xff]  }
0x1734   :  { %v6377_v56 = vsel %vm6361_vm5, %v21917_v3, %v5560_v37  ;;  %10425 = vperm.xlu0 %14372, %v10382_v29   ;;  %v6338_v12 = vpop.permute.xlu1 %6337  ;;  %v21920_v37 = vld [vmem:[#allocation16_spill] sm:$0xff]  ;;  %13512 = vmatprep.subr.bf16.mxu0 %v14539_v18 }
0x1735   :  { %vm6360_vm8 = vcmp.eq.s32.totalorder %v6338_v12, 1  ;;  %v5562_v29 = vsel %vm5546_vm6, %v21920_v37, 0.0  ;;  %13513 = vmatpush3.bf16.msra.mxu0 %v14539_v18 }
0x1736   :  { %v6376_v53 = vsel %vm6360_vm8, %v21919_v34, %v5559_v39  ;;  %v6347_v48 = vpop.permute.xlu0 %6346  ;;  %10422 = vperm.xlu1 %14373, %v10381_v51   ;;  %v11199_v51 = vsel %vm11183_vm10, 1, %v21727_v23  ;;  %v21923_v39 = vld [vmem:[#allocation30_spill] sm:$0xff]  ;;  %13514 = vmatprep.subr.bf16.mxu0 %v14540_v5 }
0x1737   :  { %vm6363_vm11 = vcmp.eq.s32.totalorder %v6347_v48, 1 }
0x1738   :  { %v6379_v12 = vsel %vm6363_vm11, %v21921_v13, %v5562_v29  ;;  %10431 = vperm.xlu0 %14372, %v10384_v8   ;;  %v6344_v3 = vpop.permute.xlu1 %6343  ;;  %v11198_v8 = vsel %vm11182_vm12, 1, %v21727_v23  ;;  %v11201_v29 = vsel %vm11185_vm14, 1, %v21727_v23 }
0x1739   :  { %vm6362_vm13 = vcmp.eq.s32.totalorder %v6344_v3, 1  ;;  %13515 = vmatpush3.bf16.msra.mxu0 %v14540_v5  ;;  %v21926_v3 = vld [vmem:[#allocation47_spill] sm:$0xff]  ;;  %v21927_v5 = vld [vmem:[#allocation46_spill] sm:$0xff] }
0x173a   :  { %v6378_v34 = vsel %vm6362_vm13, %v21923_v39, %v5561_v15  ;;  %v7158_v48 = vpop.permute.xlu0 %7157  ;;  %10428 = vperm.xlu1 %14373, %v10383_v17   ;;  %v14541_v15 = vld [vmem:[%s21569_s11 + $0x38] sm:$0xff]  }
0x173b   :  { %vm7178_vm15 = vcmp.eq.s32.totalorder %v7158_v48, 1  ;;  %13516 = vmatprep.subr.bf16.mxu0 %v14541_v15  ;;  %v21086_v48 = vld [vmem:[%s21570_s2 + $0x8] sm:$0xf] }
0x173c   :  { %v21054_v18 = vsel %vm7178_vm15, %v21924_v19, %v6377_v56  ;;  %11242 = vperm.xlu0 %14372, %v11199_v51   ;;  %v7155_v37 = vpop.permute.xlu1 %7154  ;;  %v11200_v56 = vsel %vm11184_vm0, 1, %v21727_v23  ;;  %v21071_v51 = vld [vmem:[%s21570_s2] sm:$0xf]  ;;  %v21096_v19 = vld [vmem:[%s21570_s2 + $0x10] sm:$0xf] }
0x173d   :  { %vm7177_vm2 = vcmp.eq.s32.totalorder %v7155_v37, 1  ;;  %13517 = vmatpush3.bf16.msra.mxu0 %v14541_v15  ;;  %21928 = vst [vmem:[#allocation90_spill] sm:$0xff] %v21096_v19  ;;  %v11287_v37 = vld [vmem:[%s21570_s2 + $0x14] sm:$0xf] }
0x173e   :  { %v21062_v17 = vsel %vm7177_vm2, %v21925_v38, %v6376_v53  ;;  %v7164_v13 = vpop.permute.xlu0 %7163  ;;  %11239 = vperm.xlu1 %14373, %v11198_v8   ;;  %v21076_v53 = vld [vmem:[%s21570_s2 + $0x4] sm:$0xf]  ;;  %v21091_v8 = vld [vmem:[%s21570_s2 + $0xc] sm:$0xf]  ;;  %v12828_v15 = vcombine.low %v21096_v19, %v11287_v37  ;;  %v21112_v38 = vld [vmem:[%s21570_s2 + $0x1c] sm:$0xf] }
0x173f   :  { %vm7180_vm3 = vcmp.eq.s32.totalorder %v7164_v13, 1  ;;  %21929 = vst [vmem:[#allocation14_spill] sm:$0xff] %v21112_v38  ;;  %v11290_v13 = vld [vmem:[%s21570_s2 + $0x20] sm:$0xf]  ;;  %v11293_v37 = vld [vmem:[%s21570_s2 + $0x2c] sm:$0xf] }
0x1740   :  { %v21066_v47 = vsel %vm7180_vm3, %v21926_v3, %v6379_v12  ;;  %11248 = vperm.xlu0 %14372, %v11201_v29   ;;  %v7161_v20 = vpop.permute.xlu1 %7160  ;;  %v12826_v12 = vcombine.low %v21071_v51, %v21076_v53  ;;  %v21107_v29 = vld [vmem:[%s21570_s2 + $0x18] sm:$0xf]  ;;  %v14548_v3 = vld [vmem:[%s21571_s10] sm:$0xff]  }
0x1741   :  { %vm7179_vm4 = vcmp.eq.s32.totalorder %v7161_v20, 1  ;;  %13534 = vmatprep.subr.bf16.mxu0 %v14548_v3  ;;  %v12829_v20 = vcombine.low %v21107_v29, %v21112_v38  ;;  %v10899_v38 = vmul.f32 %v20909_v59, %v20118_v54  ;;  %v11296_v54 = vld [vmem:[%s21570_s2 + $0x38] sm:$0xf]  ;;  %v11297_v59 = vld [vmem:[%s21570_s2 + $0x3c] sm:$0xf] }
0x1742   :  { %v21079_v39 = vsel %vm7179_vm4, %v21927_v5, %v6378_v34  ;;  %11245 = vperm.xlu1 %14373, %v11200_v56   ;;  %v12827_v34 = vcombine.low %v21086_v48, %v21091_v8  ;;  %13518 = vmatprep.mubr.bf16.mxu0 %v12826_v12  ;;  %v11291_v56 = vld [vmem:[%s21570_s2 + $0x24] sm:$0xf]  ;;  %v10898_v12 = vmul.f32 %v20905_v35, %v20113_v10  ;;  %v14549_v10 = vld [vmem:[%s21571_s10 + $0x8] sm:$0xff]   ;;  %v11294_v35 = vld [vmem:[%s21570_s2 + $0x30] sm:$0xf] }
0x1743   :  { %v12830_v5 = vcombine.low %v11290_v13, %v11291_v56 }
0x1744   :  { %13519 = vmatmul.mubr.bf16.vlgmr.msra.gmra.mrb[168].mxu0 %v12827_v34  ;;  %v11292_v34 = vld [vmem:[%s21570_s2 + $0x28] sm:$0xf] }
0x1745   :  { %13522 = vmatprep.mubr.bf16.mxu0 %v12828_v15  ;;  %13535 = vmatpush3.bf16.msra.mxu0 %v14548_v3  ;;  %v12831_v13 = vcombine.low %v11292_v34, %v11293_v37  ;;  %v10901_v34 = vmul.f32 %v20921_v58, %v20128_v61  ;;  %v10902_v61 = vmul.f32 %v20929_v28, %v20135_v24 }
0x1746   :  { %13536 = vmatprep.subr.bf16.mxu0 %v14549_v10  ;;  %v10904_v24 = vmul.f32 %v20941_v26, %v20147_v2 }
0x1749   :  { %13537 = vmatpush3.bf16.msra.mxu0 %v14549_v10 }
0x174c   :  { %13523 = vmatmul.mubr.bf16.gmra.mrb[172].mxu0 %v12829_v20  ;;  %v11295_v20 = vld [vmem:[%s21570_s2 + $0x34] sm:$0xf] }
0x174d   :  { %13526 = vmatprep.mubr.bf16.mxu0 %v12830_v5  ;;  %v12832_v5 = vcombine.low %v11294_v35, %v11295_v20  ;;  %v10903_v35 = vmul.f32 %v20934_v7, %v20140_v1 }
0x1752   :  { %v11011_v15 = vpop.permute.xlu0 %11010 }
0x1753   :  { %v11058_v19 = vadd.f32 %v11011_v15, %v10898_v12 }
0x1754   :  { %v11013_v3 = vpop.permute.xlu1 %11012  ;;  %13527 = vmatmul.mubr.bf16.gmra.mrb[176].mxu0 %v12831_v13 }
0x1755   :  { %15806 = vtanh.f32 %v11058_v19  ;;  %v11059_v56 = vadd.f32 %v11013_v3, %v10899_v38  ;;  %v14552_v19 = vld [vmem:[%s21571_s10 + $0x10] sm:$0xff]   ;;  %v10900_v38 = vmul.f32 %v20917_v42, %v20123_v43  ;;  %13530 = vmatprep.mubr.bf16.mxu0 %v12832_v5  ;;  %v12833_v3 = vcombine.low %v11296_v54, %v11297_v59  ;;  %v14553_v43 = vld [vmem:[%s21571_s10 + $0x18] sm:$0xff]  }
0x1756   :  { %13538 = vmatprep.subr.bf16.mxu0 %v14552_v19 }
0x1757   :  { %15808 = vtanh.f32 %v11059_v56  ;;  %13539 = vmatpush3.bf16.msra.mxu0 %v14552_v19 }
0x1758   :  { %13540 = vmatprep.subr.bf16.mxu0 %v14553_v43 }
0x175a   :  { %v11015_v12 = vpop.permute.xlu0 %11014 }
0x175b   :  { %v11060_v37 = vadd.f32 %v11015_v12, %v10900_v38  ;;  %13541 = vmatpush3.bf16.msra.mxu0 %v14553_v43  ;;  %v10905_v38 = vmul.f32 %v20945_v60, %v20152_v22  ;;  %v10909_v43 = vmul.f32 %v20962_v0, %v20176_v21 }
0x175c   :  { %v11017_v15 = vpop.permute.xlu1 %11016  ;;  %13531 = vmatmul.mubr.bf16.gmra.mrb[180].mxu0 %v12833_v3 }
0x175d   :  { %v11061_v13 = vadd.f32 %v11017_v15, %v10901_v34  ;;  %15810 = vtanh.f32 %v11060_v37  ;;  %v10906_v37 = vmul.f32 %v20951_v6, %v20159_v27  ;;  %v10907_v15 = vmul.f32 %v20953_v62, %v20164_v40 }
0x175f   :  { %v15807_v56 = vpop.eup %15806  ;;  %15812 = vtanh.f32 %v11061_v13 }
0x1760   :  { %11106 = vrot.lane.b32.xlu1 %v15807_v56, %s15900_s5  ;;  %v10908_v56 = vmul.f32 %v20959_v63, %v20171_v36 }
0x1761   :  { %v15809_v42 = vpop.eup %15808 }
0x1762   :  { %11108 = vrot.lane.b32.xlu0 %v15809_v42, %s15900_s5  ;;  %v11019_v58 = vpop.permute.xlu0 %11018 }
0x1763   :  { %v11062_v10 = vadd.f32 %v11019_v58, %v10902_v61  ;;  %v10910_v58 = vmul.f32 %v20970_v14, %v20183_v30 }
0x1764   :  { %v11021_v20 = vpop.permute.xlu1 %11020 }
0x1765   :  { %15814 = vtanh.f32 %v11062_v10  ;;  %v11063_v5 = vadd.f32 %v11021_v20, %v10903_v35  ;;  %v10911_v10 = vmul.f32 %v20973_v45, %v20188_v9 }
0x1767   :  { %v15811_v54 = vpop.eup %15810  ;;  %15816 = vtanh.f32 %v11063_v5  ;;  %v10912_v5 = vmul.f32 %v20981_v31, %v20195_v46  ;;  %v21201_v46 = vld [vmem:[%s21572_s13] sm:$0xff]  }
0x1768   :  { %11110 = vrot.lane.b32.xlu1 %v15811_v54, %s15900_s5  ;;  %v10913_v54 = vmul.f32 %v20985_v32, %v20200_v4  ;;  %13558 = vmatprep.subr.bf16.mxu0 %v21201_v46 }
0x1769   :  { %v15813_v59 = vpop.eup %15812 }
0x176a   :  { %11112 = vrot.lane.b32.xlu0 %v15813_v59, %s15900_s5  ;;  %v11023_v28 = vpop.permute.xlu0 %11022 }
0x176b   :  { %v11064_v19 = vadd.f32 %v11023_v28, %v10904_v24  ;;  %v21930_v28 = vld [vmem:[#allocation61_spill] sm:$0xff] }
0x176c   :  { %v11025_v12 = vpop.permute.xlu1 %11024 }
0x176d   :  { %15818 = vtanh.f32 %v11064_v19  ;;  %v11065_v1 = vadd.f32 %v11025_v12, %v10905_v38  ;;  %v21931_v12 = vld [vmem:[#allocation60_spill] sm:$0xff] }
0x176f   :  { %v15815_v7 = vpop.eup %15814  ;;  %15820 = vtanh.f32 %v11065_v1 }
0x1770   :  { %11114 = vrot.lane.b32.xlu1 %v15815_v7, %s15900_s5 }
0x1771   :  { %v15817_v34 = vpop.eup %15816 }
0x1772   :  { %11116 = vrot.lane.b32.xlu0 %v15817_v34, %s15900_s5  ;;  %v11027_v2 = vpop.permute.xlu0 %11026  ;;  %v21932_v34 = vld [vmem:[#allocation63_spill] sm:$0xff] }
0x1773   :  { %v11066_v26 = vadd.f32 %v11027_v2, %v10906_v37 }
0x1774   :  { %v11029_v3 = vpop.permute.xlu1 %11028 }
0x1775   :  { %15822 = vtanh.f32 %v11066_v26  ;;  %v11067_v22 = vadd.f32 %v11029_v3, %v10907_v15  ;;  %v21933_v26 = vld [vmem:[#allocation62_spill] sm:$0xff] }
0x1777   :  { %v15819_v60 = vpop.eup %15818  ;;  %15824 = vtanh.f32 %v11067_v22  ;;  %v21934_v22 = vld [vmem:[#allocation77_spill] sm:$0xff] }
0x1778   :  { %11118 = vrot.lane.b32.xlu1 %v15819_v60, %s15900_s5 }
0x1779   :  { %v15821_v13 = vpop.eup %15820 }
0x177a   :  { %11120 = vrot.lane.b32.xlu0 %v15821_v13, %s15900_s5  ;;  %v11031_v27 = vpop.permute.xlu0 %11030  ;;  %v21935_v13 = vld [vmem:[#allocation76_spill] sm:$0xff] }
0x177b   :  { %v11068_v6 = vadd.f32 %v11031_v27, %v10908_v56 }
0x177c   :  { %v11033_v42 = vpop.permute.xlu1 %11032 }
0x177d   :  { %15826 = vtanh.f32 %v11068_v6  ;;  %v11069_v40 = vadd.f32 %v11033_v42, %v10909_v43 }
0x177f   :  { %v15823_v62 = vpop.eup %15822  ;;  %15828 = vtanh.f32 %v11069_v40 }
0x1780   :  { %11122 = vrot.lane.b32.xlu1 %v15823_v62, %s15900_s5  ;;  %v21938_v62 = vld [vmem:[#allocation93_spill] sm:$0xff] }
0x1781   :  { %v15825_v61 = vpop.eup %15824 }
0x1782   :  { %11124 = vrot.lane.b32.xlu0 %v15825_v61, %s15900_s5  ;;  %v11035_v36 = vpop.permute.xlu0 %11034 }
0x1783   :  { %v11070_v63 = vadd.f32 %v11035_v36, %v10910_v58  ;;  %v21939_v58 = vld [vmem:[#allocation92_spill] sm:$0xff] }
0x1784   :  { %v11037_v35 = vpop.permute.xlu1 %11036 }
0x1785   :  { %15830 = vtanh.f32 %v11070_v63  ;;  %v11071_v21 = vadd.f32 %v11037_v35, %v10911_v10  ;;  %v21940_v10 = vld [vmem:[#allocation95_spill] sm:$0xff] }
0x1787   :  { %v15827_v0 = vpop.eup %15826  ;;  %15832 = vtanh.f32 %v11071_v21 }
0x1788   :  { %11126 = vrot.lane.b32.xlu1 %v15827_v0, %s15900_s5  ;;  %v21941_v0 = vld [vmem:[#allocation94_spill] sm:$0xff] }
0x1789   :  { %v15829_v20 = vpop.eup %15828 }
0x178a   :  { %11128 = vrot.lane.b32.xlu0 %v15829_v20, %s15900_s5  ;;  %v11039_v30 = vpop.permute.xlu0 %11038 }
0x178b   :  { %v11072_v14 = vadd.f32 %v11039_v30, %v10912_v5 }
0x178c   :  { %v11041_v59 = vpop.permute.xlu1 %11040 }
0x178d   :  { %15834 = vtanh.f32 %v11072_v14  ;;  %v11073_v9 = vadd.f32 %v11041_v59, %v10913_v54 }
0x178f   :  { %v15831_v45 = vpop.eup %15830  ;;  %15836 = vtanh.f32 %v11073_v9 }
0x1790   :  { %11130 = vrot.lane.b32.xlu1 %v15831_v45, %s15900_s5 }
0x1791   :  { %v15833_v24 = vpop.eup %15832 }
0x1792   :  { %11132 = vrot.lane.b32.xlu0 %v15833_v24, %s15900_s5 }
0x1797   :  { %v15835_v31 = vpop.eup %15834 }
0x1798   :  { %11134 = vrot.lane.b32.xlu1 %v15835_v31, %s15900_s5 }
0x1799   :  { %v15837_v4 = vpop.eup %15836 }
0x179a   :  { %11136 = vrot.lane.b32.xlu0 %v15837_v4, %s15900_s5 }
0x179b   :  { %v7975_v32 = vpop.permute.xlu0 %7974 }
0x179c   :  { %vm7995_vm5 = vcmp.eq.s32.totalorder %v7975_v32, 1  ;;  %v21945_v32 = vld [vmem:[#allocation107_spill] sm:$0xff] }
0x179d   :  { %v8011_v19 = vsel %vm7995_vm5, %v21930_v28, %v21054_v18  ;;  %v7972_v38 = vpop.permute.xlu1 %7971 }
0x179e   :  { %vm7994_vm6 = vcmp.eq.s32.totalorder %v7972_v38, 1 }
0x179f   :  { %v8010_v1 = vsel %vm7994_vm6, %v21931_v12, %v21062_v17  ;;  %v7981_v7 = vpop.permute.xlu0 %7980  ;;  %v21936_v17 = vld [vmem:[#allocation79_spill] sm:$0xff]  ;;  %vm5531_vm6 = vcmp.eq.s32.totalorder %v20478_v57, 1  ;;  %v21948_v12 = vld [vmem:[#allocation108_spill] sm:$0xff] }
0x17a0   :  { %vm7997_vm7 = vcmp.eq.s32.totalorder %v7981_v7, 1  ;;  %v21951_v7 = vld [vmem:[#allocation5_spill] sm:$0xff] }
0x17a1   :  { %v8013_v37 = vsel %vm7997_vm7, %v21932_v34, %v21066_v47  ;;  %v7978_v2 = vpop.permute.xlu1 %7977  ;;  %v21937_v47 = vld [vmem:[#allocation78_spill] sm:$0xff]  ;;  %vm5532_vm7 = vcmp.eq.s32.totalorder %v20482_v33, 1 }
0x17a2   :  { %vm7996_vm8 = vcmp.eq.s32.totalorder %v7978_v2, 1  ;;  %v21950_v33 = vld [vmem:[#allocation6_spill] sm:$0xff]  ;;  %v21953_v2 = vld [vmem:[#allocation113_spill] sm:$0xff] }
0x17a3   :  { %v8012_v15 = vsel %vm7996_vm8, %v21933_v26, %v21079_v39  ;;  %v8792_v3 = vpop.permute.xlu0 %8791  ;;  %vm5534_vm8 = vcmp.eq.s32.totalorder %v20486_v41, 1  ;;  %v21954_v26 = vld [vmem:[#allocation17_spill] sm:$0xff] }
0x17a4   :  { %vm8812_vm9 = vcmp.eq.s32.totalorder %v8792_v3, 1  ;;  %v5550_v41 = vsel %vm5534_vm8, %v21950_v33, 0.0  ;;  %v21955_v3 = vld [vmem:[#allocation7_spill] sm:$0xff] }
0x17a5   :  { %v8828_v60 = vsel %vm8812_vm9, %v21934_v22, %v8011_v19  ;;  %v8789_v18 = vpop.permute.xlu1 %8788  ;;  %v21947_v19 = vld [vmem:[#allocation4_spill] sm:$0xff] }
0x17a6   :  { %vm8811_vm10 = vcmp.eq.s32.totalorder %v8789_v18, 1  ;;  %v5548_v38 = vsel %vm5532_vm7, %v21947_v19, 0.0  ;;  %v21975_v19 = vld [vmem:[#allocation80_spill] sm:$0xff] }
0x17a7   :  { %v8827_v56 = vsel %vm8811_vm10, %v21935_v13, %v8010_v1  ;;  %v8798_v27 = vpop.permute.xlu0 %8797  ;;  %v21949_v1 = vld [vmem:[#allocation109_spill] sm:$0xff]  ;;  %v21957_v13 = vld [vmem:[#allocation114_spill] sm:$0xff] }
0x17a8   :  { %vm8814_vm11 = vcmp.eq.s32.totalorder %v8798_v27, 1  ;;  %v21958_v27 = vld [vmem:[#allocation18_spill] sm:$0xff] }
0x17a9   :  { %v8830_v6 = vsel %vm8814_vm11, %v21936_v17, %v8013_v37  ;;  %v8795_v43 = vpop.permute.xlu1 %8794  ;;  %v21952_v37 = vld [vmem:[#allocation110_spill] sm:$0xff] }
0x17aa   :  { %vm8813_vm12 = vcmp.eq.s32.totalorder %v8795_v43, 1 }
0x17ab   :  { %v8829_v42 = vsel %vm8813_vm12, %v21937_v47, %v8012_v15  ;;  %v9609_v40 = vpop.permute.xlu0 %9608  ;;  %vm6351_vm12 = vcmp.eq.s32.totalorder %v21945_v32, 1  ;;  %v21960_v47 = vld [vmem:[#allocation117_spill] sm:$0xff]  ;;  %v21973_v32 = vld [vmem:[#allocation115_spill] sm:$0xff] }
0x17ac   :  { %vm9629_vm13 = vcmp.eq.s32.totalorder %v9609_v40, 1  ;;  %v21962_v40 = vld [vmem:[#allocation32_spill] sm:$0xff] }
0x17ad   :  { %v9645_v39 = vsel %vm9629_vm13, %v21938_v62, %v8828_v60  ;;  %v9606_v61 = vpop.permute.xlu1 %9605  ;;  %vm6350_vm13 = vcmp.eq.s32.totalorder %v21948_v12, 1  ;;  %v21956_v60 = vld [vmem:[#allocation19_spill] sm:$0xff] }
0x17ae   :  { %vm9628_vm14 = vcmp.eq.s32.totalorder %v9606_v61, 1  ;;  %v6367_v18 = vsel %vm6351_vm12, %v21956_v60, %v5550_v41  ;;  %v21983_v60 = vld [vmem:[#allocation120_spill] sm:$0xff] }
0x17af   :  { %v9644_v36 = vsel %vm9628_vm14, %v21939_v58, %v8827_v56  ;;  %v9615_v63 = vpop.permute.xlu0 %9614  ;;  %vm7166_vm14 = vcmp.eq.s32.totalorder %v21949_v1, 1  ;;  %v21964_v58 = vld [vmem:[#allocation121_spill] sm:$0xff] }
0x17b0   :  { %vm9631_vm15 = vcmp.eq.s32.totalorder %v9615_v63, 1  ;;  %v21976_v1 = vld [vmem:[#allocation97_spill] sm:$0xff] }
0x17b1   :  { %v9647_v35 = vsel %vm9631_vm15, %v21940_v10, %v8830_v6  ;;  %v9612_v21 = vpop.permute.xlu1 %9611  ;;  %vm7165_vm15 = vcmp.eq.s32.totalorder %v21952_v37, 1  ;;  %v21959_v6 = vld [vmem:[#allocation33_spill] sm:$0xff]  ;;  %v21966_v10 = vld [vmem:[#allocation48_spill] sm:$0xff] }
0x17b2   :  { %vm9630_vm0 = vcmp.eq.s32.totalorder %v9612_v21, 1  ;;  %v21967_v21 = vld [vmem:[#allocation125_spill] sm:$0xff]  ;;  %v21980_v37 = vld [vmem:[#allocation116_spill] sm:$0xff] }
0x17b3   :  { %v9646_v20 = vsel %vm9630_vm0, %v21941_v0, %v8829_v42  ;;  %v10426_v5 = vpop.permute.xlu0 %10425  ;;  %vm7983_vm0 = vcmp.eq.s32.totalorder %v21953_v2, 1  ;;  %v21961_v42 = vld [vmem:[#allocation118_spill] sm:$0xff]  ;;  %vm10434_vm7 = vcmp.eq.s32.totalorder %v21967_v21, 1  ;;  %v21981_v2 = vld [vmem:[#allocation119_spill] sm:$0xff] }
0x17b4   :  { %vm10446_vm2 = vcmp.eq.s32.totalorder %v10426_v5, 1  ;;  %v21968_v0 = vld [vmem:[#allocation126_spill] sm:$0xff]  ;;  %v21969_v5 = vld [vmem:[#allocation111_spill] sm:$0xff] }
0x17b5   :  { %v21223_v30 = vsel %vm10446_vm2, %v20421_v50, %v9645_v39  ;;  %v10423_v14 = vpop.permute.xlu1 %10422  ;;  %v21943_v50 = vld [vmem:[#allocation105_spill] sm:$0xff]  ;;  %vm7982_vm2 = vcmp.eq.s32.totalorder %v21957_v13, 1  ;;  %vm10433_vm8 = vcmp.eq.s32.totalorder %v21968_v0, 1  ;;  %v21995_v0 = vld [vmem:[#allocation82_spill] sm:$0xff] }
0x17b6   :  { %vm10445_vm3 = vcmp.eq.s32.totalorder %v10423_v14, 1  ;;  %vm6349_vm10 = vcmp.eq.s32.totalorder %v21943_v50, 1  ;;  %v21963_v39 = vld [vmem:[#allocation49_spill] sm:$0xff]  ;;  %v21970_v14 = vld [vmem:[#allocation112_spill] sm:$0xff] }
0x17b7   :  { %v21226_v54 = vsel %vm10445_vm3, %v20418_v52, %v9644_v36  ;;  %v10432_v59 = vpop.permute.xlu0 %10431  ;;  %v21942_v52 = vld [vmem:[#allocation104_spill] sm:$0xff]  ;;  %v6365_v15 = vsel %vm6349_vm10, %v21954_v26, %v5548_v38  ;;  %vm8800_vm3 = vcmp.eq.s32.totalorder %v21960_v47, 1  ;;  %v21965_v36 = vld [vmem:[#allocation122_spill] sm:$0xff]  ;;  %vm7167_vm10 = vcmp.eq.s32.totalorder %v21970_v14, 1 }
0x17b8   :  { %vm10448_vm4 = vcmp.eq.s32.totalorder %v10432_v59, 1  ;;  %vm5533_vm9 = vcmp.eq.s32.totalorder %v21942_v52, 1  ;;  %v7182_v43 = vsel %vm7166_vm14, %v21959_v6, %v6365_v15  ;;  %v21971_v59 = vld [vmem:[#allocation65_spill] sm:$0xff]  ;;  %v21972_v52 = vld [vmem:[#allocation64_spill] sm:$0xff]  ;;  %vm7984_vm14 = vcmp.eq.s32.totalorder %v21980_v37, 1  ;;  %v22007_v37 = vld [vmem:[#allocation142_spill] sm:$0xff] }
0x17b9   :  { %v21229_v9 = vsel %vm10448_vm4, %v20439_v55, %v9647_v35  ;;  %v10429_v45 = vpop.permute.xlu1 %10428  ;;  %v21944_v55 = vld [vmem:[#allocation106_spill] sm:$0xff]  ;;  %v5549_v34 = vsel %vm5533_vm9, %v21951_v7, 0.0  ;;  %vm8799_vm4 = vcmp.eq.s32.totalorder %v21961_v42, 1  ;;  %v7999_v61 = vsel %vm7983_vm0, %v21963_v39, %v7182_v43  ;;  %v21978_v7 = vld [vmem:[#allocation129_spill] sm:$0xff]  ;;  %v21986_v43 = vld [vmem:[#allocation51_spill] sm:$0xff] }
0x17ba   :  { %vm10447_vm5 = vcmp.eq.s32.totalorder %v10429_v45, 1  ;;  %vm6348_vm11 = vcmp.eq.s32.totalorder %v21944_v55, 1  ;;  %v6366_v17 = vsel %vm6350_vm13, %v21958_v27, %v5549_v34  ;;  %vm7168_vm9 = vcmp.eq.s32.totalorder %v21969_v5, 1  ;;  %v21979_v34 = vld [vmem:[#allocation130_spill] sm:$0xff]  ;;  %v21987_v42 = vld [vmem:[#allocation124_spill] sm:$0xff]  ;;  %v21996_v5 = vld [vmem:[#allocation99_spill] sm:$0xff] }
0x17bb   :  { %v21232_v24 = vsel %vm10447_vm5, %v20436_v11, %v9646_v20  ;;  %v21236_v4 = vpop.permute.xlu0 %11242  ;;  %v21946_v11 = vld [vmem:[#allocation3_spill] sm:$0xff]  ;;  %vm9617_vm5 = vcmp.eq.s32.totalorder %v21964_v58, 1  ;;  %v8816_v45 = vsel %vm8800_vm3, %v21971_v59, %v7999_v61  ;;  %vm11251_vm12 = vcmp.eq.s32.totalorder %v21978_v7, 1  ;;  %v21985_v27 = vld [vmem:[#allocation34_spill] sm:$0xff]  ;;  %v21991_v58 = vld [vmem:[#allocation128_spill] sm:$0xff] }
0x17bc   :  { %v5547_v28 = vsel %vm5531_vm6, %v21946_v11, 0.0  ;;  %vm9616_vm6 = vcmp.eq.s32.totalorder %v21965_v36, 1  ;;  %v21974_v11 = vld [vmem:[#allocation81_spill] sm:$0xff]  ;;  %vm11250_vm13 = vcmp.eq.s32.totalorder %v21979_v34, 1  ;;  %vm8801_vm0 = vcmp.eq.s32.totalorder %v21983_v60, 1  ;;  %v21992_v36 = vld [vmem:[#allocation131_spill] sm:$0xff] }
0x17bd   :  { %v21234_v31 = vpop.permute.xlu1 %11239  ;;  %v6364_v22 = vsel %vm6348_vm11, %v21955_v3, %v5547_v28  ;;  %vm7985_vm11 = vcmp.eq.s32.totalorder %v21973_v32, 1  ;;  %v9633_v28 = vsel %vm9617_vm5, %v21974_v11, %v8816_v45  ;;  %v21982_v3 = vld [vmem:[#allocation35_spill] sm:$0xff]  ;;  %v7183_v6 = vsel %vm7167_vm10, %v21985_v27, %v6366_v17  ;;  %v21999_v11 = vld [vmem:[#allocation132_spill] sm:$0xff]  ;;  %v22006_v7 = vld [vmem:[#allocation9_spill] sm:$0xff] }
0x17be   :  { %v7181_v62 = vsel %vm7165_vm15, %v21962_v40, %v6364_v22  ;;  %v10450_v33 = vsel %vm10434_vm7, %v21976_v1, %v9633_v28  ;;  %vm8802_vm15 = vcmp.eq.s32.totalorder %v21981_v2, 1  ;;  %v7184_v22 = vsel %vm7168_vm9, %v21982_v3, %v6367_v18  ;;  %v21988_v40 = vld [vmem:[#allocation127_spill] sm:$0xff]  ;;  %v22003_v1 = vld [vmem:[#allocation137_spill] sm:$0xff]  ;;  %v22013_v27 = vld [vmem:[#allocation20_spill] sm:$0xff] }
0x17bf   :  { %v21259_v56 = vpop.permute.xlu0 %11248  ;;  %v7998_v35 = vsel %vm7982_vm2, %v21966_v10, %v7181_v62  ;;  %v8001_v47 = vsel %vm7985_vm11, %v21986_v43, %v7184_v22  ;;  %vm9618_vm3 = vcmp.eq.s32.totalorder %v21987_v42, 1  ;;  %v21989_v62 = vld [vmem:[#allocation50_spill] sm:$0xff]  ;;  %v21990_v18 = vld [vmem:[#allocation67_spill] sm:$0xff]  ;;  %vm10435_vm5 = vcmp.eq.s32.totalorder %v21991_v58, 1  ;;  %v22008_v2 = vld [vmem:[#allocation145_spill] sm:$0xff] }
0x17c0   :  { %v8815_v50 = vsel %vm8799_vm4, %v21972_v52, %v7998_v35  ;;  %vm10436_vm4 = vcmp.eq.s32.totalorder %v21988_v40, 1  ;;  %v8000_v39 = vsel %vm7984_vm14, %v21989_v62, %v7183_v6  ;;  %v8818_v61 = vsel %vm8802_vm15, %v21990_v18, %v8001_v47  ;;  %v21994_v10 = vld [vmem:[#allocation83_spill] sm:$0xff]  ;;  %v21997_v52 = vld [vmem:[#allocation98_spill] sm:$0xff]  ;;  %v22010_v22 = vld [vmem:[#allocation136_spill] sm:$0xff] }
0x17c1   :  { %v21249_v57 = vpop.permute.xlu1 %11245  ;;  %v9632_v38 = vsel %vm9616_vm6, %v21975_v19, %v8815_v50  ;;  %vm5536_vm6 = vcmp.eq.s32.totalorder %v21992_v36, 1  ;;  %vm5535_vm7 = vcmp.eq.s32.totalorder %v21999_v11, 1  ;;  %v22000_v19 = vld [vmem:[#allocation133_spill] sm:$0xff]  ;;  %vm6353_vm11 = vcmp.eq.s32.totalorder %v22003_v1, 1  ;;  %v22016_v40 = vld [vmem:[#allocation150_spill] sm:$0xff]  ;;  %v22017_v62 = vld [vmem:[#allocation36_spill] sm:$0xff] }
0x17c2   :  { %v5551_v34 = vsel %vm5535_vm7, %v22006_v7, 0.0  ;;  %vm7169_vm14 = vcmp.eq.s32.totalorder %v22007_v37, 1  ;;  %vm7987_vm15 = vcmp.eq.s32.totalorder %v22008_v2, 1  ;;  %v22011_v60 = vld [vmem:[#allocation21_spill] sm:$0xff]  ;;  %v22020_v36 = vld [vmem:[#allocation154_spill] sm:$0xff]  ;;  %v22038_v37 = vld [vmem:[#allocation147_spill] sm:$0xff] }
0x17c3   :  { %v22014_v43 = vld [vmem:[#allocation37_spill] sm:$0xff]  ;;  %v22036_v7 = vld [vmem:[#allocation162_spill] sm:$0xff] }
0x17c4   :  { %v22015_v42 = vld [vmem:[#allocation149_spill] sm:$0xff] }
0x17c5   :  { %v22018_v18 = vld [vmem:[#allocation53_spill] sm:$0xff] }
0x17c6   :  { %v22019_v58 = vld [vmem:[#allocation153_spill] sm:$0xff] }
0x17c7   :  { %v22033_v1 = vld [vmem:[#allocation101_spill] sm:$0xff] }
0x17d2   :  { %v11107_v63 = vpop.permute.xlu1 %11106 }
0x17d3   :  { %v11154_v20 = vmul.f32 %v20731_v25, %v11107_v63  ;;  %v21977_v25 = vld [vmem:[#allocation96_spill] sm:$0xff]  ;;  %v21993_v63 = vld [vmem:[#allocation66_spill] sm:$0xff] }
0x17d4   :  { %v11109_v55 = vpop.permute.xlu0 %11108  ;;  %v10449_v41 = vsel %vm10433_vm8, %v21977_v25, %v9632_v38  ;;  %v8817_v17 = vsel %vm8801_vm0, %v21993_v63, %v8000_v39  ;;  %vm11253_vm8 = vcmp.eq.s32.totalorder %v22000_v19, 1  ;;  %v22001_v38 = vld [vmem:[#allocation134_spill] sm:$0xff]  ;;  %vm5537_vm0 = vcmp.eq.s32.totalorder %v22010_v22, 1 }
0x17d5   :  { %v11155_v12 = vmul.f32 %v20736_v16, %v11109_v55  ;;  %v11266_v26 = vsel %vm11250_vm13, %v11154_v20, %v10449_v41  ;;  %v21984_v16 = vld [vmem:[#allocation123_spill] sm:$0xff]  ;;  %v9634_v20 = vsel %vm9618_vm3, %v21995_v0, %v8817_v17  ;;  %v21998_v55 = vld [vmem:[#allocation8_spill] sm:$0xff]  ;;  %vm11252_vm9 = vcmp.eq.s32.totalorder %v22001_v38, 1  ;;  %v22024_v0 = vld [vmem:[#allocation26_spill] sm:$0xff] }
0x17d6   :  { %vm9619_vm2 = vcmp.eq.s32.totalorder %v21984_v16, 1  ;;  %v10451_v50 = vsel %vm10435_vm5, %v21997_v52, %v9634_v20  ;;  %v5552_v32 = vsel %vm5536_vm6, %v21998_v55, 0.0  ;;  %vm8804_vm3 = vcmp.eq.s32.totalorder %v22015_v42, 1  ;;  %v22021_v17 = vld [vmem:[#allocation52_spill] sm:$0xff]  ;;  %v22029_v55 = vld [vmem:[#allocation143_spill] sm:$0xff]  ;;  %v22046_v22 = vld [vmem:[#allocation38_spill] sm:$0xff] }
0x17d7   :  { %v11267_v15 = vsel %vm11251_vm12, %v11155_v12, %v10450_v33  ;;  %v9635_v35 = vsel %vm9619_vm2, %v21994_v10, %v8818_v61  ;;  %v22002_v12 = vld [vmem:[#allocation135_spill] sm:$0xff]  ;;  %v22004_v33 = vld [vmem:[#allocation138_spill] sm:$0xff]  ;;  %v6369_v16 = vsel %vm6353_vm11, %v22011_v60, %v5552_v32  ;;  %vm9621_vm5 = vcmp.eq.s32.totalorder %v22019_v58, 1  ;;  %v22028_v52 = vld [vmem:[#allocation68_spill] sm:$0xff] }
0x17d8   :  { %v11298_v13 = vpack.c.bf16 %v11267_v15, %v11266_v26  ;;  %v10452_v14 = vsel %vm10436_vm4, %v21996_v5, %v9635_v35  ;;  %vm5538_vm10 = vcmp.eq.s32.totalorder %v22002_v12, 1  ;;  %vm6352_vm12 = vcmp.eq.s32.totalorder %v22004_v33, 1  ;;  %v14555_v26 = vld [vmem:[%s21572_s13 + $0x8] sm:$0xff]   ;;  %v22009_v15 = vld [vmem:[#allocation11_spill] sm:$0xff]  ;;  %v22022_v35 = vld [vmem:[#allocation157_spill] sm:$0xff] }
0x17d9   :  { %v5554_v3 = vsel %vm5538_vm10, %v22009_v15, 0.0  ;;  %v6368_v6 = vsel %vm6352_vm12, %v22013_v27, %v5551_v34  ;;  %vm8803_vm4 = vcmp.eq.s32.totalorder %v22016_v40, 1  ;;  %vm9620_vm6 = vcmp.eq.s32.totalorder %v22020_v36, 1  ;;  %v22025_v5 = vld [vmem:[#allocation139_spill] sm:$0xff]  ;;  %v22030_v32 = vld [vmem:[#allocation85_spill] sm:$0xff]  ;;  %v22037_v34 = vld [vmem:[#allocation144_spill] sm:$0xff] }
0x17da   :  { %13542 = vmatprep.mubr.msk.bf16.mxu0 %vm4806_vm1, %v11298_v13  ;;  %v11111_v21 = vpop.permute.xlu1 %11110  ;;  %v22012_v13 = vld [vmem:[#allocation146_spill] sm:$0xff]  ;;  %v7185_v39 = vsel %vm7169_vm14, %v22017_v62, %v6368_v6  ;;  %vm10438_vm7 = vcmp.eq.s32.totalorder %v22022_v35, 1  ;;  %vm7172_vm11 = vcmp.eq.s32.totalorder %v22029_v55, 1  ;;  %v22032_v38 = vld [vmem:[#allocation43_spill] sm:$0xff]  ;;  %vm7171_vm14 = vcmp.eq.s32.totalorder %v22037_v34, 1  ;;  %v22041_v27 = vld [vmem:[#allocation148_spill] sm:$0xff] }
0x17db   :  { %v11156_v59 = vmul.f32 %v20751_v44, %v11111_v21  ;;  %v22005_v44 = vld [vmem:[#allocation141_spill] sm:$0xff]  ;;  %vm7986_vm2 = vcmp.eq.s32.totalorder %v22012_v13, 1  ;;  %v22023_v21 = vld [vmem:[#allocation158_spill] sm:$0xff]  ;;  %v22044_v40 = vld [vmem:[#allocation151_spill] sm:$0xff] }
0x17dc   :  { %v11113_v45 = vpop.permute.xlu0 %11112  ;;  %vm7170_vm13 = vcmp.eq.s32.totalorder %v22005_v44, 1  ;;  %v8002_v10 = vsel %vm7986_vm2, %v22021_v17, %v7185_v39  ;;  %v22034_v44 = vld [vmem:[#allocation100_spill] sm:$0xff]  ;;  %v22039_v15 = vld [vmem:[#allocation10_spill] sm:$0xff]  ;;  %vm7988_vm2 = vcmp.eq.s32.totalorder %v22041_v27, 1  ;;  %v22063_v34 = vld [vmem:[#allocation59_spill] sm:$0xff] }
0x17dd   :  { %v11157_v28 = vmul.f32 %v20757_v49, %v11113_v45  ;;  %v11268_v25 = vsel %vm11252_vm9, %v11156_v59, %v10451_v50  ;;  %v7186_v47 = vsel %vm7170_vm13, %v22014_v43, %v6369_v16  ;;  %vm6355_vm9 = vcmp.eq.s32.totalorder %v22025_v5, 1  ;;  %v22027_v59 = vld [vmem:[#allocation69_spill] sm:$0xff]  ;;  %v22040_v16 = vld [vmem:[#allocation23_spill] sm:$0xff]  ;;  %v22042_v43 = vld [vmem:[#allocation22_spill] sm:$0xff] }
0x17de   :  { %v8003_v61 = vsel %vm7987_vm15, %v22018_v18, %v7186_v47  ;;  %vm11254_vm13 = vcmp.eq.s32.totalorder %v22036_v7, 1  ;;  %vm7989_vm15 = vcmp.eq.s32.totalorder %v22038_v37, 1  ;;  %v5553_v60 = vsel %vm5537_vm0, %v22039_v15, 0.0  ;;  %v22043_v47 = vld [vmem:[#allocation39_spill] sm:$0xff]  ;;  %v22045_v62 = vld [vmem:[#allocation152_spill] sm:$0xff] }
0x17df   :  { %v11269_v41 = vsel %vm11253_vm8, %v11157_v28, %v10452_v14  ;;  %vm10437_vm8 = vcmp.eq.s32.totalorder %v22023_v21, 1  ;;  %v22026_v14 = vld [vmem:[#allocation140_spill] sm:$0xff]  ;;  %v8820_v45 = vsel %vm8804_vm3, %v22027_v59, %v8003_v61  ;;  %v6371_v13 = vsel %vm6355_vm9, %v22040_v16, %v5554_v3  ;;  %v22047_v18 = vld [vmem:[#allocation55_spill] sm:$0xff]  ;;  %v22053_v21 = vld [vmem:[#allocation41_spill] sm:$0xff] }
0x17e0   :  { %v11299_v49 = vpack.c.bf16 %v11269_v41, %v11268_v25  ;;  %vm6354_vm10 = vcmp.eq.s32.totalorder %v22026_v14, 1  ;;  %v9637_v11 = vsel %vm9621_vm5, %v22030_v32, %v8820_v45  ;;  %v22031_v28 = vld [vmem:[#allocation84_spill] sm:$0xff]  ;;  %v22035_v41 = vld [vmem:[#allocation161_spill] sm:$0xff]  ;;  %v7188_v42 = vsel %vm7172_vm11, %v22043_v47, %v6371_v13  ;;  %v22048_v3 = vld [vmem:[#allocation155_spill] sm:$0xff] }
0x17e1   :  { %v10454_v33 = vsel %vm10438_vm7, %v22033_v1, %v9637_v11  ;;  %vm11255_vm12 = vcmp.eq.s32.totalorder %v22035_v41, 1  ;;  %vm8806_vm3 = vcmp.eq.s32.totalorder %v22044_v40, 1  ;;  %v8005_v61 = vsel %vm7989_vm15, %v22047_v18, %v7188_v42  ;;  %v22049_v58 = vld [vmem:[#allocation156_spill] sm:$0xff]  ;;  %v22055_v14 = vld [vmem:[#allocation70_spill] sm:$0xff]  ;;  %v22061_v1 = vld [vmem:[#allocation163_spill] sm:$0xff] }
0x17e2   :  { %13543 = vmatmul.mubr.msk.bf16.vlgmr.msra.gmra.mrb[168].mxu0 %vm4806_vm1, %v11299_v49  ;;  %v11115_v63 = vpop.permute.xlu1 %11114  ;;  %vm9623_vm0 = vcmp.eq.s32.totalorder %v22048_v3, 1  ;;  %vm9622_vm5 = vcmp.eq.s32.totalorder %v22049_v58, 1  ;;  %v22052_v35 = vld [vmem:[#allocation160_spill] sm:$0xff]  ;;  %v22058_v32 = vld [vmem:[#allocation42_spill] sm:$0xff]  ;;  %v22066_v16 = vld [vmem:[#allocation89_spill] sm:$0xff]  ;;  %vm11262_vm15 = vcmp.eq.s32.totalorder %v21234_v31, 1 }
0x17e3   :  { %13559 = vmatpush3.bf16.msra.mxu0 %v21201_v46  ;;  %v11158_v20 = vmul.f32 %v22024_v0, %v11115_v63  ;;  %v8819_v46 = vsel %vm8803_vm4, %v22028_v52, %v8002_v10  ;;  %vm8805_vm4 = vcmp.eq.s32.totalorder %v22045_v62, 1  ;;  %v22050_v63 = vld [vmem:[#allocation54_spill] sm:$0xff]  ;;  %v22051_v10 = vld [vmem:[#allocation159_spill] sm:$0xff]  ;;  %vm10439_vm7 = vcmp.eq.s32.totalorder %v22052_v35, 1  ;;  %v22067_v13 = vld [vmem:[#allocation25_spill] sm:$0xff] }
0x17e4   :  { %13560 = vmatprep.subr.bf16.mxu0 %v14555_v26  ;;  %v11117_v50 = vpop.permute.xlu0 %11116  ;;  %v9636_v19 = vsel %vm9620_vm6, %v22031_v28, %v8819_v46  ;;  %vm10440_vm6 = vcmp.eq.s32.totalorder %v22051_v10, 1  ;;  %v22056_v52 = vld [vmem:[#allocation87_spill] sm:$0xff]  ;;  %vm11258_vm11 = vcmp.eq.s32.totalorder %v22066_v16, 1  ;;  %v22069_v42 = vld [vmem:[#allocation57_spill] sm:$0xff]  ;;  %v22073_v58 = vld [vmem:[#allocation88_spill] sm:$0xff] }
0x17e5   :  { %v11159_v12 = vmul.f32 %v22032_v38, %v11117_v50  ;;  %v10453_v25 = vsel %vm10437_vm8, %v22034_v44, %v9636_v19  ;;  %v22057_v50 = vld [vmem:[#allocation86_spill] sm:$0xff]  ;;  %v22059_v28 = vld [vmem:[#allocation103_spill] sm:$0xff]  ;;  %vm11257_vm8 = vcmp.eq.s32.totalorder %v22061_v1, 1 }
0x17e6   :  { %v11270_v2 = vsel %vm11254_vm13, %v11158_v20, %v10453_v25  ;;  %v22054_v20 = vld [vmem:[#allocation71_spill] sm:$0xff]  ;;  %v22060_v38 = vld [vmem:[#allocation102_spill] sm:$0xff]  ;;  %vm11261_vm13 = vcmp.eq.s32.totalorder %v22073_v58, 1 }
0x17e7   :  { %13561 = vmatpush3.bf16.msra.mxu0 %v14555_v26  ;;  %v11271_v49 = vsel %vm11255_vm12, %v11159_v12, %v10454_v33  ;;  %v6370_v26 = vsel %vm6354_vm10, %v22042_v43, %v5553_v60  ;;  %v8822_v5 = vsel %vm8806_vm3, %v22054_v20, %v8005_v61  ;;  %v22062_v33 = vld [vmem:[#allocation164_spill] sm:$0xff]  ;;  %v22070_v62 = vld [vmem:[#allocation91_spill] sm:$0xff]  ;;  %v22072_v61 = vld [vmem:[#allocation58_spill] sm:$0xff]  ;;  %vm11265_vm3 = vcmp.eq.s32.totalorder %v21259_v56, 1 }
0x17e8   :  { %v11300_v6 = vpack.c.bf16 %v11271_v49, %v11270_v2  ;;  %v7187_v39 = vsel %vm7171_vm14, %v22046_v22, %v6370_v26  ;;  %v9639_v46 = vsel %vm9623_vm0, %v22056_v52, %v8822_v5  ;;  %vm11256_vm9 = vcmp.eq.s32.totalorder %v22062_v33, 1  ;;  %v22064_v49 = vld [vmem:[#allocation40_spill] sm:$0xff]  ;;  %v22075_v35 = vld [vmem:[#allocation75_spill] sm:$0xff] }
0x17e9   :  { %v8004_v17 = vsel %vm7988_vm2, %v22050_v63, %v7187_v39  ;;  %v10456_v19 = vsel %vm10440_vm6, %v22059_v28, %v9639_v46  ;;  %v22065_v60 = vld [vmem:[#allocation72_spill] sm:$0xff]  ;;  %vm11260_vm12 = vcmp.eq.s32.totalorder %v22070_v62, 1  ;;  %v22071_v39 = vld [vmem:[#allocation27_spill] sm:$0xff]  ;;  %vm11263_vm14 = vcmp.eq.s32.totalorder %v21236_v4, 1  ;;  %v22077_v46 = vld [vmem:[#allocation73_spill] sm:$0xff] }
0x17ea   :  { %13546 = vmatprep.mubr.msk.bf16.mxu0 %vm4806_vm1, %v11300_v6  ;;  %v11119_v36 = vpop.permute.xlu1 %11118  ;;  %v8821_v59 = vsel %vm8805_vm4, %v22055_v14, %v8004_v17  ;;  %vm11259_vm10 = vcmp.eq.s32.totalorder %v22065_v60, 1  ;;  %v22068_v6 = vld [vmem:[#allocation12_spill] sm:$0xff]  ;;  %vm11264_vm2 = vcmp.eq.s32.totalorder %v21249_v57, 1  ;;  %v14557_v4 = vld [vmem:[%s21572_s13 + $0x18] sm:$0xff]   ;;  %vm11877_vm4 = vcmp.eq.bf16.partialorder %v21086_v48, 1065369472 }
0x17eb   :  { %v11160_v0 = vmul.f32 %v22053_v21, %v11119_v36  ;;  %v9638_v55 = vsel %vm9622_vm5, %v22057_v50, %v8821_v59  ;;  %v22074_v36 = vld [vmem:[#allocation24_spill] sm:$0xff]  ;;  %vm11875_vm0 = vcmp.eq.bf16.partialorder %v21071_v51, 1065369472  ;;  %vm11878_vm5 = vcmp.eq.bf16.partialorder %v21091_v8, 1065369472 }
0x17ec   :  { %v11121_v45 = vpop.permute.xlu0 %11120  ;;  %v10455_v12 = vsel %vm10439_vm7, %v22060_v38, %v9638_v55  ;;  %v22076_v20 = vld [vmem:[#allocation56_spill] sm:$0xff]  ;;  %vm11876_vm6 = vcmp.eq.bf16.partialorder %v21076_v53, 1065369472  ;;  %v21452_v48 = vld [vmem:[%s21574_s14] ss:$0 sm:$0xff] }
0x17ed   :  { %v11161_v11 = vmul.f32 %v22058_v32, %v11121_v45  ;;  %v11272_v44 = vsel %vm11256_vm9, %v11160_v0, %v10455_v12 }
0x17ef   :  { %v11273_v25 = vsel %vm11257_vm8, %v11161_v11, %v10456_v19  ;;  %v22078_v11 = vld [vmem:[#allocation74_spill] sm:$0xff] }
0x17f0   :  { %v11301_v41 = vpack.c.bf16 %v11273_v25, %v11272_v44 }
0x17f2   :  { %13547 = vmatmul.mubr.msk.bf16.gmra.mrb[172].mxu0 %vm4806_vm1, %v11301_v41  ;;  %v11123_v7 = vpop.permute.xlu1 %11122 }
0x17f3   :  { %v11162_v37 = vmul.f32 %v22063_v34, %v11123_v7 }
0x17f4   :  { %v11125_v2 = vpop.permute.xlu0 %11124 }
0x17f5   :  { %v11163_v15 = vmul.f32 %v22064_v49, %v11125_v2  ;;  %v11274_v27 = vsel %vm11258_vm11, %v11162_v37, %v22067_v13 }
0x17f7   :  { %v11275_v43 = vsel %vm11259_vm10, %v11163_v15, %v22068_v6  ;;  %vm11881_vm10 = vcmp.eq.bf16.partialorder %v21107_v29, 1065369472 }
0x17f8   :  { %v11302_v26 = vpack.c.bf16 %v11275_v43, %v11274_v27 }
0x17fa   :  { %13550 = vmatprep.mubr.msk.bf16.mxu0 %vm4806_vm1, %v11302_v26  ;;  %v11127_v47 = vpop.permute.xlu1 %11126 }
0x17fb   :  { %v11164_v40 = vmul.f32 %v22069_v42, %v11127_v47 }
0x17fc   :  { %v11129_v22 = vpop.permute.xlu0 %11128 }
0x17fd   :  { %v11276_v18 = vsel %vm11260_vm12, %v11164_v40, %v22071_v39  ;;  %v11165_v3 = vmul.f32 %v22072_v61, %v11129_v22 }
0x17ff   :  { %v11277_v63 = vsel %vm11261_vm13, %v11165_v3, %v22074_v36 }
0x1800   :  { %v11303_v17 = vpack.c.bf16 %v11277_v63, %v11276_v18 }
0x1802   :  { %13551 = vmatmul.mubr.msk.bf16.gmra.mrb[176].mxu0 %vm4806_vm1, %v11303_v17  ;;  %v11131_v10 = vpop.permute.xlu1 %11130 }
0x1803   :  { %v11166_v21 = vmul.f32 %v22075_v35, %v11131_v10 }
0x1804   :  { %v11133_v0 = vpop.permute.xlu0 %11132 }
0x1805   :  { %v11167_v5 = vmul.f32 %v22076_v20, %v11133_v0  ;;  %v11278_v14 = vsel %vm11262_vm15, %v11166_v21, %v21226_v54 }
0x1807   :  { %v11279_v59 = vsel %vm11263_vm14, %v11167_v5, %v21223_v30  ;;  %v14556_v30 = vld [vmem:[%s21572_s13 + $0x10] sm:$0xff]  }
0x1808   :  { %v11304_v45 = vpack.c.bf16 %v11279_v59, %v11278_v14  ;;  %13562 = vmatprep.subr.bf16.mxu0 %v14556_v30 }
0x1809   :  { %13563 = vmatpush3.bf16.msra.mxu0 %v14556_v30 }
0x180a   :  { %13554 = vmatprep.mubr.msk.bf16.mxu0 %vm4806_vm1, %v11304_v45  ;;  %v11135_v52 = vpop.permute.xlu1 %11134  ;;  %13564 = vmatprep.subr.bf16.mxu0 %v14557_v4 }
0x180b   :  { %v11168_v50 = vmul.f32 %v22077_v46, %v11135_v52 }
0x180c   :  { %v11137_v55 = vpop.permute.xlu0 %11136 }
0x180d   :  { %v11280_v32 = vsel %vm11264_vm2, %v11168_v50, %v21232_v24  ;;  %v11169_v28 = vmul.f32 %v22078_v11, %v11137_v55  ;;  %13565 = vmatpush3.bf16.msra.mxu0 %v14557_v4  ;;  %v12854_v24 = vld [vmem:[%s21573_s12] ss:$0 sm:$0xff]  ;;  %v11893_v4 = vsel %vm11877_vm4, 65537, %v21727_v23 }
0x180f   :  { %v11281_v31 = vsel %vm11265_vm3, %v11169_v28, %v21229_v9 }
0x1810   :  { %v11305_v54 = vpack.c.bf16 %v11281_v31, %v11280_v32 }
0x1812   :  { %13555 = vmatmul.mubr.msk.bf16.gmra.mrb[180].mxu0 %vm4806_vm1, %v11305_v54 }
0x18b5   :  { %v13544_v9 = vpop.f32.mrb[168].mxu0 }
0x18b6   :  { %v11677_v57 = vadd.f32 %v13544_v9, %v12854_v24  ;;  %v11605_v56 = vpop.f32.mrb[169].mxu0  ;;  %v11894_v9 = vsel %vm11878_vm5, 65537, %v21727_v23 }
0x18b7   :  { %v11675_v19 = vadd.f32 %v12854_v24, %v11605_v56  ;;  %v13545_v38 = vpop.f32.mrb[170].mxu0  ;;  %v11892_v56 = vsel %vm11876_vm6, 65537, %v21727_v23  ;;  %v11910_v51 = vunpack.c.l.b16 %v11894_v9 }
0x18b8   :  { %v11678_v12 = vadd.f32 %v13545_v38, %v12854_v24  ;;  %v11608_v1 = vpop.f32.mrb[171].mxu0  ;;  %v11693_v44 = vmax.f32 %v11677_v57, 0.0  ;;  %v11909_v57 = vunpack.c.l.b16 %v11893_v4  ;;  %v11908_v38 = vunpack.c.l.b16 %v11892_v56 }
0x18b9   :  { %v11676_v33 = vadd.f32 %v12854_v24, %v11608_v1  ;;  %v11691_v41 = vmax.f32 %v11675_v19, 0.0  ;;  %vm11926_vm8 = vcmp.ne.s32.totalorder %v11910_v51, 0  ;;  %v15896_v51 = vld [vmem:[%s21570_s2 + $0x30] sm:$0xf] }
0x18ba   :  { %v11694_v25 = vmax.f32 %v11678_v12, 0.0  ;;  %vm11924_vm9 = vcmp.ne.s32.totalorder %v11908_v38, 0  ;;  %v15897_v38 = vld [vmem:[%s21570_s2 + $0x3c] sm:$0xf] }
0x18bb   :  { %v11692_v7 = vmax.f32 %v11676_v33, 0.0 }
0x18bc   :  { %v11708_v34 = vpack.c.bf16 %v11694_v25, %v11693_v44 }
0x18bd   :  { %v11707_v37 = vpack.c.bf16 %v11692_v7, %v11691_v41 }
0x18bf   :  { %13566 = vmatprep.mubr.msk.bf16.mxu0 %vm4806_vm1, %v11707_v37 }
0x18c0   :  { %13567 = vmatmul.mubr.msk.bf16.vlgmr.msra.gmra.mrb[184].mxu0 %vm4806_vm1, %v11708_v34 }
0x18c5   :  { %v13548_v2 = vpop.f32.mrb[172].mxu0 }
0x18c6   :  { %v11681_v49 = vadd.f32 %v13548_v2, %v12854_v24  ;;  %v11621_v15 = vpop.f32.mrb[173].mxu0 }
0x18c7   :  { %v11679_v60 = vadd.f32 %v12854_v24, %v11621_v15  ;;  %v13549_v16 = vpop.f32.mrb[174].mxu0  ;;  %v22080_v15 = vld [vmem:[#allocation14_spill] sm:$0xff] }
0x18c8   :  { %v11682_v13 = vadd.f32 %v13549_v16, %v12854_v24  ;;  %v11624_v27 = vpop.f32.mrb[175].mxu0  ;;  %v11697_v43 = vmax.f32 %v11681_v49, 0.0  ;;  %v22079_v49 = vld [vmem:[#allocation90_spill] sm:$0xff]  ;;  %vm11882_vm12 = vcmp.eq.bf16.partialorder %v22080_v15, 1065369472 }
0x18c9   :  { %v11680_v6 = vadd.f32 %v12854_v24, %v11624_v27  ;;  %v11695_v47 = vmax.f32 %v11679_v60, 0.0  ;;  %vm11879_vm11 = vcmp.eq.bf16.partialorder %v22079_v49, 1065369472  ;;  %v11897_v60 = vsel %vm11881_vm10, 65537, %v21727_v23  ;;  %v15890_v16 = vld [vmem:[%s21570_s2 + $0x14] sm:$0xf] }
0x18ca   :  { %v11698_v26 = vmax.f32 %v11682_v13, 0.0  ;;  %vm11880_vm13 = vcmp.eq.bf16.partialorder %v15890_v16, 1065369472  ;;  %v11895_v13 = vsel %vm11879_vm11, 65537, %v21727_v23  ;;  %v11898_v27 = vsel %vm11882_vm12, 65537, %v21727_v23 }
0x18cb   :  { %v11696_v42 = vmax.f32 %v11680_v6, 0.0  ;;  %v11913_v6 = vunpack.c.l.b16 %v11897_v60  ;;  %v11914_v29 = vunpack.c.l.b16 %v11898_v27  ;;  %vm11887_vm11 = vcmp.eq.bf16.partialorder %v15896_v51, 1065369472 }
0x18cc   :  { %v11710_v40 = vpack.c.bf16 %v11698_v26, %v11697_v43  ;;  %v11896_v43 = vsel %vm11880_vm13, 65537, %v21727_v23  ;;  %v11911_v26 = vunpack.c.l.b16 %v11895_v13  ;;  %vm11890_vm12 = vcmp.eq.bf16.partialorder %v15897_v38, 1065369472 }
0x18cd   :  { %v11709_v62 = vpack.c.bf16 %v11696_v42, %v11695_v47  ;;  %v11912_v47 = vunpack.c.l.b16 %v11896_v43  ;;  %vm11929_vm14 = vcmp.ne.s32.totalorder %v11913_v6, 0  ;;  %vm11930_vm2 = vcmp.ne.s32.totalorder %v11914_v29, 0 }
0x18ce   :  { %vm11927_vm15 = vcmp.ne.s32.totalorder %v11911_v26, 0 }
0x18cf   :  { %13570 = vmatprep.mubr.msk.bf16.mxu0 %vm4806_vm1, %v11709_v62  ;;  %vm11928_vm3 = vcmp.ne.s32.totalorder %v11912_v47, 0 }
0x18d0   :  { %13571 = vmatmul.mubr.msk.bf16.gmra.mrb[188].mxu0 %vm4806_vm1, %v11710_v40 }
0x18d5   :  { %v13552_v22 = vpop.f32.mrb[176].mxu0 }
0x18d6   :  { %v11685_v39 = vadd.f32 %v13552_v22, %v12854_v24  ;;  %v11637_v18 = vpop.f32.mrb[177].mxu0 }
0x18d7   :  { %v11683_v61 = vadd.f32 %v12854_v24, %v11637_v18  ;;  %v13553_v3 = vpop.f32.mrb[178].mxu0 }
0x18d8   :  { %v11686_v58 = vadd.f32 %v13553_v3, %v12854_v24  ;;  %v11640_v36 = vpop.f32.mrb[179].mxu0  ;;  %v11701_v17 = vmax.f32 %v11685_v39, 0.0 }
0x18d9   :  { %v11684_v63 = vadd.f32 %v12854_v24, %v11640_v36  ;;  %v11699_v35 = vmax.f32 %v11683_v61, 0.0 }
0x18da   :  { %v11702_v10 = vmax.f32 %v11686_v58, 0.0 }
0x18db   :  { %v11700_v21 = vmax.f32 %v11684_v63, 0.0 }
0x18dc   :  { %v11712_v0 = vpack.c.bf16 %v11702_v10, %v11701_v17  ;;  %v15891_v10 = vld [vmem:[%s21570_s2 + $0x28] sm:$0xf] }
0x18dd   :  { %v11711_v20 = vpack.c.bf16 %v11700_v21, %v11699_v35  ;;  %vm11885_vm4 = vcmp.eq.bf16.partialorder %v15891_v10, 1065369472  ;;  %v15892_v35 = vld [vmem:[%s21570_s2 + $0x20] sm:$0xf]  ;;  %v15893_v21 = vld [vmem:[%s21570_s2 + $0x2c] sm:$0xf] }
0x18de   :  { %vm11886_vm5 = vcmp.eq.bf16.partialorder %v15893_v21, 1065369472 }
0x18df   :  { %13574 = vmatprep.mubr.msk.bf16.mxu0 %vm4806_vm1, %v11711_v20  ;;  %v15894_v20 = vld [vmem:[%s21570_s2 + $0x24] sm:$0xf] }
0x18e0   :  { %13575 = vmatmul.mubr.msk.bf16.gmra.mrb[192].mxu0 %vm4806_vm1, %v11712_v0  ;;  %v11901_v0 = vsel %vm11885_vm4, 65537, %v21727_v23  ;;  %vm11884_vm6 = vcmp.eq.bf16.partialorder %v15894_v20, 1065369472 }
0x18e5   :  { %v13556_v5 = vpop.f32.mrb[180].mxu0 }
0x18e6   :  { %v11689_v14 = vadd.f32 %v13556_v5, %v12854_v24  ;;  %v11653_v59 = vpop.f32.mrb[181].mxu0 }
0x18e7   :  { %v11687_v45 = vadd.f32 %v12854_v24, %v11653_v59  ;;  %v13557_v52 = vpop.f32.mrb[182].mxu0  ;;  %v11917_v59 = vunpack.c.l.b16 %v11901_v0 }
0x18e8   :  { %v11690_v46 = vadd.f32 %v13557_v52, %v12854_v24  ;;  %v11656_v50 = vpop.f32.mrb[183].mxu0  ;;  %v11705_v32 = vmax.f32 %v11689_v14, 0.0  ;;  %v11902_v14 = vsel %vm11886_vm5, 65537, %v21727_v23 }
0x18e9   :  { %v11688_v55 = vadd.f32 %v12854_v24, %v11656_v50  ;;  %v11703_v28 = vmax.f32 %v11687_v45, 0.0  ;;  %v11891_v24 = vsel %vm11875_vm0, 65537, %v21727_v23  ;;  %vm11883_vm0 = vcmp.eq.bf16.partialorder %v15892_v35, 1065369472 }
0x18ea   :  { %v11706_v11 = vmax.f32 %v11690_v46, 0.0  ;;  %v11907_v19 = vunpack.c.l.b16 %v11891_v24  ;;  %v11899_v5 = vsel %vm11883_vm0, 65537, %v21727_v23  ;;  %v11900_v45 = vsel %vm11884_vm6, 65537, %v21727_v23 }
0x18eb   :  { %v11704_v31 = vmax.f32 %v11688_v55, 0.0  ;;  %v11915_v52 = vunpack.c.l.b16 %v11899_v5  ;;  %v11918_v46 = vunpack.c.l.b16 %v11902_v14  ;;  %v11916_v50 = vunpack.c.l.b16 %v11900_v45 }
0x18ec   :  { %v11714_v54 = vpack.c.bf16 %v11706_v11, %v11705_v32  ;;  %vm11923_vm7 = vcmp.ne.s32.totalorder %v11907_v19, 0  ;;  %v15895_v19 = vld [vmem:[%s21570_s2 + $0x38] sm:$0xf] }
0x18ed   :  { %v11713_v30 = vpack.c.bf16 %v11704_v31, %v11703_v28  ;;  %vm11889_vm10 = vcmp.eq.bf16.partialorder %v15895_v19, 1065369472 }
0x18ef   :  { %13578 = vmatprep.mubr.msk.bf16.mxu0 %vm4806_vm1, %v11713_v30 }
0x18f0   :  { %13579 = vmatmul.mubr.msk.bf16.gmra.mrb[196].mxu0 %vm4806_vm1, %v11714_v54  ;;  %vm11925_vm1 = vcmp.ne.s32.totalorder %v11909_v57, 0 }
0x1993   :  { %v13568_v8 = vpop.f32.mrb[184].mxu0 }
0x1994   :  { %v11821_v12 = vadd.f32 %v13568_v8, %v21452_v48  ;;  %v11812_v53 = vpop.f32.mrb[185].mxu0  ;;  %v11905_v8 = vsel %vm11889_vm10, 65537, %v21727_v23 }
0x1995   :  { %v11813_v1 = vadd.f32 %v21452_v48, %v11812_v53  ;;  %v13569_v33 = vpop.f32.mrb[186].mxu0  ;;  %v11903_v53 = vsel %vm11887_vm11, 65537, %v21727_v23 }
0x1996   :  { %v11941_v44 = vsel %vm11925_vm1, -inf, %v11821_v12  ;;  %v11824_v25 = vadd.f32 %v13569_v33, %v21452_v48  ;;  %v11815_v41 = vpop.f32.mrb[187].mxu0  ;;  %vm11933_vm1 = vcmp.ne.s32.totalorder %v11917_v59, 0  ;;  %v15898_v12 = vld [vmem:[%s21570_s2 + $0x34] sm:$0xf]  ;;  %v11921_v33 = vunpack.c.l.b16 %v11905_v8 }
0x1997   :  { %11957 = vst [vmem:[%s21575_s15 + $0x10] sm:$0xff] %v11941_v44  ;;  %v11939_v7 = vsel %vm11923_vm7, -inf, %v11813_v1  ;;  %v11816_v34 = vadd.f32 %v21452_v48, %v11815_v41  ;;  %vm11931_vm7 = vcmp.ne.s32.totalorder %v11915_v52, 0  ;;  %vm11888_vm13 = vcmp.eq.bf16.partialorder %v15898_v12, 1065369472 }
0x1998   :  { %11955 = vst [vmem:[%s21575_s15] sm:$0xff] %v11939_v7  ;;  %v11942_v37 = vsel %vm11926_vm8, -inf, %v11824_v25  ;;  %vm11934_vm8 = vcmp.ne.s32.totalorder %v11918_v46, 0  ;;  %v11906_v1 = vsel %vm11890_vm12, 65537, %v21727_v23  ;;  %v11904_v44 = vsel %vm11888_vm13, 65537, %v21727_v23 }
0x1999   :  { %11958 = vst [vmem:[%s21575_s15 + $0x18] sm:$0xff] %v11942_v37  ;;  %v11940_v2 = vsel %vm11924_vm9, -inf, %v11816_v34  ;;  %vm11932_vm9 = vcmp.ne.s32.totalorder %v11916_v50, 0  ;;  %v11919_v25 = vunpack.c.l.b16 %v11903_v53  ;;  %v11922_v41 = vunpack.c.l.b16 %v11906_v1 }
0x199a   :  { %11956 = vst [vmem:[%s21575_s15 + $0x8] sm:$0xff] %v11940_v2  ;;  %v11920_v7 = vunpack.c.l.b16 %v11904_v44 }
0x19a3   :  { %v13572_v42 = vpop.f32.mrb[188].mxu0 }
0x19a4   :  { %v11837_v40 = vadd.f32 %v13572_v42, %v21452_v48  ;;  %v11828_v62 = vpop.f32.mrb[189].mxu0 }
0x19a5   :  { %v11829_v22 = vadd.f32 %v21452_v48, %v11828_v62  ;;  %v13573_v39 = vpop.f32.mrb[190].mxu0 }
0x19a6   :  { %v11945_v18 = vsel %vm11929_vm14, -inf, %v11837_v40  ;;  %v11840_v61 = vadd.f32 %v13573_v39, %v21452_v48  ;;  %v11831_v3 = vpop.f32.mrb[191].mxu0  ;;  %vm11937_vm14 = vcmp.ne.s32.totalorder %v11921_v33, 0 }
0x19a7   :  { %11961 = vst [vmem:[%s21575_s15 + $0x30] sm:$0xff] %v11945_v18  ;;  %v11943_v58 = vsel %vm11927_vm15, -inf, %v11829_v22  ;;  %v11832_v36 = vadd.f32 %v21452_v48, %v11831_v3  ;;  %vm11935_vm15 = vcmp.ne.s32.totalorder %v11919_v25, 0 }
0x19a8   :  { %11959 = vst [vmem:[%s21575_s15 + $0x20] sm:$0xff] %v11943_v58  ;;  %v11946_v63 = vsel %vm11930_vm2, -inf, %v11840_v61  ;;  %vm11938_vm2 = vcmp.ne.s32.totalorder %v11922_v41, 0 }
0x19a9   :  { %11962 = vst [vmem:[%s21575_s15 + $0x38] sm:$0xff] %v11946_v63  ;;  %v11944_v17 = vsel %vm11928_vm3, -inf, %v11832_v36  ;;  %vm11936_vm3 = vcmp.ne.s32.totalorder %v11920_v7, 0 }
0x19aa   :  { %11960 = vst [vmem:[%s21575_s15 + $0x28] sm:$0xff] %v11944_v17 }
0x19b3   :  { %v13576_v55 = vpop.f32.mrb[192].mxu0 }
0x19b4   :  { %v11853_v32 = vadd.f32 %v13576_v55, %v21452_v48  ;;  %v11844_v11 = vpop.f32.mrb[193].mxu0 }
0x19b5   :  { %v11845_v28 = vadd.f32 %v21452_v48, %v11844_v11  ;;  %v13577_v31 = vpop.f32.mrb[194].mxu0 }
0x19b6   :  { %v11949_v54 = vsel %vm11933_vm1, -inf, %v11853_v32  ;;  %v11856_v30 = vadd.f32 %v13577_v31, %v21452_v48  ;;  %v11847_v4 = vpop.f32.mrb[195].mxu0 }
0x19b7   :  { %11965 = vst [vmem:[%s21575_s15 + $0x50] sm:$0xff] %v11949_v54  ;;  %v11947_v24 = vsel %vm11931_vm7, -inf, %v11845_v28  ;;  %v11848_v9 = vadd.f32 %v21452_v48, %v11847_v4 }
0x19b8   :  { %11963 = vst [vmem:[%s21575_s15 + $0x40] sm:$0xff] %v11947_v24  ;;  %v11950_v57 = vsel %vm11934_vm8, -inf, %v11856_v30 }
0x19b9   :  { %11966 = vst [vmem:[%s21575_s15 + $0x58] sm:$0xff] %v11950_v57  ;;  %v11948_v56 = vsel %vm11932_vm9, -inf, %v11848_v9 }
0x19ba   :  { %11964 = vst [vmem:[%s21575_s15 + $0x48] sm:$0xff] %v11948_v56 }
0x19c3   :  { %v13580_v34 = vpop.f32.mrb[196].mxu0 }
0x19c4   :  { %v11869_v37 = vadd.f32 %v13580_v34, %v21452_v48  ;;  %v11860_v2 = vpop.f32.mrb[197].mxu0 }
0x19c5   :  { %v11861_v49 = vadd.f32 %v21452_v48, %v11860_v2  ;;  %v13581_v15 = vpop.f32.mrb[198].mxu0 }
0x19c6   :  { %v11953_v60 = vsel %vm11937_vm14, -inf, %v11869_v37  ;;  %v11872_v16 = vadd.f32 %v13581_v15, %v21452_v48  ;;  %v11863_v13 = vpop.f32.mrb[199].mxu0 }
0x19c7   :  { %11969 = vst [vmem:[%s21575_s15 + $0x70] sm:$0xff] %v11953_v60  ;;  %v11951_v23 = vsel %vm11935_vm15, -inf, %v11861_v49  ;;  %v11864_v27 = vadd.f32 %v21452_v48, %v11863_v13 }
0x19c8   :  { %11967 = vst [vmem:[%s21575_s15 + $0x60] sm:$0xff] %v11951_v23  ;;  %v11954_v6 = vsel %vm11938_vm2, -inf, %v11872_v16 }
0x19c9   :  { %11970 = vst [vmem:[%s21575_s15 + $0x78] sm:$0xff] %v11954_v6  ;;  %v11952_v43 = vsel %vm11936_vm3, -inf, %v11864_v27 }
0x19ca   :  { %11968 = vst [vmem:[%s21575_s15 + $0x68] sm:$0xff] %v11952_v43 }

</bundles_post_ra>
